<compile_context>
chip_gen: v7x
topology: tpu7x:2x2x1
jax: 0.10.0
libtpu: 0.0.40
codegen_flags: <defaults>
</compile_context>

<pallas_src>
import jax
import jax.numpy as jnp
from jax import lax
from jax.experimental import pallas as pl
from jax.experimental.pallas import tpu as pltpu

H1 = 128           # hidden_size_1
H2 = 32            # hidden_size_2
DROPOUT_P = 0.5    # dropout_probability
_UNROLL_T_MAX = 64  # fully unroll the in-kernel time loop for T <= this


def _sigmoid(x):
    # sigmoid(x) = 0.5 * tanh(0.5 * x) + 0.5 -- one EUP op per call.
    return 0.5 * jnp.tanh(0.5 * x) + 0.5


# -----------------------------------------------------------------------------
# Fused kernel: whole BayesianLSTM forward for one (time-major) batch.
# -----------------------------------------------------------------------------
def _fused_bayesian_lstm_kernel(
    # inputs ------------------------------------------------------------------
    xproj_ref,                        # (T, B, 4*H1) f32 : x @ W1a_ih + b1a (hoisted)
    w1a_hh_ref,                       # (H1, 4*H1) bf16
    w1b_ih_ref, w1b_hh_ref, b1b_ref,  # (H1,4H1)(H1,4H1) bf16, (1,4H1) f32
    w2a_ih_ref, w2a_hh_ref, b2a_ref,  # (H1,4H2)(H2,4H2) bf16, (1,4H2) f32
    w2b_ih_ref, w2b_hh_ref, b2b_ref,  # (H2,4H2)(H2,4H2) bf16, (1,4H2) f32
    mask1_ref,                        # (T, B, H1) bf16 : dropout keep-mask * 2
    mask2_ref,                        # (B, H2)    bf16
    fc_w_ref, fc_b_ref,               # (H2, OUT) f32, (1, OUT) f32
    # output ------------------------------------------------------------------
    out_ref,                          # (B, OUT) f32
):
    T, B, _ = xproj_ref.shape

    # Hoist bias broadcasts out of the time loop (JAX does not CSE
    # broadcast_in_dim; leaving them in the loop emits T redundant broadcasts).
    b1b = jnp.broadcast_to(b1b_ref[...], (B, 4 * H1))
    b2a = jnp.broadcast_to(b2a_ref[...], (B, 4 * H2))
    b2b = jnp.broadcast_to(b2b_ref[...], (B, 4 * H2))

    def lstm_cell(pre_gates, h, c, whh_ref, hs):
        """One LSTM cell.  `pre_gates` is the input projection + bias (f32).
        Gates land in one (B, 4*hs) tile; 4*H2 = 128 so even the small cells'
        gate extraction is 32-lane slices instead of 4 separate tiny dots."""
        gates = pre_gates + jnp.dot(h.astype(jnp.bfloat16), whh_ref[...],
                                    preferred_element_type=jnp.float32)
        i_g = _sigmoid(gates[:, 0 * hs:1 * hs])
        f_g = _sigmoid(gates[:, 1 * hs:2 * hs])
        g_g = jnp.tanh(gates[:, 2 * hs:3 * hs])
        o_g = _sigmoid(gates[:, 3 * hs:4 * hs])
        c_new = f_g * c + i_g * g_g
        h_new = o_g * jnp.tanh(c_new)
        return h_new, c_new

    def step(t, carry):
        h1a, c1a, h1b, c1b, h2a, c2a, h2b, c2b = carry
        # ---- lstm1 layer 0: ih projection already hoisted out of the loop ----
        h1a, c1a = lstm_cell(xproj_ref[t], h1a, c1a, w1a_hh_ref, H1)
        # ---- lstm1 layer 1 ----
        pre = (jnp.dot(h1a.astype(jnp.bfloat16), w1b_ih_ref[...],
                       preferred_element_type=jnp.float32) + b1b)
        h1b, c1b = lstm_cell(pre, h1b, c1b, w1b_hh_ref, H1)
        # ---- MC dropout after lstm1 (p=0.5, training=True), fused in-loop ----
        d = h1b * mask1_ref[t].astype(jnp.float32)
        # ---- lstm2 layer 0 ----
        pre = (jnp.dot(d.astype(jnp.bfloat16), w2a_ih_ref[...],
                       preferred_element_type=jnp.float32) + b2a)
        h2a, c2a = lstm_cell(pre, h2a, c2a, w2a_hh_ref, H2)
        # ---- lstm2 layer 1 ----
        pre = (jnp.dot(h2a.astype(jnp.bfloat16), w2b_ih_ref[...],
                       preferred_element_type=jnp.float32) + b2b)
        h2b, c2b = lstm_cell(pre, h2b, c2b, w2b_hh_ref, H2)
        return (h1a, c1a, h1b, c1b, h2a, c2a, h2b, c2b)

    # Zero initial (h, c) -- matches init_hidden1 / init_hidden2; carried as
    # loop values (vregs), not VMEM scratch, so nothing round-trips VMEM per step.
    z1 = jnp.zeros((B, H1), jnp.float32)
    z2 = jnp.zeros((B, H2), jnp.float32)
    carry = (z1, z1, z1, z1, z2, z2, z2, z2)

    if T <= _UNROLL_T_MAX:
        # Full unroll: cross-iteration visibility lets step t+1's input-side
        # work overlap step t's recurrent hh chain.
        for t in range(T):
            carry = step(t, carry)
    else:
        carry = lax.fori_loop(0, T, step, carry)

    h2b = carry[6]
    # output[:, -1, :] -> second MC dropout (only last step reaches fc) -> fc.
    dropped = h2b * mask2_ref[...].astype(jnp.float32)
    y = (jnp.dot(dropped, fc_w_ref[...], preferred_element_type=jnp.float32)
         + fc_b_ref[...])
    out_ref[...] = y.astype(out_ref.dtype)


# -----------------------------------------------------------------------------
# Wrapper: one pallas_call, everything VMEM-resident, no grid.
# -----------------------------------------------------------------------------
@jax.jit
def bayesian_lstm_forward(x_btf, params, key):
    """x_btf: (B, T, F) batch-first (PyTorch convention).
    key: traced jax PRNG key -> fresh MC-dropout masks per call, no recompile.
    For MC-dropout inference, stack samples along the batch dimension."""
    B, T, F = x_btf.shape
    out_len = params["fc_w"].shape[1]

    (w1a_ih, w1a_hh, b1a), (w1b_ih, w1b_hh, b1b) = params["lstm1"]
    (w2a_ih, w2a_hh, b2a), (w2b_ih, w2b_hh, b2b) = params["lstm2"]

    # Hoisted, time-invariant layer-0 input projection: one MXU-efficient
    # (T*B, F) x (F, 4*H1) matmul instead of T tiny B-row dots inside the
    # recurrence; the lane-padded x never enters the kernel.
    x_tbf = jnp.transpose(x_btf, (1, 0, 2))                           # (T, B, F)
    x_proj = jnp.dot(x_tbf.reshape(T * B, F).astype(jnp.bfloat16), w1a_ih,
                     preferred_element_type=jnp.float32)
    x_proj = x_proj.reshape(T, B, 4 * H1) + b1a                       # fold b1a

    # F.dropout(p, training=True): keep w.p. (1-p), scale survivors by 1/(1-p).
    # Mask values are exactly {0, 1/(1-p)} = {0, 2}, so bf16 storage is lossless.
    keep = 1.0 - DROPOUT_P
    k1, k2 = jax.random.split(key)
    mask1 = (jax.random.bernoulli(k1, keep, (T, B, H1)).astype(jnp.float32)
             * (1.0 / keep)).astype(jnp.bfloat16)
    mask2 = (jax.random.bernoulli(k2, keep, (B, H2)).astype(jnp.float32)
             * (1.0 / keep)).astype(jnp.bfloat16)
    # TODO(synk): on hardware the masks could be generated in-kernel with
    # pltpu.prng_seed / pltpu.prng_random_bits (saves mask HBM traffic), but
    # that path has no CPU-interpret lowering, so keep jax.random here.

    vmem = pl.BlockSpec(memory_space=pltpu.MemorySpace.VMEM)
    return pl.pallas_call(
        _fused_bayesian_lstm_kernel,
        out_shape=jax.ShapeDtypeStruct((B, out_len), jnp.float32),
        in_specs=[vmem] * 15,
        out_specs=vmem,
        compiler_params=pltpu.CompilerParams(
            # Raise the default scoped-VMEM limit (16 MiB v5e / 32 MiB v6e,v7x)
            # so MC-stacked batches / longer sequences stay VMEM-resident.
            vmem_limit_bytes=64 * 1024 * 1024),
    )(x_proj,
      w1a_hh,
      w1b_ih, w1b_hh, b1b,
      w2a_ih, w2a_hh, b2a,
      w2b_ih, w2b_hh, b2b,
      mask1, mask2,
      params["fc_w"], params["fc_b"])


# -----------------------------------------------------------------------------
# Parameter init (mirrors nn.LSTM / nn.Linear U(-k, k); b = b_ih + b_hh).
# Weights stored pre-transposed (in, 4H), PyTorch gate order i|f|g|o along the
# 4H axis, and cast to bf16 for the MXU.  Biases / fc stay f32.
# -----------------------------------------------------------------------------
def init_params(key, n_features, output_length):
    def uniform(k, shape, bound):
        return jax.random.uniform(k, shape, jnp.float32, -bound, bound)

    def lstm_layer(key, in_size, hidden):
        bound = hidden ** -0.5
        kw, ku, kb1, kb2 = jax.random.split(key, 4)
        w_ih = uniform(kw, (in_size, 4 * hidden), bound).astype(jnp.bfloat16)
        w_hh = uniform(ku, (hidden, 4 * hidden), bound).astype(jnp.bfloat16)
        b = (uniform(kb1, (1, 4 * hidden), bound)
             + uniform(kb2, (1, 4 * hidden), bound))        # b_ih + b_hh
        return (w_ih, w_hh, b)

    keys = jax.random.split(key, 6)
    params = {
        "lstm1": [lstm_layer(keys[0], n_features, H1),   # F   -> 128
                  lstm_layer(keys[1], H1, H1)],          # 128 -> 128
        "lstm2": [lstm_layer(keys[2], H1, H2),           # 128 -> 32
                  lstm_layer(keys[3], H2, H2)],          # 32  -> 32
    }
    bound = H2 ** -0.5
    params["fc_w"] = uniform(keys[4], (H2, output_length), bound)
    params["fc_b"] = uniform(keys[5], (1, output_length), bound)
    return params


if __name__ == "__main__":
    # Small shapes consistent with the module's forward.  For production MC
    # inference, stack samples along the batch dim to fill sublanes/MXU rows.
    batch_size = 2
    seq_len = 8
    n_features = 8
    output_length = 4

    root = jax.random.PRNGKey(0)
    k_x, k_p, k_drop = jax.random.split(root, 3)
    x = jax.random.normal(k_x, (batch_size, seq_len, n_features), jnp.float32)
    params = init_params(k_p, n_features, output_length)

    y = bayesian_lstm_forward(x, params, k_drop)
    y = jax.block_until_ready(y)
    assert y.shape == (batch_size, output_length)
    assert bool(jnp.all(jnp.isfinite(y)))
    print("KERNEL_OK")
</pallas_src>

<mosaic_0001>
module attributes {stable_mosaic.version = 11 : i64} {
  func.func @_fused_bayesian_lstm_kernel(%arg0: memref<8x2x512xf32, #tpu.memory_space<vmem>>, %arg1: memref<128x512xbf16, #tpu.memory_space<vmem>>, %arg2: memref<128x512xbf16, #tpu.memory_space<vmem>>, %arg3: memref<128x512xbf16, #tpu.memory_space<vmem>>, %arg4: memref<1x512xf32, #tpu.memory_space<vmem>>, %arg5: memref<128x128xbf16, #tpu.memory_space<vmem>>, %arg6: memref<32x128xbf16, #tpu.memory_space<vmem>>, %arg7: memref<1x128xf32, #tpu.memory_space<vmem>>, %arg8: memref<32x128xbf16, #tpu.memory_space<vmem>>, %arg9: memref<32x128xbf16, #tpu.memory_space<vmem>>, %arg10: memref<1x128xf32, #tpu.memory_space<vmem>>, %arg11: memref<8x2x128xbf16, #tpu.memory_space<vmem>>, %arg12: memref<2x32xbf16, #tpu.memory_space<vmem>>, %arg13: memref<32x4xf32, #tpu.memory_space<vmem>>, %arg14: memref<1x4xf32, #tpu.memory_space<vmem>>, %arg15: memref<2x4xf32, #tpu.memory_space<vmem>>) attributes {dimension_semantics = [], scalar_prefetch = 0 : i64, scratch_operands = 0 : i64, tpu.core_type = #tpu.core_type<tc>} {
    %c0 = arith.constant 0 : index
    %c0_0 = arith.constant 0 : index
    %0 = vector.load %arg4[%c0, %c0_0] : memref<1x512xf32, #tpu.memory_space<vmem>>, vector<1x512xf32>
    %1 = vector.shape_cast %0 : vector<1x512xf32> to vector<1x512xf32>
    %2 = vector.broadcast %1 : vector<1x512xf32> to vector<2x512xf32>
    %c0_1 = arith.constant 0 : index
    %c0_2 = arith.constant 0 : index
    %3 = vector.load %arg7[%c0_1, %c0_2] : memref<1x128xf32, #tpu.memory_space<vmem>>, vector<1x128xf32>
    %4 = vector.shape_cast %3 : vector<1x128xf32> to vector<1x128xf32>
    %5 = vector.broadcast %4 : vector<1x128xf32> to vector<2x128xf32>
    %c0_3 = arith.constant 0 : index
    %c0_4 = arith.constant 0 : index
    %6 = vector.load %arg10[%c0_3, %c0_4] : memref<1x128xf32, #tpu.memory_space<vmem>>, vector<1x128xf32>
    %7 = vector.shape_cast %6 : vector<1x128xf32> to vector<1x128xf32>
    %8 = vector.broadcast %7 : vector<1x128xf32> to vector<2x128xf32>
    %cst = arith.constant 0.000000e+00 : f32
    %9 = vector.broadcast %cst : f32 to vector<2x128xf32>
    %cst_5 = arith.constant 0.000000e+00 : f32
    %10 = vector.broadcast %cst_5 : f32 to vector<2x32xf32>
    %c0_6 = arith.constant 0 : index
    %c0_7 = arith.constant 0 : index
    %c0_8 = arith.constant 0 : index
    %11 = vector.load %arg0[%c0_6, %c0_7, %c0_8] : memref<8x2x512xf32, #tpu.memory_space<vmem>>, vector<1x2x512xf32>
    %12 = vector.shape_cast %11 : vector<1x2x512xf32> to vector<2x512xf32>
    %13 = arith.truncf %9 : vector<2x128xf32> to vector<2x128xbf16>
    %c0_9 = arith.constant 0 : index
    %c0_10 = arith.constant 0 : index
    %14 = vector.load %arg1[%c0_9, %c0_10] : memref<128x512xbf16, #tpu.memory_space<vmem>>, vector<128x512xbf16>
    %cst_11 = arith.constant dense<0.000000e+00> : vector<2x512xf32>
    %15 = tpu.matmul %13, %14, %cst_11 {dimension_numbers = #tpu.dot_dimension_numbers<[1], [0], [0], [1], [0, 0, 1, 1], [], []>} : vector<2x128xbf16>, vector<128x512xbf16>, vector<2x512xf32> -> vector<2x512xf32>
    %16 = arith.addf %12, %15 : vector<2x512xf32>
    %17 = vector.extract_strided_slice %16 {offsets = [0, 0], sizes = [2, 128], strides = [1, 1]} : vector<2x512xf32> to vector<2x128xf32>
    %cst_12 = arith.constant 5.000000e-01 : f32
    %18 = vector.broadcast %cst_12 : f32 to vector<2x128xf32>
    %19 = arith.mulf %18, %17 : vector<2x128xf32>
    %20 = math.tanh %19 : vector<2x128xf32>
    %cst_13 = arith.constant 5.000000e-01 : f32
    %21 = vector.broadcast %cst_13 : f32 to vector<2x128xf32>
    %22 = arith.mulf %21, %20 : vector<2x128xf32>
    %cst_14 = arith.constant 5.000000e-01 : f32
    %23 = vector.broadcast %cst_14 : f32 to vector<2x128xf32>
    %24 = arith.addf %22, %23 : vector<2x128xf32>
    %25 = vector.extract_strided_slice %16 {offsets = [0, 128], sizes = [2, 128], strides = [1, 1]} : vector<2x512xf32> to vector<2x128xf32>
    %cst_15 = arith.constant 5.000000e-01 : f32
    %26 = vector.broadcast %cst_15 : f32 to vector<2x128xf32>
    %27 = arith.mulf %26, %25 : vector<2x128xf32>
    %28 = math.tanh %27 : vector<2x128xf32>
    %cst_16 = arith.constant 5.000000e-01 : f32
    %29 = vector.broadcast %cst_16 : f32 to vector<2x128xf32>
    %30 = arith.mulf %29, %28 : vector<2x128xf32>
    %cst_17 = arith.constant 5.000000e-01 : f32
    %31 = vector.broadcast %cst_17 : f32 to vector<2x128xf32>
    %32 = arith.addf %30, %31 : vector<2x128xf32>
    %33 = vector.extract_strided_slice %16 {offsets = [0, 256], sizes = [2, 128], strides = [1, 1]} : vector<2x512xf32> to vector<2x128xf32>
    %34 = math.tanh %33 : vector<2x128xf32>
    %35 = vector.extract_strided_slice %16 {offsets = [0, 384], sizes = [2, 128], strides = [1, 1]} : vector<2x512xf32> to vector<2x128xf32>
    %cst_18 = arith.constant 5.000000e-01 : f32
    %36 = vector.broadcast %cst_18 : f32 to vector<2x128xf32>
    %37 = arith.mulf %36, %35 : vector<2x128xf32>
    %38 = math.tanh %37 : vector<2x128xf32>
    %cst_19 = arith.constant 5.000000e-01 : f32
    %39 = vector.broadcast %cst_19 : f32 to vector<2x128xf32>
    %40 = arith.mulf %39, %38 : vector<2x128xf32>
    %cst_20 = arith.constant 5.000000e-01 : f32
    %41 = vector.broadcast %cst_20 : f32 to vector<2x128xf32>
    %42 = arith.addf %40, %41 : vector<2x128xf32>
    %43 = arith.mulf %32, %9 : vector<2x128xf32>
    %44 = arith.mulf %24, %34 : vector<2x128xf32>
    %45 = arith.addf %43, %44 : vector<2x128xf32>
    %46 = math.tanh %45 : vector<2x128xf32>
    %47 = arith.mulf %42, %46 : vector<2x128xf32>
    %48 = arith.truncf %47 : vector<2x128xf32> to vector<2x128xbf16>
    %c0_21 = arith.constant 0 : index
    %c0_22 = arith.constant 0 : index
    %49 = vector.load %arg2[%c0_21, %c0_22] : memref<128x512xbf16, #tpu.memory_space<vmem>>, vector<128x512xbf16>
    %cst_23 = arith.constant dense<0.000000e+00> : vector<2x512xf32>
    %50 = tpu.matmul %48, %49, %cst_23 {dimension_numbers = #tpu.dot_dimension_numbers<[1], [0], [0], [1], [0, 0, 1, 1], [], []>} : vector<2x128xbf16>, vector<128x512xbf16>, vector<2x512xf32> -> vector<2x512xf32>
    %51 = arith.addf %50, %2 : vector<2x512xf32>
    %52 = arith.truncf %9 : vector<2x128xf32> to vector<2x128xbf16>
    %c0_24 = arith.constant 0 : index
    %c0_25 = arith.constant 0 : index
    %53 = vector.load %arg3[%c0_24, %c0_25] : memref<128x512xbf16, #tpu.memory_space<vmem>>, vector<128x512xbf16>
    %cst_26 = arith.constant dense<0.000000e+00> : vector<2x512xf32>
    %54 = tpu.matmul %52, %53, %cst_26 {dimension_numbers = #tpu.dot_dimension_numbers<[1], [0], [0], [1], [0, 0, 1, 1], [], []>} : vector<2x128xbf16>, vector<128x512xbf16>, vector<2x512xf32> -> vector<2x512xf32>
    %55 = arith.addf %51, %54 : vector<2x512xf32>
    %56 = vector.extract_strided_slice %55 {offsets = [0, 0], sizes = [2, 128], strides = [1, 1]} : vector<2x512xf32> to vector<2x128xf32>
    %cst_27 = arith.constant 5.000000e-01 : f32
    %57 = vector.broadcast %cst_27 : f32 to vector<2x128xf32>
    %58 = arith.mulf %57, %56 : vector<2x128xf32>
    %59 = math.tanh %58 : vector<2x128xf32>
    %cst_28 = arith.constant 5.000000e-01 : f32
    %60 = vector.broadcast %cst_28 : f32 to vector<2x128xf32>
    %61 = arith.mulf %60, %59 : vector<2x128xf32>
    %cst_29 = arith.constant 5.000000e-01 : f32
    %62 = vector.broadcast %cst_29 : f32 to vector<2x128xf32>
    %63 = arith.addf %61, %62 : vector<2x128xf32>
    %64 = vector.extract_strided_slice %55 {offsets = [0, 128], sizes = [2, 128], strides = [1, 1]} : vector<2x512xf32> to vector<2x128xf32>
    %cst_30 = arith.constant 5.000000e-01 : f32
    %65 = vector.broadcast %cst_30 : f32 to vector<2x128xf32>
    %66 = arith.mulf %65, %64 : vector<2x128xf32>
    %67 = math.tanh %66 : vector<2x128xf32>
    %cst_31 = arith.constant 5.000000e-01 : f32
    %68 = vector.broadcast %cst_31 : f32 to vector<2x128xf32>
    %69 = arith.mulf %68, %67 : vector<2x128xf32>
    %cst_32 = arith.constant 5.000000e-01 : f32
    %70 = vector.broadcast %cst_32 : f32 to vector<2x128xf32>
    %71 = arith.addf %69, %70 : vector<2x128xf32>
    %72 = vector.extract_strided_slice %55 {offsets = [0, 256], sizes = [2, 128], strides = [1, 1]} : vector<2x512xf32> to vector<2x128xf32>
    %73 = math.tanh %72 : vector<2x128xf32>
    %74 = vector.extract_strided_slice %55 {offsets = [0, 384], sizes = [2, 128], strides = [1, 1]} : vector<2x512xf32> to vector<2x128xf32>
    %cst_33 = arith.constant 5.000000e-01 : f32
    %75 = vector.broadcast %cst_33 : f32 to vector<2x128xf32>
    %76 = arith.mulf %75, %74 : vector<2x128xf32>
    %77 = math.tanh %76 : vector<2x128xf32>
    %cst_34 = arith.constant 5.000000e-01 : f32
    %78 = vector.broadcast %cst_34 : f32 to vector<2x128xf32>
    %79 = arith.mulf %78, %77 : vector<2x128xf32>
    %cst_35 = arith.constant 5.000000e-01 : f32
    %80 = vector.broadcast %cst_35 : f32 to vector<2x128xf32>
    %81 = arith.addf %79, %80 : vector<2x128xf32>
    %82 = arith.mulf %71, %9 : vector<2x128xf32>
    %83 = arith.mulf %63, %73 : vector<2x128xf32>
    %84 = arith.addf %82, %83 : vector<2x128xf32>
    %85 = math.tanh %84 : vector<2x128xf32>
    %86 = arith.mulf %81, %85 : vector<2x128xf32>
    %c0_36 = arith.constant 0 : index
    %c0_37 = arith.constant 0 : index
    %c0_38 = arith.constant 0 : index
    %87 = vector.load %arg11[%c0_36, %c0_37, %c0_38] : memref<8x2x128xbf16, #tpu.memory_space<vmem>>, vector<1x2x128xbf16>
    %88 = vector.shape_cast %87 : vector<1x2x128xbf16> to vector<2x128xbf16>
    %89 = arith.extf %88 : vector<2x128xbf16> to vector<2x128xf32>
    %90 = arith.mulf %86, %89 : vector<2x128xf32>
    %91 = arith.truncf %90 : vector<2x128xf32> to vector<2x128xbf16>
    %c0_39 = arith.constant 0 : index
    %c0_40 = arith.constant 0 : index
    %92 = vector.load %arg5[%c0_39, %c0_40] : memref<128x128xbf16, #tpu.memory_space<vmem>>, vector<128x128xbf16>
    %cst_41 = arith.constant dense<0.000000e+00> : vector<2x128xf32>
    %93 = tpu.matmul %91, %92, %cst_41 {dimension_numbers = #tpu.dot_dimension_numbers<[1], [0], [0], [1], [0, 0, 1, 1], [], []>} : vector<2x128xbf16>, vector<128x128xbf16>, vector<2x128xf32> -> vector<2x128xf32>
    %94 = arith.addf %93, %5 : vector<2x128xf32>
    %95 = arith.truncf %10 : vector<2x32xf32> to vector<2x32xbf16>
    %c0_42 = arith.constant 0 : index
    %c0_43 = arith.constant 0 : index
    %96 = vector.load %arg6[%c0_42, %c0_43] : memref<32x128xbf16, #tpu.memory_space<vmem>>, vector<32x128xbf16>
    %cst_44 = arith.constant dense<0.000000e+00> : vector<2x128xf32>
    %97 = tpu.matmul %95, %96, %cst_44 {dimension_numbers = #tpu.dot_dimension_numbers<[1], [0], [0], [1], [0, 0, 1, 1], [], []>} : vector<2x32xbf16>, vector<32x128xbf16>, vector<2x128xf32> -> vector<2x128xf32>
    %98 = arith.addf %94, %97 : vector<2x128xf32>
    %99 = vector.extract_strided_slice %98 {offsets = [0, 0], sizes = [2, 32], strides = [1, 1]} : vector<2x128xf32> to vector<2x32xf32>
    %cst_45 = arith.constant 5.000000e-01 : f32
    %100 = vector.broadcast %cst_45 : f32 to vector<2x32xf32>
    %101 = arith.mulf %100, %99 : vector<2x32xf32>
    %102 = math.tanh %101 : vector<2x32xf32>
    %cst_46 = arith.constant 5.000000e-01 : f32
    %103 = vector.broadcast %cst_46 : f32 to vector<2x32xf32>
    %104 = arith.mulf %103, %102 : vector<2x32xf32>
    %cst_47 = arith.constant 5.000000e-01 : f32
    %105 = vector.broadcast %cst_47 : f32 to vector<2x32xf32>
    %106 = arith.addf %104, %105 : vector<2x32xf32>
    %107 = vector.extract_strided_slice %98 {offsets = [0, 32], sizes = [2, 32], strides = [1, 1]} : vector<2x128xf32> to vector<2x32xf32>
    %cst_48 = arith.constant 5.000000e-01 : f32
    %108 = vector.broadcast %cst_48 : f32 to vector<2x32xf32>
    %109 = arith.mulf %108, %107 : vector<2x32xf32>
    %110 = math.tanh %109 : vector<2x32xf32>
    %cst_49 = arith.constant 5.000000e-01 : f32
    %111 = vector.broadcast %cst_49 : f32 to vector<2x32xf32>
    %112 = arith.mulf %111, %110 : vector<2x32xf32>
    %cst_50 = arith.constant 5.000000e-01 : f32
    %113 = vector.broadcast %cst_50 : f32 to vector<2x32xf32>
    %114 = arith.addf %112, %113 : vector<2x32xf32>
    %115 = vector.extract_strided_slice %98 {offsets = [0, 64], sizes = [2, 32], strides = [1, 1]} : vector<2x128xf32> to vector<2x32xf32>
    %116 = math.tanh %115 : vector<2x32xf32>
    %117 = vector.extract_strided_slice %98 {offsets = [0, 96], sizes = [2, 32], strides = [1, 1]} : vector<2x128xf32> to vector<2x32xf32>
    %cst_51 = arith.constant 5.000000e-01 : f32
    %118 = vector.broadcast %cst_51 : f32 to vector<2x32xf32>
    %119 = arith.mulf %118, %117 : vector<2x32xf32>
    %120 = math.tanh %119 : vector<2x32xf32>
    %cst_52 = arith.constant 5.000000e-01 : f32
    %121 = vector.broadcast %cst_52 : f32 to vector<2x32xf32>
    %122 = arith.mulf %121, %120 : vector<2x32xf32>
    %cst_53 = arith.constant 5.000000e-01 : f32
    %123 = vector.broadcast %cst_53 : f32 to vector<2x32xf32>
    %124 = arith.addf %122, %123 : vector<2x32xf32>
    %125 = arith.mulf %114, %10 : vector<2x32xf32>
    %126 = arith.mulf %106, %116 : vector<2x32xf32>
    %127 = arith.addf %125, %126 : vector<2x32xf32>
    %128 = math.tanh %127 : vector<2x32xf32>
    %129 = arith.mulf %124, %128 : vector<2x32xf32>
    %130 = arith.truncf %129 : vector<2x32xf32> to vector<2x32xbf16>
    %c0_54 = arith.constant 0 : index
    %c0_55 = arith.constant 0 : index
    %131 = vector.load %arg8[%c0_54, %c0_55] : memref<32x128xbf16, #tpu.memory_space<vmem>>, vector<32x128xbf16>
    %cst_56 = arith.constant dense<0.000000e+00> : vector<2x128xf32>
    %132 = tpu.matmul %130, %131, %cst_56 {dimension_numbers = #tpu.dot_dimension_numbers<[1], [0], [0], [1], [0, 0, 1, 1], [], []>} : vector<2x32xbf16>, vector<32x128xbf16>, vector<2x128xf32> -> vector<2x128xf32>
    %133 = arith.addf %132, %8 : vector<2x128xf32>
    %134 = arith.truncf %10 : vector<2x32xf32> to vector<2x32xbf16>
    %c0_57 = arith.constant 0 : index
    %c0_58 = arith.constant 0 : index
    %135 = vector.load %arg9[%c0_57, %c0_58] : memref<32x128xbf16, #tpu.memory_space<vmem>>, vector<32x128xbf16>
    %cst_59 = arith.constant dense<0.000000e+00> : vector<2x128xf32>
    %136 = tpu.matmul %134, %135, %cst_59 {dimension_numbers = #tpu.dot_dimension_numbers<[1], [0], [0], [1], [0, 0, 1, 1], [], []>} : vector<2x32xbf16>, vector<32x128xbf16>, vector<2x128xf32> -> vector<2x128xf32>
    %137 = arith.addf %133, %136 : vector<2x128xf32>
    %138 = vector.extract_strided_slice %137 {offsets = [0, 0], sizes = [2, 32], strides = [1, 1]} : vector<2x128xf32> to vector<2x32xf32>
    %cst_60 = arith.constant 5.000000e-01 : f32
    %139 = vector.broadcast %cst_60 : f32 to vector<2x32xf32>
    %140 = arith.mulf %139, %138 : vector<2x32xf32>
    %141 = math.tanh %140 : vector<2x32xf32>
    %cst_61 = arith.constant 5.000000e-01 : f32
    %142 = vector.broadcast %cst_61 : f32 to vector<2x32xf32>
    %143 = arith.mulf %142, %141 : vector<2x32xf32>
    %cst_62 = arith.constant 5.000000e-01 : f32
    %144 = vector.broadcast %cst_62 : f32 to vector<2x32xf32>
    %145 = arith.addf %143, %144 : vector<2x32xf32>
    %146 = vector.extract_strided_slice %137 {offsets = [0, 32], sizes = [2, 32], strides = [1, 1]} : vector<2x128xf32> to vector<2x32xf32>
    %cst_63 = arith.constant 5.000000e-01 : f32
    %147 = vector.broadcast %cst_63 : f32 to vector<2x32xf32>
    %148 = arith.mulf %147, %146 : vector<2x32xf32>
    %149 = math.tanh %148 : vector<2x32xf32>
    %cst_64 = arith.constant 5.000000e-01 : f32
    %150 = vector.broadcast %cst_64 : f32 to vector<2x32xf32>
    %151 = arith.mulf %150, %149 : vector<2x32xf32>
    %cst_65 = arith.constant 5.000000e-01 : f32
    %152 = vector.broadcast %cst_65 : f32 to vector<2x32xf32>
    %153 = arith.addf %151, %152 : vector<2x32xf32>
    %154 = vector.extract_strided_slice %137 {offsets = [0, 64], sizes = [2, 32], strides = [1, 1]} : vector<2x128xf32> to vector<2x32xf32>
    %155 = math.tanh %154 : vector<2x32xf32>
    %156 = vector.extract_strided_slice %137 {offsets = [0, 96], sizes = [2, 32], strides = [1, 1]} : vector<2x128xf32> to vector<2x32xf32>
    %cst_66 = arith.constant 5.000000e-01 : f32
    %157 = vector.broadcast %cst_66 : f32 to vector<2x32xf32>
    %158 = arith.mulf %157, %156 : vector<2x32xf32>
    %159 = math.tanh %158 : vector<2x32xf32>
    %cst_67 = arith.constant 5.000000e-01 : f32
    %160 = vector.broadcast %cst_67 : f32 to vector<2x32xf32>
    %161 = arith.mulf %160, %159 : vector<2x32xf32>
    %cst_68 = arith.constant 5.000000e-01 : f32
    %162 = vector.broadcast %cst_68 : f32 to vector<2x32xf32>
    %163 = arith.addf %161, %162 : vector<2x32xf32>
    %164 = arith.mulf %153, %10 : vector<2x32xf32>
    %165 = arith.mulf %145, %155 : vector<2x32xf32>
    %166 = arith.addf %164, %165 : vector<2x32xf32>
    %167 = math.tanh %166 : vector<2x32xf32>
    %168 = arith.mulf %163, %167 : vector<2x32xf32>
    %c1 = arith.constant 1 : index
    %c0_69 = arith.constant 0 : index
    %c0_70 = arith.constant 0 : index
    %169 = vector.load %arg0[%c1, %c0_69, %c0_70] : memref<8x2x512xf32, #tpu.memory_space<vmem>>, vector<1x2x512xf32>
    %170 = vector.shape_cast %169 : vector<1x2x512xf32> to vector<2x512xf32>
    %171 = arith.truncf %47 : vector<2x128xf32> to vector<2x128xbf16>
    %c0_71 = arith.constant 0 : index
    %c0_72 = arith.constant 0 : index
    %172 = vector.load %arg1[%c0_71, %c0_72] : memref<128x512xbf16, #tpu.memory_space<vmem>>, vector<128x512xbf16>
    %cst_73 = arith.constant dense<0.000000e+00> : vector<2x512xf32>
    %173 = tpu.matmul %171, %172, %cst_73 {dimension_numbers = #tpu.dot_dimension_numbers<[1], [0], [0], [1], [0, 0, 1, 1], [], []>} : vector<2x128xbf16>, vector<128x512xbf16>, vector<2x512xf32> -> vector<2x512xf32>
    %174 = arith.addf %170, %173 : vector<2x512xf32>
    %175 = vector.extract_strided_slice %174 {offsets = [0, 0], sizes = [2, 128], strides = [1, 1]} : vector<2x512xf32> to vector<2x128xf32>
    %cst_74 = arith.constant 5.000000e-01 : f32
    %176 = vector.broadcast %cst_74 : f32 to vector<2x128xf32>
    %177 = arith.mulf %176, %175 : vector<2x128xf32>
    %178 = math.tanh %177 : vector<2x128xf32>
    %cst_75 = arith.constant 5.000000e-01 : f32
    %179 = vector.broadcast %cst_75 : f32 to vector<2x128xf32>
    %180 = arith.mulf %179, %178 : vector<2x128xf32>
    %cst_76 = arith.constant 5.000000e-01 : f32
    %181 = vector.broadcast %cst_76 : f32 to vector<2x128xf32>
    %182 = arith.addf %180, %181 : vector<2x128xf32>
    %183 = vector.extract_strided_slice %174 {offsets = [0, 128], sizes = [2, 128], strides = [1, 1]} : vector<2x512xf32> to vector<2x128xf32>
    %cst_77 = arith.constant 5.000000e-01 : f32
    %184 = vector.broadcast %cst_77 : f32 to vector<2x128xf32>
    %185 = arith.mulf %184, %183 : vector<2x128xf32>
    %186 = math.tanh %185 : vector<2x128xf32>
    %cst_78 = arith.constant 5.000000e-01 : f32
    %187 = vector.broadcast %cst_78 : f32 to vector<2x128xf32>
    %188 = arith.mulf %187, %186 : vector<2x128xf32>
    %cst_79 = arith.constant 5.000000e-01 : f32
    %189 = vector.broadcast %cst_79 : f32 to vector<2x128xf32>
    %190 = arith.addf %188, %189 : vector<2x128xf32>
    %191 = vector.extract_strided_slice %174 {offsets = [0, 256], sizes = [2, 128], strides = [1, 1]} : vector<2x512xf32> to vector<2x128xf32>
    %192 = math.tanh %191 : vector<2x128xf32>
    %193 = vector.extract_strided_slice %174 {offsets = [0, 384], sizes = [2, 128], strides = [1, 1]} : vector<2x512xf32> to vector<2x128xf32>
    %cst_80 = arith.constant 5.000000e-01 : f32
    %194 = vector.broadcast %cst_80 : f32 to vector<2x128xf32>
    %195 = arith.mulf %194, %193 : vector<2x128xf32>
    %196 = math.tanh %195 : vector<2x128xf32>
    %cst_81 = arith.constant 5.000000e-01 : f32
    %197 = vector.broadcast %cst_81 : f32 to vector<2x128xf32>
    %198 = arith.mulf %197, %196 : vector<2x128xf32>
    %cst_82 = arith.constant 5.000000e-01 : f32
    %199 = vector.broadcast %cst_82 : f32 to vector<2x128xf32>
    %200 = arith.addf %198, %199 : vector<2x128xf32>
    %201 = arith.mulf %190, %45 : vector<2x128xf32>
    %202 = arith.mulf %182, %192 : vector<2x128xf32>
    %203 = arith.addf %201, %202 : vector<2x128xf32>
    %204 = math.tanh %203 : vector<2x128xf32>
    %205 = arith.mulf %200, %204 : vector<2x128xf32>
    %206 = arith.truncf %205 : vector<2x128xf32> to vector<2x128xbf16>
    %c0_83 = arith.constant 0 : index
    %c0_84 = arith.constant 0 : index
    %207 = vector.load %arg2[%c0_83, %c0_84] : memref<128x512xbf16, #tpu.memory_space<vmem>>, vector<128x512xbf16>
    %cst_85 = arith.constant dense<0.000000e+00> : vector<2x512xf32>
    %208 = tpu.matmul %206, %207, %cst_85 {dimension_numbers = #tpu.dot_dimension_numbers<[1], [0], [0], [1], [0, 0, 1, 1], [], []>} : vector<2x128xbf16>, vector<128x512xbf16>, vector<2x512xf32> -> vector<2x512xf32>
    %209 = arith.addf %208, %2 : vector<2x512xf32>
    %210 = arith.truncf %86 : vector<2x128xf32> to vector<2x128xbf16>
    %c0_86 = arith.constant 0 : index
    %c0_87 = arith.constant 0 : index
    %211 = vector.load %arg3[%c0_86, %c0_87] : memref<128x512xbf16, #tpu.memory_space<vmem>>, vector<128x512xbf16>
    %cst_88 = arith.constant dense<0.000000e+00> : vector<2x512xf32>
    %212 = tpu.matmul %210, %211, %cst_88 {dimension_numbers = #tpu.dot_dimension_numbers<[1], [0], [0], [1], [0, 0, 1, 1], [], []>} : vector<2x128xbf16>, vector<128x512xbf16>, vector<2x512xf32> -> vector<2x512xf32>
    %213 = arith.addf %209, %212 : vector<2x512xf32>
    %214 = vector.extract_strided_slice %213 {offsets = [0, 0], sizes = [2, 128], strides = [1, 1]} : vector<2x512xf32> to vector<2x128xf32>
    %cst_89 = arith.constant 5.000000e-01 : f32
    %215 = vector.broadcast %cst_89 : f32 to vector<2x128xf32>
    %216 = arith.mulf %215, %214 : vector<2x128xf32>
    %217 = math.tanh %216 : vector<2x128xf32>
    %cst_90 = arith.constant 5.000000e-01 : f32
    %218 = vector.broadcast %cst_90 : f32 to vector<2x128xf32>
    %219 = arith.mulf %218, %217 : vector<2x128xf32>
    %cst_91 = arith.constant 5.000000e-01 : f32
    %220 = vector.broadcast %cst_91 : f32 to vector<2x128xf32>
    %221 = arith.addf %219, %220 : vector<2x128xf32>
    %222 = vector.extract_strided_slice %213 {offsets = [0, 128], sizes = [2, 128], strides = [1, 1]} : vector<2x512xf32> to vector<2x128xf32>
    %cst_92 = arith.constant 5.000000e-01 : f32
    %223 = vector.broadcast %cst_92 : f32 to vector<2x128xf32>
    %224 = arith.mulf %223, %222 : vector<2x128xf32>
    %225 = math.tanh %224 : vector<2x128xf32>
    %cst_93 = arith.constant 5.000000e-01 : f32
    %226 = vector.broadcast %cst_93 : f32 to vector<2x128xf32>
    %227 = arith.mulf %226, %225 : vector<2x128xf32>
    %cst_94 = arith.constant 5.000000e-01 : f32
    %228 = vector.broadcast %cst_94 : f32 to vector<2x128xf32>
    %229 = arith.addf %227, %228 : vector<2x128xf32>
    %230 = vector.extract_strided_slice %213 {offsets = [0, 256], sizes = [2, 128], strides = [1, 1]} : vector<2x512xf32> to vector<2x128xf32>
    %231 = math.tanh %230 : vector<2x128xf32>
    %232 = vector.extract_strided_slice %213 {offsets = [0, 384], sizes = [2, 128], strides = [1, 1]} : vector<2x512xf32> to vector<2x128xf32>
    %cst_95 = arith.constant 5.000000e-01 : f32
    %233 = vector.broadcast %cst_95 : f32 to vector<2x128xf32>
    %234 = arith.mulf %233, %232 : vector<2x128xf32>
    %235 = math.tanh %234 : vector<2x128xf32>
    %cst_96 = arith.constant 5.000000e-01 : f32
    %236 = vector.broadcast %cst_96 : f32 to vector<2x128xf32>
    %237 = arith.mulf %236, %235 : vector<2x128xf32>
    %cst_97 = arith.constant 5.000000e-01 : f32
    %238 = vector.broadcast %cst_97 : f32 to vector<2x128xf32>
    %239 = arith.addf %237, %238 : vector<2x128xf32>
    %240 = arith.mulf %229, %84 : vector<2x128xf32>
    %241 = arith.mulf %221, %231 : vector<2x128xf32>
    %242 = arith.addf %240, %241 : vector<2x128xf32>
    %243 = math.tanh %242 : vector<2x128xf32>
    %244 = arith.mulf %239, %243 : vector<2x128xf32>
    %c1_98 = arith.constant 1 : index
    %c0_99 = arith.constant 0 : index
    %c0_100 = arith.constant 0 : index
    %245 = vector.load %arg11[%c1_98, %c0_99, %c0_100] : memref<8x2x128xbf16, #tpu.memory_space<vmem>>, vector<1x2x128xbf16>
    %246 = vector.shape_cast %245 : vector<1x2x128xbf16> to vector<2x128xbf16>
    %247 = arith.extf %246 : vector<2x128xbf16> to vector<2x128xf32>
    %248 = arith.mulf %244, %247 : vector<2x128xf32>
    %249 = arith.truncf %248 : vector<2x128xf32> to vector<2x128xbf16>
    %c0_101 = arith.constant 0 : index
    %c0_102 = arith.constant 0 : index
    %250 = vector.load %arg5[%c0_101, %c0_102] : memref<128x128xbf16, #tpu.memory_space<vmem>>, vector<128x128xbf16>
    %cst_103 = arith.constant dense<0.000000e+00> : vector<2x128xf32>
    %251 = tpu.matmul %249, %250, %cst_103 {dimension_numbers = #tpu.dot_dimension_numbers<[1], [0], [0], [1], [0, 0, 1, 1], [], []>} : vector<2x128xbf16>, vector<128x128xbf16>, vector<2x128xf32> -> vector<2x128xf32>
    %252 = arith.addf %251, %5 : vector<2x128xf32>
    %253 = arith.truncf %129 : vector<2x32xf32> to vector<2x32xbf16>
    %c0_104 = arith.constant 0 : index
    %c0_105 = arith.constant 0 : index
    %254 = vector.load %arg6[%c0_104, %c0_105] : memref<32x128xbf16, #tpu.memory_space<vmem>>, vector<32x128xbf16>
    %cst_106 = arith.constant dense<0.000000e+00> : vector<2x128xf32>
    %255 = tpu.matmul %253, %254, %cst_106 {dimension_numbers = #tpu.dot_dimension_numbers<[1], [0], [0], [1], [0, 0, 1, 1], [], []>} : vector<2x32xbf16>, vector<32x128xbf16>, vector<2x128xf32> -> vector<2x128xf32>
    %256 = arith.addf %252, %255 : vector<2x128xf32>
    %257 = vector.extract_strided_slice %256 {offsets = [0, 0], sizes = [2, 32], strides = [1, 1]} : vector<2x128xf32> to vector<2x32xf32>
    %cst_107 = arith.constant 5.000000e-01 : f32
    %258 = vector.broadcast %cst_107 : f32 to vector<2x32xf32>
    %259 = arith.mulf %258, %257 : vector<2x32xf32>
    %260 = math.tanh %259 : vector<2x32xf32>
    %cst_108 = arith.constant 5.000000e-01 : f32
    %261 = vector.broadcast %cst_108 : f32 to vector<2x32xf32>
    %262 = arith.mulf %261, %260 : vector<2x32xf32>
    %cst_109 = arith.constant 5.000000e-01 : f32
    %263 = vector.broadcast %cst_109 : f32 to vector<2x32xf32>
    %264 = arith.addf %262, %263 : vector<2x32xf32>
    %265 = vector.extract_strided_slice %256 {offsets = [0, 32], sizes = [2, 32], strides = [1, 1]} : vector<2x128xf32> to vector<2x32xf32>
    %cst_110 = arith.constant 5.000000e-01 : f32
    %266 = vector.broadcast %cst_110 : f32 to vector<2x32xf32>
    %267 = arith.mulf %266, %265 : vector<2x32xf32>
    %268 = math.tanh %267 : vector<2x32xf32>
    %cst_111 = arith.constant 5.000000e-01 : f32
    %269 = vector.broadcast %cst_111 : f32 to vector<2x32xf32>
    %270 = arith.mulf %269, %268 : vector<2x32xf32>
    %cst_112 = arith.constant 5.000000e-01 : f32
    %271 = vector.broadcast %cst_112 : f32 to vector<2x32xf32>
    %272 = arith.addf %270, %271 : vector<2x32xf32>
    %273 = vector.extract_strided_slice %256 {offsets = [0, 64], sizes = [2, 32], strides = [1, 1]} : vector<2x128xf32> to vector<2x32xf32>
    %274 = math.tanh %273 : vector<2x32xf32>
    %275 = vector.extract_strided_slice %256 {offsets = [0, 96], sizes = [2, 32], strides = [1, 1]} : vector<2x128xf32> to vector<2x32xf32>
    %cst_113 = arith.constant 5.000000e-01 : f32
    %276 = vector.broadcast %cst_113 : f32 to vector<2x32xf32>
    %277 = arith.mulf %276, %275 : vector<2x32xf32>
    %278 = math.tanh %277 : vector<2x32xf32>
    %cst_114 = arith.constant 5.000000e-01 : f32
    %279 = vector.broadcast %cst_114 : f32 to vector<2x32xf32>
    %280 = arith.mulf %279, %278 : vector<2x32xf32>
    %cst_115 = arith.constant 5.000000e-01 : f32
    %281 = vector.broadcast %cst_115 : f32 to vector<2x32xf32>
    %282 = arith.addf %280, %281 : vector<2x32xf32>
    %283 = arith.mulf %272, %127 : vector<2x32xf32>
    %284 = arith.mulf %264, %274 : vector<2x32xf32>
    %285 = arith.addf %283, %284 : vector<2x32xf32>
    %286 = math.tanh %285 : vector<2x32xf32>
    %287 = arith.mulf %282, %286 : vector<2x32xf32>
    %288 = arith.truncf %287 : vector<2x32xf32> to vector<2x32xbf16>
    %c0_116 = arith.constant 0 : index
    %c0_117 = arith.constant 0 : index
    %289 = vector.load %arg8[%c0_116, %c0_117] : memref<32x128xbf16, #tpu.memory_space<vmem>>, vector<32x128xbf16>
    %cst_118 = arith.constant dense<0.000000e+00> : vector<2x128xf32>
    %290 = tpu.matmul %288, %289, %cst_118 {dimension_numbers = #tpu.dot_dimension_numbers<[1], [0], [0], [1], [0, 0, 1, 1], [], []>} : vector<2x32xbf16>, vector<32x128xbf16>, vector<2x128xf32> -> vector<2x128xf32>
    %291 = arith.addf %290, %8 : vector<2x128xf32>
    %292 = arith.truncf %168 : vector<2x32xf32> to vector<2x32xbf16>
    %c0_119 = arith.constant 0 : index
    %c0_120 = arith.constant 0 : index
    %293 = vector.load %arg9[%c0_119, %c0_120] : memref<32x128xbf16, #tpu.memory_space<vmem>>, vector<32x128xbf16>
    %cst_121 = arith.constant dense<0.000000e+00> : vector<2x128xf32>
    %294 = tpu.matmul %292, %293, %cst_121 {dimension_numbers = #tpu.dot_dimension_numbers<[1], [0], [0], [1], [0, 0, 1, 1], [], []>} : vector<2x32xbf16>, vector<32x128xbf16>, vector<2x128xf32> -> vector<2x128xf32>
    %295 = arith.addf %291, %294 : vector<2x128xf32>
    %296 = vector.extract_strided_slice %295 {offsets = [0, 0], sizes = [2, 32], strides = [1, 1]} : vector<2x128xf32> to vector<2x32xf32>
    %cst_122 = arith.constant 5.000000e-01 : f32
    %297 = vector.broadcast %cst_122 : f32 to vector<2x32xf32>
    %298 = arith.mulf %297, %296 : vector<2x32xf32>
    %299 = math.tanh %298 : vector<2x32xf32>
    %cst_123 = arith.constant 5.000000e-01 : f32
    %300 = vector.broadcast %cst_123 : f32 to vector<2x32xf32>
    %301 = arith.mulf %300, %299 : vector<2x32xf32>
    %cst_124 = arith.constant 5.000000e-01 : f32
    %302 = vector.broadcast %cst_124 : f32 to vector<2x32xf32>
    %303 = arith.addf %301, %302 : vector<2x32xf32>
    %304 = vector.extract_strided_slice %295 {offsets = [0, 32], sizes = [2, 32], strides = [1, 1]} : vector<2x128xf32> to vector<2x32xf32>
    %cst_125 = arith.constant 5.000000e-01 : f32
    %305 = vector.broadcast %cst_125 : f32 to vector<2x32xf32>
    %306 = arith.mulf %305, %304 : vector<2x32xf32>
    %307 = math.tanh %306 : vector<2x32xf32>
    %cst_126 = arith.constant 5.000000e-01 : f32
    %308 = vector.broadcast %cst_126 : f32 to vector<2x32xf32>
    %309 = arith.mulf %308, %307 : vector<2x32xf32>
    %cst_127 = arith.constant 5.000000e-01 : f32
    %310 = vector.broadcast %cst_127 : f32 to vector<2x32xf32>
    %311 = arith.addf %309, %310 : vector<2x32xf32>
    %312 = vector.extract_strided_slice %295 {offsets = [0, 64], sizes = [2, 32], strides = [1, 1]} : vector<2x128xf32> to vector<2x32xf32>
    %313 = math.tanh %312 : vector<2x32xf32>
    %314 = vector.extract_strided_slice %295 {offsets = [0, 96], sizes = [2, 32], strides = [1, 1]} : vector<2x128xf32> to vector<2x32xf32>
    %cst_128 = arith.constant 5.000000e-01 : f32
    %315 = vector.broadcast %cst_128 : f32 to vector<2x32xf32>
    %316 = arith.mulf %315, %314 : vector<2x32xf32>
    %317 = math.tanh %316 : vector<2x32xf32>
    %cst_129 = arith.constant 5.000000e-01 : f32
    %318 = vector.broadcast %cst_129 : f32 to vector<2x32xf32>
    %319 = arith.mulf %318, %317 : vector<2x32xf32>
    %cst_130 = arith.constant 5.000000e-01 : f32
    %320 = vector.broadcast %cst_130 : f32 to vector<2x32xf32>
    %321 = arith.addf %319, %320 : vector<2x32xf32>
    %322 = arith.mulf %311, %166 : vector<2x32xf32>
    %323 = arith.mulf %303, %313 : vector<2x32xf32>
    %324 = arith.addf %322, %323 : vector<2x32xf32>
    %325 = math.tanh %324 : vector<2x32xf32>
    %326 = arith.mulf %321, %325 : vector<2x32xf32>
    %c2 = arith.constant 2 : index
    %c0_131 = arith.constant 0 : index
    %c0_132 = arith.constant 0 : index
    %327 = vector.load %arg0[%c2, %c0_131, %c0_132] : memref<8x2x512xf32, #tpu.memory_space<vmem>>, vector<1x2x512xf32>
    %328 = vector.shape_cast %327 : vector<1x2x512xf32> to vector<2x512xf32>
    %329 = arith.truncf %205 : vector<2x128xf32> to vector<2x128xbf16>
    %c0_133 = arith.constant 0 : index
    %c0_134 = arith.constant 0 : index
    %330 = vector.load %arg1[%c0_133, %c0_134] : memref<128x512xbf16, #tpu.memory_space<vmem>>, vector<128x512xbf16>
    %cst_135 = arith.constant dense<0.000000e+00> : vector<2x512xf32>
    %331 = tpu.matmul %329, %330, %cst_135 {dimension_numbers = #tpu.dot_dimension_numbers<[1], [0], [0], [1], [0, 0, 1, 1], [], []>} : vector<2x128xbf16>, vector<128x512xbf16>, vector<2x512xf32> -> vector<2x512xf32>
    %332 = arith.addf %328, %331 : vector<2x512xf32>
    %333 = vector.extract_strided_slice %332 {offsets = [0, 0], sizes = [2, 128], strides = [1, 1]} : vector<2x512xf32> to vector<2x128xf32>
    %cst_136 = arith.constant 5.000000e-01 : f32
    %334 = vector.broadcast %cst_136 : f32 to vector<2x128xf32>
    %335 = arith.mulf %334, %333 : vector<2x128xf32>
    %336 = math.tanh %335 : vector<2x128xf32>
    %cst_137 = arith.constant 5.000000e-01 : f32
    %337 = vector.broadcast %cst_137 : f32 to vector<2x128xf32>
    %338 = arith.mulf %337, %336 : vector<2x128xf32>
    %cst_138 = arith.constant 5.000000e-01 : f32
    %339 = vector.broadcast %cst_138 : f32 to vector<2x128xf32>
    %340 = arith.addf %338, %339 : vector<2x128xf32>
    %341 = vector.extract_strided_slice %332 {offsets = [0, 128], sizes = [2, 128], strides = [1, 1]} : vector<2x512xf32> to vector<2x128xf32>
    %cst_139 = arith.constant 5.000000e-01 : f32
    %342 = vector.broadcast %cst_139 : f32 to vector<2x128xf32>
    %343 = arith.mulf %342, %341 : vector<2x128xf32>
    %344 = math.tanh %343 : vector<2x128xf32>
    %cst_140 = arith.constant 5.000000e-01 : f32
    %345 = vector.broadcast %cst_140 : f32 to vector<2x128xf32>
    %346 = arith.mulf %345, %344 : vector<2x128xf32>
    %cst_141 = arith.constant 5.000000e-01 : f32
    %347 = vector.broadcast %cst_141 : f32 to vector<2x128xf32>
    %348 = arith.addf %346, %347 : vector<2x128xf32>
    %349 = vector.extract_strided_slice %332 {offsets = [0, 256], sizes = [2, 128], strides = [1, 1]} : vector<2x512xf32> to vector<2x128xf32>
    %350 = math.tanh %349 : vector<2x128xf32>
    %351 = vector.extract_strided_slice %332 {offsets = [0, 384], sizes = [2, 128], strides = [1, 1]} : vector<2x512xf32> to vector<2x128xf32>
    %cst_142 = arith.constant 5.000000e-01 : f32
    %352 = vector.broadcast %cst_142 : f32 to vector<2x128xf32>
    %353 = arith.mulf %352, %351 : vector<2x128xf32>
    %354 = math.tanh %353 : vector<2x128xf32>
    %cst_143 = arith.constant 5.000000e-01 : f32
    %355 = vector.broadcast %cst_143 : f32 to vector<2x128xf32>
    %356 = arith.mulf %355, %354 : vector<2x128xf32>
    %cst_144 = arith.constant 5.000000e-01 : f32
    %357 = vector.broadcast %cst_144 : f32 to vector<2x128xf32>
    %358 = arith.addf %356, %357 : vector<2x128xf32>
    %359 = arith.mulf %348, %203 : vector<2x128xf32>
    %360 = arith.mulf %340, %350 : vector<2x128xf32>
    %361 = arith.addf %359, %360 : vector<2x128xf32>
    %362 = math.tanh %361 : vector<2x128xf32>
    %363 = arith.mulf %358, %362 : vector<2x128xf32>
    %364 = arith.truncf %363 : vector<2x128xf32> to vector<2x128xbf16>
    %c0_145 = arith.constant 0 : index
    %c0_146 = arith.constant 0 : index
    %365 = vector.load %arg2[%c0_145, %c0_146] : memref<128x512xbf16, #tpu.memory_space<vmem>>, vector<128x512xbf16>
    %cst_147 = arith.constant dense<0.000000e+00> : vector<2x512xf32>
    %366 = tpu.matmul %364, %365, %cst_147 {dimension_numbers = #tpu.dot_dimension_numbers<[1], [0], [0], [1], [0, 0, 1, 1], [], []>} : vector<2x128xbf16>, vector<128x512xbf16>, vector<2x512xf32> -> vector<2x512xf32>
    %367 = arith.addf %366, %2 : vector<2x512xf32>
    %368 = arith.truncf %244 : vector<2x128xf32> to vector<2x128xbf16>
    %c0_148 = arith.constant 0 : index
    %c0_149 = arith.constant 0 : index
    %369 = vector.load %arg3[%c0_148, %c0_149] : memref<128x512xbf16, #tpu.memory_space<vmem>>, vector<128x512xbf16>
    %cst_150 = arith.constant dense<0.000000e+00> : vector<2x512xf32>
    %370 = tpu.matmul %368, %369, %cst_150 {dimension_numbers = #tpu.dot_dimension_numbers<[1], [0], [0], [1], [0, 0, 1, 1], [], []>} : vector<2x128xbf16>, vector<128x512xbf16>, vector<2x512xf32> -> vector<2x512xf32>
    %371 = arith.addf %367, %370 : vector<2x512xf32>
    %372 = vector.extract_strided_slice %371 {offsets = [0, 0], sizes = [2, 128], strides = [1, 1]} : vector<2x512xf32> to vector<2x128xf32>
    %cst_151 = arith.constant 5.000000e-01 : f32
    %373 = vector.broadcast %cst_151 : f32 to vector<2x128xf32>
    %374 = arith.mulf %373, %372 : vector<2x128xf32>
    %375 = math.tanh %374 : vector<2x128xf32>
    %cst_152 = arith.constant 5.000000e-01 : f32
    %376 = vector.broadcast %cst_152 : f32 to vector<2x128xf32>
    %377 = arith.mulf %376, %375 : vector<2x128xf32>
    %cst_153 = arith.constant 5.000000e-01 : f32
    %378 = vector.broadcast %cst_153 : f32 to vector<2x128xf32>
    %379 = arith.addf %377, %378 : vector<2x128xf32>
    %380 = vector.extract_strided_slice %371 {offsets = [0, 128], sizes = [2, 128], strides = [1, 1]} : vector<2x512xf32> to vector<2x128xf32>
    %cst_154 = arith.constant 5.000000e-01 : f32
    %381 = vector.broadcast %cst_154 : f32 to vector<2x128xf32>
    %382 = arith.mulf %381, %380 : vector<2x128xf32>
    %383 = math.tanh %382 : vector<2x128xf32>
    %cst_155 = arith.constant 5.000000e-01 : f32
    %384 = vector.broadcast %cst_155 : f32 to vector<2x128xf32>
    %385 = arith.mulf %384, %383 : vector<2x128xf32>
    %cst_156 = arith.constant 5.000000e-01 : f32
    %386 = vector.broadcast %cst_156 : f32 to vector<2x128xf32>
    %387 = arith.addf %385, %386 : vector<2x128xf32>
    %388 = vector.extract_strided_slice %371 {offsets = [0, 256], sizes = [2, 128], strides = [1, 1]} : vector<2x512xf32> to vector<2x128xf32>
    %389 = math.tanh %388 : vector<2x128xf32>
    %390 = vector.extract_strided_slice %371 {offsets = [0, 384], sizes = [2, 128], strides = [1, 1]} : vector<2x512xf32> to vector<2x128xf32>
    %cst_157 = arith.constant 5.000000e-01 : f32
    %391 = vector.broadcast %cst_157 : f32 to vector<2x128xf32>
    %392 = arith.mulf %391, %390 : vector<2x128xf32>
    %393 = math.tanh %392 : vector<2x128xf32>
    %cst_158 = arith.constant 5.000000e-01 : f32
    %394 = vector.broadcast %cst_158 : f32 to vector<2x128xf32>
    %395 = arith.mulf %394, %393 : vector<2x128xf32>
    %cst_159 = arith.constant 5.000000e-01 : f32
    %396 = vector.broadcast %cst_159 : f32 to vector<2x128xf32>
    %397 = arith.addf %395, %396 : vector<2x128xf32>
    %398 = arith.mulf %387, %242 : vector<2x128xf32>
    %399 = arith.mulf %379, %389 : vector<2x128xf32>
    %400 = arith.addf %398, %399 : vector<2x128xf32>
    %401 = math.tanh %400 : vector<2x128xf32>
    %402 = arith.mulf %397, %401 : vector<2x128xf32>
    %c2_160 = arith.constant 2 : index
    %c0_161 = arith.constant 0 : index
    %c0_162 = arith.constant 0 : index
    %403 = vector.load %arg11[%c2_160, %c0_161, %c0_162] : memref<8x2x128xbf16, #tpu.memory_space<vmem>>, vector<1x2x128xbf16>
    %404 = vector.shape_cast %403 : vector<1x2x128xbf16> to vector<2x128xbf16>
    %405 = arith.extf %404 : vector<2x128xbf16> to vector<2x128xf32>
    %406 = arith.mulf %402, %405 : vector<2x128xf32>
    %407 = arith.truncf %406 : vector<2x128xf32> to vector<2x128xbf16>
    %c0_163 = arith.constant 0 : index
    %c0_164 = arith.constant 0 : index
    %408 = vector.load %arg5[%c0_163, %c0_164] : memref<128x128xbf16, #tpu.memory_space<vmem>>, vector<128x128xbf16>
    %cst_165 = arith.constant dense<0.000000e+00> : vector<2x128xf32>
    %409 = tpu.matmul %407, %408, %cst_165 {dimension_numbers = #tpu.dot_dimension_numbers<[1], [0], [0], [1], [0, 0, 1, 1], [], []>} : vector<2x128xbf16>, vector<128x128xbf16>, vector<2x128xf32> -> vector<2x128xf32>
    %410 = arith.addf %409, %5 : vector<2x128xf32>
    %411 = arith.truncf %287 : vector<2x32xf32> to vector<2x32xbf16>
    %c0_166 = arith.constant 0 : index
    %c0_167 = arith.constant 0 : index
    %412 = vector.load %arg6[%c0_166, %c0_167] : memref<32x128xbf16, #tpu.memory_space<vmem>>, vector<32x128xbf16>
    %cst_168 = arith.constant dense<0.000000e+00> : vector<2x128xf32>
    %413 = tpu.matmul %411, %412, %cst_168 {dimension_numbers = #tpu.dot_dimension_numbers<[1], [0], [0], [1], [0, 0, 1, 1], [], []>} : vector<2x32xbf16>, vector<32x128xbf16>, vector<2x128xf32> -> vector<2x128xf32>
    %414 = arith.addf %410, %413 : vector<2x128xf32>
    %415 = vector.extract_strided_slice %414 {offsets = [0, 0], sizes = [2, 32], strides = [1, 1]} : vector<2x128xf32> to vector<2x32xf32>
    %cst_169 = arith.constant 5.000000e-01 : f32
    %416 = vector.broadcast %cst_169 : f32 to vector<2x32xf32>
    %417 = arith.mulf %416, %415 : vector<2x32xf32>
    %418 = math.tanh %417 : vector<2x32xf32>
    %cst_170 = arith.constant 5.000000e-01 : f32
    %419 = vector.broadcast %cst_170 : f32 to vector<2x32xf32>
    %420 = arith.mulf %419, %418 : vector<2x32xf32>
    %cst_171 = arith.constant 5.000000e-01 : f32
    %421 = vector.broadcast %cst_171 : f32 to vector<2x32xf32>
    %422 = arith.addf %420, %421 : vector<2x32xf32>
    %423 = vector.extract_strided_slice %414 {offsets = [0, 32], sizes = [2, 32], strides = [1, 1]} : vector<2x128xf32> to vector<2x32xf32>
    %cst_172 = arith.constant 5.000000e-01 : f32
    %424 = vector.broadcast %cst_172 : f32 to vector<2x32xf32>
    %425 = arith.mulf %424, %423 : vector<2x32xf32>
    %426 = math.tanh %425 : vector<2x32xf32>
    %cst_173 = arith.constant 5.000000e-01 : f32
    %427 = vector.broadcast %cst_173 : f32 to vector<2x32xf32>
    %428 = arith.mulf %427, %426 : vector<2x32xf32>
    %cst_174 = arith.constant 5.000000e-01 : f32
    %429 = vector.broadcast %cst_174 : f32 to vector<2x32xf32>
    %430 = arith.addf %428, %429 : vector<2x32xf32>
    %431 = vector.extract_strided_slice %414 {offsets = [0, 64], sizes = [2, 32], strides = [1, 1]} : vector<2x128xf32> to vector<2x32xf32>
    %432 = math.tanh %431 : vector<2x32xf32>
    %433 = vector.extract_strided_slice %414 {offsets = [0, 96], sizes = [2, 32], strides = [1, 1]} : vector<2x128xf32> to vector<2x32xf32>
    %cst_175 = arith.constant 5.000000e-01 : f32
    %434 = vector.broadcast %cst_175 : f32 to vector<2x32xf32>
    %435 = arith.mulf %434, %433 : vector<2x32xf32>
    %436 = math.tanh %435 : vector<2x32xf32>
    %cst_176 = arith.constant 5.000000e-01 : f32
    %437 = vector.broadcast %cst_176 : f32 to vector<2x32xf32>
    %438 = arith.mulf %437, %436 : vector<2x32xf32>
    %cst_177 = arith.constant 5.000000e-01 : f32
    %439 = vector.broadcast %cst_177 : f32 to vector<2x32xf32>
    %440 = arith.addf %438, %439 : vector<2x32xf32>
    %441 = arith.mulf %430, %285 : vector<2x32xf32>
    %442 = arith.mulf %422, %432 : vector<2x32xf32>
    %443 = arith.addf %441, %442 : vector<2x32xf32>
    %444 = math.tanh %443 : vector<2x32xf32>
    %445 = arith.mulf %440, %444 : vector<2x32xf32>
    %446 = arith.truncf %445 : vector<2x32xf32> to vector<2x32xbf16>
    %c0_178 = arith.constant 0 : index
    %c0_179 = arith.constant 0 : index
    %447 = vector.load %arg8[%c0_178, %c0_179] : memref<32x128xbf16, #tpu.memory_space<vmem>>, vector<32x128xbf16>
    %cst_180 = arith.constant dense<0.000000e+00> : vector<2x128xf32>
    %448 = tpu.matmul %446, %447, %cst_180 {dimension_numbers = #tpu.dot_dimension_numbers<[1], [0], [0], [1], [0, 0, 1, 1], [], []>} : vector<2x32xbf16>, vector<32x128xbf16>, vector<2x128xf32> -> vector<2x128xf32>
    %449 = arith.addf %448, %8 : vector<2x128xf32>
    %450 = arith.truncf %326 : vector<2x32xf32> to vector<2x32xbf16>
    %c0_181 = arith.constant 0 : index
    %c0_182 = arith.constant 0 : index
    %451 = vector.load %arg9[%c0_181, %c0_182] : memref<32x128xbf16, #tpu.memory_space<vmem>>, vector<32x128xbf16>
    %cst_183 = arith.constant dense<0.000000e+00> : vector<2x128xf32>
    %452 = tpu.matmul %450, %451, %cst_183 {dimension_numbers = #tpu.dot_dimension_numbers<[1], [0], [0], [1], [0, 0, 1, 1], [], []>} : vector<2x32xbf16>, vector<32x128xbf16>, vector<2x128xf32> -> vector<2x128xf32>
    %453 = arith.addf %449, %452 : vector<2x128xf32>
    %454 = vector.extract_strided_slice %453 {offsets = [0, 0], sizes = [2, 32], strides = [1, 1]} : vector<2x128xf32> to vector<2x32xf32>
    %cst_184 = arith.constant 5.000000e-01 : f32
    %455 = vector.broadcast %cst_184 : f32 to vector<2x32xf32>
    %456 = arith.mulf %455, %454 : vector<2x32xf32>
    %457 = math.tanh %456 : vector<2x32xf32>
    %cst_185 = arith.constant 5.000000e-01 : f32
    %458 = vector.broadcast %cst_185 : f32 to vector<2x32xf32>
    %459 = arith.mulf %458, %457 : vector<2x32xf32>
    %cst_186 = arith.constant 5.000000e-01 : f32
    %460 = vector.broadcast %cst_186 : f32 to vector<2x32xf32>
    %461 = arith.addf %459, %460 : vector<2x32xf32>
    %462 = vector.extract_strided_slice %453 {offsets = [0, 32], sizes = [2, 32], strides = [1, 1]} : vector<2x128xf32> to vector<2x32xf32>
    %cst_187 = arith.constant 5.000000e-01 : f32
    %463 = vector.broadcast %cst_187 : f32 to vector<2x32xf32>
    %464 = arith.mulf %463, %462 : vector<2x32xf32>
    %465 = math.tanh %464 : vector<2x32xf32>
    %cst_188 = arith.constant 5.000000e-01 : f32
    %466 = vector.broadcast %cst_188 : f32 to vector<2x32xf32>
    %467 = arith.mulf %466, %465 : vector<2x32xf32>
    %cst_189 = arith.constant 5.000000e-01 : f32
    %468 = vector.broadcast %cst_189 : f32 to vector<2x32xf32>
    %469 = arith.addf %467, %468 : vector<2x32xf32>
    %470 = vector.extract_strided_slice %453 {offsets = [0, 64], sizes = [2, 32], strides = [1, 1]} : vector<2x128xf32> to vector<2x32xf32>
    %471 = math.tanh %470 : vector<2x32xf32>
    %472 = vector.extract_strided_slice %453 {offsets = [0, 96], sizes = [2, 32], strides = [1, 1]} : vector<2x128xf32> to vector<2x32xf32>
    %cst_190 = arith.constant 5.000000e-01 : f32
    %473 = vector.broadcast %cst_190 : f32 to vector<2x32xf32>
    %474 = arith.mulf %473, %472 : vector<2x32xf32>
    %475 = math.tanh %474 : vector<2x32xf32>
    %cst_191 = arith.constant 5.000000e-01 : f32
    %476 = vector.broadcast %cst_191 : f32 to vector<2x32xf32>
    %477 = arith.mulf %476, %475 : vector<2x32xf32>
    %cst_192 = arith.constant 5.000000e-01 : f32
    %478 = vector.broadcast %cst_192 : f32 to vector<2x32xf32>
    %479 = arith.addf %477, %478 : vector<2x32xf32>
    %480 = arith.mulf %469, %324 : vector<2x32xf32>
    %481 = arith.mulf %461, %471 : vector<2x32xf32>
    %482 = arith.addf %480, %481 : vector<2x32xf32>
    %483 = math.tanh %482 : vector<2x32xf32>
    %484 = arith.mulf %479, %483 : vector<2x32xf32>
    %c3 = arith.constant 3 : index
    %c0_193 = arith.constant 0 : index
    %c0_194 = arith.constant 0 : index
    %485 = vector.load %arg0[%c3, %c0_193, %c0_194] : memref<8x2x512xf32, #tpu.memory_space<vmem>>, vector<1x2x512xf32>
    %486 = vector.shape_cast %485 : vector<1x2x512xf32> to vector<2x512xf32>
    %487 = arith.truncf %363 : vector<2x128xf32> to vector<2x128xbf16>
    %c0_195 = arith.constant 0 : index
    %c0_196 = arith.constant 0 : index
    %488 = vector.load %arg1[%c0_195, %c0_196] : memref<128x512xbf16, #tpu.memory_space<vmem>>, vector<128x512xbf16>
    %cst_197 = arith.constant dense<0.000000e+00> : vector<2x512xf32>
    %489 = tpu.matmul %487, %488, %cst_197 {dimension_numbers = #tpu.dot_dimension_numbers<[1], [0], [0], [1], [0, 0, 1, 1], [], []>} : vector<2x128xbf16>, vector<128x512xbf16>, vector<2x512xf32> -> vector<2x512xf32>
    %490 = arith.addf %486, %489 : vector<2x512xf32>
    %491 = vector.extract_strided_slice %490 {offsets = [0, 0], sizes = [2, 128], strides = [1, 1]} : vector<2x512xf32> to vector<2x128xf32>
    %cst_198 = arith.constant 5.000000e-01 : f32
    %492 = vector.broadcast %cst_198 : f32 to vector<2x128xf32>
    %493 = arith.mulf %492, %491 : vector<2x128xf32>
    %494 = math.tanh %493 : vector<2x128xf32>
    %cst_199 = arith.constant 5.000000e-01 : f32
    %495 = vector.broadcast %cst_199 : f32 to vector<2x128xf32>
    %496 = arith.mulf %495, %494 : vector<2x128xf32>
    %cst_200 = arith.constant 5.000000e-01 : f32
    %497 = vector.broadcast %cst_200 : f32 to vector<2x128xf32>
    %498 = arith.addf %496, %497 : vector<2x128xf32>
    %499 = vector.extract_strided_slice %490 {offsets = [0, 128], sizes = [2, 128], strides = [1, 1]} : vector<2x512xf32> to vector<2x128xf32>
    %cst_201 = arith.constant 5.000000e-01 : f32
    %500 = vector.broadcast %cst_201 : f32 to vector<2x128xf32>
    %501 = arith.mulf %500, %499 : vector<2x128xf32>
    %502 = math.tanh %501 : vector<2x128xf32>
    %cst_202 = arith.constant 5.000000e-01 : f32
    %503 = vector.broadcast %cst_202 : f32 to vector<2x128xf32>
    %504 = arith.mulf %503, %502 : vector<2x128xf32>
    %cst_203 = arith.constant 5.000000e-01 : f32
    %505 = vector.broadcast %cst_203 : f32 to vector<2x128xf32>
    %506 = arith.addf %504, %505 : vector<2x128xf32>
    %507 = vector.extract_strided_slice %490 {offsets = [0, 256], sizes = [2, 128], strides = [1, 1]} : vector<2x512xf32> to vector<2x128xf32>
    %508 = math.tanh %507 : vector<2x128xf32>
    %509 = vector.extract_strided_slice %490 {offsets = [0, 384], sizes = [2, 128], strides = [1, 1]} : vector<2x512xf32> to vector<2x128xf32>
    %cst_204 = arith.constant 5.000000e-01 : f32
    %510 = vector.broadcast %cst_204 : f32 to vector<2x128xf32>
    %511 = arith.mulf %510, %509 : vector<2x128xf32>
    %512 = math.tanh %511 : vector<2x128xf32>
    %cst_205 = arith.constant 5.000000e-01 : f32
    %513 = vector.broadcast %cst_205 : f32 to vector<2x128xf32>
    %514 = arith.mulf %513, %512 : vector<2x128xf32>
    %cst_206 = arith.constant 5.000000e-01 : f32
    %515 = vector.broadcast %cst_206 : f32 to vector<2x128xf32>
    %516 = arith.addf %514, %515 : vector<2x128xf32>
    %517 = arith.mulf %506, %361 : vector<2x128xf32>
    %518 = arith.mulf %498, %508 : vector<2x128xf32>
    %519 = arith.addf %517, %518 : vector<2x128xf32>
    %520 = math.tanh %519 : vector<2x128xf32>
    %521 = arith.mulf %516, %520 : vector<2x128xf32>
    %522 = arith.truncf %521 : vector<2x128xf32> to vector<2x128xbf16>
    %c0_207 = arith.constant 0 : index
    %c0_208 = arith.constant 0 : index
    %523 = vector.load %arg2[%c0_207, %c0_208] : memref<128x512xbf16, #tpu.memory_space<vmem>>, vector<128x512xbf16>
    %cst_209 = arith.constant dense<0.000000e+00> : vector<2x512xf32>
    %524 = tpu.matmul %522, %523, %cst_209 {dimension_numbers = #tpu.dot_dimension_numbers<[1], [0], [0], [1], [0, 0, 1, 1], [], []>} : vector<2x128xbf16>, vector<128x512xbf16>, vector<2x512xf32> -> vector<2x512xf32>
    %525 = arith.addf %524, %2 : vector<2x512xf32>
    %526 = arith.truncf %402 : vector<2x128xf32> to vector<2x128xbf16>
    %c0_210 = arith.constant 0 : index
    %c0_211 = arith.constant 0 : index
    %527 = vector.load %arg3[%c0_210, %c0_211] : memref<128x512xbf16, #tpu.memory_space<vmem>>, vector<128x512xbf16>
    %cst_212 = arith.constant dense<0.000000e+00> : vector<2x512xf32>
    %528 = tpu.matmul %526, %527, %cst_212 {dimension_numbers = #tpu.dot_dimension_numbers<[1], [0], [0], [1], [0, 0, 1, 1], [], []>} : vector<2x128xbf16>, vector<128x512xbf16>, vector<2x512xf32> -> vector<2x512xf32>
    %529 = arith.addf %525, %528 : vector<2x512xf32>
    %530 = vector.extract_strided_slice %529 {offsets = [0, 0], sizes = [2, 128], strides = [1, 1]} : vector<2x512xf32> to vector<2x128xf32>
    %cst_213 = arith.constant 5.000000e-01 : f32
    %531 = vector.broadcast %cst_213 : f32 to vector<2x128xf32>
    %532 = arith.mulf %531, %530 : vector<2x128xf32>
    %533 = math.tanh %532 : vector<2x128xf32>
    %cst_214 = arith.constant 5.000000e-01 : f32
    %534 = vector.broadcast %cst_214 : f32 to vector<2x128xf32>
    %535 = arith.mulf %534, %533 : vector<2x128xf32>
    %cst_215 = arith.constant 5.000000e-01 : f32
    %536 = vector.broadcast %cst_215 : f32 to vector<2x128xf32>
    %537 = arith.addf %535, %536 : vector<2x128xf32>
    %538 = vector.extract_strided_slice %529 {offsets = [0, 128], sizes = [2, 128], strides = [1, 1]} : vector<2x512xf32> to vector<2x128xf32>
    %cst_216 = arith.constant 5.000000e-01 : f32
    %539 = vector.broadcast %cst_216 : f32 to vector<2x128xf32>
    %540 = arith.mulf %539, %538 : vector<2x128xf32>
    %541 = math.tanh %540 : vector<2x128xf32>
    %cst_217 = arith.constant 5.000000e-01 : f32
    %542 = vector.broadcast %cst_217 : f32 to vector<2x128xf32>
    %543 = arith.mulf %542, %541 : vector<2x128xf32>
    %cst_218 = arith.constant 5.000000e-01 : f32
    %544 = vector.broadcast %cst_218 : f32 to vector<2x128xf32>
    %545 = arith.addf %543, %544 : vector<2x128xf32>
    %546 = vector.extract_strided_slice %529 {offsets = [0, 256], sizes = [2, 128], strides = [1, 1]} : vector<2x512xf32> to vector<2x128xf32>
    %547 = math.tanh %546 : vector<2x128xf32>
    %548 = vector.extract_strided_slice %529 {offsets = [0, 384], sizes = [2, 128], strides = [1, 1]} : vector<2x512xf32> to vector<2x128xf32>
    %cst_219 = arith.constant 5.000000e-01 : f32
    %549 = vector.broadcast %cst_219 : f32 to vector<2x128xf32>
    %550 = arith.mulf %549, %548 : vector<2x128xf32>
    %551 = math.tanh %550 : vector<2x128xf32>
    %cst_220 = arith.constant 5.000000e-01 : f32
    %552 = vector.broadcast %cst_220 : f32 to vector<2x128xf32>
    %553 = arith.mulf %552, %551 : vector<2x128xf32>
    %cst_221 = arith.constant 5.000000e-01 : f32
    %554 = vector.broadcast %cst_221 : f32 to vector<2x128xf32>
    %555 = arith.addf %553, %554 : vector<2x128xf32>
    %556 = arith.mulf %545, %400 : vector<2x128xf32>
    %557 = arith.mulf %537, %547 : vector<2x128xf32>
    %558 = arith.addf %556, %557 : vector<2x128xf32>
    %559 = math.tanh %558 : vector<2x128xf32>
    %560 = arith.mulf %555, %559 : vector<2x128xf32>
    %c3_222 = arith.constant 3 : index
    %c0_223 = arith.constant 0 : index
    %c0_224 = arith.constant 0 : index
    %561 = vector.load %arg11[%c3_222, %c0_223, %c0_224] : memref<8x2x128xbf16, #tpu.memory_space<vmem>>, vector<1x2x128xbf16>
    %562 = vector.shape_cast %561 : vector<1x2x128xbf16> to vector<2x128xbf16>
    %563 = arith.extf %562 : vector<2x128xbf16> to vector<2x128xf32>
    %564 = arith.mulf %560, %563 : vector<2x128xf32>
    %565 = arith.truncf %564 : vector<2x128xf32> to vector<2x128xbf16>
    %c0_225 = arith.constant 0 : index
    %c0_226 = arith.constant 0 : index
    %566 = vector.load %arg5[%c0_225, %c0_226] : memref<128x128xbf16, #tpu.memory_space<vmem>>, vector<128x128xbf16>
    %cst_227 = arith.constant dense<0.000000e+00> : vector<2x128xf32>
    %567 = tpu.matmul %565, %566, %cst_227 {dimension_numbers = #tpu.dot_dimension_numbers<[1], [0], [0], [1], [0, 0, 1, 1], [], []>} : vector<2x128xbf16>, vector<128x128xbf16>, vector<2x128xf32> -> vector<2x128xf32>
    %568 = arith.addf %567, %5 : vector<2x128xf32>
    %569 = arith.truncf %445 : vector<2x32xf32> to vector<2x32xbf16>
    %c0_228 = arith.constant 0 : index
    %c0_229 = arith.constant 0 : index
    %570 = vector.load %arg6[%c0_228, %c0_229] : memref<32x128xbf16, #tpu.memory_space<vmem>>, vector<32x128xbf16>
    %cst_230 = arith.constant dense<0.000000e+00> : vector<2x128xf32>
    %571 = tpu.matmul %569, %570, %cst_230 {dimension_numbers = #tpu.dot_dimension_numbers<[1], [0], [0], [1], [0, 0, 1, 1], [], []>} : vector<2x32xbf16>, vector<32x128xbf16>, vector<2x128xf32> -> vector<2x128xf32>
    %572 = arith.addf %568, %571 : vector<2x128xf32>
    %573 = vector.extract_strided_slice %572 {offsets = [0, 0], sizes = [2, 32], strides = [1, 1]} : vector<2x128xf32> to vector<2x32xf32>
    %cst_231 = arith.constant 5.000000e-01 : f32
    %574 = vector.broadcast %cst_231 : f32 to vector<2x32xf32>
    %575 = arith.mulf %574, %573 : vector<2x32xf32>
    %576 = math.tanh %575 : vector<2x32xf32>
    %cst_232 = arith.constant 5.000000e-01 : f32
    %577 = vector.broadcast %cst_232 : f32 to vector<2x32xf32>
    %578 = arith.mulf %577, %576 : vector<2x32xf32>
    %cst_233 = arith.constant 5.000000e-01 : f32
    %579 = vector.broadcast %cst_233 : f32 to vector<2x32xf32>
    %580 = arith.addf %578, %579 : vector<2x32xf32>
    %581 = vector.extract_strided_slice %572 {offsets = [0, 32], sizes = [2, 32], strides = [1, 1]} : vector<2x128xf32> to vector<2x32xf32>
    %cst_234 = arith.constant 5.000000e-01 : f32
    %582 = vector.broadcast %cst_234 : f32 to vector<2x32xf32>
    %583 = arith.mulf %582, %581 : vector<2x32xf32>
    %584 = math.tanh %583 : vector<2x32xf32>
    %cst_235 = arith.constant 5.000000e-01 : f32
    %585 = vector.broadcast %cst_235 : f32 to vector<2x32xf32>
    %586 = arith.mulf %585, %584 : vector<2x32xf32>
    %cst_236 = arith.constant 5.000000e-01 : f32
    %587 = vector.broadcast %cst_236 : f32 to vector<2x32xf32>
    %588 = arith.addf %586, %587 : vector<2x32xf32>
    %589 = vector.extract_strided_slice %572 {offsets = [0, 64], sizes = [2, 32], strides = [1, 1]} : vector<2x128xf32> to vector<2x32xf32>
    %590 = math.tanh %589 : vector<2x32xf32>
    %591 = vector.extract_strided_slice %572 {offsets = [0, 96], sizes = [2, 32], strides = [1, 1]} : vector<2x128xf32> to vector<2x32xf32>
    %cst_237 = arith.constant 5.000000e-01 : f32
    %592 = vector.broadcast %cst_237 : f32 to vector<2x32xf32>
    %593 = arith.mulf %592, %591 : vector<2x32xf32>
    %594 = math.tanh %593 : vector<2x32xf32>
    %cst_238 = arith.constant 5.000000e-01 : f32
    %595 = vector.broadcast %cst_238 : f32 to vector<2x32xf32>
    %596 = arith.mulf %595, %594 : vector<2x32xf32>
    %cst_239 = arith.constant 5.000000e-01 : f32
    %597 = vector.broadcast %cst_239 : f32 to vector<2x32xf32>
    %598 = arith.addf %596, %597 : vector<2x32xf32>
    %599 = arith.mulf %588, %443 : vector<2x32xf32>
    %600 = arith.mulf %580, %590 : vector<2x32xf32>
    %601 = arith.addf %599, %600 : vector<2x32xf32>
    %602 = math.tanh %601 : vector<2x32xf32>
    %603 = arith.mulf %598, %602 : vector<2x32xf32>
    %604 = arith.truncf %603 : vector<2x32xf32> to vector<2x32xbf16>
    %c0_240 = arith.constant 0 : index
    %c0_241 = arith.constant 0 : index
    %605 = vector.load %arg8[%c0_240, %c0_241] : memref<32x128xbf16, #tpu.memory_space<vmem>>, vector<32x128xbf16>
    %cst_242 = arith.constant dense<0.000000e+00> : vector<2x128xf32>
    %606 = tpu.matmul %604, %605, %cst_242 {dimension_numbers = #tpu.dot_dimension_numbers<[1], [0], [0], [1], [0, 0, 1, 1], [], []>} : vector<2x32xbf16>, vector<32x128xbf16>, vector<2x128xf32> -> vector<2x128xf32>
    %607 = arith.addf %606, %8 : vector<2x128xf32>
    %608 = arith.truncf %484 : vector<2x32xf32> to vector<2x32xbf16>
    %c0_243 = arith.constant 0 : index
    %c0_244 = arith.constant 0 : index
    %609 = vector.load %arg9[%c0_243, %c0_244] : memref<32x128xbf16, #tpu.memory_space<vmem>>, vector<32x128xbf16>
    %cst_245 = arith.constant dense<0.000000e+00> : vector<2x128xf32>
    %610 = tpu.matmul %608, %609, %cst_245 {dimension_numbers = #tpu.dot_dimension_numbers<[1], [0], [0], [1], [0, 0, 1, 1], [], []>} : vector<2x32xbf16>, vector<32x128xbf16>, vector<2x128xf32> -> vector<2x128xf32>
    %611 = arith.addf %607, %610 : vector<2x128xf32>
    %612 = vector.extract_strided_slice %611 {offsets = [0, 0], sizes = [2, 32], strides = [1, 1]} : vector<2x128xf32> to vector<2x32xf32>
    %cst_246 = arith.constant 5.000000e-01 : f32
    %613 = vector.broadcast %cst_246 : f32 to vector<2x32xf32>
    %614 = arith.mulf %613, %612 : vector<2x32xf32>
    %615 = math.tanh %614 : vector<2x32xf32>
    %cst_247 = arith.constant 5.000000e-01 : f32
    %616 = vector.broadcast %cst_247 : f32 to vector<2x32xf32>
    %617 = arith.mulf %616, %615 : vector<2x32xf32>
    %cst_248 = arith.constant 5.000000e-01 : f32
    %618 = vector.broadcast %cst_248 : f32 to vector<2x32xf32>
    %619 = arith.addf %617, %618 : vector<2x32xf32>
    %620 = vector.extract_strided_slice %611 {offsets = [0, 32], sizes = [2, 32], strides = [1, 1]} : vector<2x128xf32> to vector<2x32xf32>
    %cst_249 = arith.constant 5.000000e-01 : f32
    %621 = vector.broadcast %cst_249 : f32 to vector<2x32xf32>
    %622 = arith.mulf %621, %620 : vector<2x32xf32>
    %623 = math.tanh %622 : vector<2x32xf32>
    %cst_250 = arith.constant 5.000000e-01 : f32
    %624 = vector.broadcast %cst_250 : f32 to vector<2x32xf32>
    %625 = arith.mulf %624, %623 : vector<2x32xf32>
    %cst_251 = arith.constant 5.000000e-01 : f32
    %626 = vector.broadcast %cst_251 : f32 to vector<2x32xf32>
    %627 = arith.addf %625, %626 : vector<2x32xf32>
    %628 = vector.extract_strided_slice %611 {offsets = [0, 64], sizes = [2, 32], strides = [1, 1]} : vector<2x128xf32> to vector<2x32xf32>
    %629 = math.tanh %628 : vector<2x32xf32>
    %630 = vector.extract_strided_slice %611 {offsets = [0, 96], sizes = [2, 32], strides = [1, 1]} : vector<2x128xf32> to vector<2x32xf32>
    %cst_252 = arith.constant 5.000000e-01 : f32
    %631 = vector.broadcast %cst_252 : f32 to vector<2x32xf32>
    %632 = arith.mulf %631, %630 : vector<2x32xf32>
    %633 = math.tanh %632 : vector<2x32xf32>
    %cst_253 = arith.constant 5.000000e-01 : f32
    %634 = vector.broadcast %cst_253 : f32 to vector<2x32xf32>
    %635 = arith.mulf %634, %633 : vector<2x32xf32>
    %cst_254 = arith.constant 5.000000e-01 : f32
    %636 = vector.broadcast %cst_254 : f32 to vector<2x32xf32>
    %637 = arith.addf %635, %636 : vector<2x32xf32>
    %638 = arith.mulf %627, %482 : vector<2x32xf32>
    %639 = arith.mulf %619, %629 : vector<2x32xf32>
    %640 = arith.addf %638, %639 : vector<2x32xf32>
    %641 = math.tanh %640 : vector<2x32xf32>
    %642 = arith.mulf %637, %641 : vector<2x32xf32>
    %c4 = arith.constant 4 : index
    %c0_255 = arith.constant 0 : index
    %c0_256 = arith.constant 0 : index
    %643 = vector.load %arg0[%c4, %c0_255, %c0_256] : memref<8x2x512xf32, #tpu.memory_space<vmem>>, vector<1x2x512xf32>
    %644 = vector.shape_cast %643 : vector<1x2x512xf32> to vector<2x512xf32>
    %645 = arith.truncf %521 : vector<2x128xf32> to vector<2x128xbf16>
    %c0_257 = arith.constant 0 : index
    %c0_258 = arith.constant 0 : index
    %646 = vector.load %arg1[%c0_257, %c0_258] : memref<128x512xbf16, #tpu.memory_space<vmem>>, vector<128x512xbf16>
    %cst_259 = arith.constant dense<0.000000e+00> : vector<2x512xf32>
    %647 = tpu.matmul %645, %646, %cst_259 {dimension_numbers = #tpu.dot_dimension_numbers<[1], [0], [0], [1], [0, 0, 1, 1], [], []>} : vector<2x128xbf16>, vector<128x512xbf16>, vector<2x512xf32> -> vector<2x512xf32>
    %648 = arith.addf %644, %647 : vector<2x512xf32>
    %649 = vector.extract_strided_slice %648 {offsets = [0, 0], sizes = [2, 128], strides = [1, 1]} : vector<2x512xf32> to vector<2x128xf32>
    %cst_260 = arith.constant 5.000000e-01 : f32
    %650 = vector.broadcast %cst_260 : f32 to vector<2x128xf32>
    %651 = arith.mulf %650, %649 : vector<2x128xf32>
    %652 = math.tanh %651 : vector<2x128xf32>
    %cst_261 = arith.constant 5.000000e-01 : f32
    %653 = vector.broadcast %cst_261 : f32 to vector<2x128xf32>
    %654 = arith.mulf %653, %652 : vector<2x128xf32>
    %cst_262 = arith.constant 5.000000e-01 : f32
    %655 = vector.broadcast %cst_262 : f32 to vector<2x128xf32>
    %656 = arith.addf %654, %655 : vector<2x128xf32>
    %657 = vector.extract_strided_slice %648 {offsets = [0, 128], sizes = [2, 128], strides = [1, 1]} : vector<2x512xf32> to vector<2x128xf32>
    %cst_263 = arith.constant 5.000000e-01 : f32
    %658 = vector.broadcast %cst_263 : f32 to vector<2x128xf32>
    %659 = arith.mulf %658, %657 : vector<2x128xf32>
    %660 = math.tanh %659 : vector<2x128xf32>
    %cst_264 = arith.constant 5.000000e-01 : f32
    %661 = vector.broadcast %cst_264 : f32 to vector<2x128xf32>
    %662 = arith.mulf %661, %660 : vector<2x128xf32>
    %cst_265 = arith.constant 5.000000e-01 : f32
    %663 = vector.broadcast %cst_265 : f32 to vector<2x128xf32>
    %664 = arith.addf %662, %663 : vector<2x128xf32>
    %665 = vector.extract_strided_slice %648 {offsets = [0, 256], sizes = [2, 128], strides = [1, 1]} : vector<2x512xf32> to vector<2x128xf32>
    %666 = math.tanh %665 : vector<2x128xf32>
    %667 = vector.extract_strided_slice %648 {offsets = [0, 384], sizes = [2, 128], strides = [1, 1]} : vector<2x512xf32> to vector<2x128xf32>
    %cst_266 = arith.constant 5.000000e-01 : f32
    %668 = vector.broadcast %cst_266 : f32 to vector<2x128xf32>
    %669 = arith.mulf %668, %667 : vector<2x128xf32>
    %670 = math.tanh %669 : vector<2x128xf32>
    %cst_267 = arith.constant 5.000000e-01 : f32
    %671 = vector.broadcast %cst_267 : f32 to vector<2x128xf32>
    %672 = arith.mulf %671, %670 : vector<2x128xf32>
    %cst_268 = arith.constant 5.000000e-01 : f32
    %673 = vector.broadcast %cst_268 : f32 to vector<2x128xf32>
    %674 = arith.addf %672, %673 : vector<2x128xf32>
    %675 = arith.mulf %664, %519 : vector<2x128xf32>
    %676 = arith.mulf %656, %666 : vector<2x128xf32>
    %677 = arith.addf %675, %676 : vector<2x128xf32>
    %678 = math.tanh %677 : vector<2x128xf32>
    %679 = arith.mulf %674, %678 : vector<2x128xf32>
    %680 = arith.truncf %679 : vector<2x128xf32> to vector<2x128xbf16>
    %c0_269 = arith.constant 0 : index
    %c0_270 = arith.constant 0 : index
    %681 = vector.load %arg2[%c0_269, %c0_270] : memref<128x512xbf16, #tpu.memory_space<vmem>>, vector<128x512xbf16>
    %cst_271 = arith.constant dense<0.000000e+00> : vector<2x512xf32>
    %682 = tpu.matmul %680, %681, %cst_271 {dimension_numbers = #tpu.dot_dimension_numbers<[1], [0], [0], [1], [0, 0, 1, 1], [], []>} : vector<2x128xbf16>, vector<128x512xbf16>, vector<2x512xf32> -> vector<2x512xf32>
    %683 = arith.addf %682, %2 : vector<2x512xf32>
    %684 = arith.truncf %560 : vector<2x128xf32> to vector<2x128xbf16>
    %c0_272 = arith.constant 0 : index
    %c0_273 = arith.constant 0 : index
    %685 = vector.load %arg3[%c0_272, %c0_273] : memref<128x512xbf16, #tpu.memory_space<vmem>>, vector<128x512xbf16>
    %cst_274 = arith.constant dense<0.000000e+00> : vector<2x512xf32>
    %686 = tpu.matmul %684, %685, %cst_274 {dimension_numbers = #tpu.dot_dimension_numbers<[1], [0], [0], [1], [0, 0, 1, 1], [], []>} : vector<2x128xbf16>, vector<128x512xbf16>, vector<2x512xf32> -> vector<2x512xf32>
    %687 = arith.addf %683, %686 : vector<2x512xf32>
    %688 = vector.extract_strided_slice %687 {offsets = [0, 0], sizes = [2, 128], strides = [1, 1]} : vector<2x512xf32> to vector<2x128xf32>
    %cst_275 = arith.constant 5.000000e-01 : f32
    %689 = vector.broadcast %cst_275 : f32 to vector<2x128xf32>
    %690 = arith.mulf %689, %688 : vector<2x128xf32>
    %691 = math.tanh %690 : vector<2x128xf32>
    %cst_276 = arith.constant 5.000000e-01 : f32
    %692 = vector.broadcast %cst_276 : f32 to vector<2x128xf32>
    %693 = arith.mulf %692, %691 : vector<2x128xf32>
    %cst_277 = arith.constant 5.000000e-01 : f32
    %694 = vector.broadcast %cst_277 : f32 to vector<2x128xf32>
    %695 = arith.addf %693, %694 : vector<2x128xf32>
    %696 = vector.extract_strided_slice %687 {offsets = [0, 128], sizes = [2, 128], strides = [1, 1]} : vector<2x512xf32> to vector<2x128xf32>
    %cst_278 = arith.constant 5.000000e-01 : f32
    %697 = vector.broadcast %cst_278 : f32 to vector<2x128xf32>
    %698 = arith.mulf %697, %696 : vector<2x128xf32>
    %699 = math.tanh %698 : vector<2x128xf32>
    %cst_279 = arith.constant 5.000000e-01 : f32
    %700 = vector.broadcast %cst_279 : f32 to vector<2x128xf32>
    %701 = arith.mulf %700, %699 : vector<2x128xf32>
    %cst_280 = arith.constant 5.000000e-01 : f32
    %702 = vector.broadcast %cst_280 : f32 to vector<2x128xf32>
    %703 = arith.addf %701, %702 : vector<2x128xf32>
    %704 = vector.extract_strided_slice %687 {offsets = [0, 256], sizes = [2, 128], strides = [1, 1]} : vector<2x512xf32> to vector<2x128xf32>
    %705 = math.tanh %704 : vector<2x128xf32>
    %706 = vector.extract_strided_slice %687 {offsets = [0, 384], sizes = [2, 128], strides = [1, 1]} : vector<2x512xf32> to vector<2x128xf32>
    %cst_281 = arith.constant 5.000000e-01 : f32
    %707 = vector.broadcast %cst_281 : f32 to vector<2x128xf32>
    %708 = arith.mulf %707, %706 : vector<2x128xf32>
    %709 = math.tanh %708 : vector<2x128xf32>
    %cst_282 = arith.constant 5.000000e-01 : f32
    %710 = vector.broadcast %cst_282 : f32 to vector<2x128xf32>
    %711 = arith.mulf %710, %709 : vector<2x128xf32>
    %cst_283 = arith.constant 5.000000e-01 : f32
    %712 = vector.broadcast %cst_283 : f32 to vector<2x128xf32>
    %713 = arith.addf %711, %712 : vector<2x128xf32>
    %714 = arith.mulf %703, %558 : vector<2x128xf32>
    %715 = arith.mulf %695, %705 : vector<2x128xf32>
    %716 = arith.addf %714, %715 : vector<2x128xf32>
    %717 = math.tanh %716 : vector<2x128xf32>
    %718 = arith.mulf %713, %717 : vector<2x128xf32>
    %c4_284 = arith.constant 4 : index
    %c0_285 = arith.constant 0 : index
    %c0_286 = arith.constant 0 : index
    %719 = vector.load %arg11[%c4_284, %c0_285, %c0_286] : memref<8x2x128xbf16, #tpu.memory_space<vmem>>, vector<1x2x128xbf16>
    %720 = vector.shape_cast %719 : vector<1x2x128xbf16> to vector<2x128xbf16>
    %721 = arith.extf %720 : vector<2x128xbf16> to vector<2x128xf32>
    %722 = arith.mulf %718, %721 : vector<2x128xf32>
    %723 = arith.truncf %722 : vector<2x128xf32> to vector<2x128xbf16>
    %c0_287 = arith.constant 0 : index
    %c0_288 = arith.constant 0 : index
    %724 = vector.load %arg5[%c0_287, %c0_288] : memref<128x128xbf16, #tpu.memory_space<vmem>>, vector<128x128xbf16>
    %cst_289 = arith.constant dense<0.000000e+00> : vector<2x128xf32>
    %725 = tpu.matmul %723, %724, %cst_289 {dimension_numbers = #tpu.dot_dimension_numbers<[1], [0], [0], [1], [0, 0, 1, 1], [], []>} : vector<2x128xbf16>, vector<128x128xbf16>, vector<2x128xf32> -> vector<2x128xf32>
    %726 = arith.addf %725, %5 : vector<2x128xf32>
    %727 = arith.truncf %603 : vector<2x32xf32> to vector<2x32xbf16>
    %c0_290 = arith.constant 0 : index
    %c0_291 = arith.constant 0 : index
    %728 = vector.load %arg6[%c0_290, %c0_291] : memref<32x128xbf16, #tpu.memory_space<vmem>>, vector<32x128xbf16>
    %cst_292 = arith.constant dense<0.000000e+00> : vector<2x128xf32>
    %729 = tpu.matmul %727, %728, %cst_292 {dimension_numbers = #tpu.dot_dimension_numbers<[1], [0], [0], [1], [0, 0, 1, 1], [], []>} : vector<2x32xbf16>, vector<32x128xbf16>, vector<2x128xf32> -> vector<2x128xf32>
    %730 = arith.addf %726, %729 : vector<2x128xf32>
    %731 = vector.extract_strided_slice %730 {offsets = [0, 0], sizes = [2, 32], strides = [1, 1]} : vector<2x128xf32> to vector<2x32xf32>
    %cst_293 = arith.constant 5.000000e-01 : f32
    %732 = vector.broadcast %cst_293 : f32 to vector<2x32xf32>
    %733 = arith.mulf %732, %731 : vector<2x32xf32>
    %734 = math.tanh %733 : vector<2x32xf32>
    %cst_294 = arith.constant 5.000000e-01 : f32
    %735 = vector.broadcast %cst_294 : f32 to vector<2x32xf32>
    %736 = arith.mulf %735, %734 : vector<2x32xf32>
    %cst_295 = arith.constant 5.000000e-01 : f32
    %737 = vector.broadcast %cst_295 : f32 to vector<2x32xf32>
    %738 = arith.addf %736, %737 : vector<2x32xf32>
    %739 = vector.extract_strided_slice %730 {offsets = [0, 32], sizes = [2, 32], strides = [1, 1]} : vector<2x128xf32> to vector<2x32xf32>
    %cst_296 = arith.constant 5.000000e-01 : f32
    %740 = vector.broadcast %cst_296 : f32 to vector<2x32xf32>
    %741 = arith.mulf %740, %739 : vector<2x32xf32>
    %742 = math.tanh %741 : vector<2x32xf32>
    %cst_297 = arith.constant 5.000000e-01 : f32
    %743 = vector.broadcast %cst_297 : f32 to vector<2x32xf32>
    %744 = arith.mulf %743, %742 : vector<2x32xf32>
    %cst_298 = arith.constant 5.000000e-01 : f32
    %745 = vector.broadcast %cst_298 : f32 to vector<2x32xf32>
    %746 = arith.addf %744, %745 : vector<2x32xf32>
    %747 = vector.extract_strided_slice %730 {offsets = [0, 64], sizes = [2, 32], strides = [1, 1]} : vector<2x128xf32> to vector<2x32xf32>
    %748 = math.tanh %747 : vector<2x32xf32>
    %749 = vector.extract_strided_slice %730 {offsets = [0, 96], sizes = [2, 32], strides = [1, 1]} : vector<2x128xf32> to vector<2x32xf32>
    %cst_299 = arith.constant 5.000000e-01 : f32
    %750 = vector.broadcast %cst_299 : f32 to vector<2x32xf32>
    %751 = arith.mulf %750, %749 : vector<2x32xf32>
    %752 = math.tanh %751 : vector<2x32xf32>
    %cst_300 = arith.constant 5.000000e-01 : f32
    %753 = vector.broadcast %cst_300 : f32 to vector<2x32xf32>
    %754 = arith.mulf %753, %752 : vector<2x32xf32>
    %cst_301 = arith.constant 5.000000e-01 : f32
    %755 = vector.broadcast %cst_301 : f32 to vector<2x32xf32>
    %756 = arith.addf %754, %755 : vector<2x32xf32>
    %757 = arith.mulf %746, %601 : vector<2x32xf32>
    %758 = arith.mulf %738, %748 : vector<2x32xf32>
    %759 = arith.addf %757, %758 : vector<2x32xf32>
    %760 = math.tanh %759 : vector<2x32xf32>
    %761 = arith.mulf %756, %760 : vector<2x32xf32>
    %762 = arith.truncf %761 : vector<2x32xf32> to vector<2x32xbf16>
    %c0_302 = arith.constant 0 : index
    %c0_303 = arith.constant 0 : index
    %763 = vector.load %arg8[%c0_302, %c0_303] : memref<32x128xbf16, #tpu.memory_space<vmem>>, vector<32x128xbf16>
    %cst_304 = arith.constant dense<0.000000e+00> : vector<2x128xf32>
    %764 = tpu.matmul %762, %763, %cst_304 {dimension_numbers = #tpu.dot_dimension_numbers<[1], [0], [0], [1], [0, 0, 1, 1], [], []>} : vector<2x32xbf16>, vector<32x128xbf16>, vector<2x128xf32> -> vector<2x128xf32>
    %765 = arith.addf %764, %8 : vector<2x128xf32>
    %766 = arith.truncf %642 : vector<2x32xf32> to vector<2x32xbf16>
    %c0_305 = arith.constant 0 : index
    %c0_306 = arith.constant 0 : index
    %767 = vector.load %arg9[%c0_305, %c0_306] : memref<32x128xbf16, #tpu.memory_space<vmem>>, vector<32x128xbf16>
    %cst_307 = arith.constant dense<0.000000e+00> : vector<2x128xf32>
    %768 = tpu.matmul %766, %767, %cst_307 {dimension_numbers = #tpu.dot_dimension_numbers<[1], [0], [0], [1], [0, 0, 1, 1], [], []>} : vector<2x32xbf16>, vector<32x128xbf16>, vector<2x128xf32> -> vector<2x128xf32>
    %769 = arith.addf %765, %768 : vector<2x128xf32>
    %770 = vector.extract_strided_slice %769 {offsets = [0, 0], sizes = [2, 32], strides = [1, 1]} : vector<2x128xf32> to vector<2x32xf32>
    %cst_308 = arith.constant 5.000000e-01 : f32
    %771 = vector.broadcast %cst_308 : f32 to vector<2x32xf32>
    %772 = arith.mulf %771, %770 : vector<2x32xf32>
    %773 = math.tanh %772 : vector<2x32xf32>
    %cst_309 = arith.constant 5.000000e-01 : f32
    %774 = vector.broadcast %cst_309 : f32 to vector<2x32xf32>
    %775 = arith.mulf %774, %773 : vector<2x32xf32>
    %cst_310 = arith.constant 5.000000e-01 : f32
    %776 = vector.broadcast %cst_310 : f32 to vector<2x32xf32>
    %777 = arith.addf %775, %776 : vector<2x32xf32>
    %778 = vector.extract_strided_slice %769 {offsets = [0, 32], sizes = [2, 32], strides = [1, 1]} : vector<2x128xf32> to vector<2x32xf32>
    %cst_311 = arith.constant 5.000000e-01 : f32
    %779 = vector.broadcast %cst_311 : f32 to vector<2x32xf32>
    %780 = arith.mulf %779, %778 : vector<2x32xf32>
    %781 = math.tanh %780 : vector<2x32xf32>
    %cst_312 = arith.constant 5.000000e-01 : f32
    %782 = vector.broadcast %cst_312 : f32 to vector<2x32xf32>
    %783 = arith.mulf %782, %781 : vector<2x32xf32>
    %cst_313 = arith.constant 5.000000e-01 : f32
    %784 = vector.broadcast %cst_313 : f32 to vector<2x32xf32>
    %785 = arith.addf %783, %784 : vector<2x32xf32>
    %786 = vector.extract_strided_slice %769 {offsets = [0, 64], sizes = [2, 32], strides = [1, 1]} : vector<2x128xf32> to vector<2x32xf32>
    %787 = math.tanh %786 : vector<2x32xf32>
    %788 = vector.extract_strided_slice %769 {offsets = [0, 96], sizes = [2, 32], strides = [1, 1]} : vector<2x128xf32> to vector<2x32xf32>
    %cst_314 = arith.constant 5.000000e-01 : f32
    %789 = vector.broadcast %cst_314 : f32 to vector<2x32xf32>
    %790 = arith.mulf %789, %788 : vector<2x32xf32>
    %791 = math.tanh %790 : vector<2x32xf32>
    %cst_315 = arith.constant 5.000000e-01 : f32
    %792 = vector.broadcast %cst_315 : f32 to vector<2x32xf32>
    %793 = arith.mulf %792, %791 : vector<2x32xf32>
    %cst_316 = arith.constant 5.000000e-01 : f32
    %794 = vector.broadcast %cst_316 : f32 to vector<2x32xf32>
    %795 = arith.addf %793, %794 : vector<2x32xf32>
    %796 = arith.mulf %785, %640 : vector<2x32xf32>
    %797 = arith.mulf %777, %787 : vector<2x32xf32>
    %798 = arith.addf %796, %797 : vector<2x32xf32>
    %799 = math.tanh %798 : vector<2x32xf32>
    %800 = arith.mulf %795, %799 : vector<2x32xf32>
    %c5 = arith.constant 5 : index
    %c0_317 = arith.constant 0 : index
    %c0_318 = arith.constant 0 : index
    %801 = vector.load %arg0[%c5, %c0_317, %c0_318] : memref<8x2x512xf32, #tpu.memory_space<vmem>>, vector<1x2x512xf32>
    %802 = vector.shape_cast %801 : vector<1x2x512xf32> to vector<2x512xf32>
    %803 = arith.truncf %679 : vector<2x128xf32> to vector<2x128xbf16>
    %c0_319 = arith.constant 0 : index
    %c0_320 = arith.constant 0 : index
    %804 = vector.load %arg1[%c0_319, %c0_320] : memref<128x512xbf16, #tpu.memory_space<vmem>>, vector<128x512xbf16>
    %cst_321 = arith.constant dense<0.000000e+00> : vector<2x512xf32>
    %805 = tpu.matmul %803, %804, %cst_321 {dimension_numbers = #tpu.dot_dimension_numbers<[1], [0], [0], [1], [0, 0, 1, 1], [], []>} : vector<2x128xbf16>, vector<128x512xbf16>, vector<2x512xf32> -> vector<2x512xf32>
    %806 = arith.addf %802, %805 : vector<2x512xf32>
    %807 = vector.extract_strided_slice %806 {offsets = [0, 0], sizes = [2, 128], strides = [1, 1]} : vector<2x512xf32> to vector<2x128xf32>
    %cst_322 = arith.constant 5.000000e-01 : f32
    %808 = vector.broadcast %cst_322 : f32 to vector<2x128xf32>
    %809 = arith.mulf %808, %807 : vector<2x128xf32>
    %810 = math.tanh %809 : vector<2x128xf32>
    %cst_323 = arith.constant 5.000000e-01 : f32
    %811 = vector.broadcast %cst_323 : f32 to vector<2x128xf32>
    %812 = arith.mulf %811, %810 : vector<2x128xf32>
    %cst_324 = arith.constant 5.000000e-01 : f32
    %813 = vector.broadcast %cst_324 : f32 to vector<2x128xf32>
    %814 = arith.addf %812, %813 : vector<2x128xf32>
    %815 = vector.extract_strided_slice %806 {offsets = [0, 128], sizes = [2, 128], strides = [1, 1]} : vector<2x512xf32> to vector<2x128xf32>
    %cst_325 = arith.constant 5.000000e-01 : f32
    %816 = vector.broadcast %cst_325 : f32 to vector<2x128xf32>
    %817 = arith.mulf %816, %815 : vector<2x128xf32>
    %818 = math.tanh %817 : vector<2x128xf32>
    %cst_326 = arith.constant 5.000000e-01 : f32
    %819 = vector.broadcast %cst_326 : f32 to vector<2x128xf32>
    %820 = arith.mulf %819, %818 : vector<2x128xf32>
    %cst_327 = arith.constant 5.000000e-01 : f32
    %821 = vector.broadcast %cst_327 : f32 to vector<2x128xf32>
    %822 = arith.addf %820, %821 : vector<2x128xf32>
    %823 = vector.extract_strided_slice %806 {offsets = [0, 256], sizes = [2, 128], strides = [1, 1]} : vector<2x512xf32> to vector<2x128xf32>
    %824 = math.tanh %823 : vector<2x128xf32>
    %825 = vector.extract_strided_slice %806 {offsets = [0, 384], sizes = [2, 128], strides = [1, 1]} : vector<2x512xf32> to vector<2x128xf32>
    %cst_328 = arith.constant 5.000000e-01 : f32
    %826 = vector.broadcast %cst_328 : f32 to vector<2x128xf32>
    %827 = arith.mulf %826, %825 : vector<2x128xf32>
    %828 = math.tanh %827 : vector<2x128xf32>
    %cst_329 = arith.constant 5.000000e-01 : f32
    %829 = vector.broadcast %cst_329 : f32 to vector<2x128xf32>
    %830 = arith.mulf %829, %828 : vector<2x128xf32>
    %cst_330 = arith.constant 5.000000e-01 : f32
    %831 = vector.broadcast %cst_330 : f32 to vector<2x128xf32>
    %832 = arith.addf %830, %831 : vector<2x128xf32>
    %833 = arith.mulf %822, %677 : vector<2x128xf32>
    %834 = arith.mulf %814, %824 : vector<2x128xf32>
    %835 = arith.addf %833, %834 : vector<2x128xf32>
    %836 = math.tanh %835 : vector<2x128xf32>
    %837 = arith.mulf %832, %836 : vector<2x128xf32>
    %838 = arith.truncf %837 : vector<2x128xf32> to vector<2x128xbf16>
    %c0_331 = arith.constant 0 : index
    %c0_332 = arith.constant 0 : index
    %839 = vector.load %arg2[%c0_331, %c0_332] : memref<128x512xbf16, #tpu.memory_space<vmem>>, vector<128x512xbf16>
    %cst_333 = arith.constant dense<0.000000e+00> : vector<2x512xf32>
    %840 = tpu.matmul %838, %839, %cst_333 {dimension_numbers = #tpu.dot_dimension_numbers<[1], [0], [0], [1], [0, 0, 1, 1], [], []>} : vector<2x128xbf16>, vector<128x512xbf16>, vector<2x512xf32> -> vector<2x512xf32>
    %841 = arith.addf %840, %2 : vector<2x512xf32>
    %842 = arith.truncf %718 : vector<2x128xf32> to vector<2x128xbf16>
    %c0_334 = arith.constant 0 : index
    %c0_335 = arith.constant 0 : index
    %843 = vector.load %arg3[%c0_334, %c0_335] : memref<128x512xbf16, #tpu.memory_space<vmem>>, vector<128x512xbf16>
    %cst_336 = arith.constant dense<0.000000e+00> : vector<2x512xf32>
    %844 = tpu.matmul %842, %843, %cst_336 {dimension_numbers = #tpu.dot_dimension_numbers<[1], [0], [0], [1], [0, 0, 1, 1], [], []>} : vector<2x128xbf16>, vector<128x512xbf16>, vector<2x512xf32> -> vector<2x512xf32>
    %845 = arith.addf %841, %844 : vector<2x512xf32>
    %846 = vector.extract_strided_slice %845 {offsets = [0, 0], sizes = [2, 128], strides = [1, 1]} : vector<2x512xf32> to vector<2x128xf32>
    %cst_337 = arith.constant 5.000000e-01 : f32
    %847 = vector.broadcast %cst_337 : f32 to vector<2x128xf32>
    %848 = arith.mulf %847, %846 : vector<2x128xf32>
    %849 = math.tanh %848 : vector<2x128xf32>
    %cst_338 = arith.constant 5.000000e-01 : f32
    %850 = vector.broadcast %cst_338 : f32 to vector<2x128xf32>
    %851 = arith.mulf %850, %849 : vector<2x128xf32>
    %cst_339 = arith.constant 5.000000e-01 : f32
    %852 = vector.broadcast %cst_339 : f32 to vector<2x128xf32>
    %853 = arith.addf %851, %852 : vector<2x128xf32>
    %854 = vector.extract_strided_slice %845 {offsets = [0, 128], sizes = [2, 128], strides = [1, 1]} : vector<2x512xf32> to vector<2x128xf32>
    %cst_340 = arith.constant 5.000000e-01 : f32
    %855 = vector.broadcast %cst_340 : f32 to vector<2x128xf32>
    %856 = arith.mulf %855, %854 : vector<2x128xf32>
    %857 = math.tanh %856 : vector<2x128xf32>
    %cst_341 = arith.constant 5.000000e-01 : f32
    %858 = vector.broadcast %cst_341 : f32 to vector<2x128xf32>
    %859 = arith.mulf %858, %857 : vector<2x128xf32>
    %cst_342 = arith.constant 5.000000e-01 : f32
    %860 = vector.broadcast %cst_342 : f32 to vector<2x128xf32>
    %861 = arith.addf %859, %860 : vector<2x128xf32>
    %862 = vector.extract_strided_slice %845 {offsets = [0, 256], sizes = [2, 128], strides = [1, 1]} : vector<2x512xf32> to vector<2x128xf32>
    %863 = math.tanh %862 : vector<2x128xf32>
    %864 = vector.extract_strided_slice %845 {offsets = [0, 384], sizes = [2, 128], strides = [1, 1]} : vector<2x512xf32> to vector<2x128xf32>
    %cst_343 = arith.constant 5.000000e-01 : f32
    %865 = vector.broadcast %cst_343 : f32 to vector<2x128xf32>
    %866 = arith.mulf %865, %864 : vector<2x128xf32>
    %867 = math.tanh %866 : vector<2x128xf32>
    %cst_344 = arith.constant 5.000000e-01 : f32
    %868 = vector.broadcast %cst_344 : f32 to vector<2x128xf32>
    %869 = arith.mulf %868, %867 : vector<2x128xf32>
    %cst_345 = arith.constant 5.000000e-01 : f32
    %870 = vector.broadcast %cst_345 : f32 to vector<2x128xf32>
    %871 = arith.addf %869, %870 : vector<2x128xf32>
    %872 = arith.mulf %861, %716 : vector<2x128xf32>
    %873 = arith.mulf %853, %863 : vector<2x128xf32>
    %874 = arith.addf %872, %873 : vector<2x128xf32>
    %875 = math.tanh %874 : vector<2x128xf32>
    %876 = arith.mulf %871, %875 : vector<2x128xf32>
    %c5_346 = arith.constant 5 : index
    %c0_347 = arith.constant 0 : index
    %c0_348 = arith.constant 0 : index
    %877 = vector.load %arg11[%c5_346, %c0_347, %c0_348] : memref<8x2x128xbf16, #tpu.memory_space<vmem>>, vector<1x2x128xbf16>
    %878 = vector.shape_cast %877 : vector<1x2x128xbf16> to vector<2x128xbf16>
    %879 = arith.extf %878 : vector<2x128xbf16> to vector<2x128xf32>
    %880 = arith.mulf %876, %879 : vector<2x128xf32>
    %881 = arith.truncf %880 : vector<2x128xf32> to vector<2x128xbf16>
    %c0_349 = arith.constant 0 : index
    %c0_350 = arith.constant 0 : index
    %882 = vector.load %arg5[%c0_349, %c0_350] : memref<128x128xbf16, #tpu.memory_space<vmem>>, vector<128x128xbf16>
    %cst_351 = arith.constant dense<0.000000e+00> : vector<2x128xf32>
    %883 = tpu.matmul %881, %882, %cst_351 {dimension_numbers = #tpu.dot_dimension_numbers<[1], [0], [0], [1], [0, 0, 1, 1], [], []>} : vector<2x128xbf16>, vector<128x128xbf16>, vector<2x128xf32> -> vector<2x128xf32>
    %884 = arith.addf %883, %5 : vector<2x128xf32>
    %885 = arith.truncf %761 : vector<2x32xf32> to vector<2x32xbf16>
    %c0_352 = arith.constant 0 : index
    %c0_353 = arith.constant 0 : index
    %886 = vector.load %arg6[%c0_352, %c0_353] : memref<32x128xbf16, #tpu.memory_space<vmem>>, vector<32x128xbf16>
    %cst_354 = arith.constant dense<0.000000e+00> : vector<2x128xf32>
    %887 = tpu.matmul %885, %886, %cst_354 {dimension_numbers = #tpu.dot_dimension_numbers<[1], [0], [0], [1], [0, 0, 1, 1], [], []>} : vector<2x32xbf16>, vector<32x128xbf16>, vector<2x128xf32> -> vector<2x128xf32>
    %888 = arith.addf %884, %887 : vector<2x128xf32>
    %889 = vector.extract_strided_slice %888 {offsets = [0, 0], sizes = [2, 32], strides = [1, 1]} : vector<2x128xf32> to vector<2x32xf32>
    %cst_355 = arith.constant 5.000000e-01 : f32
    %890 = vector.broadcast %cst_355 : f32 to vector<2x32xf32>
    %891 = arith.mulf %890, %889 : vector<2x32xf32>
    %892 = math.tanh %891 : vector<2x32xf32>
    %cst_356 = arith.constant 5.000000e-01 : f32
    %893 = vector.broadcast %cst_356 : f32 to vector<2x32xf32>
    %894 = arith.mulf %893, %892 : vector<2x32xf32>
    %cst_357 = arith.constant 5.000000e-01 : f32
    %895 = vector.broadcast %cst_357 : f32 to vector<2x32xf32>
    %896 = arith.addf %894, %895 : vector<2x32xf32>
    %897 = vector.extract_strided_slice %888 {offsets = [0, 32], sizes = [2, 32], strides = [1, 1]} : vector<2x128xf32> to vector<2x32xf32>
    %cst_358 = arith.constant 5.000000e-01 : f32
    %898 = vector.broadcast %cst_358 : f32 to vector<2x32xf32>
    %899 = arith.mulf %898, %897 : vector<2x32xf32>
    %900 = math.tanh %899 : vector<2x32xf32>
    %cst_359 = arith.constant 5.000000e-01 : f32
    %901 = vector.broadcast %cst_359 : f32 to vector<2x32xf32>
    %902 = arith.mulf %901, %900 : vector<2x32xf32>
    %cst_360 = arith.constant 5.000000e-01 : f32
    %903 = vector.broadcast %cst_360 : f32 to vector<2x32xf32>
    %904 = arith.addf %902, %903 : vector<2x32xf32>
    %905 = vector.extract_strided_slice %888 {offsets = [0, 64], sizes = [2, 32], strides = [1, 1]} : vector<2x128xf32> to vector<2x32xf32>
    %906 = math.tanh %905 : vector<2x32xf32>
    %907 = vector.extract_strided_slice %888 {offsets = [0, 96], sizes = [2, 32], strides = [1, 1]} : vector<2x128xf32> to vector<2x32xf32>
    %cst_361 = arith.constant 5.000000e-01 : f32
    %908 = vector.broadcast %cst_361 : f32 to vector<2x32xf32>
    %909 = arith.mulf %908, %907 : vector<2x32xf32>
    %910 = math.tanh %909 : vector<2x32xf32>
    %cst_362 = arith.constant 5.000000e-01 : f32
    %911 = vector.broadcast %cst_362 : f32 to vector<2x32xf32>
    %912 = arith.mulf %911, %910 : vector<2x32xf32>
    %cst_363 = arith.constant 5.000000e-01 : f32
    %913 = vector.broadcast %cst_363 : f32 to vector<2x32xf32>
    %914 = arith.addf %912, %913 : vector<2x32xf32>
    %915 = arith.mulf %904, %759 : vector<2x32xf32>
    %916 = arith.mulf %896, %906 : vector<2x32xf32>
    %917 = arith.addf %915, %916 : vector<2x32xf32>
    %918 = math.tanh %917 : vector<2x32xf32>
    %919 = arith.mulf %914, %918 : vector<2x32xf32>
    %920 = arith.truncf %919 : vector<2x32xf32> to vector<2x32xbf16>
    %c0_364 = arith.constant 0 : index
    %c0_365 = arith.constant 0 : index
    %921 = vector.load %arg8[%c0_364, %c0_365] : memref<32x128xbf16, #tpu.memory_space<vmem>>, vector<32x128xbf16>
    %cst_366 = arith.constant dense<0.000000e+00> : vector<2x128xf32>
    %922 = tpu.matmul %920, %921, %cst_366 {dimension_numbers = #tpu.dot_dimension_numbers<[1], [0], [0], [1], [0, 0, 1, 1], [], []>} : vector<2x32xbf16>, vector<32x128xbf16>, vector<2x128xf32> -> vector<2x128xf32>
    %923 = arith.addf %922, %8 : vector<2x128xf32>
    %924 = arith.truncf %800 : vector<2x32xf32> to vector<2x32xbf16>
    %c0_367 = arith.constant 0 : index
    %c0_368 = arith.constant 0 : index
    %925 = vector.load %arg9[%c0_367, %c0_368] : memref<32x128xbf16, #tpu.memory_space<vmem>>, vector<32x128xbf16>
    %cst_369 = arith.constant dense<0.000000e+00> : vector<2x128xf32>
    %926 = tpu.matmul %924, %925, %cst_369 {dimension_numbers = #tpu.dot_dimension_numbers<[1], [0], [0], [1], [0, 0, 1, 1], [], []>} : vector<2x32xbf16>, vector<32x128xbf16>, vector<2x128xf32> -> vector<2x128xf32>
    %927 = arith.addf %923, %926 : vector<2x128xf32>
    %928 = vector.extract_strided_slice %927 {offsets = [0, 0], sizes = [2, 32], strides = [1, 1]} : vector<2x128xf32> to vector<2x32xf32>
    %cst_370 = arith.constant 5.000000e-01 : f32
    %929 = vector.broadcast %cst_370 : f32 to vector<2x32xf32>
    %930 = arith.mulf %929, %928 : vector<2x32xf32>
    %931 = math.tanh %930 : vector<2x32xf32>
    %cst_371 = arith.constant 5.000000e-01 : f32
    %932 = vector.broadcast %cst_371 : f32 to vector<2x32xf32>
    %933 = arith.mulf %932, %931 : vector<2x32xf32>
    %cst_372 = arith.constant 5.000000e-01 : f32
    %934 = vector.broadcast %cst_372 : f32 to vector<2x32xf32>
    %935 = arith.addf %933, %934 : vector<2x32xf32>
    %936 = vector.extract_strided_slice %927 {offsets = [0, 32], sizes = [2, 32], strides = [1, 1]} : vector<2x128xf32> to vector<2x32xf32>
    %cst_373 = arith.constant 5.000000e-01 : f32
    %937 = vector.broadcast %cst_373 : f32 to vector<2x32xf32>
    %938 = arith.mulf %937, %936 : vector<2x32xf32>
    %939 = math.tanh %938 : vector<2x32xf32>
    %cst_374 = arith.constant 5.000000e-01 : f32
    %940 = vector.broadcast %cst_374 : f32 to vector<2x32xf32>
    %941 = arith.mulf %940, %939 : vector<2x32xf32>
    %cst_375 = arith.constant 5.000000e-01 : f32
    %942 = vector.broadcast %cst_375 : f32 to vector<2x32xf32>
    %943 = arith.addf %941, %942 : vector<2x32xf32>
    %944 = vector.extract_strided_slice %927 {offsets = [0, 64], sizes = [2, 32], strides = [1, 1]} : vector<2x128xf32> to vector<2x32xf32>
    %945 = math.tanh %944 : vector<2x32xf32>
    %946 = vector.extract_strided_slice %927 {offsets = [0, 96], sizes = [2, 32], strides = [1, 1]} : vector<2x128xf32> to vector<2x32xf32>
    %cst_376 = arith.constant 5.000000e-01 : f32
    %947 = vector.broadcast %cst_376 : f32 to vector<2x32xf32>
    %948 = arith.mulf %947, %946 : vector<2x32xf32>
    %949 = math.tanh %948 : vector<2x32xf32>
    %cst_377 = arith.constant 5.000000e-01 : f32
    %950 = vector.broadcast %cst_377 : f32 to vector<2x32xf32>
    %951 = arith.mulf %950, %949 : vector<2x32xf32>
    %cst_378 = arith.constant 5.000000e-01 : f32
    %952 = vector.broadcast %cst_378 : f32 to vector<2x32xf32>
    %953 = arith.addf %951, %952 : vector<2x32xf32>
    %954 = arith.mulf %943, %798 : vector<2x32xf32>
    %955 = arith.mulf %935, %945 : vector<2x32xf32>
    %956 = arith.addf %954, %955 : vector<2x32xf32>
    %957 = math.tanh %956 : vector<2x32xf32>
    %958 = arith.mulf %953, %957 : vector<2x32xf32>
    %c6 = arith.constant 6 : index
    %c0_379 = arith.constant 0 : index
    %c0_380 = arith.constant 0 : index
    %959 = vector.load %arg0[%c6, %c0_379, %c0_380] : memref<8x2x512xf32, #tpu.memory_space<vmem>>, vector<1x2x512xf32>
    %960 = vector.shape_cast %959 : vector<1x2x512xf32> to vector<2x512xf32>
    %961 = arith.truncf %837 : vector<2x128xf32> to vector<2x128xbf16>
    %c0_381 = arith.constant 0 : index
    %c0_382 = arith.constant 0 : index
    %962 = vector.load %arg1[%c0_381, %c0_382] : memref<128x512xbf16, #tpu.memory_space<vmem>>, vector<128x512xbf16>
    %cst_383 = arith.constant dense<0.000000e+00> : vector<2x512xf32>
    %963 = tpu.matmul %961, %962, %cst_383 {dimension_numbers = #tpu.dot_dimension_numbers<[1], [0], [0], [1], [0, 0, 1, 1], [], []>} : vector<2x128xbf16>, vector<128x512xbf16>, vector<2x512xf32> -> vector<2x512xf32>
    %964 = arith.addf %960, %963 : vector<2x512xf32>
    %965 = vector.extract_strided_slice %964 {offsets = [0, 0], sizes = [2, 128], strides = [1, 1]} : vector<2x512xf32> to vector<2x128xf32>
    %cst_384 = arith.constant 5.000000e-01 : f32
    %966 = vector.broadcast %cst_384 : f32 to vector<2x128xf32>
    %967 = arith.mulf %966, %965 : vector<2x128xf32>
    %968 = math.tanh %967 : vector<2x128xf32>
    %cst_385 = arith.constant 5.000000e-01 : f32
    %969 = vector.broadcast %cst_385 : f32 to vector<2x128xf32>
    %970 = arith.mulf %969, %968 : vector<2x128xf32>
    %cst_386 = arith.constant 5.000000e-01 : f32
    %971 = vector.broadcast %cst_386 : f32 to vector<2x128xf32>
    %972 = arith.addf %970, %971 : vector<2x128xf32>
    %973 = vector.extract_strided_slice %964 {offsets = [0, 128], sizes = [2, 128], strides = [1, 1]} : vector<2x512xf32> to vector<2x128xf32>
    %cst_387 = arith.constant 5.000000e-01 : f32
    %974 = vector.broadcast %cst_387 : f32 to vector<2x128xf32>
    %975 = arith.mulf %974, %973 : vector<2x128xf32>
    %976 = math.tanh %975 : vector<2x128xf32>
    %cst_388 = arith.constant 5.000000e-01 : f32
    %977 = vector.broadcast %cst_388 : f32 to vector<2x128xf32>
    %978 = arith.mulf %977, %976 : vector<2x128xf32>
    %cst_389 = arith.constant 5.000000e-01 : f32
    %979 = vector.broadcast %cst_389 : f32 to vector<2x128xf32>
    %980 = arith.addf %978, %979 : vector<2x128xf32>
    %981 = vector.extract_strided_slice %964 {offsets = [0, 256], sizes = [2, 128], strides = [1, 1]} : vector<2x512xf32> to vector<2x128xf32>
    %982 = math.tanh %981 : vector<2x128xf32>
    %983 = vector.extract_strided_slice %964 {offsets = [0, 384], sizes = [2, 128], strides = [1, 1]} : vector<2x512xf32> to vector<2x128xf32>
    %cst_390 = arith.constant 5.000000e-01 : f32
    %984 = vector.broadcast %cst_390 : f32 to vector<2x128xf32>
    %985 = arith.mulf %984, %983 : vector<2x128xf32>
    %986 = math.tanh %985 : vector<2x128xf32>
    %cst_391 = arith.constant 5.000000e-01 : f32
    %987 = vector.broadcast %cst_391 : f32 to vector<2x128xf32>
    %988 = arith.mulf %987, %986 : vector<2x128xf32>
    %cst_392 = arith.constant 5.000000e-01 : f32
    %989 = vector.broadcast %cst_392 : f32 to vector<2x128xf32>
    %990 = arith.addf %988, %989 : vector<2x128xf32>
    %991 = arith.mulf %980, %835 : vector<2x128xf32>
    %992 = arith.mulf %972, %982 : vector<2x128xf32>
    %993 = arith.addf %991, %992 : vector<2x128xf32>
    %994 = math.tanh %993 : vector<2x128xf32>
    %995 = arith.mulf %990, %994 : vector<2x128xf32>
    %996 = arith.truncf %995 : vector<2x128xf32> to vector<2x128xbf16>
    %c0_393 = arith.constant 0 : index
    %c0_394 = arith.constant 0 : index
    %997 = vector.load %arg2[%c0_393, %c0_394] : memref<128x512xbf16, #tpu.memory_space<vmem>>, vector<128x512xbf16>
    %cst_395 = arith.constant dense<0.000000e+00> : vector<2x512xf32>
    %998 = tpu.matmul %996, %997, %cst_395 {dimension_numbers = #tpu.dot_dimension_numbers<[1], [0], [0], [1], [0, 0, 1, 1], [], []>} : vector<2x128xbf16>, vector<128x512xbf16>, vector<2x512xf32> -> vector<2x512xf32>
    %999 = arith.addf %998, %2 : vector<2x512xf32>
    %1000 = arith.truncf %876 : vector<2x128xf32> to vector<2x128xbf16>
    %c0_396 = arith.constant 0 : index
    %c0_397 = arith.constant 0 : index
    %1001 = vector.load %arg3[%c0_396, %c0_397] : memref<128x512xbf16, #tpu.memory_space<vmem>>, vector<128x512xbf16>
    %cst_398 = arith.constant dense<0.000000e+00> : vector<2x512xf32>
    %1002 = tpu.matmul %1000, %1001, %cst_398 {dimension_numbers = #tpu.dot_dimension_numbers<[1], [0], [0], [1], [0, 0, 1, 1], [], []>} : vector<2x128xbf16>, vector<128x512xbf16>, vector<2x512xf32> -> vector<2x512xf32>
    %1003 = arith.addf %999, %1002 : vector<2x512xf32>
    %1004 = vector.extract_strided_slice %1003 {offsets = [0, 0], sizes = [2, 128], strides = [1, 1]} : vector<2x512xf32> to vector<2x128xf32>
    %cst_399 = arith.constant 5.000000e-01 : f32
    %1005 = vector.broadcast %cst_399 : f32 to vector<2x128xf32>
    %1006 = arith.mulf %1005, %1004 : vector<2x128xf32>
    %1007 = math.tanh %1006 : vector<2x128xf32>
    %cst_400 = arith.constant 5.000000e-01 : f32
    %1008 = vector.broadcast %cst_400 : f32 to vector<2x128xf32>
    %1009 = arith.mulf %1008, %1007 : vector<2x128xf32>
    %cst_401 = arith.constant 5.000000e-01 : f32
    %1010 = vector.broadcast %cst_401 : f32 to vector<2x128xf32>
    %1011 = arith.addf %1009, %1010 : vector<2x128xf32>
    %1012 = vector.extract_strided_slice %1003 {offsets = [0, 128], sizes = [2, 128], strides = [1, 1]} : vector<2x512xf32> to vector<2x128xf32>
    %cst_402 = arith.constant 5.000000e-01 : f32
    %1013 = vector.broadcast %cst_402 : f32 to vector<2x128xf32>
    %1014 = arith.mulf %1013, %1012 : vector<2x128xf32>
    %1015 = math.tanh %1014 : vector<2x128xf32>
    %cst_403 = arith.constant 5.000000e-01 : f32
    %1016 = vector.broadcast %cst_403 : f32 to vector<2x128xf32>
    %1017 = arith.mulf %1016, %1015 : vector<2x128xf32>
    %cst_404 = arith.constant 5.000000e-01 : f32
    %1018 = vector.broadcast %cst_404 : f32 to vector<2x128xf32>
    %1019 = arith.addf %1017, %1018 : vector<2x128xf32>
    %1020 = vector.extract_strided_slice %1003 {offsets = [0, 256], sizes = [2, 128], strides = [1, 1]} : vector<2x512xf32> to vector<2x128xf32>
    %1021 = math.tanh %1020 : vector<2x128xf32>
    %1022 = vector.extract_strided_slice %1003 {offsets = [0, 384], sizes = [2, 128], strides = [1, 1]} : vector<2x512xf32> to vector<2x128xf32>
    %cst_405 = arith.constant 5.000000e-01 : f32
    %1023 = vector.broadcast %cst_405 : f32 to vector<2x128xf32>
    %1024 = arith.mulf %1023, %1022 : vector<2x128xf32>
    %1025 = math.tanh %1024 : vector<2x128xf32>
    %cst_406 = arith.constant 5.000000e-01 : f32
    %1026 = vector.broadcast %cst_406 : f32 to vector<2x128xf32>
    %1027 = arith.mulf %1026, %1025 : vector<2x128xf32>
    %cst_407 = arith.constant 5.000000e-01 : f32
    %1028 = vector.broadcast %cst_407 : f32 to vector<2x128xf32>
    %1029 = arith.addf %1027, %1028 : vector<2x128xf32>
    %1030 = arith.mulf %1019, %874 : vector<2x128xf32>
    %1031 = arith.mulf %1011, %1021 : vector<2x128xf32>
    %1032 = arith.addf %1030, %1031 : vector<2x128xf32>
    %1033 = math.tanh %1032 : vector<2x128xf32>
    %1034 = arith.mulf %1029, %1033 : vector<2x128xf32>
    %c6_408 = arith.constant 6 : index
    %c0_409 = arith.constant 0 : index
    %c0_410 = arith.constant 0 : index
    %1035 = vector.load %arg11[%c6_408, %c0_409, %c0_410] : memref<8x2x128xbf16, #tpu.memory_space<vmem>>, vector<1x2x128xbf16>
    %1036 = vector.shape_cast %1035 : vector<1x2x128xbf16> to vector<2x128xbf16>
    %1037 = arith.extf %1036 : vector<2x128xbf16> to vector<2x128xf32>
    %1038 = arith.mulf %1034, %1037 : vector<2x128xf32>
    %1039 = arith.truncf %1038 : vector<2x128xf32> to vector<2x128xbf16>
    %c0_411 = arith.constant 0 : index
    %c0_412 = arith.constant 0 : index
    %1040 = vector.load %arg5[%c0_411, %c0_412] : memref<128x128xbf16, #tpu.memory_space<vmem>>, vector<128x128xbf16>
    %cst_413 = arith.constant dense<0.000000e+00> : vector<2x128xf32>
    %1041 = tpu.matmul %1039, %1040, %cst_413 {dimension_numbers = #tpu.dot_dimension_numbers<[1], [0], [0], [1], [0, 0, 1, 1], [], []>} : vector<2x128xbf16>, vector<128x128xbf16>, vector<2x128xf32> -> vector<2x128xf32>
    %1042 = arith.addf %1041, %5 : vector<2x128xf32>
    %1043 = arith.truncf %919 : vector<2x32xf32> to vector<2x32xbf16>
    %c0_414 = arith.constant 0 : index
    %c0_415 = arith.constant 0 : index
    %1044 = vector.load %arg6[%c0_414, %c0_415] : memref<32x128xbf16, #tpu.memory_space<vmem>>, vector<32x128xbf16>
    %cst_416 = arith.constant dense<0.000000e+00> : vector<2x128xf32>
    %1045 = tpu.matmul %1043, %1044, %cst_416 {dimension_numbers = #tpu.dot_dimension_numbers<[1], [0], [0], [1], [0, 0, 1, 1], [], []>} : vector<2x32xbf16>, vector<32x128xbf16>, vector<2x128xf32> -> vector<2x128xf32>
    %1046 = arith.addf %1042, %1045 : vector<2x128xf32>
    %1047 = vector.extract_strided_slice %1046 {offsets = [0, 0], sizes = [2, 32], strides = [1, 1]} : vector<2x128xf32> to vector<2x32xf32>
    %cst_417 = arith.constant 5.000000e-01 : f32
    %1048 = vector.broadcast %cst_417 : f32 to vector<2x32xf32>
    %1049 = arith.mulf %1048, %1047 : vector<2x32xf32>
    %1050 = math.tanh %1049 : vector<2x32xf32>
    %cst_418 = arith.constant 5.000000e-01 : f32
    %1051 = vector.broadcast %cst_418 : f32 to vector<2x32xf32>
    %1052 = arith.mulf %1051, %1050 : vector<2x32xf32>
    %cst_419 = arith.constant 5.000000e-01 : f32
    %1053 = vector.broadcast %cst_419 : f32 to vector<2x32xf32>
    %1054 = arith.addf %1052, %1053 : vector<2x32xf32>
    %1055 = vector.extract_strided_slice %1046 {offsets = [0, 32], sizes = [2, 32], strides = [1, 1]} : vector<2x128xf32> to vector<2x32xf32>
    %cst_420 = arith.constant 5.000000e-01 : f32
    %1056 = vector.broadcast %cst_420 : f32 to vector<2x32xf32>
    %1057 = arith.mulf %1056, %1055 : vector<2x32xf32>
    %1058 = math.tanh %1057 : vector<2x32xf32>
    %cst_421 = arith.constant 5.000000e-01 : f32
    %1059 = vector.broadcast %cst_421 : f32 to vector<2x32xf32>
    %1060 = arith.mulf %1059, %1058 : vector<2x32xf32>
    %cst_422 = arith.constant 5.000000e-01 : f32
    %1061 = vector.broadcast %cst_422 : f32 to vector<2x32xf32>
    %1062 = arith.addf %1060, %1061 : vector<2x32xf32>
    %1063 = vector.extract_strided_slice %1046 {offsets = [0, 64], sizes = [2, 32], strides = [1, 1]} : vector<2x128xf32> to vector<2x32xf32>
    %1064 = math.tanh %1063 : vector<2x32xf32>
    %1065 = vector.extract_strided_slice %1046 {offsets = [0, 96], sizes = [2, 32], strides = [1, 1]} : vector<2x128xf32> to vector<2x32xf32>
    %cst_423 = arith.constant 5.000000e-01 : f32
    %1066 = vector.broadcast %cst_423 : f32 to vector<2x32xf32>
    %1067 = arith.mulf %1066, %1065 : vector<2x32xf32>
    %1068 = math.tanh %1067 : vector<2x32xf32>
    %cst_424 = arith.constant 5.000000e-01 : f32
    %1069 = vector.broadcast %cst_424 : f32 to vector<2x32xf32>
    %1070 = arith.mulf %1069, %1068 : vector<2x32xf32>
    %cst_425 = arith.constant 5.000000e-01 : f32
    %1071 = vector.broadcast %cst_425 : f32 to vector<2x32xf32>
    %1072 = arith.addf %1070, %1071 : vector<2x32xf32>
    %1073 = arith.mulf %1062, %917 : vector<2x32xf32>
    %1074 = arith.mulf %1054, %1064 : vector<2x32xf32>
    %1075 = arith.addf %1073, %1074 : vector<2x32xf32>
    %1076 = math.tanh %1075 : vector<2x32xf32>
    %1077 = arith.mulf %1072, %1076 : vector<2x32xf32>
    %1078 = arith.truncf %1077 : vector<2x32xf32> to vector<2x32xbf16>
    %c0_426 = arith.constant 0 : index
    %c0_427 = arith.constant 0 : index
    %1079 = vector.load %arg8[%c0_426, %c0_427] : memref<32x128xbf16, #tpu.memory_space<vmem>>, vector<32x128xbf16>
    %cst_428 = arith.constant dense<0.000000e+00> : vector<2x128xf32>
    %1080 = tpu.matmul %1078, %1079, %cst_428 {dimension_numbers = #tpu.dot_dimension_numbers<[1], [0], [0], [1], [0, 0, 1, 1], [], []>} : vector<2x32xbf16>, vector<32x128xbf16>, vector<2x128xf32> -> vector<2x128xf32>
    %1081 = arith.addf %1080, %8 : vector<2x128xf32>
    %1082 = arith.truncf %958 : vector<2x32xf32> to vector<2x32xbf16>
    %c0_429 = arith.constant 0 : index
    %c0_430 = arith.constant 0 : index
    %1083 = vector.load %arg9[%c0_429, %c0_430] : memref<32x128xbf16, #tpu.memory_space<vmem>>, vector<32x128xbf16>
    %cst_431 = arith.constant dense<0.000000e+00> : vector<2x128xf32>
    %1084 = tpu.matmul %1082, %1083, %cst_431 {dimension_numbers = #tpu.dot_dimension_numbers<[1], [0], [0], [1], [0, 0, 1, 1], [], []>} : vector<2x32xbf16>, vector<32x128xbf16>, vector<2x128xf32> -> vector<2x128xf32>
    %1085 = arith.addf %1081, %1084 : vector<2x128xf32>
    %1086 = vector.extract_strided_slice %1085 {offsets = [0, 0], sizes = [2, 32], strides = [1, 1]} : vector<2x128xf32> to vector<2x32xf32>
    %cst_432 = arith.constant 5.000000e-01 : f32
    %1087 = vector.broadcast %cst_432 : f32 to vector<2x32xf32>
    %1088 = arith.mulf %1087, %1086 : vector<2x32xf32>
    %1089 = math.tanh %1088 : vector<2x32xf32>
    %cst_433 = arith.constant 5.000000e-01 : f32
    %1090 = vector.broadcast %cst_433 : f32 to vector<2x32xf32>
    %1091 = arith.mulf %1090, %1089 : vector<2x32xf32>
    %cst_434 = arith.constant 5.000000e-01 : f32
    %1092 = vector.broadcast %cst_434 : f32 to vector<2x32xf32>
    %1093 = arith.addf %1091, %1092 : vector<2x32xf32>
    %1094 = vector.extract_strided_slice %1085 {offsets = [0, 32], sizes = [2, 32], strides = [1, 1]} : vector<2x128xf32> to vector<2x32xf32>
    %cst_435 = arith.constant 5.000000e-01 : f32
    %1095 = vector.broadcast %cst_435 : f32 to vector<2x32xf32>
    %1096 = arith.mulf %1095, %1094 : vector<2x32xf32>
    %1097 = math.tanh %1096 : vector<2x32xf32>
    %cst_436 = arith.constant 5.000000e-01 : f32
    %1098 = vector.broadcast %cst_436 : f32 to vector<2x32xf32>
    %1099 = arith.mulf %1098, %1097 : vector<2x32xf32>
    %cst_437 = arith.constant 5.000000e-01 : f32
    %1100 = vector.broadcast %cst_437 : f32 to vector<2x32xf32>
    %1101 = arith.addf %1099, %1100 : vector<2x32xf32>
    %1102 = vector.extract_strided_slice %1085 {offsets = [0, 64], sizes = [2, 32], strides = [1, 1]} : vector<2x128xf32> to vector<2x32xf32>
    %1103 = math.tanh %1102 : vector<2x32xf32>
    %1104 = vector.extract_strided_slice %1085 {offsets = [0, 96], sizes = [2, 32], strides = [1, 1]} : vector<2x128xf32> to vector<2x32xf32>
    %cst_438 = arith.constant 5.000000e-01 : f32
    %1105 = vector.broadcast %cst_438 : f32 to vector<2x32xf32>
    %1106 = arith.mulf %1105, %1104 : vector<2x32xf32>
    %1107 = math.tanh %1106 : vector<2x32xf32>
    %cst_439 = arith.constant 5.000000e-01 : f32
    %1108 = vector.broadcast %cst_439 : f32 to vector<2x32xf32>
    %1109 = arith.mulf %1108, %1107 : vector<2x32xf32>
    %cst_440 = arith.constant 5.000000e-01 : f32
    %1110 = vector.broadcast %cst_440 : f32 to vector<2x32xf32>
    %1111 = arith.addf %1109, %1110 : vector<2x32xf32>
    %1112 = arith.mulf %1101, %956 : vector<2x32xf32>
    %1113 = arith.mulf %1093, %1103 : vector<2x32xf32>
    %1114 = arith.addf %1112, %1113 : vector<2x32xf32>
    %1115 = math.tanh %1114 : vector<2x32xf32>
    %1116 = arith.mulf %1111, %1115 : vector<2x32xf32>
    %c7 = arith.constant 7 : index
    %c0_441 = arith.constant 0 : index
    %c0_442 = arith.constant 0 : index
    %1117 = vector.load %arg0[%c7, %c0_441, %c0_442] : memref<8x2x512xf32, #tpu.memory_space<vmem>>, vector<1x2x512xf32>
    %1118 = vector.shape_cast %1117 : vector<1x2x512xf32> to vector<2x512xf32>
    %1119 = arith.truncf %995 : vector<2x128xf32> to vector<2x128xbf16>
    %c0_443 = arith.constant 0 : index
    %c0_444 = arith.constant 0 : index
    %1120 = vector.load %arg1[%c0_443, %c0_444] : memref<128x512xbf16, #tpu.memory_space<vmem>>, vector<128x512xbf16>
    %cst_445 = arith.constant dense<0.000000e+00> : vector<2x512xf32>
    %1121 = tpu.matmul %1119, %1120, %cst_445 {dimension_numbers = #tpu.dot_dimension_numbers<[1], [0], [0], [1], [0, 0, 1, 1], [], []>} : vector<2x128xbf16>, vector<128x512xbf16>, vector<2x512xf32> -> vector<2x512xf32>
    %1122 = arith.addf %1118, %1121 : vector<2x512xf32>
    %1123 = vector.extract_strided_slice %1122 {offsets = [0, 0], sizes = [2, 128], strides = [1, 1]} : vector<2x512xf32> to vector<2x128xf32>
    %cst_446 = arith.constant 5.000000e-01 : f32
    %1124 = vector.broadcast %cst_446 : f32 to vector<2x128xf32>
    %1125 = arith.mulf %1124, %1123 : vector<2x128xf32>
    %1126 = math.tanh %1125 : vector<2x128xf32>
    %cst_447 = arith.constant 5.000000e-01 : f32
    %1127 = vector.broadcast %cst_447 : f32 to vector<2x128xf32>
    %1128 = arith.mulf %1127, %1126 : vector<2x128xf32>
    %cst_448 = arith.constant 5.000000e-01 : f32
    %1129 = vector.broadcast %cst_448 : f32 to vector<2x128xf32>
    %1130 = arith.addf %1128, %1129 : vector<2x128xf32>
    %1131 = vector.extract_strided_slice %1122 {offsets = [0, 128], sizes = [2, 128], strides = [1, 1]} : vector<2x512xf32> to vector<2x128xf32>
    %cst_449 = arith.constant 5.000000e-01 : f32
    %1132 = vector.broadcast %cst_449 : f32 to vector<2x128xf32>
    %1133 = arith.mulf %1132, %1131 : vector<2x128xf32>
    %1134 = math.tanh %1133 : vector<2x128xf32>
    %cst_450 = arith.constant 5.000000e-01 : f32
    %1135 = vector.broadcast %cst_450 : f32 to vector<2x128xf32>
    %1136 = arith.mulf %1135, %1134 : vector<2x128xf32>
    %cst_451 = arith.constant 5.000000e-01 : f32
    %1137 = vector.broadcast %cst_451 : f32 to vector<2x128xf32>
    %1138 = arith.addf %1136, %1137 : vector<2x128xf32>
    %1139 = vector.extract_strided_slice %1122 {offsets = [0, 256], sizes = [2, 128], strides = [1, 1]} : vector<2x512xf32> to vector<2x128xf32>
    %1140 = math.tanh %1139 : vector<2x128xf32>
    %1141 = vector.extract_strided_slice %1122 {offsets = [0, 384], sizes = [2, 128], strides = [1, 1]} : vector<2x512xf32> to vector<2x128xf32>
    %cst_452 = arith.constant 5.000000e-01 : f32
    %1142 = vector.broadcast %cst_452 : f32 to vector<2x128xf32>
    %1143 = arith.mulf %1142, %1141 : vector<2x128xf32>
    %1144 = math.tanh %1143 : vector<2x128xf32>
    %cst_453 = arith.constant 5.000000e-01 : f32
    %1145 = vector.broadcast %cst_453 : f32 to vector<2x128xf32>
    %1146 = arith.mulf %1145, %1144 : vector<2x128xf32>
    %cst_454 = arith.constant 5.000000e-01 : f32
    %1147 = vector.broadcast %cst_454 : f32 to vector<2x128xf32>
    %1148 = arith.addf %1146, %1147 : vector<2x128xf32>
    %1149 = arith.mulf %1138, %993 : vector<2x128xf32>
    %1150 = arith.mulf %1130, %1140 : vector<2x128xf32>
    %1151 = arith.addf %1149, %1150 : vector<2x128xf32>
    %1152 = math.tanh %1151 : vector<2x128xf32>
    %1153 = arith.mulf %1148, %1152 : vector<2x128xf32>
    %1154 = arith.truncf %1153 : vector<2x128xf32> to vector<2x128xbf16>
    %c0_455 = arith.constant 0 : index
    %c0_456 = arith.constant 0 : index
    %1155 = vector.load %arg2[%c0_455, %c0_456] : memref<128x512xbf16, #tpu.memory_space<vmem>>, vector<128x512xbf16>
    %cst_457 = arith.constant dense<0.000000e+00> : vector<2x512xf32>
    %1156 = tpu.matmul %1154, %1155, %cst_457 {dimension_numbers = #tpu.dot_dimension_numbers<[1], [0], [0], [1], [0, 0, 1, 1], [], []>} : vector<2x128xbf16>, vector<128x512xbf16>, vector<2x512xf32> -> vector<2x512xf32>
    %1157 = arith.addf %1156, %2 : vector<2x512xf32>
    %1158 = arith.truncf %1034 : vector<2x128xf32> to vector<2x128xbf16>
    %c0_458 = arith.constant 0 : index
    %c0_459 = arith.constant 0 : index
    %1159 = vector.load %arg3[%c0_458, %c0_459] : memref<128x512xbf16, #tpu.memory_space<vmem>>, vector<128x512xbf16>
    %cst_460 = arith.constant dense<0.000000e+00> : vector<2x512xf32>
    %1160 = tpu.matmul %1158, %1159, %cst_460 {dimension_numbers = #tpu.dot_dimension_numbers<[1], [0], [0], [1], [0, 0, 1, 1], [], []>} : vector<2x128xbf16>, vector<128x512xbf16>, vector<2x512xf32> -> vector<2x512xf32>
    %1161 = arith.addf %1157, %1160 : vector<2x512xf32>
    %1162 = vector.extract_strided_slice %1161 {offsets = [0, 0], sizes = [2, 128], strides = [1, 1]} : vector<2x512xf32> to vector<2x128xf32>
    %cst_461 = arith.constant 5.000000e-01 : f32
    %1163 = vector.broadcast %cst_461 : f32 to vector<2x128xf32>
    %1164 = arith.mulf %1163, %1162 : vector<2x128xf32>
    %1165 = math.tanh %1164 : vector<2x128xf32>
    %cst_462 = arith.constant 5.000000e-01 : f32
    %1166 = vector.broadcast %cst_462 : f32 to vector<2x128xf32>
    %1167 = arith.mulf %1166, %1165 : vector<2x128xf32>
    %cst_463 = arith.constant 5.000000e-01 : f32
    %1168 = vector.broadcast %cst_463 : f32 to vector<2x128xf32>
    %1169 = arith.addf %1167, %1168 : vector<2x128xf32>
    %1170 = vector.extract_strided_slice %1161 {offsets = [0, 128], sizes = [2, 128], strides = [1, 1]} : vector<2x512xf32> to vector<2x128xf32>
    %cst_464 = arith.constant 5.000000e-01 : f32
    %1171 = vector.broadcast %cst_464 : f32 to vector<2x128xf32>
    %1172 = arith.mulf %1171, %1170 : vector<2x128xf32>
    %1173 = math.tanh %1172 : vector<2x128xf32>
    %cst_465 = arith.constant 5.000000e-01 : f32
    %1174 = vector.broadcast %cst_465 : f32 to vector<2x128xf32>
    %1175 = arith.mulf %1174, %1173 : vector<2x128xf32>
    %cst_466 = arith.constant 5.000000e-01 : f32
    %1176 = vector.broadcast %cst_466 : f32 to vector<2x128xf32>
    %1177 = arith.addf %1175, %1176 : vector<2x128xf32>
    %1178 = vector.extract_strided_slice %1161 {offsets = [0, 256], sizes = [2, 128], strides = [1, 1]} : vector<2x512xf32> to vector<2x128xf32>
    %1179 = math.tanh %1178 : vector<2x128xf32>
    %1180 = vector.extract_strided_slice %1161 {offsets = [0, 384], sizes = [2, 128], strides = [1, 1]} : vector<2x512xf32> to vector<2x128xf32>
    %cst_467 = arith.constant 5.000000e-01 : f32
    %1181 = vector.broadcast %cst_467 : f32 to vector<2x128xf32>
    %1182 = arith.mulf %1181, %1180 : vector<2x128xf32>
    %1183 = math.tanh %1182 : vector<2x128xf32>
    %cst_468 = arith.constant 5.000000e-01 : f32
    %1184 = vector.broadcast %cst_468 : f32 to vector<2x128xf32>
    %1185 = arith.mulf %1184, %1183 : vector<2x128xf32>
    %cst_469 = arith.constant 5.000000e-01 : f32
    %1186 = vector.broadcast %cst_469 : f32 to vector<2x128xf32>
    %1187 = arith.addf %1185, %1186 : vector<2x128xf32>
    %1188 = arith.mulf %1177, %1032 : vector<2x128xf32>
    %1189 = arith.mulf %1169, %1179 : vector<2x128xf32>
    %1190 = arith.addf %1188, %1189 : vector<2x128xf32>
    %1191 = math.tanh %1190 : vector<2x128xf32>
    %1192 = arith.mulf %1187, %1191 : vector<2x128xf32>
    %c7_470 = arith.constant 7 : index
    %c0_471 = arith.constant 0 : index
    %c0_472 = arith.constant 0 : index
    %1193 = vector.load %arg11[%c7_470, %c0_471, %c0_472] : memref<8x2x128xbf16, #tpu.memory_space<vmem>>, vector<1x2x128xbf16>
    %1194 = vector.shape_cast %1193 : vector<1x2x128xbf16> to vector<2x128xbf16>
    %1195 = arith.extf %1194 : vector<2x128xbf16> to vector<2x128xf32>
    %1196 = arith.mulf %1192, %1195 : vector<2x128xf32>
    %1197 = arith.truncf %1196 : vector<2x128xf32> to vector<2x128xbf16>
    %c0_473 = arith.constant 0 : index
    %c0_474 = arith.constant 0 : index
    %1198 = vector.load %arg5[%c0_473, %c0_474] : memref<128x128xbf16, #tpu.memory_space<vmem>>, vector<128x128xbf16>
    %cst_475 = arith.constant dense<0.000000e+00> : vector<2x128xf32>
    %1199 = tpu.matmul %1197, %1198, %cst_475 {dimension_numbers = #tpu.dot_dimension_numbers<[1], [0], [0], [1], [0, 0, 1, 1], [], []>} : vector<2x128xbf16>, vector<128x128xbf16>, vector<2x128xf32> -> vector<2x128xf32>
    %1200 = arith.addf %1199, %5 : vector<2x128xf32>
    %1201 = arith.truncf %1077 : vector<2x32xf32> to vector<2x32xbf16>
    %c0_476 = arith.constant 0 : index
    %c0_477 = arith.constant 0 : index
    %1202 = vector.load %arg6[%c0_476, %c0_477] : memref<32x128xbf16, #tpu.memory_space<vmem>>, vector<32x128xbf16>
    %cst_478 = arith.constant dense<0.000000e+00> : vector<2x128xf32>
    %1203 = tpu.matmul %1201, %1202, %cst_478 {dimension_numbers = #tpu.dot_dimension_numbers<[1], [0], [0], [1], [0, 0, 1, 1], [], []>} : vector<2x32xbf16>, vector<32x128xbf16>, vector<2x128xf32> -> vector<2x128xf32>
    %1204 = arith.addf %1200, %1203 : vector<2x128xf32>
    %1205 = vector.extract_strided_slice %1204 {offsets = [0, 0], sizes = [2, 32], strides = [1, 1]} : vector<2x128xf32> to vector<2x32xf32>
    %cst_479 = arith.constant 5.000000e-01 : f32
    %1206 = vector.broadcast %cst_479 : f32 to vector<2x32xf32>
    %1207 = arith.mulf %1206, %1205 : vector<2x32xf32>
    %1208 = math.tanh %1207 : vector<2x32xf32>
    %cst_480 = arith.constant 5.000000e-01 : f32
    %1209 = vector.broadcast %cst_480 : f32 to vector<2x32xf32>
    %1210 = arith.mulf %1209, %1208 : vector<2x32xf32>
    %cst_481 = arith.constant 5.000000e-01 : f32
    %1211 = vector.broadcast %cst_481 : f32 to vector<2x32xf32>
    %1212 = arith.addf %1210, %1211 : vector<2x32xf32>
    %1213 = vector.extract_strided_slice %1204 {offsets = [0, 32], sizes = [2, 32], strides = [1, 1]} : vector<2x128xf32> to vector<2x32xf32>
    %cst_482 = arith.constant 5.000000e-01 : f32
    %1214 = vector.broadcast %cst_482 : f32 to vector<2x32xf32>
    %1215 = arith.mulf %1214, %1213 : vector<2x32xf32>
    %1216 = math.tanh %1215 : vector<2x32xf32>
    %cst_483 = arith.constant 5.000000e-01 : f32
    %1217 = vector.broadcast %cst_483 : f32 to vector<2x32xf32>
    %1218 = arith.mulf %1217, %1216 : vector<2x32xf32>
    %cst_484 = arith.constant 5.000000e-01 : f32
    %1219 = vector.broadcast %cst_484 : f32 to vector<2x32xf32>
    %1220 = arith.addf %1218, %1219 : vector<2x32xf32>
    %1221 = vector.extract_strided_slice %1204 {offsets = [0, 64], sizes = [2, 32], strides = [1, 1]} : vector<2x128xf32> to vector<2x32xf32>
    %1222 = math.tanh %1221 : vector<2x32xf32>
    %1223 = vector.extract_strided_slice %1204 {offsets = [0, 96], sizes = [2, 32], strides = [1, 1]} : vector<2x128xf32> to vector<2x32xf32>
    %cst_485 = arith.constant 5.000000e-01 : f32
    %1224 = vector.broadcast %cst_485 : f32 to vector<2x32xf32>
    %1225 = arith.mulf %1224, %1223 : vector<2x32xf32>
    %1226 = math.tanh %1225 : vector<2x32xf32>
    %cst_486 = arith.constant 5.000000e-01 : f32
    %1227 = vector.broadcast %cst_486 : f32 to vector<2x32xf32>
    %1228 = arith.mulf %1227, %1226 : vector<2x32xf32>
    %cst_487 = arith.constant 5.000000e-01 : f32
    %1229 = vector.broadcast %cst_487 : f32 to vector<2x32xf32>
    %1230 = arith.addf %1228, %1229 : vector<2x32xf32>
    %1231 = arith.mulf %1220, %1075 : vector<2x32xf32>
    %1232 = arith.mulf %1212, %1222 : vector<2x32xf32>
    %1233 = arith.addf %1231, %1232 : vector<2x32xf32>
    %1234 = math.tanh %1233 : vector<2x32xf32>
    %1235 = arith.mulf %1230, %1234 : vector<2x32xf32>
    %1236 = arith.truncf %1235 : vector<2x32xf32> to vector<2x32xbf16>
    %c0_488 = arith.constant 0 : index
    %c0_489 = arith.constant 0 : index
    %1237 = vector.load %arg8[%c0_488, %c0_489] : memref<32x128xbf16, #tpu.memory_space<vmem>>, vector<32x128xbf16>
    %cst_490 = arith.constant dense<0.000000e+00> : vector<2x128xf32>
    %1238 = tpu.matmul %1236, %1237, %cst_490 {dimension_numbers = #tpu.dot_dimension_numbers<[1], [0], [0], [1], [0, 0, 1, 1], [], []>} : vector<2x32xbf16>, vector<32x128xbf16>, vector<2x128xf32> -> vector<2x128xf32>
    %1239 = arith.addf %1238, %8 : vector<2x128xf32>
    %1240 = arith.truncf %1116 : vector<2x32xf32> to vector<2x32xbf16>
    %c0_491 = arith.constant 0 : index
    %c0_492 = arith.constant 0 : index
    %1241 = vector.load %arg9[%c0_491, %c0_492] : memref<32x128xbf16, #tpu.memory_space<vmem>>, vector<32x128xbf16>
    %cst_493 = arith.constant dense<0.000000e+00> : vector<2x128xf32>
    %1242 = tpu.matmul %1240, %1241, %cst_493 {dimension_numbers = #tpu.dot_dimension_numbers<[1], [0], [0], [1], [0, 0, 1, 1], [], []>} : vector<2x32xbf16>, vector<32x128xbf16>, vector<2x128xf32> -> vector<2x128xf32>
    %1243 = arith.addf %1239, %1242 : vector<2x128xf32>
    %1244 = vector.extract_strided_slice %1243 {offsets = [0, 0], sizes = [2, 32], strides = [1, 1]} : vector<2x128xf32> to vector<2x32xf32>
    %cst_494 = arith.constant 5.000000e-01 : f32
    %1245 = vector.broadcast %cst_494 : f32 to vector<2x32xf32>
    %1246 = arith.mulf %1245, %1244 : vector<2x32xf32>
    %1247 = math.tanh %1246 : vector<2x32xf32>
    %cst_495 = arith.constant 5.000000e-01 : f32
    %1248 = vector.broadcast %cst_495 : f32 to vector<2x32xf32>
    %1249 = arith.mulf %1248, %1247 : vector<2x32xf32>
    %cst_496 = arith.constant 5.000000e-01 : f32
    %1250 = vector.broadcast %cst_496 : f32 to vector<2x32xf32>
    %1251 = arith.addf %1249, %1250 : vector<2x32xf32>
    %1252 = vector.extract_strided_slice %1243 {offsets = [0, 32], sizes = [2, 32], strides = [1, 1]} : vector<2x128xf32> to vector<2x32xf32>
    %cst_497 = arith.constant 5.000000e-01 : f32
    %1253 = vector.broadcast %cst_497 : f32 to vector<2x32xf32>
    %1254 = arith.mulf %1253, %1252 : vector<2x32xf32>
    %1255 = math.tanh %1254 : vector<2x32xf32>
    %cst_498 = arith.constant 5.000000e-01 : f32
    %1256 = vector.broadcast %cst_498 : f32 to vector<2x32xf32>
    %1257 = arith.mulf %1256, %1255 : vector<2x32xf32>
    %cst_499 = arith.constant 5.000000e-01 : f32
    %1258 = vector.broadcast %cst_499 : f32 to vector<2x32xf32>
    %1259 = arith.addf %1257, %1258 : vector<2x32xf32>
    %1260 = vector.extract_strided_slice %1243 {offsets = [0, 64], sizes = [2, 32], strides = [1, 1]} : vector<2x128xf32> to vector<2x32xf32>
    %1261 = math.tanh %1260 : vector<2x32xf32>
    %1262 = vector.extract_strided_slice %1243 {offsets = [0, 96], sizes = [2, 32], strides = [1, 1]} : vector<2x128xf32> to vector<2x32xf32>
    %cst_500 = arith.constant 5.000000e-01 : f32
    %1263 = vector.broadcast %cst_500 : f32 to vector<2x32xf32>
    %1264 = arith.mulf %1263, %1262 : vector<2x32xf32>
    %1265 = math.tanh %1264 : vector<2x32xf32>
    %cst_501 = arith.constant 5.000000e-01 : f32
    %1266 = vector.broadcast %cst_501 : f32 to vector<2x32xf32>
    %1267 = arith.mulf %1266, %1265 : vector<2x32xf32>
    %cst_502 = arith.constant 5.000000e-01 : f32
    %1268 = vector.broadcast %cst_502 : f32 to vector<2x32xf32>
    %1269 = arith.addf %1267, %1268 : vector<2x32xf32>
    %1270 = arith.mulf %1259, %1114 : vector<2x32xf32>
    %1271 = arith.mulf %1251, %1261 : vector<2x32xf32>
    %1272 = arith.addf %1270, %1271 : vector<2x32xf32>
    %1273 = math.tanh %1272 : vector<2x32xf32>
    %1274 = arith.mulf %1269, %1273 : vector<2x32xf32>
    %c0_503 = arith.constant 0 : index
    %c0_504 = arith.constant 0 : index
    %1275 = vector.load %arg12[%c0_503, %c0_504] : memref<2x32xbf16, #tpu.memory_space<vmem>>, vector<2x32xbf16>
    %1276 = arith.extf %1275 : vector<2x32xbf16> to vector<2x32xf32>
    %1277 = arith.mulf %1274, %1276 : vector<2x32xf32>
    %c0_505 = arith.constant 0 : index
    %c0_506 = arith.constant 0 : index
    %1278 = vector.load %arg13[%c0_505, %c0_506] : memref<32x4xf32, #tpu.memory_space<vmem>>, vector<32x4xf32>
    %cst_507 = arith.constant dense<0.000000e+00> : vector<2x4xf32>
    %1279 = tpu.matmul %1277, %1278, %cst_507 {dimension_numbers = #tpu.dot_dimension_numbers<[1], [0], [0], [1], [0, 0, 1, 1], [], []>} : vector<2x32xf32>, vector<32x4xf32>, vector<2x4xf32> -> vector<2x4xf32>
    %c0_508 = arith.constant 0 : index
    %c0_509 = arith.constant 0 : index
    %1280 = vector.load %arg14[%c0_508, %c0_509] : memref<1x4xf32, #tpu.memory_space<vmem>>, vector<1x4xf32>
    %1281 = vector.broadcast %1280 : vector<1x4xf32> to vector<2x4xf32>
    %1282 = arith.addf %1279, %1281 : vector<2x4xf32>
    %c0_510 = arith.constant 0 : index
    %c0_511 = arith.constant 0 : index
    %1283 = vector.load %arg15[%c0_510, %c0_511] : memref<2x4xf32, #tpu.memory_space<vmem>>, vector<2x4xf32>
    tpu.vector_store %arg15[%c0_510, %c0_511], %1282 {strides = array<i32>} : memref<2x4xf32, #tpu.memory_space<vmem>>, vector<2x4xf32>,
    return
  }
}

</mosaic_0001>

<bundles_post_ra>
// kernel: bayesian_lstm_forward.3
= control target key start
LH: loop header
LB: loop body
LE: loop exit
PB: predicated region body
PF: predicated region fallthrough
CT: control target
= control target key end

     0   :  { %s10242_s0 = inlined_call_operand.hbm [shape: f32[8,2,512], index: 0, kind: input, shape index: {}]   ;;  %s10243_s1 = inlined_call_operand.hbm [shape: bf16[128,512], index: 1, kind: input, shape index: {}]   ;;  %s10244_s2 = inlined_call_operand.hbm [shape: bf16[128,512], index: 2, kind: input, shape index: {}]   ;;  %s10245_s3 = inlined_call_operand.hbm [shape: bf16[128,512], index: 3, kind: input, shape index: {}]   ;;  %s10246_s4 = inlined_call_operand.hbm [shape: f32[1,512], index: 4, kind: input, shape index: {}]   ;;  %s10247_s5 = inlined_call_operand.hbm [shape: bf16[128,128], index: 5, kind: input, shape index: {}]   ;;  %s10248_s6 = inlined_call_operand.hbm [shape: bf16[32,128], index: 6, kind: input, shape index: {}]   ;;  %s10249_s7 = inlined_call_operand.hbm [shape: f32[1,128], index: 7, kind: input, shape index: {}]   ;;  %s10250_s8 = inlined_call_operand.hbm [shape: bf16[32,128], index: 8, kind: input, shape index: {}]   ;;  %s10251_s9 = inlined_call_operand.hbm [shape: bf16[32,128], index: 9, kind: input, shape index: {}]   ;;  %s10252_s10 = inlined_call_operand.hbm [shape: f32[1,128], index: 10, kind: input, shape index: {}]   ;;  %s10253_s11 = inlined_call_operand.hbm [shape: bf16[8,2,128], index: 11, kind: input, shape index: {}]   ;;  %s10254_s12 = inlined_call_operand.hbm [shape: bf16[2,32], index: 12, kind: input, shape index: {}]   ;;  %s10255_s13 = inlined_call_operand.hbm [shape: f32[32,4], index: 13, kind: input, shape index: {}]   ;;  %s10256_s14 = inlined_call_operand.hbm [shape: f32[1,4], index: 14, kind: input, shape index: {}]   ;;  %s10257_s15 = inlined_call_operand.hbm [shape: f32[2,4], index: 15, kind: output, shape index: {}]  }
   0x1   :  { %10516 = sst [smem:[#allocation100_spill]] %s10257_s15 }
   0x2   :  { %20 = vsyncpa [#allocation3], 0 }
   0x3   :  { %21 = vsyncpa [#allocation6], 0 }
   0x4   :  { %22 = vsyncpa [#allocation9], 0 }
   0x5   :  { %23 = vsyncpa [#allocation12], 0 }
   0x6   :  { %24 = vsyncpa [#allocation15], 0 }
   0x7   :  { %25 = vsyncpa [#allocation18], 0 }
   0x8   :  { %26 = vsyncpa [#allocation21], 0 }
   0x9   :  { %27 = vsyncpa [#allocation24], 0 }
   0xa   :  { %28 = vsyncpa [#allocation4], 0  ;;  %s7435_s18 = smov [#allocation5]   ;;  %s7065_s22 = scalar_lea.hbm %s10243_s1, 4096 }
   0xb   :  { %s46_s19 = sshll.u32 %s7435_s18, 4  ;;  %p7066_p0 = scmp.ne.s32.totalorder %s10243_s1, %s7065_s22  ;;  %s47_s19 = int_to_ptr.vmem [resolvable:$true] %s46_s19 }
   0xc   :  { %p7069_p1 = scmp.lt.u32.totalorder %s7065_s22, %s10243_s1 }
   0xe   :  { %p7071_p2 = pnand %p7069_p1, %p7066_p0 }
  0x10   :  { %7074 = shalt.err (!%p7071_p2)
}
  0x11   :  { %s7075_s27 = scalar_lea.vmem %s47_s19, 4096  ;;  %p7080_p4 = scmp.lt.s32.totalorder %s47_s19, %s47_s19 }
  0x12   :  { %p7076_p3 = scmp.ne.s32.totalorder %s47_s19, %s7075_s27  ;;  %p7081_p5 = scmp.lt.s32.totalorder %s7075_s27, %s7075_s27 }
  0x14   :  { %p7082_p6 = por %p7081_p5, %p7080_p4 }
  0x16   :  { %p7083_p7 = pnand %p7082_p6, %p7076_p3 }
  0x18   :  { %7086 = shalt.err (!%p7083_p7)
}
  0x19   :  { %s7436_s28 = smov 256   ;;  %s7437_s29 = smov 16  }
  0x1a   :  { %52 = dma.hbm_to_vmem [thread:$0]  %s10243_s1, 4096, %s47_s19, [#allocation6], %s7436_s28, %s7436_s28, %s7437_s29  }
  0x1b   :  { %s7438_s17 = smov [#allocation8]   ;;  %s7439_s20 = smov [#allocation11]  }
  0x1c   :  { %s70_s18 = sshll.u32 %s7438_s17, 4  ;;  %s92_s21 = sshll.u32 %s7439_s20, 4  ;;  %s71_s18 = int_to_ptr.vmem [resolvable:$true] %s70_s18  ;;  %s93_s21 = int_to_ptr.vmem [resolvable:$true] %s92_s21 }
  0x1d   :  { %s7087_s24 = scalar_lea.hbm %s10245_s3, 4096 }
  0x1e   :  { %p7088_p8 = scmp.ne.s32.totalorder %s10245_s3, %s7087_s24  ;;  %p7091_p9 = scmp.lt.u32.totalorder %s7087_s24, %s10245_s3 }
  0x20   :  { %p7093_p10 = pnand %p7091_p9, %p7088_p8 }
  0x22   :  { %7096 = shalt.err (!%p7093_p10)
}
  0x23   :  { %s7097_s1 = scalar_lea.vmem %s71_s18, 4096  ;;  %p7102_p12 = scmp.lt.s32.totalorder %s71_s18, %s71_s18 }
  0x24   :  { %p7098_p11 = scmp.ne.s32.totalorder %s71_s18, %s7097_s1  ;;  %p7103_p13 = scmp.lt.s32.totalorder %s7097_s1, %s7097_s1 }
  0x26   :  { %p7104_p0 = por %p7103_p13, %p7102_p12 }
  0x28   :  { %p7105_p1 = pnand %p7104_p0, %p7098_p11 }
  0x2a   :  { %7108 = shalt.err (!%p7105_p1)
}
  0x2b   :  { %76 = dma.hbm_to_vmem [thread:$0]  %s10245_s3, 4096, %s71_s18, [#allocation9], %s7436_s28, %s7436_s28, %s7437_s29  }
  0x2c   :  { %s7109_s17 = scalar_lea.hbm %s10247_s5, 1024 }
  0x2d   :  { %p7110_p2 = scmp.ne.s32.totalorder %s10247_s5, %s7109_s17  ;;  %p7113_p3 = scmp.lt.u32.totalorder %s7109_s17, %s10247_s5 }
  0x2f   :  { %p7115_p4 = pnand %p7113_p3, %p7110_p2 }
  0x31   :  { %7118 = shalt.err (!%p7115_p4)
}
  0x32   :  { %s7119_s25 = scalar_lea.vmem %s93_s21, 1024  ;;  %p7124_p6 = scmp.lt.s32.totalorder %s93_s21, %s93_s21 }
  0x33   :  { %p7120_p5 = scmp.ne.s32.totalorder %s93_s21, %s7119_s25  ;;  %p7125_p7 = scmp.lt.s32.totalorder %s7119_s25, %s7119_s25 }
  0x35   :  { %p7126_p8 = por %p7125_p7, %p7124_p6 }
  0x37   :  { %p7127_p9 = pnand %p7126_p8, %p7120_p5 }
  0x39   :  { %7130 = shalt.err (!%p7127_p9)
}
  0x3a   :  { %s7440_s3 = smov 64   ;;  %s7441_s18 = smov 4  }
  0x3b   :  { %98 = dma.hbm_to_vmem [thread:$0]  %s10247_s5, 1024, %s93_s21, [#allocation12], %s7440_s3, %s7440_s3, %s7441_s18  }
  0x3c   :  { %s7442_s1 = smov [#allocation14]   ;;  %s7443_s30 = smov [#allocation17]  }
  0x3d   :  { %s117_s19 = sshll.u32 %s7442_s1, 4  ;;  %s138_s16 = sshll.u32 %s7443_s30, 4  ;;  %s118_s19 = int_to_ptr.vmem [resolvable:$true] %s117_s19  ;;  %s139_s16 = int_to_ptr.vmem [resolvable:$true] %s138_s16 }
  0x3e   :  { %s7131_s20 = scalar_lea.hbm %s10249_s7, 16 }
  0x3f   :  { %p7132_p10 = scmp.ne.s32.totalorder %s10249_s7, %s7131_s20  ;;  %p7135_p11 = scmp.lt.u32.totalorder %s7131_s20, %s10249_s7 }
  0x41   :  { %p7137_p12 = pnand %p7135_p11, %p7132_p10 }
  0x43   :  { %7140 = shalt.err (!%p7137_p12)
}
  0x44   :  { %s7141_s5 = scalar_lea.vmem %s118_s19, 16  ;;  %s7145_s21 = scalar_lea.vmem %s118_s19, 32 }
  0x45   :  { %p7142_p13 = scmp.ne.s32.totalorder %s118_s19, %s7141_s5  ;;  %p7146_p0 = scmp.lt.s32.totalorder %s118_s19, %s118_s19 }
  0x46   :  { %p7147_p1 = scmp.lt.s32.totalorder %s7145_s21, %s7141_s5 }
  0x48   :  { %p7148_p2 = por %p7147_p1, %p7146_p0 }
  0x4a   :  { %p7149_p3 = pnand %p7148_p2, %p7142_p13 }
  0x4c   :  { %7152 = shalt.err (!%p7149_p3)
}
  0x4d   :  { %120 = dma.hbm_to_vmem [thread:$0]  %s10249_s7, 16, %s118_s19, [#allocation15]  }
  0x4e   :  { %s7153_s15 = scalar_lea.hbm %s10251_s9, 256 }
  0x4f   :  { %p7154_p4 = scmp.ne.s32.totalorder %s10251_s9, %s7153_s15  ;;  %p7157_p5 = scmp.lt.u32.totalorder %s7153_s15, %s10251_s9 }
  0x51   :  { %p7159_p6 = pnand %p7157_p5, %p7154_p4 }
  0x53   :  { %7162 = shalt.err (!%p7159_p6)
}
  0x54   :  { %s7163_s24 = scalar_lea.vmem %s139_s16, 256  ;;  %p7168_p8 = scmp.lt.s32.totalorder %s139_s16, %s139_s16 }
  0x55   :  { %p7164_p7 = scmp.ne.s32.totalorder %s139_s16, %s7163_s24  ;;  %p7169_p9 = scmp.lt.s32.totalorder %s7163_s24, %s7163_s24 }
  0x57   :  { %p7170_p10 = por %p7169_p9, %p7168_p8 }
  0x59   :  { %p7171_p11 = pnand %p7170_p10, %p7164_p7 }
  0x5b   :  { %7174 = shalt.err (!%p7171_p11)
}
  0x5c   :  { %144 = dma.hbm_to_vmem [thread:$0]  %s10251_s9, 256, %s139_s16, [#allocation18], %s7440_s3, %s7440_s3, %s7441_s18  }
  0x5d   :  { %s7444_s25 = smov [#allocation20]   ;;  %s7175_s27 = scalar_lea.hbm %s10253_s11, 128 }
  0x5e   :  { %s160_s5 = sshll.u32 %s7444_s25, 4  ;;  %p7176_p12 = scmp.ne.s32.totalorder %s10253_s11, %s7175_s27  ;;  %s161_s5 = int_to_ptr.vmem [resolvable:$true] %s160_s5 }
  0x5f   :  { %p7179_p13 = scmp.lt.u32.totalorder %s7175_s27, %s10253_s11 }
  0x61   :  { %p7181_p0 = pnand %p7179_p13, %p7176_p12 }
  0x63   :  { %7184 = shalt.err (!%p7181_p0)
}
  0x64   :  { %s7185_s20 = scalar_lea.vmem %s161_s5, 128  ;;  %p7190_p2 = scmp.lt.s32.totalorder %s161_s5, %s161_s5 }
  0x65   :  { %p7186_p1 = scmp.ne.s32.totalorder %s161_s5, %s7185_s20  ;;  %p7191_p3 = scmp.lt.s32.totalorder %s7185_s20, %s7185_s20 }
  0x67   :  { %p7192_p4 = por %p7191_p3, %p7190_p2 }
  0x69   :  { %p7193_p5 = pnand %p7192_p4, %p7186_p1 }
  0x6b   :  { %7196 = shalt.err (!%p7193_p5)
}
  0x6c   :  { %s7445_s9 = smov 1   ;;  %s7446_s23 = smov [#allocation23]  }
  0x6d   :  { %166 = dma.hbm_to_vmem [thread:$0]  %s10253_s11, 128, %s161_s5, [#allocation21], %s7437_s29, %s7437_s29, %s7445_s9  }
  0x6e   :  { %s182_s24 = sshll.u32 %s7446_s23, 4  ;;  %s7447_s7 = smov [#allocation2]   ;;  %s183_s24 = int_to_ptr.vmem [resolvable:$true] %s182_s24 }
  0x6f   :  { %s34_s19 = sshll.u32 %s7447_s7, 4  ;;  %s7197_s26 = scalar_lea.hbm %s10255_s13, 512  ;;  %s35_s19 = int_to_ptr.vmem [resolvable:$true] %s34_s19 }
  0x70   :  { %p7198_p6 = scmp.ne.s32.totalorder %s10255_s13, %s7197_s26  ;;  %p7201_p7 = scmp.lt.u32.totalorder %s7197_s26, %s10255_s13 }
  0x72   :  { %p7203_p8 = pnand %p7201_p7, %p7198_p6 }
  0x74   :  { %7206 = shalt.err (!%p7203_p8)
}
  0x75   :  { %s7207_s11 = scalar_lea.vmem %s183_s24, 512  ;;  %p7212_p10 = scmp.lt.s32.totalorder %s183_s24, %s183_s24 }
  0x76   :  { %p7208_p9 = scmp.ne.s32.totalorder %s183_s24, %s7207_s11  ;;  %p7213_p11 = scmp.lt.s32.totalorder %s7207_s11, %s7207_s11 }
  0x78   :  { %p7214_p12 = por %p7213_p11, %p7212_p10 }
  0x7a   :  { %p7215_p13 = pnand %p7214_p12, %p7208_p9 }
  0x7c   :  { %7218 = shalt.err (!%p7215_p13)
}
  0x7d   :  { %s7448_s5 = smov 128   ;;  %s7449_s17 = smov 8  }
  0x7e   :  { %188 = dma.hbm_to_vmem [thread:$0]  %s10255_s13, 512, %s183_s24, [#allocation24], %s7448_s5, %s7448_s5, %s7449_s17  }
  0x7f   :  { %s7219_s23 = scalar_lea.hbm %s10242_s0, 1024 }
  0x80   :  { %p7220_p0 = scmp.ne.s32.totalorder %s10242_s0, %s7219_s23  ;;  %p7223_p1 = scmp.lt.u32.totalorder %s7219_s23, %s10242_s0 }
  0x82   :  { %p7225_p2 = pnand %p7223_p1, %p7220_p0 }
  0x84   :  { %7228 = shalt.err (!%p7225_p2)
}
  0x85   :  { %s7229_s27 = scalar_lea.vmem %s35_s19, 1024  ;;  %p7234_p4 = scmp.lt.s32.totalorder %s35_s19, %s35_s19 }
  0x86   :  { %p7230_p3 = scmp.ne.s32.totalorder %s35_s19, %s7229_s27  ;;  %p7235_p5 = scmp.lt.s32.totalorder %s7229_s27, %s7229_s27 }
  0x88   :  { %p7236_p6 = por %p7235_p5, %p7234_p4 }
  0x8a   :  { %p7237_p7 = pnand %p7236_p6, %p7230_p3 }
  0x8c   :  { %7240 = shalt.err (!%p7237_p7)
}
  0x8d   :  { %40 = dma.hbm_to_vmem [thread:$0]  %s10242_s0, 1024, %s35_s19, [#allocation3], %s7448_s5, %s7448_s5, %s7449_s17  }
  0x8e   :  { %s7450_s1 = smov [#allocation7]   ;;  %s7451_s15 = smov [#allocation10]  }
  0x8f   :  { %s58_s30 = sshll.u32 %s7450_s1, 4  ;;  %s83_s11 = sshll.u32 %s7451_s15, 4  ;;  %s59_s30 = int_to_ptr.vmem [resolvable:$true] %s58_s30  ;;  %s84_s11 = int_to_ptr.vmem [resolvable:$true] %s83_s11 }
  0x90   :  { %s7241_s16 = scalar_lea.hbm %s10244_s2, 4096 }
  0x91   :  { %p7242_p8 = scmp.ne.s32.totalorder %s10244_s2, %s7241_s16  ;;  %p7245_p9 = scmp.lt.u32.totalorder %s7241_s16, %s10244_s2 }
  0x93   :  { %p7247_p10 = pnand %p7245_p9, %p7242_p8 }
  0x95   :  { %7250 = shalt.err (!%p7247_p10)
}
  0x96   :  { %s7251_s0 = scalar_lea.vmem %s59_s30, 4096  ;;  %p7256_p12 = scmp.lt.s32.totalorder %s59_s30, %s59_s30 }
  0x97   :  { %p7252_p11 = scmp.ne.s32.totalorder %s59_s30, %s7251_s0  ;;  %p7257_p13 = scmp.lt.s32.totalorder %s7251_s0, %s7251_s0 }
  0x99   :  { %p7258_p0 = por %p7257_p13, %p7256_p12 }
  0x9b   :  { %p7259_p1 = pnand %p7258_p0, %p7252_p11 }
  0x9d   :  { %7262 = shalt.err (!%p7259_p1)
}
  0x9e   :  { %64 = dma.hbm_to_vmem [thread:$0]  %s10244_s2, 4096, %s59_s30, [#allocation6], %s7436_s28, %s7436_s28, %s7437_s29  }
  0x9f   :  { %s7263_s26 = scalar_lea.hbm %s10246_s4, 64 }
  0xa0   :  { %p7264_p2 = scmp.ne.s32.totalorder %s10246_s4, %s7263_s26  ;;  %p7267_p3 = scmp.lt.u32.totalorder %s7263_s26, %s10246_s4 }
  0xa2   :  { %p7269_p4 = pnand %p7267_p3, %p7264_p2 }
  0xa4   :  { %7272 = shalt.err (!%p7269_p4)
}
  0xa5   :  { %s7273_s15 = scalar_lea.vmem %s84_s11, 64  ;;  %p7278_p6 = scmp.lt.s32.totalorder %s84_s11, %s84_s11 }
  0xa6   :  { %p7274_p5 = scmp.ne.s32.totalorder %s84_s11, %s7273_s15  ;;  %p7279_p7 = scmp.lt.s32.totalorder %s7273_s15, %s7273_s15 }
  0xa8   :  { %p7280_p8 = por %p7279_p7, %p7278_p6 }
  0xaa   :  { %p7281_p9 = pnand %p7280_p8, %p7274_p5 }
  0xac   :  { %7284 = shalt.err (!%p7281_p9)
}
  0xad   :  { %86 = dma.hbm_to_vmem [thread:$0]  %s10246_s4, 64, %s84_s11, [#allocation9]  }
  0xae   :  { %s7452_s29 = smov [#allocation13]   ;;  %s7453_s20 = smov [#allocation16]  }
  0xaf   :  { %s104_s30 = sshll.u32 %s7452_s29, 4  ;;  %s126_s9 = sshll.u32 %s7453_s20, 4  ;;  %s105_s30 = int_to_ptr.vmem [resolvable:$true] %s104_s30  ;;  %s127_s9 = int_to_ptr.vmem [resolvable:$true] %s126_s9 }
  0xb0   :  { %s7285_s23 = scalar_lea.hbm %s10248_s6, 256 }
  0xb1   :  { %p7286_p10 = scmp.ne.s32.totalorder %s10248_s6, %s7285_s23  ;;  %p7289_p11 = scmp.lt.u32.totalorder %s7285_s23, %s10248_s6 }
  0xb3   :  { %p7291_p12 = pnand %p7289_p11, %p7286_p10 }
  0xb5   :  { %7294 = shalt.err (!%p7291_p12)
}
  0xb6   :  { %s7295_s4 = scalar_lea.vmem %s105_s30, 256  ;;  %p7300_p0 = scmp.lt.s32.totalorder %s105_s30, %s105_s30 }
  0xb7   :  { %p7296_p13 = scmp.ne.s32.totalorder %s105_s30, %s7295_s4  ;;  %p7301_p1 = scmp.lt.s32.totalorder %s7295_s4, %s7295_s4 }
  0xb9   :  { %p7302_p2 = por %p7301_p1, %p7300_p0 }
  0xbb   :  { %p7303_p3 = pnand %p7302_p2, %p7296_p13 }
  0xbd   :  { %7306 = shalt.err (!%p7303_p3)
}
  0xbe   :  { %110 = dma.hbm_to_vmem [thread:$0]  %s10248_s6, 256, %s105_s30, [#allocation12], %s7440_s3, %s7440_s3, %s7441_s18  }
  0xbf   :  { %s7307_s26 = scalar_lea.hbm %s10250_s8, 256 }
  0xc0   :  { %p7308_p4 = scmp.ne.s32.totalorder %s10250_s8, %s7307_s26  ;;  %p7311_p5 = scmp.lt.u32.totalorder %s7307_s26, %s10250_s8 }
  0xc2   :  { %p7313_p6 = pnand %p7311_p5, %p7308_p4 }
  0xc4   :  { %7316 = shalt.err (!%p7313_p6)
}
  0xc5   :  { %s7317_s15 = scalar_lea.vmem %s127_s9, 256  ;;  %p7322_p8 = scmp.lt.s32.totalorder %s127_s9, %s127_s9 }
  0xc6   :  { %p7318_p7 = scmp.ne.s32.totalorder %s127_s9, %s7317_s15  ;;  %p7323_p9 = scmp.lt.s32.totalorder %s7317_s15, %s7317_s15 }
  0xc8   :  { %p7324_p10 = por %p7323_p9, %p7322_p8 }
  0xca   :  { %p7325_p11 = pnand %p7324_p10, %p7318_p7 }
  0xcc   :  { %7328 = shalt.err (!%p7325_p11)
}
  0xcd   :  { %132 = dma.hbm_to_vmem [thread:$0]  %s10250_s8, 256, %s127_s9, [#allocation15], %s7440_s3, %s7440_s3, %s7441_s18  }
  0xce   :  { %s7454_s28 = smov [#allocation19]   ;;  %s7455_s30 = smov [#allocation22]  }
  0xcf   :  { %s151_s29 = sshll.u32 %s7454_s28, 4  ;;  %s173_s20 = sshll.u32 %s7455_s30, 4  ;;  %s152_s29 = int_to_ptr.vmem [resolvable:$true] %s151_s29  ;;  %s174_s20 = int_to_ptr.vmem [resolvable:$true] %s173_s20 }
  0xd0   :  { %s7329_s23 = scalar_lea.hbm %s10252_s10, 16 }
  0xd1   :  { %p7330_p12 = scmp.ne.s32.totalorder %s10252_s10, %s7329_s23  ;;  %p7333_p13 = scmp.lt.u32.totalorder %s7329_s23, %s10252_s10 }
  0xd3   :  { %p7335_p0 = pnand %p7333_p13, %p7330_p12 }
  0xd5   :  { %7338 = shalt.err (!%p7335_p0)
}
  0xd6   :  { %s7339_s8 = scalar_lea.vmem %s152_s29, 16  ;;  %s7343_s18 = scalar_lea.vmem %s152_s29, 32 }
  0xd7   :  { %p7340_p1 = scmp.ne.s32.totalorder %s152_s29, %s7339_s8  ;;  %p7344_p2 = scmp.lt.s32.totalorder %s152_s29, %s152_s29 }
  0xd8   :  { %p7345_p3 = scmp.lt.s32.totalorder %s7343_s18, %s7339_s8 }
  0xda   :  { %p7346_p4 = por %p7345_p3, %p7344_p2 }
  0xdc   :  { %p7347_p5 = pnand %p7346_p4, %p7340_p1 }
  0xde   :  { %7350 = shalt.err (!%p7347_p5)
}
  0xdf   :  { %154 = dma.hbm_to_vmem [thread:$0]  %s10252_s10, 16, %s152_s29, [#allocation18]  }
  0xe0   :  { %s7351_s17 = scalar_lea.hbm %s10254_s12, 16 }
  0xe1   :  { %p7352_p6 = scmp.ne.s32.totalorder %s10254_s12, %s7351_s17  ;;  %p7355_p7 = scmp.lt.u32.totalorder %s7351_s17, %s10254_s12 }
  0xe3   :  { %p7357_p8 = pnand %p7355_p7, %p7352_p6 }
  0xe5   :  { %7360 = shalt.err (!%p7357_p8)
}
  0xe6   :  { %s7361_s24 = scalar_lea.vmem %s174_s20, 16  ;;  %s7365_s1 = scalar_lea.vmem %s174_s20, 32 }
  0xe7   :  { %p7362_p9 = scmp.ne.s32.totalorder %s174_s20, %s7361_s24  ;;  %p7366_p10 = scmp.lt.s32.totalorder %s174_s20, %s174_s20 }
  0xe8   :  { %p7367_p11 = scmp.lt.s32.totalorder %s7365_s1, %s7361_s24 }
  0xea   :  { %p7368_p12 = por %p7367_p11, %p7366_p10 }
  0xec   :  { %p7369_p13 = pnand %p7368_p12, %p7362_p9 }
  0xee   :  { %7372 = shalt.err (!%p7369_p13)
}
  0xef   :  { %176 = dma.hbm_to_vmem [thread:$0]  %s10254_s12, 16, %s174_s20, [#allocation21]  }
  0xf0   :  { %s7456_s6 = smov [#allocation25]   ;;  %s7373_s30 = scalar_lea.hbm %s10256_s14, 16 }
  0xf1   :  { %s195_s2 = sshll.u32 %s7456_s6, 4  ;;  %p7374_p0 = scmp.ne.s32.totalorder %s10256_s14, %s7373_s30  ;;  %s196_s2 = int_to_ptr.vmem [resolvable:$true] %s195_s2 }
  0xf2   :  { %p7377_p1 = scmp.lt.u32.totalorder %s7373_s30, %s10256_s14 }
  0xf4   :  { %p7379_p2 = pnand %p7377_p1, %p7374_p0 }
  0xf6   :  { %7382 = shalt.err (!%p7379_p2)
}
  0xf7   :  { %s7383_s25 = scalar_lea.vmem %s196_s2, 16  ;;  %s7387_s12 = scalar_lea.vmem %s196_s2, 32 }
  0xf8   :  { %p7384_p3 = scmp.ne.s32.totalorder %s196_s2, %s7383_s25  ;;  %p7388_p4 = scmp.lt.s32.totalorder %s196_s2, %s196_s2 }
  0xf9   :  { %p7389_p5 = scmp.lt.s32.totalorder %s7387_s12, %s7383_s25 }
  0xfb   :  { %p7390_p6 = por %p7389_p5, %p7388_p4 }
  0xfd   :  { %p7391_p7 = pnand %p7390_p6, %p7384_p3 }
  0xff   :  { %7394 = shalt.err (!%p7391_p7)
}
 0x100   :  { %198 = dma.hbm_to_vmem [thread:$0]  %s10256_s14, 16, %s196_s2, [#allocation24]  }
 0x101   :  { %7417 = dma.done.wait [#allocation3], 1024  }
 0x102   :  { %7418 = vsyncadd [#allocation3], 4294966272 }
 0x103   :  { %7419 = dma.done.wait [#allocation6], 8192  }
 0x104   :  { %7420 = vsyncadd [#allocation6], 4294959104 }
 0x105   :  { %7421 = dma.done.wait [#allocation9], 4160  }
 0x106   :  { %7422 = vsyncadd [#allocation9], 4294963136 }
 0x107   :  { %7423 = dma.done.wait [#allocation12], 1280  }
 0x108   :  { %7424 = vsyncadd [#allocation12], 4294966016 }
 0x109   :  { %7425 = dma.done.wait [#allocation15], 272  }
 0x10a   :  { %7426 = vsyncadd [#allocation15], 4294967024 }
 0x10b   :  { %7427 = dma.done.wait [#allocation18], 272  }
 0x10c   :  { %7428 = vsyncadd [#allocation18], 4294967024 }
 0x10d   :  { %7429 = dma.done.wait [#allocation21], 144  }
 0x10e   :  { %7430 = vsyncadd [#allocation21], 4294967152 }
 0x10f   :  { %7431 = dma.done.wait [#allocation24], 528  }
 0x110   :  { %7432 = vsyncadd [#allocation24], 4294966768  ;;  %v10259_v0 = vmov 0   ;;  %v6307_v1 = vld [vmem:[#allocation5 + $0x4] ss:$16 sps:$4 sm:$0xff]   ;;  %vm7460_vm0 = vmmov 0  }
 0x111   :  { %506 = vmatprep.mubr.bf16.mxu0 %v10259_v0  ;;  %547 = vmatprep.mubr.bf16.mxu1 %v10259_v0  ;;  %v7750_v2 = vld [vmem:[#allocation5 + $0xc] ss:$16 sps:$4 sm:$0xff]   ;;  %v6311_v3 = vld [vmem:[#allocation5] ss:$16 sps:$4 sm:$0xff]   ;;  %v7752_v4 = vld [vmem:[#allocation5 + $0x8] ss:$16 sps:$4 sm:$0xff]  }
 0x112   :  { %474 = vmatprep.subr.bf16.mxu0 %v6307_v1  ;;  %515 = vmatprep.subr.bf16.mxu1 %v7750_v2  ;;  %v6313_v5 = vld [vmem:[#allocation5 + $0x24] ss:$16 sps:$4 sm:$0xff]   ;;  %v7756_v6 = vld [vmem:[#allocation5 + $0x2c] ss:$16 sps:$4 sm:$0xff]   ;;  %v6317_v7 = vld [vmem:[#allocation5 + $0x20] ss:$16 sps:$4 sm:$0xff]  }
 0x113   :  { %475 = vmatpush1.bf16.msra.mxu0 %v6311_v3  ;;  %516 = vmatpush1.bf16.msra.mxu1 %v7752_v4  ;;  %v7758_v8 = vld [vmem:[#allocation5 + $0x28] ss:$16 sps:$4 sm:$0xff]   ;;  %v6319_v9 = vld [vmem:[#allocation5 + $0x44] ss:$16 sps:$4 sm:$0xff]   ;;  %v7761_v10 = vld [vmem:[#allocation5 + $0x4c] ss:$16 sps:$4 sm:$0xff]  }
 0x114   :  { %476 = vmatprep.subr.bf16.mxu0 %v6313_v5  ;;  %517 = vmatprep.subr.bf16.mxu1 %v7756_v6  ;;  %v6323_v11 = vld [vmem:[#allocation5 + $0x40] ss:$16 sps:$4 sm:$0xff]   ;;  %v7763_v12 = vld [vmem:[#allocation5 + $0x48] ss:$16 sps:$4 sm:$0xff]   ;;  %v6325_v13 = vld [vmem:[#allocation5 + $0x64] ss:$16 sps:$4 sm:$0xff]  }
 0x115   :  { %v7767_v14 = vld [vmem:[#allocation5 + $0x6c] ss:$16 sps:$4 sm:$0xff]   ;;  %v6329_v15 = vld [vmem:[#allocation5 + $0x60] ss:$16 sps:$4 sm:$0xff]   ;;  %v7770_v16 = vld [vmem:[#allocation5 + $0x68] ss:$16 sps:$4 sm:$0xff]  }
 0x116   :  { %v7772_v17 = vld [vmem:[#allocation5 + $0x84] ss:$16 sps:$4 sm:$0xff]   ;;  %v7775_v18 = vld [vmem:[#allocation5 + $0x8c] ss:$16 sps:$4 sm:$0xff]   ;;  %v7777_v19 = vld [vmem:[#allocation5 + $0x80] ss:$16 sps:$4 sm:$0xff]  }
 0x117   :  { %477 = vmatpush1.bf16.msra.mxu0 %v6317_v7  ;;  %518 = vmatpush1.bf16.msra.mxu1 %v7758_v8  ;;  %v7779_v20 = vld [vmem:[#allocation5 + $0x88] ss:$16 sps:$4 sm:$0xff]   ;;  %v7782_v21 = vld [vmem:[#allocation5 + $0xa4] ss:$16 sps:$4 sm:$0xff]   ;;  %v7786_v22 = vld [vmem:[#allocation5 + $0xac] ss:$16 sps:$4 sm:$0xff]   ;;  %v247_v7 = vlaneseq }
 0x118   :  { %478 = vmatprep.subr.bf16.mxu0 %v6319_v9  ;;  %519 = vmatprep.subr.bf16.mxu1 %v7761_v10  ;;  %v7788_v23 = vld [vmem:[#allocation5 + $0xa0] ss:$16 sps:$4 sm:$0xff]   ;;  %v7792_v24 = vld [vmem:[#allocation5 + $0xa8] ss:$16 sps:$4 sm:$0xff]   ;;  %v7794_v25 = vld [vmem:[#allocation5 + $0xc4] ss:$16 sps:$4 sm:$0xff]  }
 0x119   :  { %v7798_v26 = vld [vmem:[#allocation5 + $0xcc] ss:$16 sps:$4 sm:$0xff]   ;;  %v7800_v27 = vld [vmem:[#allocation5 + $0xc0] ss:$16 sps:$4 sm:$0xff]   ;;  %v7802_v28 = vld [vmem:[#allocation5 + $0xc8] ss:$16 sps:$4 sm:$0xff]  }
 0x11a   :  { %v7804_v29 = vld [vmem:[#allocation5 + $0xe4] ss:$16 sps:$4 sm:$0xff]   ;;  %v7806_v30 = vld [vmem:[#allocation5 + $0xec] ss:$16 sps:$4 sm:$0xff]   ;;  %v7812_v31 = vld [vmem:[#allocation5 + $0xe0] ss:$16 sps:$4 sm:$0xff]  }
 0x11b   :  { %479 = vmatpush1.bf16.msra.mxu0 %v6323_v11  ;;  %520 = vmatpush1.bf16.msra.mxu1 %v7763_v12  ;;  %10517 = vst [vmem:[#allocation36_spill] sm:$0xff] %v7812_v31  ;;  %v7814_v32 = vld [vmem:[#allocation5 + $0xe8] ss:$16 sps:$4 sm:$0xff]   ;;  %v7826_v33 = vld [vmem:[#allocation7 + $0x4] ss:$16 sps:$4 sm:$0xff]   ;;  %s7461_s14 = smov 32  }
 0x11c   :  { %480 = vmatprep.subr.bf16.mxu0 %v6325_v13  ;;  %521 = vmatprep.subr.bf16.mxu1 %v7767_v14  ;;  %10518 = vst [vmem:[#allocation37_spill] sm:$0xff] %v7826_v33  ;;  %v7828_v34 = vld [vmem:[#allocation7 + $0xc] ss:$16 sps:$4 sm:$0xff]   ;;  %v7830_v35 = vld [vmem:[#allocation7] ss:$16 sps:$4 sm:$0xff]   ;;  %v7928_v13 = vshrl.u32 %v247_v7, 7 }
 0x11d   :  { %10519 = vst [vmem:[#allocation38_spill] sm:$0xff] %v7830_v35  ;;  %v7832_v36 = vld [vmem:[#allocation7 + $0x8] ss:$16 sps:$4 sm:$0xff]   ;;  %v7838_v37 = vld [vmem:[#allocation7 + $0x24] ss:$16 sps:$4 sm:$0xff]   ;;  %vm1299_vm1 = vcmask 261120  }
 0x11e   :  { %10520 = vst [vmem:[#allocation39_spill] sm:$0xff] %v7838_v37  ;;  %v7840_v38 = vld [vmem:[#allocation7 + $0x2c] ss:$16 sps:$4 sm:$0xff]   ;;  %v7842_v39 = vld [vmem:[#allocation7 + $0x20] ss:$16 sps:$4 sm:$0xff]   ;;  %s7462_s19 = smov 96  }
 0x11f   :  { %481 = vmatpush1.bf16.msra.mxu0 %v6329_v15  ;;  %522 = vmatpush1.bf16.msra.mxu1 %v7770_v16  ;;  %10521 = vst [vmem:[#allocation40_spill] sm:$0xff] %v7842_v39  ;;  %v7844_v40 = vld [vmem:[#allocation7 + $0x28] ss:$16 sps:$4 sm:$0xff]   ;;  %v7850_v41 = vld [vmem:[#allocation7 + $0x44] ss:$16 sps:$4 sm:$0xff]   ;;  %s7464_s8 = smov [#allocation26]  }
 0x120   :  { %482 = vmatprep.subr.bf16.mxu0 %v7772_v17  ;;  %523 = vmatprep.subr.bf16.mxu1 %v7775_v18  ;;  %10522 = vst [vmem:[#allocation41_spill] sm:$0xff] %v7850_v41  ;;  %v7852_v42 = vld [vmem:[#allocation7 + $0x4c] ss:$16 sps:$4 sm:$0xff]   ;;  %v7854_v43 = vld [vmem:[#allocation7 + $0x40] ss:$16 sps:$4 sm:$0xff]   ;;  %s5431_s18 = sshll.u32 %s7464_s8, 4  ;;  %s5432_s18 = int_to_ptr.vmem [resolvable:$true] %s5431_s18 }
 0x121   :  { %10523 = vst [vmem:[#allocation42_spill] sm:$0xff] %v7854_v43  ;;  %v7856_v44 = vld [vmem:[#allocation7 + $0x48] ss:$16 sps:$4 sm:$0xff]   ;;  %v7862_v45 = vld [vmem:[#allocation7 + $0x64] ss:$16 sps:$4 sm:$0xff]   ;;  %vm5423_vm2 = vcmask 25600   ;;  %p7400_p9 = scmp.lt.s32.totalorder %s5432_s18, %s5432_s18 }
 0x122   :  { %10524 = vst [vmem:[#allocation43_spill] sm:$0xff] %v7862_v45  ;;  %v7864_v46 = vld [vmem:[#allocation7 + $0x6c] ss:$16 sps:$4 sm:$0xff]   ;;  %v7866_v47 = vld [vmem:[#allocation7 + $0x60] ss:$16 sps:$4 sm:$0xff]   ;;  %s7395_s9 = scalar_lea.vmem %s5432_s18, 32 }
 0x123   :  { %483 = vmatpush1.bf16.msra.mxu0 %v7777_v19  ;;  %524 = vmatpush1.bf16.msra.mxu1 %v7779_v20  ;;  %10525 = vst [vmem:[#allocation44_spill] sm:$0xff] %v7866_v47  ;;  %v7868_v48 = vld [vmem:[#allocation7 + $0x68] ss:$16 sps:$4 sm:$0xff]   ;;  %v7874_v49 = vld [vmem:[#allocation7 + $0x84] ss:$16 sps:$4 sm:$0xff]   ;;  %p7396_p8 = scmp.ne.s32.totalorder %s5432_s18, %s7395_s9  ;;  %p7401_p10 = scmp.lt.s32.totalorder %s7395_s9, %s7395_s9 }
 0x124   :  { %484 = vmatprep.subr.bf16.mxu0 %v7782_v21  ;;  %525 = vmatprep.subr.bf16.mxu1 %v7786_v22  ;;  %10526 = vst [vmem:[#allocation45_spill] sm:$0xff] %v7874_v49  ;;  %v7876_v50 = vld [vmem:[#allocation7 + $0x8c] ss:$16 sps:$4 sm:$0xff]   ;;  %v7878_v51 = vld [vmem:[#allocation7 + $0x80] ss:$16 sps:$4 sm:$0xff]  }
 0x125   :  { %10527 = vst [vmem:[#allocation46_spill] sm:$0xff] %v7878_v51  ;;  %v7880_v52 = vld [vmem:[#allocation7 + $0x88] ss:$16 sps:$4 sm:$0xff]   ;;  %v7882_v53 = vld [vmem:[#allocation7 + $0xa4] ss:$16 sps:$4 sm:$0xff]   ;;  %p7402_p11 = por %p7401_p10, %p7400_p9 }
 0x126   :  { %10528 = vst [vmem:[#allocation47_spill] sm:$0xff] %v7882_v53  ;;  %v7884_v54 = vld [vmem:[#allocation7 + $0xac] ss:$16 sps:$4 sm:$0xff]   ;;  %v7890_v55 = vld [vmem:[#allocation7 + $0xa0] ss:$16 sps:$4 sm:$0xff]  }
 0x127   :  { %485 = vmatpush1.bf16.msra.mxu0 %v7788_v23  ;;  %526 = vmatpush1.bf16.msra.mxu1 %v7792_v24  ;;  %10529 = vst [vmem:[#allocation48_spill] sm:$0xff] %v7890_v55  ;;  %v7892_v56 = vld [vmem:[#allocation7 + $0xa8] ss:$16 sps:$4 sm:$0xff]   ;;  %v7896_v57 = vld [vmem:[#allocation7 + $0xc4] ss:$16 sps:$4 sm:$0xff]   ;;  %p7403_p12 = pnand %p7402_p11, %p7396_p8 }
 0x128   :  { %486 = vmatprep.subr.bf16.mxu0 %v7794_v25  ;;  %527 = vmatprep.subr.bf16.mxu1 %v7798_v26  ;;  %10530 = vst [vmem:[#allocation49_spill] sm:$0xff] %v7896_v57  ;;  %v7898_v58 = vld [vmem:[#allocation7 + $0xcc] ss:$16 sps:$4 sm:$0xff]   ;;  %v7902_v59 = vld [vmem:[#allocation7 + $0xc0] ss:$16 sps:$4 sm:$0xff]  }
 0x129   :  { %10531 = vst [vmem:[#allocation50_spill] sm:$0xff] %v7902_v59  ;;  %v7904_v60 = vld [vmem:[#allocation7 + $0xc8] ss:$16 sps:$4 sm:$0xff]   ;;  %v7908_v61 = vld [vmem:[#allocation7 + $0xe4] ss:$16 sps:$4 sm:$0xff]  }
 0x12a   :  { %10532 = vst [vmem:[#allocation51_spill] sm:$0xff] %v7908_v61  ;;  %v7910_v62 = vld [vmem:[#allocation7 + $0xec] ss:$16 sps:$4 sm:$0xff]   ;;  %v7914_v63 = vld [vmem:[#allocation7 + $0xe0] ss:$16 sps:$4 sm:$0xff]  }
 0x12b   :  { %487 = vmatpush1.bf16.msra.mxu0 %v7800_v27  ;;  %528 = vmatpush1.bf16.msra.mxu1 %v7802_v28  ;;  %10533 = vst [vmem:[#allocation52_spill] sm:$0xff] %v7914_v63  ;;  %v7916_v1 = vld [vmem:[#allocation7 + $0xe8] ss:$16 sps:$4 sm:$0xff]   ;;  %v7920_v3 = vld [vmem:[#allocation8 + $0x4] ss:$16 sps:$4 sm:$0xff]  }
 0x12c   :  { %488 = vmatprep.subr.bf16.mxu0 %v7804_v29  ;;  %529 = vmatprep.subr.bf16.mxu1 %v7806_v30  ;;  %10534 = vst [vmem:[#allocation53_spill] sm:$0xff] %v7920_v3  ;;  %v7922_v5 = vld [vmem:[#allocation8 + $0xc] ss:$16 sps:$4 sm:$0xff]   ;;  %v7458_v9 = vmov 1983009808   ;;  %v281_v7 = vld [vmem:[#allocation2] sm:$0xff] }
 0x12d   :  { %v563_v11 = vunpack.c.l.s4 %v7458_v9 }
 0x12f   :  { %489 = vmatpush1.bf16.msra.mxu0 %v7812_v31  ;;  %530 = vmatpush1.bf16.msra.mxu1 %v7814_v32  ;;  %v564_v15 = vunpack.c.0.s8 %v563_v11 }
 0x130   :  { %797 = vmatprep.subr.bf16.mxu0 %v7826_v33  ;;  %838 = vmatprep.subr.bf16.mxu1 %v7828_v34 }
 0x132   :  { %507 = vmatmul.mubr.bf16.vlgmr.msra.gmra.mrb[0].mxu0 %v10259_v0  ;;  %548 = vmatmul.mubr.bf16.vlgmr.msra.gmra.mrb[0].mxu1 %v10259_v0 }
 0x133   :  { %829 = vmatprep.mubr.bf16.mxu0 %v10259_v0  ;;  %870 = vmatprep.mubr.bf16.mxu1 %v10259_v0 }
 0x134   :  { %798 = vmatpush1.bf16.msra.mxu0 %v7830_v35  ;;  %839 = vmatpush1.bf16.msra.mxu1 %v7832_v36 }
 0x135   :  { %799 = vmatprep.subr.bf16.mxu0 %v7838_v37  ;;  %840 = vmatprep.subr.bf16.mxu1 %v7840_v38 }
 0x138   :  { %800 = vmatpush1.bf16.msra.mxu0 %v7842_v39  ;;  %841 = vmatpush1.bf16.msra.mxu1 %v7844_v40 }
 0x139   :  { %801 = vmatprep.subr.bf16.mxu0 %v7850_v41  ;;  %842 = vmatprep.subr.bf16.mxu1 %v7852_v42 }
 0x13c   :  { %802 = vmatpush1.bf16.msra.mxu0 %v7854_v43  ;;  %843 = vmatpush1.bf16.msra.mxu1 %v7856_v44 }
 0x13d   :  { %803 = vmatprep.subr.bf16.mxu0 %v7862_v45  ;;  %844 = vmatprep.subr.bf16.mxu1 %v7864_v46 }
 0x140   :  { %804 = vmatpush1.bf16.msra.mxu0 %v7866_v47  ;;  %845 = vmatpush1.bf16.msra.mxu1 %v7868_v48 }
 0x141   :  { %805 = vmatprep.subr.bf16.mxu0 %v7874_v49  ;;  %846 = vmatprep.subr.bf16.mxu1 %v7876_v50 }
 0x144   :  { %806 = vmatpush1.bf16.msra.mxu0 %v7878_v51  ;;  %847 = vmatpush1.bf16.msra.mxu1 %v7880_v52 }
 0x145   :  { %807 = vmatprep.subr.bf16.mxu0 %v7882_v53  ;;  %848 = vmatprep.subr.bf16.mxu1 %v7884_v54 }
 0x148   :  { %808 = vmatpush1.bf16.msra.mxu0 %v7890_v55  ;;  %849 = vmatpush1.bf16.msra.mxu1 %v7892_v56 }
 0x149   :  { %809 = vmatprep.subr.bf16.mxu0 %v7896_v57  ;;  %850 = vmatprep.subr.bf16.mxu1 %v7898_v58 }
 0x14c   :  { %810 = vmatpush1.bf16.msra.mxu0 %v7902_v59  ;;  %851 = vmatpush1.bf16.msra.mxu1 %v7904_v60  ;;  %v7931_v59 = vsub.s32 %v564_v15, %v7928_v13 }
 0x14d   :  { %811 = vmatprep.subr.bf16.mxu0 %v7908_v61  ;;  %852 = vmatprep.subr.bf16.mxu1 %v7910_v62 }
 0x14e   :  { %10535 = vst [vmem:[#allocation54_spill] sm:$0xff] %v7931_v59 }
 0x150   :  { %812 = vmatpush1.bf16.msra.mxu0 %v7914_v63  ;;  %853 = vmatpush1.bf16.msra.mxu1 %v7916_v1 }
 0x151   :  { %1071 = vmatprep.subr.bf16.mxu0 %v7920_v3  ;;  %1112 = vmatprep.subr.bf16.mxu1 %v7922_v5 }
 0x205   :  { %v508_v0 = vpop.f32.mrb[0].mxu0  ;;  %v549_v61 = vpop.f32.mrb[0].mxu1 }
 0x206   :  { %v510_v57 = vpop.f32.mrb[1].mxu0  ;;  %v551_v55 = vpop.f32.mrb[1].mxu1 }
 0x207   :  { %v560_v63 = vcombine.low %v508_v0, %v510_v57  ;;  %v561_v53 = vcombine.low %v549_v61, %v551_v55  ;;  %v512_v51 = vpop.f32.mrb[2].mxu0  ;;  %v553_v49 = vpop.f32.mrb[2].mxu1 }
 0x208   :  { %v513_v3 = vpop.f32.mrb[3].mxu0  ;;  %v554_v47 = vpop.f32.mrb[3].mxu1 }
 0x209   :  { %v568_v45 = vrot.slane %v560_v63, %v7931_v59  ;;  %v575_v9 = vrot.slane %v561_v53, %v7931_v59 }
 0x20b   :  { %v576_v43 = vcombine.low %v568_v45, %v575_v9 }
 0x20d   :  { %v578_v11 = vadd.f32 %v576_v43, %v281_v7  ;;  %v7940_v7 = vld [vmem:[#allocation8 + $0x8] ss:$16 sps:$4 sm:$0xff]  }
 0x20e   :  { %10538 = vst [vmem:[#allocation57_spill] sm:$0xff] %v7940_v7 }
 0x20f   :  { %v579_v41 = vmul.f32 0.5, %v578_v11  ;;  %v584_v39 = vrot.slane %v578_v11, 2  ;;  %v590_v37 = vrot.slane %v578_v11, 4  ;;  %v593_v35 = vrot.slane %v578_v11, 6 }
 0x211   :  { %6465 = vtanh.f32 %v579_v41  ;;  %v586_v15 = vmul.f32 0.5, %v584_v39  ;;  %v595_v0 = vmul.f32 0.5, %v593_v35  ;;  %v7938_v35 = vld [vmem:[#allocation8] ss:$16 sps:$4 sm:$0xff]  }
 0x212   :  { %10537 = vst [vmem:[#allocation56_spill] sm:$0xff] %v7938_v35 }
 0x213   :  { %6467 = vtanh.f32 %v586_v15  ;;  %v7944_v15 = vld [vmem:[#allocation8 + $0x24] ss:$16 sps:$4 sm:$0xff]  }
 0x214   :  { %6469 = vtanh.f32 %v590_v37  ;;  %10539 = vst [vmem:[#allocation58_spill] sm:$0xff] %v7944_v15 }
 0x215   :  { %6471 = vtanh.f32 %v595_v0  ;;  %v7946_v0 = vld [vmem:[#allocation8 + $0x2c] ss:$16 sps:$4 sm:$0xff]  }
 0x216   :  { %10540 = vst [vmem:[#allocation59_spill] sm:$0xff] %v7946_v0 }
 0x21b   :  { %v6466_v51 = vpop.eup %6465 }
 0x21c   :  { %v581_v49 = vmul.f32 0.5, %v6466_v51  ;;  %v7952_v51 = vld [vmem:[#allocation8 + $0x20] ss:$16 sps:$4 sm:$0xff]  }
 0x21d   :  { %v6468_v55 = vpop.eup %6467  ;;  %10541 = vst [vmem:[#allocation60_spill] sm:$0xff] %v7952_v51 }
 0x21e   :  { %v582_v47 = vadd.f32 0.5, %v581_v49  ;;  %v588_v57 = vmul.f32 0.5, %v6468_v55  ;;  %v6470_v53 = vpop.eup %6469  ;;  %v7954_v49 = vld [vmem:[#allocation8 + $0x28] ss:$16 sps:$4 sm:$0xff]   ;;  %v7958_v55 = vld [vmem:[#allocation8 + $0x44] ss:$16 sps:$4 sm:$0xff]  }
 0x21f   :  { %v6472_v39 = vpop.eup %6471  ;;  %10542 = vst [vmem:[#allocation61_spill] sm:$0xff] %v7954_v49  ;;  %10543 = vst [vmem:[#allocation62_spill] sm:$0xff] %v7958_v55 }
 0x220   :  { %v589_v61 = vadd.f32 0.5, %v588_v57  ;;  %v600_v45 = vmul.f32 %v6470_v53, %v582_v47  ;;  %v597_v41 = vmul.f32 0.5, %v6472_v39  ;;  %v7960_v47 = vld [vmem:[#allocation8 + $0x4c] ss:$16 sps:$4 sm:$0xff]   ;;  %v10545_v57 = vmov 0  }
 0x221   :  { %10544 = vst [vmem:[#allocation63_spill] sm:$0xff] %v7960_v47  ;;  %v7968_v53 = vld [vmem:[#allocation8 + $0x48] ss:$16 sps:$4 sm:$0xff]   ;;  %v7978_v39 = vld [vmem:[#allocation8 + $0x60] ss:$16 sps:$4 sm:$0xff]  }
 0x222   :  { %v599_v63 = vmul.f32 0.0, %v589_v61  ;;  %v598_v3 = vadd.f32 0.5, %v597_v41  ;;  %v7966_v61 = vld [vmem:[#allocation8 + $0x40] ss:$16 sps:$4 sm:$0xff]   ;;  %10547 = vst [vmem:[#allocation65_spill] sm:$0xff] %v7968_v53  ;;  %10550 = vst [vmem:[#allocation68_spill] sm:$0xff] %v7978_v39 }
 0x223   :  { %10546 = vst [vmem:[#allocation64_spill] sm:$0xff] %v7966_v61  ;;  %v7980_v41 = vld [vmem:[#allocation8 + $0x68] ss:$16 sps:$4 sm:$0xff]  }
 0x224   :  { %v7935_v43 = vadd.f32 %v600_v45, %v599_v63  ;;  %v7972_v63 = vld [vmem:[#allocation8 + $0x64] ss:$16 sps:$4 sm:$0xff]   ;;  %v7974_v45 = vld [vmem:[#allocation8 + $0x6c] ss:$16 sps:$4 sm:$0xff]   ;;  %10551 = vst [vmem:[#allocation69_spill] sm:$0xff] %v7980_v41 }
 0x225   :  { %10548 = vst [vmem:[#allocation66_spill] sm:$0xff] %v7972_v63  ;;  %10549 = vst [vmem:[#allocation67_spill] sm:$0xff] %v7974_v45 }
 0x226   :  { %10536 = vst [vmem:[#allocation55_spill] sm:$0xff] %v7935_v43  ;;  %6473 = vtanh.f32 %v7935_v43 }
 0x230   :  { %v6474_v9 = vpop.eup %6473 }
 0x231   :  { %v603_v37 = vmul.f32 %v6474_v9, %v598_v3  ;;  %v7984_v3 = vld [vmem:[#allocation8 + $0x84] ss:$16 sps:$4 sm:$0xff]   ;;  %v7986_v9 = vld [vmem:[#allocation8 + $0x8c] ss:$16 sps:$4 sm:$0xff]  }
 0x232   :  { %10552 = vst [vmem:[#allocation70_spill] sm:$0xff] %v7984_v3  ;;  %10553 = vst [vmem:[#allocation71_spill] sm:$0xff] %v7986_v9 }
 0x233   :  { %v7942_v11 = vpack.c.bf16 %v603_v37, %v603_v37  ;;  %v7990_v37 = vld [vmem:[#allocation8 + $0x80] ss:$16 sps:$4 sm:$0xff]  }
 0x234   :  { %10554 = vst [vmem:[#allocation72_spill] sm:$0xff] %v7990_v37 }
 0x235   :  { %830 = vmatmul.mubr.bf16.vlgmr.msra.gmra.mrb[4].mxu0 %v7942_v11  ;;  %871 = vmatmul.mubr.bf16.vlgmr.msra.gmra.mrb[4].mxu1 %v7942_v11 }
 0x236   :  { %1072 = vmatpush1.bf16.msra.mxu0 %v7938_v35  ;;  %1113 = vmatpush1.bf16.msra.mxu1 %v7940_v7 }
 0x237   :  { %1073 = vmatprep.subr.bf16.mxu0 %v7944_v15  ;;  %1114 = vmatprep.subr.bf16.mxu1 %v7946_v0 }
 0x238   :  { %1103 = vmatprep.mubr.bf16.mxu0 %v10545_v57  ;;  %1144 = vmatprep.mubr.bf16.mxu1 %v10545_v57 }
 0x23a   :  { %1074 = vmatpush1.bf16.msra.mxu0 %v7952_v51  ;;  %1115 = vmatpush1.bf16.msra.mxu1 %v7954_v49 }
 0x23b   :  { %1075 = vmatprep.subr.bf16.mxu0 %v7958_v55  ;;  %1116 = vmatprep.subr.bf16.mxu1 %v7960_v47 }
 0x23e   :  { %1076 = vmatpush1.bf16.msra.mxu0 %v7966_v61  ;;  %1117 = vmatpush1.bf16.msra.mxu1 %v7968_v53  ;;  %v7992_v61 = vld [vmem:[#allocation8 + $0x88] ss:$16 sps:$4 sm:$0xff]   ;;  %v7996_v53 = vld [vmem:[#allocation8 + $0xa4] ss:$16 sps:$4 sm:$0xff]  }
 0x23f   :  { %1077 = vmatprep.subr.bf16.mxu0 %v7972_v63  ;;  %1118 = vmatprep.subr.bf16.mxu1 %v7974_v45  ;;  %10555 = vst [vmem:[#allocation73_spill] sm:$0xff] %v7992_v61  ;;  %10556 = vst [vmem:[#allocation74_spill] sm:$0xff] %v7996_v53  ;;  %v7998_v63 = vld [vmem:[#allocation8 + $0xac] ss:$16 sps:$4 sm:$0xff]   ;;  %v8002_v45 = vld [vmem:[#allocation8 + $0xa0] ss:$16 sps:$4 sm:$0xff]  }
 0x240   :  { %10557 = vst [vmem:[#allocation75_spill] sm:$0xff] %v7998_v63  ;;  %10558 = vst [vmem:[#allocation76_spill] sm:$0xff] %v8002_v45 }
 0x242   :  { %1078 = vmatpush1.bf16.msra.mxu0 %v7978_v39  ;;  %1119 = vmatpush1.bf16.msra.mxu1 %v7980_v41  ;;  %v8004_v39 = vld [vmem:[#allocation8 + $0xa8] ss:$16 sps:$4 sm:$0xff]   ;;  %v8008_v41 = vld [vmem:[#allocation8 + $0xc4] ss:$16 sps:$4 sm:$0xff]  }
 0x243   :  { %1079 = vmatprep.subr.bf16.mxu0 %v7984_v3  ;;  %1120 = vmatprep.subr.bf16.mxu1 %v7986_v9  ;;  %10559 = vst [vmem:[#allocation77_spill] sm:$0xff] %v8004_v39  ;;  %10560 = vst [vmem:[#allocation78_spill] sm:$0xff] %v8008_v41  ;;  %v8010_v3 = vld [vmem:[#allocation8 + $0xcc] ss:$16 sps:$4 sm:$0xff]   ;;  %v8014_v9 = vld [vmem:[#allocation8 + $0xc0] ss:$16 sps:$4 sm:$0xff]  }
 0x244   :  { %10561 = vst [vmem:[#allocation79_spill] sm:$0xff] %v8010_v3  ;;  %10562 = vst [vmem:[#allocation80_spill] sm:$0xff] %v8014_v9 }
 0x246   :  { %1080 = vmatpush1.bf16.msra.mxu0 %v7990_v37  ;;  %1121 = vmatpush1.bf16.msra.mxu1 %v7992_v61  ;;  %v8016_v37 = vld [vmem:[#allocation8 + $0xc8] ss:$16 sps:$4 sm:$0xff]   ;;  %v8020_v61 = vld [vmem:[#allocation8 + $0xe4] ss:$16 sps:$4 sm:$0xff]  }
 0x247   :  { %1081 = vmatprep.subr.bf16.mxu0 %v7996_v53  ;;  %1122 = vmatprep.subr.bf16.mxu1 %v7998_v63  ;;  %10563 = vst [vmem:[#allocation81_spill] sm:$0xff] %v8016_v37  ;;  %10564 = vst [vmem:[#allocation82_spill] sm:$0xff] %v8020_v61  ;;  %v8022_v53 = vld [vmem:[#allocation8 + $0xec] ss:$16 sps:$4 sm:$0xff]   ;;  %v8026_v63 = vld [vmem:[#allocation8 + $0xe0] ss:$16 sps:$4 sm:$0xff]  }
 0x248   :  { %10565 = vst [vmem:[#allocation83_spill] sm:$0xff] %v8022_v53  ;;  %10566 = vst [vmem:[#allocation84_spill] sm:$0xff] %v8026_v63 }
 0x24a   :  { %1082 = vmatpush1.bf16.msra.mxu0 %v8002_v45  ;;  %1123 = vmatpush1.bf16.msra.mxu1 %v8004_v39  ;;  %v8028_v45 = vld [vmem:[#allocation8 + $0xe8] ss:$16 sps:$4 sm:$0xff]  }
 0x24b   :  { %1083 = vmatprep.subr.bf16.mxu0 %v8008_v41  ;;  %1124 = vmatprep.subr.bf16.mxu1 %v8010_v3  ;;  %10567 = vst [vmem:[#allocation85_spill] sm:$0xff] %v8028_v45  ;;  %v8036_v3 = vld [vmem:[#allocation11] sm:$0xff]  }
 0x24c   :  { %10568 = vst [vmem:[#allocation86_spill] sm:$0xff] %v8036_v3 }
 0x24e   :  { %1084 = vmatpush1.bf16.msra.mxu0 %v8014_v9  ;;  %1125 = vmatpush1.bf16.msra.mxu1 %v8016_v37  ;;  %v10310_v9 = vmov 0.0   ;;  %v257_v37 = vsub.s32 2, %v7928_v13 }
 0x24f   :  { %1085 = vmatprep.subr.bf16.mxu0 %v8020_v61  ;;  %1126 = vmatprep.subr.bf16.mxu1 %v8022_v53  ;;  %v8042_v53 = vld [vmem:[#allocation11 + $0x8] sm:$0xff]   ;;  %v8065_v61 = vld [vmem:[#allocation11 + $0x38] sm:$0xff]  }
 0x250   :  { %10569 = vst [vmem:[#allocation87_spill] sm:$0xff] %v8042_v53  ;;  %10575 = vst [vmem:[#allocation93_spill] sm:$0xff] %v8065_v61 }
 0x252   :  { %1086 = vmatpush1.bf16.msra.mxu0 %v8026_v63  ;;  %1127 = vmatpush1.bf16.msra.mxu1 %v8028_v45  ;;  %v8046_v45 = vld [vmem:[#allocation11 + $0x10] sm:$0xff]   ;;  %v8050_v63 = vld [vmem:[#allocation11 + $0x18] sm:$0xff]  }
 0x253   :  { %5732 = vmatprep.subr.bf16.mxu0 %v10310_v9  ;;  %5760 = vmatprep.subr.bf16.mxu1 %v10310_v9  ;;  %10570 = vst [vmem:[#allocation88_spill] sm:$0xff] %v8046_v45  ;;  %10571 = vst [vmem:[#allocation89_spill] sm:$0xff] %v8050_v63 }
 0x255   :  { %1104 = vmatmul.mubr.bf16.vlgmr.msra.gmra.mrb[4].mxu0 %v10545_v57  ;;  %1145 = vmatmul.mubr.bf16.vlgmr.msra.gmra.mrb[4].mxu1 %v10545_v57 }
 0x256   :  { %5733 = vmatpush3.bf16.msra.mxu0 %v8036_v3  ;;  %v8054_v3 = vld [vmem:[#allocation11 + $0x20] sm:$0xff]   ;;  %5748 = vmatprep.mubr.msk.bf16.mxu0 %vm7460_vm0, %v10310_v9 }
 0x257   :  { %5734 = vmatprep.subr.bf16.mxu0 %v10310_v9  ;;  %10572 = vst [vmem:[#allocation90_spill] sm:$0xff] %v8054_v3  ;;  %5764 = vmatprep.mubr.msk.bf16.mxu1 %vm7460_vm0, %v10310_v9 }
 0x25a   :  { %5735 = vmatpush3.bf16.msra.mxu0 %v8042_v53  ;;  %v8058_v53 = vld [vmem:[#allocation11 + $0x28] sm:$0xff]  }
 0x25b   :  { %5736 = vmatprep.subr.bf16.mxu0 %v10310_v9  ;;  %10573 = vst [vmem:[#allocation91_spill] sm:$0xff] %v8058_v53 }
 0x25e   :  { %5737 = vmatpush3.bf16.msra.mxu0 %v8046_v45  ;;  %v8062_v45 = vld [vmem:[#allocation11 + $0x30] sm:$0xff]  }
 0x25f   :  { %5738 = vmatprep.subr.bf16.mxu0 %v10310_v9  ;;  %10574 = vst [vmem:[#allocation92_spill] sm:$0xff] %v8062_v45 }
 0x262   :  { %5739 = vmatpush3.bf16.msra.mxu0 %v8050_v63 }
 0x263   :  { %5740 = vmatprep.subr.bf16.mxu0 %v10310_v9 }
 0x266   :  { %5741 = vmatpush3.bf16.msra.mxu0 %v8054_v3  ;;  %v245_v3 = vld [vmem:[#allocation10] sm:$0xf] }
 0x267   :  { %5742 = vmatprep.subr.bf16.mxu0 %v10310_v9  ;;  %v8082_v49 = vrot.slane %v245_v3, %v257_v37 }
 0x26a   :  { %5743 = vmatpush3.bf16.msra.mxu0 %v8058_v53  ;;  %v249_v53 = vsub.s32 0, %v7928_v13 }
 0x26b   :  { %5744 = vmatprep.subr.bf16.mxu0 %v10310_v9 }
 0x26c   :  { %v8076_v63 = vrot.slane %v245_v3, %v249_v53 }
 0x26e   :  { %5745 = vmatpush3.bf16.msra.mxu0 %v8062_v45  ;;  %v253_v45 = vsub.s32 1, %v7928_v13  ;;  %10576 = vst [vmem:[#allocation94_spill] sm:$0xff] %v8076_v63 }
 0x26f   :  { %5746 = vmatprep.subr.bf16.mxu0 %v10310_v9 }
 0x270   :  { %v8079_v41 = vrot.slane %v245_v3, %v253_v45 }
 0x272   :  { %5747 = vmatpush3.bf16.msra.mxu0 %v8065_v61 }
 0x273   :  { %5752 = vmatprep.subr.bf16.mxu0 %v10310_v9  ;;  %v261_v9 = vsub.s32 3, %v7928_v13 }
 0x275   :  { %v8087_v33 = vrot.slane %v245_v3, %v261_v9  ;;  %v1175_v3 = vld [vmem:[#allocation20] sm:$0x1] }
 0x328   :  { %v1105_v39 = vpop.f32.mrb[4].mxu0  ;;  %v1146_v47 = vpop.f32.mrb[4].mxu1 }
 0x329   :  { %v6101_v55 = vadd.f32 %v1105_v39, %v8076_v63  ;;  %v1107_v61 = vpop.f32.mrb[5].mxu0  ;;  %v1148_v51 = vpop.f32.mrb[5].mxu1  ;;  %v6103_v45 = vadd.f32 %v1146_v47, %v8082_v49 }
 0x32a   :  { %v6102_v0 = vadd.f32 %v1107_v61, %v8079_v41  ;;  %v1109_v15 = vpop.f32.mrb[6].mxu0  ;;  %v1150_v7 = vpop.f32.mrb[6].mxu1  ;;  %v6104_v39 = vadd.f32 %v1148_v51, %v8087_v33  ;;  %v1176_v51 = vunpack.c.l.bf16 %v1175_v3  ;;  %v10588_v3 = vld [vmem:[#allocation46_spill] sm:$0xff] }
 0x32b   :  { %v1157_v53 = vmul.f32 0.5, %v6101_v55  ;;  %v1110_v35 = vpop.f32.mrb[7].mxu0  ;;  %v1151_v43 = vpop.f32.mrb[7].mxu1 }
 0x32c   :  { %v1161_v59 = vmul.f32 0.5, %v6102_v0  ;;  %v1166_v37 = vmul.f32 0.5, %v6104_v39  ;;  %v8096_v39 = vld [vmem:[#allocation13] sm:$0xff]  }
 0x32d   :  { %6475 = vtanh.f32 %v1157_v53 }
 0x32e   :  { %6477 = vtanh.f32 %v1161_v59 }
 0x32f   :  { %6479 = vtanh.f32 %v6103_v45 }
 0x330   :  { %6481 = vtanh.f32 %v1166_v37  ;;  %v8099_v37 = vld [vmem:[#allocation13 + $0x8] sm:$0xff]  }
 0x337   :  { %v6476_v13 = vpop.eup %6475 }
 0x338   :  { %v6478_v63 = vpop.eup %6477  ;;  %v1159_v31 = vmul.f32 0.5, %v6476_v13  ;;  %v10577_v13 = vmov 0.0  }
 0x339   :  { %v1163_v61 = vmul.f32 0.5, %v6478_v63  ;;  %v6480_v15 = vpop.eup %6479 }
 0x33a   :  { %v1160_v7 = vadd.f32 0.5, %v1159_v31  ;;  %v6482_v47 = vpop.eup %6481 }
 0x33b   :  { %v1164_v35 = vadd.f32 0.5, %v1163_v61  ;;  %v1168_v59 = vmul.f32 0.5, %v6482_v47  ;;  %v8190_v61 = vld [vmem:[#allocation5 + $0x20] ss:$16 sps:$4 sm:$0xff]  }
 0x33c   :  { %v1171_v43 = vmul.f32 %v6480_v15, %v1160_v7  ;;  %v8193_v7 = vld [vmem:[#allocation5 + $0x44] ss:$16 sps:$4 sm:$0xff]   ;;  %v8196_v15 = vld [vmem:[#allocation5 + $0x40] ss:$16 sps:$4 sm:$0xff]  }
 0x33d   :  { %v1170_v0 = vmul.f32 0.0, %v1164_v35  ;;  %v1169_v9 = vadd.f32 0.5, %v1168_v59  ;;  %v8199_v35 = vld [vmem:[#allocation5 + $0x64] ss:$16 sps:$4 sm:$0xff]  }
 0x33e   :  { %v10579_v47 = vld [vmem:[#allocation37_spill] sm:$0xff]  ;;  %v10580_v59 = vld [vmem:[#allocation38_spill] sm:$0xff] }
 0x33f   :  { %v8090_v55 = vadd.f32 %v1171_v43, %v1170_v0  ;;  %v8202_v43 = vld [vmem:[#allocation5 + $0x60] ss:$16 sps:$4 sm:$0xff]   ;;  %v10578_v0 = vld [vmem:[#allocation36_spill] sm:$0xff] }
 0x341   :  { %6483 = vtanh.f32 %v8090_v55 }
 0x34b   :  { %v6484_v53 = vpop.eup %6483 }
 0x34c   :  { %v8093_v45 = vmul.f32 %v6484_v53, %v1169_v9  ;;  %v10590_v9 = vld [vmem:[#allocation48_spill] sm:$0xff]  ;;  %v10592_v53 = vld [vmem:[#allocation50_spill] sm:$0xff] }
 0x34e   :  { %v1177_v63 = vmul.f32 %v1176_v51, %v8093_v45  ;;  %v10591_v51 = vld [vmem:[#allocation49_spill] sm:$0xff] }
 0x350   :  { %v1178_v31 = vpack.c.bf16 %v1177_v63, %v1177_v63  ;;  %v10593_v63 = vld [vmem:[#allocation51_spill] sm:$0xff] }
 0x352   :  { %5749 = vmatmul.mubr.bf16.vlgmr.msra.gmra.mrb[8].mxu0 %v1178_v31  ;;  %v10594_v31 = vld [vmem:[#allocation52_spill] sm:$0xff] }
 0x353   :  { %5753 = vmatpush3.bf16.msra.mxu0 %v8096_v39  ;;  %5756 = vmatprep.mubr.msk.bf16.mxu0 %vm7460_vm0, %v10577_v13 }
 0x354   :  { %5754 = vmatprep.subr.bf16.mxu0 %v10577_v13 }
 0x357   :  { %5755 = vmatpush3.bf16.msra.mxu0 %v8099_v37 }
 0x358   :  { %1551 = vmatprep.subr.bf16.mxu0 %v7750_v2  ;;  %v8142_v2 = vld [vmem:[#allocation14] ss:$0 sm:$0xff] }
 0x35e   :  { %5757 = vmatmul.mubr.bf16.vlgmr.msra.gmra.mrb[8].mxu0 %v10545_v57 }
 0x35f   :  { %1552 = vmatpush1.bf16.msra.mxu0 %v7752_v4  ;;  %1583 = vmatprep.mubr.bf16.mxu0 %v10545_v57 }
 0x360   :  { %1553 = vmatprep.subr.bf16.mxu0 %v7756_v6 }
 0x363   :  { %1554 = vmatpush1.bf16.msra.mxu0 %v7758_v8 }
 0x364   :  { %1555 = vmatprep.subr.bf16.mxu0 %v7761_v10 }
 0x367   :  { %1556 = vmatpush1.bf16.msra.mxu0 %v7763_v12 }
 0x368   :  { %1557 = vmatprep.subr.bf16.mxu0 %v7767_v14 }
 0x36b   :  { %1558 = vmatpush1.bf16.msra.mxu0 %v7770_v16 }
 0x36c   :  { %1559 = vmatprep.subr.bf16.mxu0 %v7775_v18 }
 0x36f   :  { %1560 = vmatpush1.bf16.msra.mxu0 %v7779_v20 }
 0x370   :  { %1561 = vmatprep.subr.bf16.mxu0 %v7786_v22 }
 0x373   :  { %1562 = vmatpush1.bf16.msra.mxu0 %v7792_v24 }
 0x374   :  { %1563 = vmatprep.subr.bf16.mxu0 %v7798_v26 }
 0x377   :  { %1564 = vmatpush1.bf16.msra.mxu0 %v7802_v28 }
 0x378   :  { %1565 = vmatprep.subr.bf16.mxu0 %v7806_v30 }
 0x37b   :  { %1566 = vmatpush1.bf16.msra.mxu0 %v7814_v32 }
 0x37c   :  { %1682 = vmatprep.subr.bf16.mxu0 %v7828_v34 }
 0x37e   :  { %1584 = vmatmul.mubr.bf16.vlgmr.msra.gmra.mrb[12].mxu0 %v7942_v11 }
 0x37f   :  { %1683 = vmatpush1.bf16.msra.mxu0 %v7832_v36  ;;  %1714 = vmatprep.mubr.bf16.mxu0 %v10545_v57 }
 0x380   :  { %1684 = vmatprep.subr.bf16.mxu0 %v7840_v38 }
 0x383   :  { %1685 = vmatpush1.bf16.msra.mxu0 %v7844_v40 }
 0x384   :  { %1686 = vmatprep.subr.bf16.mxu0 %v7852_v42 }
 0x387   :  { %1687 = vmatpush1.bf16.msra.mxu0 %v7856_v44  ;;  %v8156_v44 = vld [vmem:[#allocation16] sm:$0xff]  }
 0x388   :  { %1688 = vmatprep.subr.bf16.mxu0 %v7864_v46  ;;  %5761 = vmatpush3.bf16.msra.mxu1 %v8156_v44  ;;  %v8159_v46 = vld [vmem:[#allocation16 + $0x8] sm:$0xff]  }
 0x389   :  { %5762 = vmatprep.subr.bf16.mxu1 %v10577_v13 }
 0x38b   :  { %1689 = vmatpush1.bf16.msra.mxu0 %v7868_v48 }
 0x38c   :  { %1690 = vmatprep.subr.bf16.mxu0 %v7876_v50  ;;  %5763 = vmatpush3.bf16.msra.mxu1 %v8159_v46 }
 0x38d   :  { %5768 = vmatprep.subr.bf16.mxu1 %v10577_v13 }
 0x38f   :  { %1691 = vmatpush1.bf16.msra.mxu0 %v7880_v52 }
 0x390   :  { %1692 = vmatprep.subr.bf16.mxu0 %v7884_v54 }
 0x393   :  { %1693 = vmatpush1.bf16.msra.mxu0 %v7892_v56  ;;  %v8166_v56 = vld [vmem:[#allocation17] sm:$0xff]  }
 0x394   :  { %1694 = vmatprep.subr.bf16.mxu0 %v7898_v58 }
 0x397   :  { %1695 = vmatpush1.bf16.msra.mxu0 %v7904_v60  ;;  %v8173_v60 = vld [vmem:[#allocation17 + $0x8] sm:$0xff]  }
 0x398   :  { %1696 = vmatprep.subr.bf16.mxu0 %v7910_v62  ;;  %v8179_v62 = vld [vmem:[#allocation5 + $0x4] ss:$16 sps:$4 sm:$0xff]  }
 0x39b   :  { %1697 = vmatpush1.bf16.msra.mxu0 %v7916_v1  ;;  %v8183_v1 = vld [vmem:[#allocation5] ss:$16 sps:$4 sm:$0xff]  }
 0x39c   :  { %1765 = vmatprep.subr.bf16.mxu0 %v7922_v5  ;;  %v8187_v5 = vld [vmem:[#allocation5 + $0x24] ss:$16 sps:$4 sm:$0xff]  }
 0x431   :  { %v1337_v4 = vpop.f32.mrb[8].mxu0 }
 0x432   :  { %v6105_v6 = vadd.f32 %v8142_v2, %v1337_v4  ;;  %v5758_v8 = vpop.f32.mrb[9].mxu0  ;;  %v10595_v4 = vld [vmem:[#allocation53_spill] sm:$0xff] }
 0x433   :  { %v1340_v10 = vpop.f32.mrb[10].mxu0 }
 0x434   :  { %v5759_v12 = vpop.f32.mrb[11].mxu0  ;;  %6485 = vtanh.f32 %v6105_v6  ;;  %v1344_v26 = vmul.f32 0.5, %v6105_v6  ;;  %v8232_v6 = vld [vmem:[#allocation19] ss:$0 sm:$0xff] }
 0x436   :  { %6487 = vtanh.f32 %v1344_v26 }
 0x43e   :  { %v6486_v14 = vpop.eup %6485 }
 0x43f   :  { %1351 = vrot.lane.b32.xlu0 %v6486_v14, %s7440_s3 }
 0x440   :  { %v6488_v28 = vpop.eup %6487 }
 0x441   :  { %v1346_v30 = vmul.f32 0.5, %v6488_v28 }
 0x443   :  { %v1347_v32 = vadd.f32 0.5, %v1346_v30 }
 0x445   :  { %v1349_v38 = vmul.f32 0.0, %v1347_v32 }
 0x451   :  { %v8146_v16 = vpop.f32.mrb[12].mxu0 }
 0x452   :  { %v8148_v18 = vpop.f32.mrb[13].mxu0 }
 0x453   :  { %v1597_v20 = vcombine.low %v8146_v16, %v8148_v18  ;;  %v1589_v22 = vpop.f32.mrb[14].mxu0 }
 0x454   :  { %v1590_v24 = vpop.f32.mrb[15].mxu0 }
 0x4b1   :  { %v1352_v34 = vpop.permute.xlu0 %1351 }
 0x4b2   :  { %v1354_v36 = vmul.f32 %v1352_v34, %v1347_v32 }
 0x4b4   :  { %1356 = vrot.lane.b32.xlu0 %v1354_v36, %s7461_s14  ;;  %v10596_v36 = vld [vmem:[#allocation54_spill] sm:$0xff] }
 0x526   :  { %v1357_v40 = vpop.permute.xlu0 %1356 }
 0x527   :  { %v8153_v42 = vadd.f32 %v1357_v40, %v1349_v38  ;;  %v1611_v38 = vrot.slane %v1597_v20, %v10596_v36 }
 0x529   :  { %6489 = vtanh.f32 %v8153_v42 }
 0x533   :  { %v6490_v48 = vpop.eup %6489 }
 0x534   :  { %1362 = vrot.lane.b32.xlu1 %v6490_v48, %s7440_s3  ;;  %v1509_v48 = vld [vmem:[#allocation2 + $0x8] sm:$0xff] }
 0x5a6   :  { %v1363_v50 = vpop.permute.xlu1 %1362 }
 0x5a7   :  { %v1365_v52 = vmul.f32 %v1363_v50, %v1347_v32 }
 0x5a9   :  { %v1366_v54 = vpack.c.bf16 %v1365_v52, %v1365_v52 }
 0x5ab   :  { %1372 = vrot.lane.b32.xlu1 %v1366_v54, %s7461_s14 }
 0x61d   :  { %v8168_v58 = vpop.permute.xlu1 %1372 }
 0x61e   :  { %5765 = vmatmul.mubr.msk.bf16.vlgmr.msra.gmra.mrb[8].mxu1 %vm1299_vm1, %v8168_v58 }
 0x61f   :  { %5769 = vmatpush3.bf16.msra.mxu1 %v8166_v56  ;;  %5772 = vmatprep.mubr.msk.bf16.mxu1 %vm7460_vm0, %v10577_v13 }
 0x620   :  { %5770 = vmatprep.subr.bf16.mxu1 %v10577_v13 }
 0x623   :  { %5771 = vmatpush3.bf16.msra.mxu1 %v8173_v60 }
 0x624   :  { %1510 = vmatprep.subr.bf16.mxu1 %v8179_v62 }
 0x62a   :  { %5773 = vmatmul.mubr.bf16.vlgmr.msra.gmra.mrb[8].mxu1 %v10545_v57 }
 0x62b   :  { %1511 = vmatpush1.bf16.msra.mxu1 %v8183_v1  ;;  %1542 = vmatprep.mubr.bf16.mxu1 %v10545_v57 }
 0x62c   :  { %1512 = vmatprep.subr.bf16.mxu1 %v8187_v5 }
 0x62f   :  { %1513 = vmatpush1.bf16.msra.mxu1 %v8190_v61 }
 0x630   :  { %1514 = vmatprep.subr.bf16.mxu1 %v8193_v7 }
 0x633   :  { %1515 = vmatpush1.bf16.msra.mxu1 %v8196_v15 }
 0x634   :  { %1516 = vmatprep.subr.bf16.mxu1 %v8199_v35 }
 0x637   :  { %1517 = vmatpush1.bf16.msra.mxu1 %v8202_v43 }
 0x638   :  { %1518 = vmatprep.subr.bf16.mxu1 %v7772_v17  ;;  %v10581_v17 = vld [vmem:[#allocation39_spill] sm:$0xff] }
 0x63b   :  { %1519 = vmatpush1.bf16.msra.mxu1 %v7777_v19  ;;  %v10582_v19 = vld [vmem:[#allocation40_spill] sm:$0xff] }
 0x63c   :  { %1520 = vmatprep.subr.bf16.mxu1 %v7782_v21  ;;  %v10583_v21 = vld [vmem:[#allocation41_spill] sm:$0xff] }
 0x63f   :  { %1521 = vmatpush1.bf16.msra.mxu1 %v7788_v23  ;;  %v10584_v23 = vld [vmem:[#allocation42_spill] sm:$0xff] }
 0x640   :  { %1522 = vmatprep.subr.bf16.mxu1 %v7794_v25  ;;  %v10585_v25 = vld [vmem:[#allocation43_spill] sm:$0xff] }
 0x643   :  { %1523 = vmatpush1.bf16.msra.mxu1 %v7800_v27  ;;  %v10586_v27 = vld [vmem:[#allocation44_spill] sm:$0xff] }
 0x644   :  { %1524 = vmatprep.subr.bf16.mxu1 %v7804_v29  ;;  %v10587_v29 = vld [vmem:[#allocation45_spill] sm:$0xff] }
 0x647   :  { %1525 = vmatpush1.bf16.msra.mxu1 %v10578_v0 }
 0x648   :  { %1641 = vmatprep.subr.bf16.mxu1 %v10579_v47 }
 0x64a   :  { %1543 = vmatmul.mubr.bf16.vlgmr.msra.gmra.mrb[12].mxu1 %v7942_v11  ;;  %v10589_v11 = vld [vmem:[#allocation47_spill] sm:$0xff] }
 0x64b   :  { %1642 = vmatpush1.bf16.msra.mxu1 %v10580_v59  ;;  %1673 = vmatprep.mubr.bf16.mxu1 %v10545_v57 }
 0x64c   :  { %1643 = vmatprep.subr.bf16.mxu1 %v10581_v17 }
 0x64f   :  { %1644 = vmatpush1.bf16.msra.mxu1 %v10582_v19 }
 0x650   :  { %1645 = vmatprep.subr.bf16.mxu1 %v10583_v21 }
 0x653   :  { %1646 = vmatpush1.bf16.msra.mxu1 %v10584_v23 }
 0x654   :  { %1647 = vmatprep.subr.bf16.mxu1 %v10585_v25 }
 0x657   :  { %1648 = vmatpush1.bf16.msra.mxu1 %v10586_v27 }
 0x658   :  { %1649 = vmatprep.subr.bf16.mxu1 %v10587_v29  ;;  %v10597_v29 = vld [vmem:[#allocation55_spill] sm:$0xff] }
 0x65b   :  { %1650 = vmatpush1.bf16.msra.mxu1 %v10588_v3 }
 0x65c   :  { %1651 = vmatprep.subr.bf16.mxu1 %v10589_v11 }
 0x65f   :  { %1652 = vmatpush1.bf16.msra.mxu1 %v10590_v9 }
 0x660   :  { %1653 = vmatprep.subr.bf16.mxu1 %v10591_v51 }
 0x663   :  { %1654 = vmatpush1.bf16.msra.mxu1 %v10592_v53 }
 0x664   :  { %1655 = vmatprep.subr.bf16.mxu1 %v10593_v63 }
 0x667   :  { %1656 = vmatpush1.bf16.msra.mxu1 %v10594_v31 }
 0x668   :  { %1724 = vmatprep.subr.bf16.mxu1 %v10595_v4 }
 0x6fd   :  { %v1479_v8 = vpop.f32.mrb[8].mxu1 }
 0x6fe   :  { %v8235_v10 = vadd.f32 %v8232_v6, %v1479_v8  ;;  %v5774_v12 = vpop.f32.mrb[9].mxu1 }
 0x6ff   :  { %v1482_v14 = vpop.f32.mrb[10].mxu1  ;;  %v10598_v12 = vld [vmem:[#allocation56_spill] sm:$0xff] }
 0x700   :  { %6491 = vtanh.f32 %v8235_v10  ;;  %v5775_v22 = vpop.f32.mrb[11].mxu1  ;;  %v10599_v14 = vld [vmem:[#allocation57_spill] sm:$0xff] }
 0x701   :  { %v10600_v22 = vld [vmem:[#allocation58_spill] sm:$0xff] }
 0x70a   :  { %v6492_v24 = vpop.eup %6491 }
 0x70b   :  { %1493 = vrot.lane.b32.xlu1 %v6492_v24, %s7440_s3  ;;  %v10601_v24 = vld [vmem:[#allocation59_spill] sm:$0xff] }
 0x71d   :  { %v1544_v26 = vpop.f32.mrb[12].mxu1 }
 0x71e   :  { %v1546_v28 = vpop.f32.mrb[13].mxu1 }
 0x71f   :  { %v1596_v30 = vcombine.low %v1544_v26, %v1546_v28  ;;  %v1548_v32 = vpop.f32.mrb[14].mxu1  ;;  %v10602_v26 = vld [vmem:[#allocation60_spill] sm:$0xff]  ;;  %v10603_v28 = vld [vmem:[#allocation61_spill] sm:$0xff] }
 0x720   :  { %v1549_v34 = vpop.f32.mrb[15].mxu1  ;;  %v10605_v32 = vld [vmem:[#allocation63_spill] sm:$0xff] }
 0x721   :  { %v1604_v40 = vrot.slane %v1596_v30, %v10596_v36  ;;  %v10604_v30 = vld [vmem:[#allocation62_spill] sm:$0xff]  ;;  %v10606_v34 = vld [vmem:[#allocation64_spill] sm:$0xff] }
 0x723   :  { %v1612_v50 = vcombine.low %v1604_v40, %v1611_v38  ;;  %v10607_v38 = vld [vmem:[#allocation65_spill] sm:$0xff]  ;;  %v10608_v40 = vld [vmem:[#allocation66_spill] sm:$0xff] }
 0x725   :  { %v1614_v52 = vadd.f32 %v1612_v50, %v1509_v48  ;;  %v10609_v48 = vld [vmem:[#allocation67_spill] sm:$0xff]  ;;  %v10610_v50 = vld [vmem:[#allocation68_spill] sm:$0xff] }
 0x727   :  { %v1615_v54 = vmul.f32 0.5, %v1614_v52  ;;  %v1620_v0 = vrot.slane %v1614_v52, 2  ;;  %v1626_v59 = vrot.slane %v1614_v52, 4  ;;  %v1629_v17 = vrot.slane %v1614_v52, 6  ;;  %v10611_v52 = vld [vmem:[#allocation69_spill] sm:$0xff] }
 0x729   :  { %6493 = vtanh.f32 %v1615_v54  ;;  %v1622_v47 = vmul.f32 0.5, %v1620_v0  ;;  %v1631_v19 = vmul.f32 0.5, %v1629_v17  ;;  %v10612_v54 = vld [vmem:[#allocation70_spill] sm:$0xff]  ;;  %v10613_v0 = vld [vmem:[#allocation71_spill] sm:$0xff] }
 0x72a   :  { %v10616_v17 = vld [vmem:[#allocation74_spill] sm:$0xff] }
 0x72b   :  { %6495 = vtanh.f32 %v1622_v47  ;;  %v10614_v47 = vld [vmem:[#allocation72_spill] sm:$0xff] }
 0x72c   :  { %6497 = vtanh.f32 %v1626_v59  ;;  %v10615_v59 = vld [vmem:[#allocation73_spill] sm:$0xff] }
 0x72d   :  { %6499 = vtanh.f32 %v1631_v19  ;;  %v10617_v19 = vld [vmem:[#allocation75_spill] sm:$0xff] }
 0x733   :  { %v6494_v21 = vpop.eup %6493 }
 0x734   :  { %v1617_v23 = vmul.f32 0.5, %v6494_v21  ;;  %v10618_v21 = vld [vmem:[#allocation76_spill] sm:$0xff] }
 0x735   :  { %v6496_v25 = vpop.eup %6495 }
 0x736   :  { %v1618_v27 = vadd.f32 0.5, %v1617_v23  ;;  %v1624_v16 = vmul.f32 0.5, %v6496_v25  ;;  %v6498_v20 = vpop.eup %6497  ;;  %v10619_v23 = vld [vmem:[#allocation77_spill] sm:$0xff]  ;;  %v10620_v25 = vld [vmem:[#allocation78_spill] sm:$0xff] }
 0x737   :  { %v6500_v51 = vpop.eup %6499 }
 0x738   :  { %v1625_v18 = vadd.f32 0.5, %v1624_v16  ;;  %v1636_v11 = vmul.f32 %v6498_v20, %v1618_v27  ;;  %v1633_v53 = vmul.f32 0.5, %v6500_v51  ;;  %v10621_v27 = vld [vmem:[#allocation79_spill] sm:$0xff]  ;;  %v10622_v16 = vld [vmem:[#allocation80_spill] sm:$0xff]  ;;  %v1486_v20 = vmul.f32 0.5, %v8235_v10  ;;  %v10627_v51 = vld [vmem:[#allocation85_spill] sm:$0xff] }
 0x73a   :  { %v1635_v3 = vmul.f32 %v1625_v18, %v10597_v29  ;;  %v1634_v63 = vadd.f32 0.5, %v1633_v53  ;;  %v10623_v18 = vld [vmem:[#allocation81_spill] sm:$0xff]  ;;  %v10624_v29 = vld [vmem:[#allocation82_spill] sm:$0xff]  ;;  %v1723_v53 = vpack.c.bf16 %v8093_v45, %v8093_v45  ;;  %v10629_v45 = vld [vmem:[#allocation87_spill] sm:$0xff] }
 0x73c   :  { %v8245_v9 = vadd.f32 %v1636_v11, %v1635_v3  ;;  %v10625_v3 = vld [vmem:[#allocation83_spill] sm:$0xff]  ;;  %v10626_v11 = vld [vmem:[#allocation84_spill] sm:$0xff] }
 0x73e   :  { %6501 = vtanh.f32 %v8245_v9 }
 0x73f   :  { %6503 = vtanh.f32 %v1486_v20 }
 0x748   :  { %v6502_v31 = vpop.eup %6501 }
 0x749   :  { %v1639_v4 = vmul.f32 %v6502_v31, %v1634_v63  ;;  %v10628_v63 = vld [vmem:[#allocation86_spill] sm:$0xff]  ;;  %v6504_v10 = vpop.eup %6503  ;;  %v10630_v31 = vld [vmem:[#allocation88_spill] sm:$0xff] }
 0x74b   :  { %v8248_v8 = vpack.c.bf16 %v1639_v4, %v1639_v4  ;;  %v1488_v4 = vmul.f32 0.5, %v6504_v10 }
 0x74d   :  { %1674 = vmatmul.mubr.bf16.vlgmr.msra.gmra.mrb[16].mxu1 %v8248_v8  ;;  %1715 = vmatmul.mubr.bf16.vlgmr.msra.gmra.mrb[16].mxu0 %v8248_v8 }
 0x74e   :  { %1725 = vmatpush1.bf16.msra.mxu1 %v10598_v12  ;;  %1766 = vmatpush1.bf16.msra.mxu0 %v10599_v14  ;;  %v10631_v12 = vld [vmem:[#allocation89_spill] sm:$0xff]  ;;  %v8305_v14 = vadd.f32 0.5, %v1488_v4 }
 0x74f   :  { %1726 = vmatprep.subr.bf16.mxu1 %v10600_v22  ;;  %1767 = vmatprep.subr.bf16.mxu0 %v10601_v24 }
 0x750   :  { %1756 = vmatprep.mubr.bf16.mxu1 %v10545_v57  ;;  %1797 = vmatprep.mubr.bf16.mxu0 %v10545_v57 }
 0x752   :  { %1727 = vmatpush1.bf16.msra.mxu1 %v10602_v26  ;;  %1768 = vmatpush1.bf16.msra.mxu0 %v10603_v28  ;;  %v10632_v26 = vld [vmem:[#allocation90_spill] sm:$0xff]  ;;  %v10633_v28 = vld [vmem:[#allocation91_spill] sm:$0xff] }
 0x753   :  { %1728 = vmatprep.subr.bf16.mxu1 %v10604_v30  ;;  %1769 = vmatprep.subr.bf16.mxu0 %v10605_v32  ;;  %v10634_v30 = vld [vmem:[#allocation92_spill] sm:$0xff]  ;;  %v10635_v32 = vld [vmem:[#allocation93_spill] sm:$0xff] }
 0x756   :  { %1729 = vmatpush1.bf16.msra.mxu1 %v10606_v34  ;;  %1770 = vmatpush1.bf16.msra.mxu0 %v10607_v38  ;;  %v1491_v34 = vmul.f32 0.0, %v8305_v14 }
 0x757   :  { %1730 = vmatprep.subr.bf16.mxu1 %v10608_v40  ;;  %1771 = vmatprep.subr.bf16.mxu0 %v10609_v48 }
 0x75a   :  { %1731 = vmatpush1.bf16.msra.mxu1 %v10610_v50  ;;  %1772 = vmatpush1.bf16.msra.mxu0 %v10611_v52 }
 0x75b   :  { %1732 = vmatprep.subr.bf16.mxu1 %v10612_v54  ;;  %1773 = vmatprep.subr.bf16.mxu0 %v10613_v0  ;;  %v10636_v54 = vld [vmem:[#allocation94_spill] sm:$0xff] }
 0x75e   :  { %1733 = vmatpush1.bf16.msra.mxu1 %v10614_v47  ;;  %1774 = vmatpush1.bf16.msra.mxu0 %v10615_v59 }
 0x75f   :  { %1734 = vmatprep.subr.bf16.mxu1 %v10616_v17  ;;  %1775 = vmatprep.subr.bf16.mxu0 %v10617_v19 }
 0x762   :  { %1735 = vmatpush1.bf16.msra.mxu1 %v10618_v21  ;;  %1776 = vmatpush1.bf16.msra.mxu0 %v10619_v23 }
 0x763   :  { %1736 = vmatprep.subr.bf16.mxu1 %v10620_v25  ;;  %1777 = vmatprep.subr.bf16.mxu0 %v10621_v27 }
 0x766   :  { %1737 = vmatpush1.bf16.msra.mxu1 %v10622_v16  ;;  %1778 = vmatpush1.bf16.msra.mxu0 %v10623_v18 }
 0x767   :  { %1738 = vmatprep.subr.bf16.mxu1 %v10624_v29  ;;  %1779 = vmatprep.subr.bf16.mxu0 %v10625_v3 }
 0x76a   :  { %1739 = vmatpush1.bf16.msra.mxu1 %v10626_v11  ;;  %1780 = vmatpush1.bf16.msra.mxu0 %v10627_v51 }
 0x76b   :  { %5776 = vmatprep.subr.bf16.mxu1 %v10577_v13  ;;  %5804 = vmatprep.subr.bf16.mxu0 %v10577_v13 }
 0x76d   :  { %1757 = vmatmul.mubr.bf16.vlgmr.msra.gmra.mrb[16].mxu1 %v1723_v53  ;;  %1798 = vmatmul.mubr.bf16.vlgmr.msra.gmra.mrb[16].mxu0 %v1723_v53 }
 0x76e   :  { %5777 = vmatpush3.bf16.msra.mxu1 %v10628_v63  ;;  %5792 = vmatprep.mubr.msk.bf16.mxu1 %vm7460_vm0, %v10577_v13 }
 0x76f   :  { %5778 = vmatprep.subr.bf16.mxu1 %v10577_v13  ;;  %5805 = vmatpush3.bf16.msra.mxu0 %v8156_v44 }
 0x770   :  { %5806 = vmatprep.subr.bf16.mxu0 %v10577_v13  ;;  %5808 = vmatprep.mubr.msk.bf16.mxu0 %vm7460_vm0, %v10577_v13 }
 0x772   :  { %5779 = vmatpush3.bf16.msra.mxu1 %v10629_v45 }
 0x773   :  { %5780 = vmatprep.subr.bf16.mxu1 %v10577_v13  ;;  %5807 = vmatpush3.bf16.msra.mxu0 %v8159_v46 }
 0x774   :  { %5812 = vmatprep.subr.bf16.mxu0 %v10577_v13 }
 0x776   :  { %5781 = vmatpush3.bf16.msra.mxu1 %v10630_v31 }
 0x777   :  { %5782 = vmatprep.subr.bf16.mxu1 %v10577_v13 }
 0x77a   :  { %5783 = vmatpush3.bf16.msra.mxu1 %v10631_v12 }
 0x77b   :  { %5784 = vmatprep.subr.bf16.mxu1 %v10577_v13 }
 0x77d   :  { %v1494_v22 = vpop.permute.xlu1 %1493 }
 0x77e   :  { %v1496_v24 = vmul.f32 %v1494_v22, %v8305_v14  ;;  %5785 = vmatpush3.bf16.msra.mxu1 %v10632_v26  ;;  %v1829_v26 = vld [vmem:[#allocation20 + $0x1] sm:$0x1] }
 0x77f   :  { %5786 = vmatprep.subr.bf16.mxu1 %v10577_v13 }
 0x780   :  { %1498 = vrot.lane.b32.xlu1 %v1496_v24, %s7461_s14 }
 0x782   :  { %5787 = vmatpush3.bf16.msra.mxu1 %v10633_v28 }
 0x783   :  { %5788 = vmatprep.subr.bf16.mxu1 %v10577_v13 }
 0x786   :  { %5789 = vmatpush3.bf16.msra.mxu1 %v10634_v30  ;;  %v1830_v30 = vunpack.c.l.bf16 %v1829_v26  ;;  %v8429_v26 = vld [vmem:[#allocation7 + $0xcc] ss:$16 sps:$4 sm:$0xff]  }
 0x787   :  { %5790 = vmatprep.subr.bf16.mxu1 %v10577_v13  ;;  %10643 = vst [vmem:[#allocation42_spill] sm:$0xff] %v8429_v26 }
 0x78a   :  { %5791 = vmatpush3.bf16.msra.mxu1 %v10635_v32 }
 0x78b   :  { %5796 = vmatprep.subr.bf16.mxu1 %v10577_v13 }
 0x7f2   :  { %v1499_v38 = vpop.permute.xlu1 %1498 }
 0x7f3   :  { %v8318_v40 = vadd.f32 %v1499_v38, %v1491_v34 }
 0x7f5   :  { %6505 = vtanh.f32 %v8318_v40 }
 0x7ff   :  { %v6506_v48 = vpop.eup %6505 }
 0x800   :  { %1504 = vrot.lane.b32.xlu1 %v6506_v48, %s7440_s3 }
 0x840   :  { %v1758_v50 = vpop.f32.mrb[16].mxu1  ;;  %v1799_v52 = vpop.f32.mrb[16].mxu0 }
 0x841   :  { %v6107_v0 = vadd.f32 %v1758_v50, %v10636_v54  ;;  %v1760_v47 = vpop.f32.mrb[17].mxu1  ;;  %v1801_v59 = vpop.f32.mrb[17].mxu0  ;;  %v6109_v18 = vadd.f32 %v1799_v52, %v8082_v49 }
 0x842   :  { %v6108_v17 = vadd.f32 %v1760_v47, %v8079_v41  ;;  %v1762_v19 = vpop.f32.mrb[18].mxu1  ;;  %v1803_v21 = vpop.f32.mrb[18].mxu0  ;;  %v6110_v20 = vadd.f32 %v1801_v59, %v8087_v33  ;;  %v8344_v47 = vld [vmem:[#allocation5 + $0x8] ss:$16 sps:$4 sm:$0xff]   ;;  %v8361_v59 = vld [vmem:[#allocation5 + $0x6c] ss:$16 sps:$4 sm:$0xff]  }
 0x843   :  { %v1810_v23 = vmul.f32 0.5, %v6107_v0  ;;  %v1763_v25 = vpop.f32.mrb[19].mxu1  ;;  %v1804_v27 = vpop.f32.mrb[19].mxu0  ;;  %v8367_v19 = vld [vmem:[#allocation5 + $0x8c] ss:$16 sps:$4 sm:$0xff]  }
 0x844   :  { %v1814_v16 = vmul.f32 0.5, %v6108_v17  ;;  %v1819_v29 = vmul.f32 0.5, %v6110_v20  ;;  %v8364_v17 = vld [vmem:[#allocation5 + $0x68] ss:$16 sps:$4 sm:$0xff]   ;;  %v8379_v27 = vld [vmem:[#allocation5 + $0xcc] ss:$16 sps:$4 sm:$0xff]  }
 0x845   :  { %6507 = vtanh.f32 %v1810_v23  ;;  %v8370_v21 = vld [vmem:[#allocation5 + $0x88] ss:$16 sps:$4 sm:$0xff]   ;;  %v8373_v23 = vld [vmem:[#allocation5 + $0xac] ss:$16 sps:$4 sm:$0xff]  }
 0x846   :  { %6509 = vtanh.f32 %v1814_v16  ;;  %v8376_v25 = vld [vmem:[#allocation5 + $0xa8] ss:$16 sps:$4 sm:$0xff]  }
 0x847   :  { %6511 = vtanh.f32 %v6109_v18  ;;  %v8382_v16 = vld [vmem:[#allocation5 + $0xc8] ss:$16 sps:$4 sm:$0xff]   ;;  %v8385_v18 = vld [vmem:[#allocation5 + $0xec] ss:$16 sps:$4 sm:$0xff]  }
 0x848   :  { %6513 = vtanh.f32 %v1819_v29  ;;  %v8388_v20 = vld [vmem:[#allocation5 + $0xe8] ss:$16 sps:$4 sm:$0xff]   ;;  %v8391_v29 = vld [vmem:[#allocation7 + $0xc] ss:$16 sps:$4 sm:$0xff]  }
 0x84f   :  { %v6508_v3 = vpop.eup %6507 }
 0x850   :  { %v6510_v11 = vpop.eup %6509  ;;  %v1812_v51 = vmul.f32 0.5, %v6508_v3  ;;  %v8395_v3 = vld [vmem:[#allocation7 + $0x8] ss:$16 sps:$4 sm:$0xff]  }
 0x851   :  { %v1816_v53 = vmul.f32 0.5, %v6510_v11  ;;  %v6512_v45 = vpop.eup %6511  ;;  %v8399_v11 = vld [vmem:[#allocation7 + $0x2c] ss:$16 sps:$4 sm:$0xff]  }
 0x852   :  { %v1813_v63 = vadd.f32 0.5, %v1812_v51  ;;  %v6514_v22 = vpop.eup %6513  ;;  %v8402_v51 = vld [vmem:[#allocation7 + $0x28] ss:$16 sps:$4 sm:$0xff]  }
 0x853   :  { %v1817_v10 = vadd.f32 0.5, %v1816_v53  ;;  %v1821_v24 = vmul.f32 0.5, %v6514_v22  ;;  %v8405_v53 = vld [vmem:[#allocation7 + $0x4c] ss:$16 sps:$4 sm:$0xff]  }
 0x854   :  { %v1824_v31 = vmul.f32 %v6512_v45, %v1813_v63  ;;  %v8408_v63 = vld [vmem:[#allocation7 + $0x48] ss:$16 sps:$4 sm:$0xff]   ;;  %v8411_v45 = vld [vmem:[#allocation7 + $0x6c] ss:$16 sps:$4 sm:$0xff]  }
 0x855   :  { %v1823_v4 = vmul.f32 %v1817_v10, %v8090_v55  ;;  %v1822_v28 = vadd.f32 0.5, %v1821_v24  ;;  %v8338_v55 = vld [vmem:[#allocation5 + $0xc] ss:$16 sps:$4 sm:$0xff]   ;;  %10637 = vst [vmem:[#allocation36_spill] sm:$0xff] %v8411_v45  ;;  %v8414_v10 = vld [vmem:[#allocation7 + $0x68] ss:$16 sps:$4 sm:$0xff]  }
 0x856   :  { %10638 = vst [vmem:[#allocation37_spill] sm:$0xff] %v8414_v10  ;;  %v8423_v22 = vld [vmem:[#allocation7 + $0xac] ss:$16 sps:$4 sm:$0xff]   ;;  %v8426_v24 = vld [vmem:[#allocation7 + $0xa8] ss:$16 sps:$4 sm:$0xff]  }
 0x857   :  { %v8327_v12 = vadd.f32 %v1824_v31, %v1823_v4  ;;  %v8417_v31 = vld [vmem:[#allocation7 + $0x8c] ss:$16 sps:$4 sm:$0xff]   ;;  %v8420_v4 = vld [vmem:[#allocation7 + $0x88] ss:$16 sps:$4 sm:$0xff]   ;;  %10641 = vst [vmem:[#allocation40_spill] sm:$0xff] %v8423_v22  ;;  %10642 = vst [vmem:[#allocation41_spill] sm:$0xff] %v8426_v24 }
 0x858   :  { %10639 = vst [vmem:[#allocation38_spill] sm:$0xff] %v8417_v31  ;;  %10640 = vst [vmem:[#allocation39_spill] sm:$0xff] %v8420_v4 }
 0x859   :  { %6515 = vtanh.f32 %v8327_v12 }
 0x863   :  { %v6516_v32 = vpop.eup %6515 }
 0x864   :  { %v8330_v34 = vmul.f32 %v6516_v32, %v1822_v28  ;;  %v8432_v28 = vld [vmem:[#allocation7 + $0xc8] ss:$16 sps:$4 sm:$0xff]  }
 0x865   :  { %10644 = vst [vmem:[#allocation43_spill] sm:$0xff] %v8432_v28  ;;  %v8438_v32 = vld [vmem:[#allocation7 + $0xe8] ss:$16 sps:$4 sm:$0xff]  }
 0x866   :  { %v1831_v38 = vmul.f32 %v1830_v30, %v8330_v34  ;;  %v8435_v30 = vld [vmem:[#allocation7 + $0xec] ss:$16 sps:$4 sm:$0xff]   ;;  %10646 = vst [vmem:[#allocation45_spill] sm:$0xff] %v8438_v32 }
 0x867   :  { %10645 = vst [vmem:[#allocation44_spill] sm:$0xff] %v8435_v30 }
 0x868   :  { %v1832_v48 = vpack.c.bf16 %v1831_v38, %v1831_v38  ;;  %v8441_v38 = vld [vmem:[#allocation8 + $0xc] ss:$16 sps:$4 sm:$0xff]  }
 0x869   :  { %10647 = vst [vmem:[#allocation46_spill] sm:$0xff] %v8441_v38 }
 0x86a   :  { %5793 = vmatmul.mubr.bf16.vlgmr.msra.gmra.mrb[20].mxu1 %v1832_v48 }
 0x86b   :  { %5797 = vmatpush3.bf16.msra.mxu1 %v8096_v39  ;;  %5800 = vmatprep.mubr.msk.bf16.mxu1 %vm7460_vm0, %v10577_v13  ;;  %v8348_v39 = vld [vmem:[#allocation5 + $0x2c] ss:$16 sps:$4 sm:$0xff]  }
 0x86c   :  { %5798 = vmatprep.subr.bf16.mxu1 %v10577_v13 }
 0x86f   :  { %5799 = vmatpush3.bf16.msra.mxu1 %v8099_v37  ;;  %v8352_v37 = vld [vmem:[#allocation5 + $0x28] ss:$16 sps:$4 sm:$0xff]  }
 0x870   :  { %2096 = vmatprep.subr.bf16.mxu1 %v8338_v55 }
 0x872   :  { %v1505_v50 = vpop.permute.xlu1 %1504 }
 0x873   :  { %v1507_v52 = vmul.f32 %v1505_v50, %v8305_v14  ;;  %v8355_v14 = vld [vmem:[#allocation5 + $0x4c] ss:$16 sps:$4 sm:$0xff]  }
 0x875   :  { %v1983_v0 = vpack.c.bf16 %v1507_v52, %v1507_v52 }
 0x876   :  { %5801 = vmatmul.mubr.msk.bf16.vlgmr.msra.gmra.mrb[20].mxu1 %vm1299_vm1, %v8168_v58  ;;  %v8358_v58 = vld [vmem:[#allocation5 + $0x48] ss:$16 sps:$4 sm:$0xff]  }
 0x877   :  { %2097 = vmatpush1.bf16.msra.mxu1 %v8344_v47  ;;  %1985 = vrot.lane.b32.xlu1 %v1983_v0, %s7461_s14 }
 0x878   :  { %2098 = vmatprep.subr.bf16.mxu1 %v8348_v39  ;;  %2128 = vmatprep.mubr.bf16.mxu1 %v10545_v57 }
 0x87b   :  { %2099 = vmatpush1.bf16.msra.mxu1 %v8352_v37 }
 0x87c   :  { %2100 = vmatprep.subr.bf16.mxu1 %v8355_v14 }
 0x87f   :  { %2101 = vmatpush1.bf16.msra.mxu1 %v8358_v58 }
 0x880   :  { %2102 = vmatprep.subr.bf16.mxu1 %v8361_v59 }
 0x883   :  { %2103 = vmatpush1.bf16.msra.mxu1 %v8364_v17 }
 0x884   :  { %2104 = vmatprep.subr.bf16.mxu1 %v8367_v19 }
 0x887   :  { %2105 = vmatpush1.bf16.msra.mxu1 %v8370_v21 }
 0x888   :  { %2106 = vmatprep.subr.bf16.mxu1 %v8373_v23 }
 0x88b   :  { %2107 = vmatpush1.bf16.msra.mxu1 %v8376_v25 }
 0x88c   :  { %2108 = vmatprep.subr.bf16.mxu1 %v8379_v27 }
 0x88f   :  { %2109 = vmatpush1.bf16.msra.mxu1 %v8382_v16 }
 0x890   :  { %2110 = vmatprep.subr.bf16.mxu1 %v8385_v18 }
 0x893   :  { %2111 = vmatpush1.bf16.msra.mxu1 %v8388_v20 }
 0x894   :  { %2227 = vmatprep.subr.bf16.mxu1 %v8391_v29 }
 0x896   :  { %2129 = vmatmul.mubr.bf16.vlgmr.msra.gmra.mrb[24].mxu1 %v8248_v8 }
 0x897   :  { %2228 = vmatpush1.bf16.msra.mxu1 %v8395_v3  ;;  %2259 = vmatprep.mubr.bf16.mxu1 %v10545_v57 }
 0x898   :  { %2229 = vmatprep.subr.bf16.mxu1 %v8399_v11 }
 0x89b   :  { %2230 = vmatpush1.bf16.msra.mxu1 %v8402_v51 }
 0x89c   :  { %2231 = vmatprep.subr.bf16.mxu1 %v8405_v53 }
 0x89f   :  { %2232 = vmatpush1.bf16.msra.mxu1 %v8408_v63 }
 0x8a0   :  { %2233 = vmatprep.subr.bf16.mxu1 %v8411_v45 }
 0x8a3   :  { %2234 = vmatpush1.bf16.msra.mxu1 %v8414_v10 }
 0x8a4   :  { %2235 = vmatprep.subr.bf16.mxu1 %v8417_v31 }
 0x8a7   :  { %2236 = vmatpush1.bf16.msra.mxu1 %v8420_v4 }
 0x8a8   :  { %2237 = vmatprep.subr.bf16.mxu1 %v8423_v22 }
 0x8ab   :  { %2238 = vmatpush1.bf16.msra.mxu1 %v8426_v24 }
 0x8ac   :  { %2239 = vmatprep.subr.bf16.mxu1 %v8429_v26 }
 0x8af   :  { %2240 = vmatpush1.bf16.msra.mxu1 %v8432_v28 }
 0x8b0   :  { %2241 = vmatprep.subr.bf16.mxu1 %v8435_v30 }
 0x8b3   :  { %2242 = vmatpush1.bf16.msra.mxu1 %v8438_v32  ;;  %v8549_v32 = vld [vmem:[#allocation7 + $0xe0] ss:$16 sps:$4 sm:$0xff]  }
 0x8b4   :  { %2310 = vmatprep.subr.bf16.mxu1 %v8441_v38  ;;  %10664 = vst [vmem:[#allocation63_spill] sm:$0xff] %v8549_v32 }
 0x949   :  { %v1907_v48 = vpop.f32.mrb[20].mxu1 }
 0x94a   :  { %v6111_v50 = vadd.f32 %v8142_v2, %v1907_v48  ;;  %v5802_v52 = vpop.f32.mrb[21].mxu1 }
 0x94b   :  { %v1910_v0 = vpop.f32.mrb[22].mxu1 }
 0x94c   :  { %6517 = vtanh.f32 %v6111_v50  ;;  %v5803_v26 = vpop.f32.mrb[23].mxu1  ;;  %v1914_v38 = vmul.f32 0.5, %v6111_v50  ;;  %v8513_v50 = vld [vmem:[#allocation7 + $0x20] ss:$16 sps:$4 sm:$0xff]  }
 0x94d   :  { %10652 = vst [vmem:[#allocation51_spill] sm:$0xff] %v8513_v50 }
 0x94e   :  { %6519 = vtanh.f32 %v1914_v38 }
 0x956   :  { %v6518_v28 = vpop.eup %6517 }
 0x957   :  { %1921 = vrot.lane.b32.xlu0 %v6518_v28, %s7440_s3 }
 0x958   :  { %v6520_v31 = vpop.eup %6519 }
 0x959   :  { %v1916_v2 = vmul.f32 0.5, %v6520_v31 }
 0x95b   :  { %v1917_v48 = vadd.f32 0.5, %v1916_v2  ;;  %v8516_v2 = vld [vmem:[#allocation7 + $0x44] ss:$16 sps:$4 sm:$0xff]  }
 0x95c   :  { %10653 = vst [vmem:[#allocation52_spill] sm:$0xff] %v8516_v2 }
 0x95d   :  { %v1919_v26 = vmul.f32 %v1917_v48, %v8153_v42  ;;  %v1986_v42 = vpop.permute.xlu1 %1985 }
 0x969   :  { %v8446_v24 = vpop.f32.mrb[24].mxu1 }
 0x96a   :  { %v8448_v30 = vpop.f32.mrb[25].mxu1 }
 0x96b   :  { %v2134_v22 = vpop.f32.mrb[26].mxu1 }
 0x96c   :  { %v2135_v4 = vpop.f32.mrb[27].mxu1 }
 0x9c9   :  { %v1922_v52 = vpop.permute.xlu0 %1921 }
 0x9ca   :  { %v1924_v0 = vmul.f32 %v1922_v52, %v1917_v48  ;;  %v8525_v52 = vld [vmem:[#allocation7 + $0x60] ss:$16 sps:$4 sm:$0xff]  }
 0x9cb   :  { %10656 = vst [vmem:[#allocation55_spill] sm:$0xff] %v8525_v52 }
 0x9cc   :  { %1926 = vrot.lane.b32.xlu0 %v1924_v0, %s7461_s14  ;;  %v8528_v0 = vld [vmem:[#allocation7 + $0x84] ss:$16 sps:$4 sm:$0xff]  }
 0x9cd   :  { %10657 = vst [vmem:[#allocation56_spill] sm:$0xff] %v8528_v0 }
 0xa3e   :  { %v1927_v28 = vpop.permute.xlu0 %1926 }
 0xa3f   :  { %v8454_v10 = vadd.f32 %v1927_v28, %v1919_v26  ;;  %v8531_v26 = vld [vmem:[#allocation7 + $0x80] ss:$16 sps:$4 sm:$0xff]   ;;  %v8534_v28 = vld [vmem:[#allocation7 + $0xa4] ss:$16 sps:$4 sm:$0xff]  }
 0xa40   :  { %10658 = vst [vmem:[#allocation57_spill] sm:$0xff] %v8531_v26  ;;  %10659 = vst [vmem:[#allocation58_spill] sm:$0xff] %v8534_v28 }
 0xa41   :  { %6521 = vtanh.f32 %v8454_v10 }
 0xa4b   :  { %v6522_v45 = vpop.eup %6521 }
 0xa4c   :  { %1932 = vrot.lane.b32.xlu0 %v6522_v45, %s7440_s3  ;;  %v8510_v45 = vld [vmem:[#allocation7 + $0x24] ss:$16 sps:$4 sm:$0xff]  }
 0xa4d   :  { %10651 = vst [vmem:[#allocation50_spill] sm:$0xff] %v8510_v45 }
 0xabe   :  { %v1933_v4 = vpop.permute.xlu0 %1932 }
 0xabf   :  { %v1935_v22 = vmul.f32 %v1933_v4, %v1917_v48  ;;  %v8519_v48 = vld [vmem:[#allocation7 + $0x40] ss:$16 sps:$4 sm:$0xff]  }
 0xac0   :  { %10654 = vst [vmem:[#allocation53_spill] sm:$0xff] %v8519_v48  ;;  %v8537_v4 = vld [vmem:[#allocation7 + $0xa0] ss:$16 sps:$4 sm:$0xff]  }
 0xac1   :  { %v1936_v38 = vpack.c.bf16 %v1935_v22, %v1935_v22  ;;  %10660 = vst [vmem:[#allocation59_spill] sm:$0xff] %v8537_v4  ;;  %v8540_v22 = vld [vmem:[#allocation7 + $0xc4] ss:$16 sps:$4 sm:$0xff]  }
 0xac2   :  { %10661 = vst [vmem:[#allocation60_spill] sm:$0xff] %v8540_v22 }
 0xac3   :  { %1938 = vrot.lane.b32.xlu0 %v1936_v38, %s7461_s14  ;;  %v8543_v38 = vld [vmem:[#allocation7 + $0xc0] ss:$16 sps:$4 sm:$0xff]  }
 0xac4   :  { %10662 = vst [vmem:[#allocation61_spill] sm:$0xff] %v8543_v38 }
 0xb35   :  { %v8459_v31 = vpop.permute.xlu0 %1938 }
 0xb36   :  { %5809 = vmatmul.mubr.msk.bf16.vlgmr.msra.gmra.mrb[20].mxu0 %vm1299_vm1, %v8459_v31 }
 0xb37   :  { %5813 = vmatpush3.bf16.msra.mxu0 %v8166_v56  ;;  %5816 = vmatprep.mubr.msk.bf16.mxu0 %vm7460_vm0, %v10577_v13  ;;  %v8478_v56 = vld [vmem:[#allocation5 + $0x84] ss:$16 sps:$4 sm:$0xff]  }
 0xb38   :  { %5814 = vmatprep.subr.bf16.mxu0 %v10577_v13 }
 0xb3b   :  { %5815 = vmatpush3.bf16.msra.mxu0 %v8173_v60  ;;  %v8481_v60 = vld [vmem:[#allocation5 + $0x80] ss:$16 sps:$4 sm:$0xff]  }
 0xb3c   :  { %2055 = vmatprep.subr.bf16.mxu0 %v8179_v62  ;;  %v8484_v62 = vld [vmem:[#allocation5 + $0xa4] ss:$16 sps:$4 sm:$0xff]  }
 0xb42   :  { %5817 = vmatmul.mubr.msk.bf16.vlgmr.msra.gmra.mrb[20].mxu0 %vm1299_vm1, %v1986_v42  ;;  %v8546_v42 = vld [vmem:[#allocation7 + $0xe4] ss:$16 sps:$4 sm:$0xff]  }
 0xb43   :  { %2056 = vmatpush1.bf16.msra.mxu0 %v8183_v1  ;;  %2087 = vmatprep.mubr.bf16.mxu0 %v10545_v57  ;;  %v8487_v1 = vld [vmem:[#allocation5 + $0xa0] ss:$16 sps:$4 sm:$0xff]   ;;  %10663 = vst [vmem:[#allocation62_spill] sm:$0xff] %v8546_v42 }
 0xb44   :  { %2057 = vmatprep.subr.bf16.mxu0 %v8187_v5  ;;  %v8490_v5 = vld [vmem:[#allocation5 + $0xc4] ss:$16 sps:$4 sm:$0xff]  }
 0xb47   :  { %2058 = vmatpush1.bf16.msra.mxu0 %v8190_v61  ;;  %v8493_v61 = vld [vmem:[#allocation5 + $0xc0] ss:$16 sps:$4 sm:$0xff]  }
 0xb48   :  { %2059 = vmatprep.subr.bf16.mxu0 %v8193_v7  ;;  %v8496_v7 = vld [vmem:[#allocation5 + $0xe4] ss:$16 sps:$4 sm:$0xff]  }
 0xb4b   :  { %2060 = vmatpush1.bf16.msra.mxu0 %v8196_v15  ;;  %v8499_v15 = vld [vmem:[#allocation5 + $0xe0] ss:$16 sps:$4 sm:$0xff]  }
 0xb4c   :  { %2061 = vmatprep.subr.bf16.mxu0 %v8199_v35  ;;  %10648 = vst [vmem:[#allocation47_spill] sm:$0xff] %v8499_v15  ;;  %v8502_v35 = vld [vmem:[#allocation7 + $0x4] ss:$16 sps:$4 sm:$0xff]  }
 0xb4d   :  { %10649 = vst [vmem:[#allocation48_spill] sm:$0xff] %v8502_v35 }
 0xb4f   :  { %2062 = vmatpush1.bf16.msra.mxu0 %v8202_v43  ;;  %v8506_v43 = vld [vmem:[#allocation7] ss:$16 sps:$4 sm:$0xff]  }
 0xb50   :  { %2063 = vmatprep.subr.bf16.mxu0 %v8478_v56  ;;  %10650 = vst [vmem:[#allocation49_spill] sm:$0xff] %v8506_v43 }
 0xb53   :  { %2064 = vmatpush1.bf16.msra.mxu0 %v8481_v60 }
 0xb54   :  { %2065 = vmatprep.subr.bf16.mxu0 %v8484_v62 }
 0xb57   :  { %2066 = vmatpush1.bf16.msra.mxu0 %v8487_v1 }
 0xb58   :  { %2067 = vmatprep.subr.bf16.mxu0 %v8490_v5 }
 0xb5b   :  { %2068 = vmatpush1.bf16.msra.mxu0 %v8493_v61 }
 0xb5c   :  { %2069 = vmatprep.subr.bf16.mxu0 %v8496_v7 }
 0xb5f   :  { %2070 = vmatpush1.bf16.msra.mxu0 %v8499_v15 }
 0xb60   :  { %2186 = vmatprep.subr.bf16.mxu0 %v8502_v35 }
 0xb62   :  { %2088 = vmatmul.mubr.bf16.vlgmr.msra.gmra.mrb[24].mxu0 %v8248_v8  ;;  %v8522_v8 = vld [vmem:[#allocation7 + $0x64] ss:$16 sps:$4 sm:$0xff]  }
 0xb63   :  { %2187 = vmatpush1.bf16.msra.mxu0 %v8506_v43  ;;  %2218 = vmatprep.mubr.bf16.mxu0 %v10545_v57  ;;  %10655 = vst [vmem:[#allocation54_spill] sm:$0xff] %v8522_v8 }
 0xb64   :  { %2188 = vmatprep.subr.bf16.mxu0 %v8510_v45 }
 0xb67   :  { %2189 = vmatpush1.bf16.msra.mxu0 %v8513_v50 }
 0xb68   :  { %2190 = vmatprep.subr.bf16.mxu0 %v8516_v2 }
 0xb6b   :  { %2191 = vmatpush1.bf16.msra.mxu0 %v8519_v48 }
 0xb6c   :  { %2192 = vmatprep.subr.bf16.mxu0 %v8522_v8 }
 0xb6f   :  { %2193 = vmatpush1.bf16.msra.mxu0 %v8525_v52 }
 0xb70   :  { %2194 = vmatprep.subr.bf16.mxu0 %v8528_v0 }
 0xb73   :  { %2195 = vmatpush1.bf16.msra.mxu0 %v8531_v26 }
 0xb74   :  { %2196 = vmatprep.subr.bf16.mxu0 %v8534_v28  ;;  %v8552_v28 = vld [vmem:[#allocation8 + $0x4] ss:$16 sps:$4 sm:$0xff]  }
 0xb75   :  { %10665 = vst [vmem:[#allocation64_spill] sm:$0xff] %v8552_v28 }
 0xb77   :  { %2197 = vmatpush1.bf16.msra.mxu0 %v8537_v4 }
 0xb78   :  { %2198 = vmatprep.subr.bf16.mxu0 %v8540_v22 }
 0xb7b   :  { %2199 = vmatpush1.bf16.msra.mxu0 %v8543_v38 }
 0xb7c   :  { %2200 = vmatprep.subr.bf16.mxu0 %v8546_v42 }
 0xb7f   :  { %2201 = vmatpush1.bf16.msra.mxu0 %v8549_v32 }
 0xb80   :  { %2269 = vmatprep.subr.bf16.mxu0 %v8552_v28  ;;  %v10666_v28 = vcombine.low %v8446_v24, %v8448_v30 }
 0xb82   :  { %v2156_v50 = vrot.slane %v10666_v28, %v10596_v36 }
 0xc15   :  { %v2024_v4 = vpop.f32.mrb[20].mxu0 }
 0xc16   :  { %v8556_v26 = vadd.f32 %v8232_v6, %v2024_v4  ;;  %v5818_v22 = vpop.f32.mrb[21].mxu0  ;;  %v2054_v4 = vld [vmem:[#allocation2 + $0x10] sm:$0xff] }
 0xc17   :  { %v2027_v0 = vpop.f32.mrb[22].mxu0 }
 0xc18   :  { %6523 = vtanh.f32 %v8556_v26  ;;  %v5819_v38 = vpop.f32.mrb[23].mxu0 }
 0xc22   :  { %v6524_v52 = vpop.eup %6523 }
 0xc23   :  { %2038 = vrot.lane.b32.xlu1 %v6524_v52, %s7440_s3 }
 0xc35   :  { %v2089_v42 = vpop.f32.mrb[24].mxu0 }
 0xc36   :  { %v2091_v8 = vpop.f32.mrb[25].mxu0 }
 0xc37   :  { %v2141_v48 = vcombine.low %v2089_v42, %v2091_v8  ;;  %v2093_v32 = vpop.f32.mrb[26].mxu0 }
 0xc38   :  { %v2094_v2 = vpop.f32.mrb[27].mxu0 }
 0xc39   :  { %v2149_v6 = vrot.slane %v2141_v48, %v10596_v36 }
 0xc3b   :  { %v2157_v0 = vcombine.low %v2149_v6, %v2156_v50 }
 0xc3d   :  { %v2159_v22 = vadd.f32 %v2157_v0, %v2054_v4 }
 0xc3f   :  { %v2160_v45 = vmul.f32 0.5, %v2159_v22  ;;  %v2165_v38 = vrot.slane %v2159_v22, 2  ;;  %v2171_v52 = vrot.slane %v2159_v22, 4  ;;  %v2174_v35 = vrot.slane %v2159_v22, 6 }
 0xc41   :  { %6525 = vtanh.f32 %v2160_v45  ;;  %v2167_v43 = vmul.f32 0.5, %v2165_v38  ;;  %v2176_v32 = vmul.f32 0.5, %v2174_v35  ;;  %v8573_v38 = vld [vmem:[#allocation8] ss:$16 sps:$4 sm:$0xff]  }
 0xc43   :  { %6527 = vtanh.f32 %v2167_v43 }
 0xc44   :  { %6529 = vtanh.f32 %v2171_v52  ;;  %v8582_v52 = vld [vmem:[#allocation8 + $0x2c] ss:$16 sps:$4 sm:$0xff]  }
 0xc45   :  { %6531 = vtanh.f32 %v2176_v32  ;;  %v8587_v32 = vld [vmem:[#allocation8 + $0x20] ss:$16 sps:$4 sm:$0xff]  }
 0xc4b   :  { %v6526_v2 = vpop.eup %6525 }
 0xc4c   :  { %v2162_v8 = vmul.f32 0.5, %v6526_v2  ;;  %v8590_v2 = vld [vmem:[#allocation8 + $0x28] ss:$16 sps:$4 sm:$0xff]  }
 0xc4d   :  { %v6528_v42 = vpop.eup %6527  ;;  %10667 = vst [vmem:[#allocation65_spill] sm:$0xff] %v8590_v2 }
 0xc4e   :  { %v2163_v15 = vadd.f32 0.5, %v2162_v8  ;;  %v2169_v24 = vmul.f32 0.5, %v6528_v42  ;;  %v6530_v48 = vpop.eup %6529  ;;  %v8593_v8 = vld [vmem:[#allocation8 + $0x44] ss:$16 sps:$4 sm:$0xff]   ;;  %v8596_v42 = vld [vmem:[#allocation8 + $0x4c] ss:$16 sps:$4 sm:$0xff]  }
 0xc4f   :  { %v6532_v43 = vpop.eup %6531  ;;  %10668 = vst [vmem:[#allocation66_spill] sm:$0xff] %v8593_v8  ;;  %10669 = vst [vmem:[#allocation67_spill] sm:$0xff] %v8596_v42 }
 0xc50   :  { %v2170_v30 = vadd.f32 0.5, %v2169_v24  ;;  %v2181_v28 = vmul.f32 %v6530_v48, %v2163_v15  ;;  %v2178_v45 = vmul.f32 0.5, %v6532_v43  ;;  %v8579_v15 = vld [vmem:[#allocation8 + $0x24] ss:$16 sps:$4 sm:$0xff]   ;;  %v8599_v24 = vld [vmem:[#allocation8 + $0x40] ss:$16 sps:$4 sm:$0xff]  }
 0xc51   :  { %10670 = vst [vmem:[#allocation68_spill] sm:$0xff] %v8599_v24  ;;  %v8605_v48 = vld [vmem:[#allocation8 + $0x64] ss:$16 sps:$4 sm:$0xff]   ;;  %v8614_v43 = vld [vmem:[#allocation8 + $0x68] ss:$16 sps:$4 sm:$0xff]  }
 0xc52   :  { %v2180_v50 = vmul.f32 %v2170_v30, %v8245_v9  ;;  %v2179_v4 = vadd.f32 0.5, %v2178_v45  ;;  %v8576_v9 = vld [vmem:[#allocation8 + $0x8] ss:$16 sps:$4 sm:$0xff]   ;;  %10672 = vst [vmem:[#allocation70_spill] sm:$0xff] %v8605_v48  ;;  %10675 = vst [vmem:[#allocation73_spill] sm:$0xff] %v8614_v43 }
 0xc53   :  { %v8602_v30 = vld [vmem:[#allocation8 + $0x48] ss:$16 sps:$4 sm:$0xff]   ;;  %v8617_v45 = vld [vmem:[#allocation8 + $0x84] ss:$16 sps:$4 sm:$0xff]  }
 0xc54   :  { %v8566_v6 = vadd.f32 %v2181_v28, %v2180_v50  ;;  %10671 = vst [vmem:[#allocation69_spill] sm:$0xff] %v8602_v30  ;;  %v8608_v50 = vld [vmem:[#allocation8 + $0x6c] ss:$16 sps:$4 sm:$0xff]   ;;  %v8611_v28 = vld [vmem:[#allocation8 + $0x60] ss:$16 sps:$4 sm:$0xff]   ;;  %10676 = vst [vmem:[#allocation74_spill] sm:$0xff] %v8617_v45 }
 0xc55   :  { %10673 = vst [vmem:[#allocation71_spill] sm:$0xff] %v8608_v50  ;;  %10674 = vst [vmem:[#allocation72_spill] sm:$0xff] %v8611_v28 }
 0xc56   :  { %6533 = vtanh.f32 %v8566_v6 }
 0xc60   :  { %v6534_v0 = vpop.eup %6533 }
 0xc61   :  { %v2184_v35 = vmul.f32 %v6534_v0, %v2179_v4  ;;  %v8620_v4 = vld [vmem:[#allocation8 + $0x8c] ss:$16 sps:$4 sm:$0xff]   ;;  %v8623_v0 = vld [vmem:[#allocation8 + $0x80] ss:$16 sps:$4 sm:$0xff]  }
 0xc62   :  { %10677 = vst [vmem:[#allocation75_spill] sm:$0xff] %v8620_v4  ;;  %10678 = vst [vmem:[#allocation76_spill] sm:$0xff] %v8623_v0 }
 0xc63   :  { %v8569_v22 = vpack.c.bf16 %v2184_v35, %v2184_v35  ;;  %v8626_v35 = vld [vmem:[#allocation8 + $0x88] ss:$16 sps:$4 sm:$0xff]  }
 0xc64   :  { %10679 = vst [vmem:[#allocation77_spill] sm:$0xff] %v8626_v35 }
 0xc65   :  { %2219 = vmatmul.mubr.bf16.vlgmr.msra.gmra.mrb[28].mxu0 %v8569_v22  ;;  %2260 = vmatmul.mubr.bf16.vlgmr.msra.gmra.mrb[28].mxu1 %v8569_v22 }
 0xc66   :  { %2270 = vmatpush1.bf16.msra.mxu0 %v8573_v38  ;;  %2311 = vmatpush1.bf16.msra.mxu1 %v8576_v9 }
 0xc67   :  { %2271 = vmatprep.subr.bf16.mxu0 %v8579_v15  ;;  %2312 = vmatprep.subr.bf16.mxu1 %v8582_v52 }
 0xc68   :  { %2301 = vmatprep.mubr.bf16.mxu0 %v10545_v57  ;;  %2342 = vmatprep.mubr.bf16.mxu1 %v10545_v57 }
 0xc6a   :  { %2272 = vmatpush1.bf16.msra.mxu0 %v8587_v32  ;;  %2313 = vmatpush1.bf16.msra.mxu1 %v8590_v2 }
 0xc6b   :  { %2273 = vmatprep.subr.bf16.mxu0 %v8593_v8  ;;  %2314 = vmatprep.subr.bf16.mxu1 %v8596_v42 }
 0xc6e   :  { %2274 = vmatpush1.bf16.msra.mxu0 %v8599_v24  ;;  %2315 = vmatpush1.bf16.msra.mxu1 %v8602_v30 }
 0xc6f   :  { %2275 = vmatprep.subr.bf16.mxu0 %v8605_v48  ;;  %2316 = vmatprep.subr.bf16.mxu1 %v8608_v50  ;;  %v8654_v50 = vld [vmem:[#allocation8 + $0xe4] ss:$16 sps:$4 sm:$0xff]  }
 0xc70   :  { %10688 = vst [vmem:[#allocation86_spill] sm:$0xff] %v8654_v50 }
 0xc72   :  { %2276 = vmatpush1.bf16.msra.mxu0 %v8611_v28  ;;  %2317 = vmatpush1.bf16.msra.mxu1 %v8614_v43  ;;  %v8629_v28 = vld [vmem:[#allocation8 + $0xa4] ss:$16 sps:$4 sm:$0xff]   ;;  %v8632_v43 = vld [vmem:[#allocation8 + $0xac] ss:$16 sps:$4 sm:$0xff]  }
 0xc73   :  { %2277 = vmatprep.subr.bf16.mxu0 %v8617_v45  ;;  %2318 = vmatprep.subr.bf16.mxu1 %v8620_v4  ;;  %10680 = vst [vmem:[#allocation78_spill] sm:$0xff] %v8629_v28  ;;  %10681 = vst [vmem:[#allocation79_spill] sm:$0xff] %v8632_v43  ;;  %v8635_v45 = vld [vmem:[#allocation8 + $0xa0] ss:$16 sps:$4 sm:$0xff]   ;;  %v8638_v4 = vld [vmem:[#allocation8 + $0xa8] ss:$16 sps:$4 sm:$0xff]  }
 0xc74   :  { %10682 = vst [vmem:[#allocation80_spill] sm:$0xff] %v8635_v45  ;;  %10683 = vst [vmem:[#allocation81_spill] sm:$0xff] %v8638_v4 }
 0xc76   :  { %2278 = vmatpush1.bf16.msra.mxu0 %v8623_v0  ;;  %2319 = vmatpush1.bf16.msra.mxu1 %v8626_v35  ;;  %v8641_v0 = vld [vmem:[#allocation8 + $0xc4] ss:$16 sps:$4 sm:$0xff]   ;;  %v8644_v35 = vld [vmem:[#allocation8 + $0xcc] ss:$16 sps:$4 sm:$0xff]  }
 0xc77   :  { %2279 = vmatprep.subr.bf16.mxu0 %v8629_v28  ;;  %2320 = vmatprep.subr.bf16.mxu1 %v8632_v43  ;;  %10684 = vst [vmem:[#allocation82_spill] sm:$0xff] %v8641_v0  ;;  %10685 = vst [vmem:[#allocation83_spill] sm:$0xff] %v8644_v35  ;;  %v8647_v28 = vld [vmem:[#allocation8 + $0xc0] ss:$16 sps:$4 sm:$0xff]   ;;  %v8650_v43 = vld [vmem:[#allocation8 + $0xc8] ss:$16 sps:$4 sm:$0xff]  }
 0xc78   :  { %10686 = vst [vmem:[#allocation84_spill] sm:$0xff] %v8647_v28  ;;  %10687 = vst [vmem:[#allocation85_spill] sm:$0xff] %v8650_v43 }
 0xc7a   :  { %2280 = vmatpush1.bf16.msra.mxu0 %v8635_v45  ;;  %2321 = vmatpush1.bf16.msra.mxu1 %v8638_v4  ;;  %v2031_v45 = vmul.f32 0.5, %v8556_v26  ;;  %v8657_v4 = vld [vmem:[#allocation8 + $0xec] ss:$16 sps:$4 sm:$0xff]   ;;  %v2268_v26 = vpack.c.bf16 %v8330_v34, %v8330_v34 }
 0xc7b   :  { %2281 = vmatprep.subr.bf16.mxu0 %v8641_v0  ;;  %2322 = vmatprep.subr.bf16.mxu1 %v8644_v35  ;;  %10689 = vst [vmem:[#allocation87_spill] sm:$0xff] %v8657_v4  ;;  %v8660_v0 = vld [vmem:[#allocation8 + $0xe0] ss:$16 sps:$4 sm:$0xff]   ;;  %v8663_v35 = vld [vmem:[#allocation8 + $0xe8] ss:$16 sps:$4 sm:$0xff]  }
 0xc7c   :  { %10690 = vst [vmem:[#allocation88_spill] sm:$0xff] %v8660_v0  ;;  %10691 = vst [vmem:[#allocation89_spill] sm:$0xff] %v8663_v35  ;;  %6535 = vtanh.f32 %v2031_v45  ;;  %v8680_v34 = vld [vmem:[#allocation11 + $0x8] sm:$0xff]  }
 0xc7d   :  { %10693 = vst [vmem:[#allocation91_spill] sm:$0xff] %v8680_v34 }
 0xc7e   :  { %2282 = vmatpush1.bf16.msra.mxu0 %v8647_v28  ;;  %2323 = vmatpush1.bf16.msra.mxu1 %v8650_v43 }
 0xc7f   :  { %2283 = vmatprep.subr.bf16.mxu0 %v8654_v50  ;;  %2324 = vmatprep.subr.bf16.mxu1 %v8657_v4  ;;  %v8670_v50 = vld [vmem:[#allocation11] sm:$0xff]  }
 0xc80   :  { %10692 = vst [vmem:[#allocation90_spill] sm:$0xff] %v8670_v50 }
 0xc82   :  { %2284 = vmatpush1.bf16.msra.mxu0 %v8660_v0  ;;  %2325 = vmatpush1.bf16.msra.mxu1 %v8663_v35  ;;  %v8697_v0 = vld [vmem:[#allocation11 + $0x20] sm:$0xff]  }
 0xc83   :  { %5820 = vmatprep.subr.bf16.mxu0 %v10577_v13  ;;  %5848 = vmatprep.subr.bf16.mxu1 %v10577_v13  ;;  %10696 = vst [vmem:[#allocation95_spill] sm:$0xff] %v8697_v0 }
 0xc85   :  { %2302 = vmatmul.mubr.bf16.vlgmr.msra.gmra.mrb[28].mxu0 %v2268_v26  ;;  %2343 = vmatmul.mubr.bf16.vlgmr.msra.gmra.mrb[28].mxu1 %v2268_v26  ;;  %v8686_v26 = vld [vmem:[#allocation11 + $0x10] sm:$0xff]  }
 0xc86   :  { %5821 = vmatpush3.bf16.msra.mxu0 %v8670_v50  ;;  %5836 = vmatprep.mubr.msk.bf16.mxu0 %vm7460_vm0, %v10577_v13  ;;  %v6536_v45 = vpop.eup %6535  ;;  %10694 = vst [vmem:[#allocation92_spill] sm:$0xff] %v8686_v26  ;;  %v8690_v50 = vld [vmem:[#allocation11 + $0x18] sm:$0xff]  }
 0xc87   :  { %5822 = vmatprep.subr.bf16.mxu0 %v10577_v13  ;;  %5849 = vmatpush3.bf16.msra.mxu1 %v8156_v44  ;;  %v2033_v44 = vmul.f32 0.5, %v6536_v45  ;;  %10695 = vst [vmem:[#allocation93_spill] sm:$0xff] %v8690_v50  ;;  %v8702_v45 = vld [vmem:[#allocation11 + $0x28] sm:$0xff]  }
 0xc88   :  { %5850 = vmatprep.subr.bf16.mxu1 %v10577_v13  ;;  %5852 = vmatprep.mubr.msk.bf16.mxu1 %vm7460_vm0, %v10577_v13  ;;  %10697 = vst [vmem:[#allocation96_spill] sm:$0xff] %v8702_v45 }
 0xc8a   :  { %5823 = vmatpush3.bf16.msra.mxu0 %v8680_v34  ;;  %v8694_v34 = vadd.f32 0.5, %v2033_v44 }
 0xc8b   :  { %5824 = vmatprep.subr.bf16.mxu0 %v10577_v13  ;;  %5851 = vmatpush3.bf16.msra.mxu1 %v8159_v46 }
 0xc8c   :  { %5856 = vmatprep.subr.bf16.mxu1 %v10577_v13  ;;  %v2036_v44 = vmul.f32 %v8694_v34, %v8318_v40 }
 0xc8e   :  { %5825 = vmatpush3.bf16.msra.mxu0 %v8686_v26 }
 0xc8f   :  { %5826 = vmatprep.subr.bf16.mxu0 %v10577_v13 }
 0xc92   :  { %5827 = vmatpush3.bf16.msra.mxu0 %v8690_v50  ;;  %v8706_v50 = vld [vmem:[#allocation11 + $0x30] sm:$0xff]  }
 0xc93   :  { %5828 = vmatprep.subr.bf16.mxu0 %v10577_v13  ;;  %10698 = vst [vmem:[#allocation97_spill] sm:$0xff] %v8706_v50 }
 0xc95   :  { %v2039_v35 = vpop.permute.xlu1 %2038 }
 0xc96   :  { %v2041_v46 = vmul.f32 %v2039_v35, %v8694_v34  ;;  %5829 = vmatpush3.bf16.msra.mxu0 %v8697_v0  ;;  %v8710_v35 = vld [vmem:[#allocation11 + $0x38] sm:$0xff]  }
 0xc97   :  { %5830 = vmatprep.subr.bf16.mxu0 %v10577_v13  ;;  %10699 = vst [vmem:[#allocation98_spill] sm:$0xff] %v8710_v35 }
 0xc98   :  { %2043 = vrot.lane.b32.xlu1 %v2041_v46, %s7461_s14 }
 0xc9a   :  { %5831 = vmatpush3.bf16.msra.mxu0 %v8702_v45 }
 0xc9b   :  { %5832 = vmatprep.subr.bf16.mxu0 %v10577_v13 }
 0xc9e   :  { %5833 = vmatpush3.bf16.msra.mxu0 %v8706_v50 }
 0xc9f   :  { %5834 = vmatprep.subr.bf16.mxu0 %v10577_v13 }
 0xca2   :  { %5835 = vmatpush3.bf16.msra.mxu0 %v8710_v35 }
 0xca3   :  { %5840 = vmatprep.subr.bf16.mxu0 %v10577_v13 }
 0xd0a   :  { %v2044_v46 = vpop.permute.xlu1 %2043 }
 0xd0b   :  { %v8716_v0 = vadd.f32 %v2044_v46, %v2036_v44 }
 0xd0d   :  { %10700 = vst [vmem:[#allocation99_spill] sm:$0xff] %v8716_v0  ;;  %6537 = vtanh.f32 %v8716_v0 }
 0xd17   :  { %v6538_v45 = vpop.eup %6537 }
 0xd18   :  { %2049 = vrot.lane.b32.xlu1 %v6538_v45, %s7440_s3 }
 0xd58   :  { %v2303_v50 = vpop.f32.mrb[28].mxu0  ;;  %v2344_v26 = vpop.f32.mrb[28].mxu1 }
 0xd59   :  { %v6113_v4 = vadd.f32 %v2303_v50, %v10636_v54  ;;  %v2305_v43 = vpop.f32.mrb[29].mxu0  ;;  %v2346_v28 = vpop.f32.mrb[29].mxu1  ;;  %v6115_v46 = vadd.f32 %v2344_v26, %v8082_v49 }
 0xd5a   :  { %v6114_v35 = vadd.f32 %v2305_v43, %v8079_v41  ;;  %v2307_v48 = vpop.f32.mrb[30].mxu0  ;;  %v2348_v30 = vpop.f32.mrb[30].mxu1  ;;  %v6116_v45 = vadd.f32 %v2346_v28, %v8087_v33 }
 0xd5b   :  { %v2355_v24 = vmul.f32 0.5, %v6113_v4  ;;  %v2308_v40 = vpop.f32.mrb[31].mxu0  ;;  %v2349_v42 = vpop.f32.mrb[31].mxu1 }
 0xd5c   :  { %v2359_v44 = vmul.f32 0.5, %v6114_v35  ;;  %v2364_v0 = vmul.f32 0.5, %v6116_v45  ;;  %v2374_v40 = vld [vmem:[#allocation20 + $0x2] sm:$0x1] }
 0xd5d   :  { %6539 = vtanh.f32 %v2355_v24 }
 0xd5e   :  { %6541 = vtanh.f32 %v2359_v44  ;;  %v2375_v44 = vunpack.c.l.bf16 %v2374_v40 }
 0xd5f   :  { %6543 = vtanh.f32 %v6115_v46 }
 0xd60   :  { %6545 = vtanh.f32 %v2364_v0 }
 0xd67   :  { %v6540_v8 = vpop.eup %6539 }
 0xd68   :  { %v6542_v50 = vpop.eup %6541  ;;  %v2357_v54 = vmul.f32 0.5, %v6540_v8 }
 0xd69   :  { %v2361_v2 = vmul.f32 0.5, %v6542_v50  ;;  %v6544_v48 = vpop.eup %6543 }
 0xd6a   :  { %v2358_v43 = vadd.f32 0.5, %v2357_v54  ;;  %v6546_v24 = vpop.eup %6545 }
 0xd6b   :  { %v2362_v30 = vadd.f32 0.5, %v2361_v2  ;;  %v2366_v26 = vmul.f32 0.5, %v6546_v24  ;;  %v8731_v2 = vld [vmem:[#allocation13] sm:$0xff]  }
 0xd6c   :  { %v2369_v4 = vmul.f32 %v6544_v48, %v2358_v43 }
 0xd6d   :  { %v2368_v42 = vmul.f32 %v2362_v30, %v8327_v12  ;;  %v2367_v28 = vadd.f32 0.5, %v2366_v26  ;;  %v8737_v12 = vld [vmem:[#allocation13 + $0x8] sm:$0xff]  }
 0xd6f   :  { %v8725_v35 = vadd.f32 %v2369_v4, %v2368_v42 }
 0xd71   :  { %6547 = vtanh.f32 %v8725_v35 }
 0xd7b   :  { %v6548_v46 = vpop.eup %6547 }
 0xd7c   :  { %v8728_v45 = vmul.f32 %v6548_v46, %v2367_v28 }
 0xd7e   :  { %v2376_v8 = vmul.f32 %v2375_v44, %v8728_v45 }
 0xd80   :  { %v2377_v54 = vpack.c.bf16 %v2376_v8, %v2376_v8 }
 0xd82   :  { %5837 = vmatmul.mubr.bf16.vlgmr.msra.gmra.mrb[32].mxu0 %v2377_v54 }
 0xd83   :  { %5841 = vmatpush3.bf16.msra.mxu0 %v8731_v2  ;;  %5844 = vmatprep.mubr.msk.bf16.mxu0 %vm7460_vm0, %v10577_v13 }
 0xd84   :  { %5842 = vmatprep.subr.bf16.mxu0 %v10577_v13 }
 0xd87   :  { %5843 = vmatpush3.bf16.msra.mxu0 %v8737_v12 }
 0xd88   :  { %2641 = vmatprep.subr.bf16.mxu0 %v8338_v55  ;;  %v10701_v55 = vld [vmem:[#allocation36_spill] sm:$0xff] }
 0xd8a   :  { %v2050_v0 = vpop.permute.xlu1 %2049 }
 0xd8b   :  { %v2052_v50 = vmul.f32 %v2050_v0, %v8694_v34 }
 0xd8d   :  { %v2528_v43 = vpack.c.bf16 %v2052_v50, %v2052_v50  ;;  %v8801_v50 = vld [vmem:[#allocation17] sm:$0xff]  }
 0xd8e   :  { %5845 = vmatmul.mubr.msk.bf16.vlgmr.msra.gmra.mrb[32].mxu0 %vm1299_vm1, %v8459_v31 }
 0xd8f   :  { %2642 = vmatpush1.bf16.msra.mxu0 %v8344_v47  ;;  %2530 = vrot.lane.b32.xlu1 %v2528_v43, %s7461_s14  ;;  %v10702_v47 = vld [vmem:[#allocation37_spill] sm:$0xff] }
 0xd90   :  { %2643 = vmatprep.subr.bf16.mxu0 %v8348_v39  ;;  %2673 = vmatprep.mubr.bf16.mxu0 %v10545_v57  ;;  %v10703_v39 = vld [vmem:[#allocation38_spill] sm:$0xff] }
 0xd91   :  { %v8810_v43 = vld [vmem:[#allocation5 + $0x4] ss:$16 sps:$4 sm:$0xff]  }
 0xd93   :  { %2644 = vmatpush1.bf16.msra.mxu0 %v8352_v37  ;;  %v10704_v37 = vld [vmem:[#allocation39_spill] sm:$0xff] }
 0xd94   :  { %2645 = vmatprep.subr.bf16.mxu0 %v8355_v14  ;;  %v10705_v14 = vld [vmem:[#allocation40_spill] sm:$0xff] }
 0xd97   :  { %2646 = vmatpush1.bf16.msra.mxu0 %v8358_v58  ;;  %v10706_v58 = vld [vmem:[#allocation41_spill] sm:$0xff] }
 0xd98   :  { %2647 = vmatprep.subr.bf16.mxu0 %v8361_v59  ;;  %v10707_v59 = vld [vmem:[#allocation42_spill] sm:$0xff] }
 0xd9b   :  { %2648 = vmatpush1.bf16.msra.mxu0 %v8364_v17  ;;  %v10708_v17 = vld [vmem:[#allocation43_spill] sm:$0xff] }
 0xd9c   :  { %2649 = vmatprep.subr.bf16.mxu0 %v8367_v19  ;;  %v10709_v19 = vld [vmem:[#allocation44_spill] sm:$0xff] }
 0xd9f   :  { %2650 = vmatpush1.bf16.msra.mxu0 %v8370_v21  ;;  %v10710_v21 = vld [vmem:[#allocation45_spill] sm:$0xff] }
 0xda0   :  { %2651 = vmatprep.subr.bf16.mxu0 %v8373_v23  ;;  %v10711_v23 = vld [vmem:[#allocation46_spill] sm:$0xff] }
 0xda3   :  { %2652 = vmatpush1.bf16.msra.mxu0 %v8376_v25 }
 0xda4   :  { %2653 = vmatprep.subr.bf16.mxu0 %v8379_v27  ;;  %v8780_v27 = vld [vmem:[#allocation14] ss:$0 sm:$0xff] }
 0xda7   :  { %2654 = vmatpush1.bf16.msra.mxu0 %v8382_v16 }
 0xda8   :  { %2655 = vmatprep.subr.bf16.mxu0 %v8385_v18 }
 0xdab   :  { %2656 = vmatpush1.bf16.msra.mxu0 %v8388_v20 }
 0xdac   :  { %2772 = vmatprep.subr.bf16.mxu0 %v8391_v29 }
 0xdae   :  { %2674 = vmatmul.mubr.bf16.vlgmr.msra.gmra.mrb[36].mxu0 %v8569_v22 }
 0xdaf   :  { %2773 = vmatpush1.bf16.msra.mxu0 %v8395_v3  ;;  %2804 = vmatprep.mubr.bf16.mxu0 %v10545_v57 }
 0xdb0   :  { %2774 = vmatprep.subr.bf16.mxu0 %v8399_v11 }
 0xdb3   :  { %2775 = vmatpush1.bf16.msra.mxu0 %v8402_v51 }
 0xdb4   :  { %2776 = vmatprep.subr.bf16.mxu0 %v8405_v53 }
 0xdb7   :  { %2777 = vmatpush1.bf16.msra.mxu0 %v8408_v63 }
 0xdb8   :  { %2778 = vmatprep.subr.bf16.mxu0 %v10701_v55 }
 0xdbb   :  { %2779 = vmatpush1.bf16.msra.mxu0 %v10702_v47  ;;  %v8814_v47 = vld [vmem:[#allocation5] ss:$16 sps:$4 sm:$0xff]  }
 0xdbc   :  { %2780 = vmatprep.subr.bf16.mxu0 %v10703_v39  ;;  %v8818_v39 = vld [vmem:[#allocation5 + $0x24] ss:$16 sps:$4 sm:$0xff]  }
 0xdbf   :  { %2781 = vmatpush1.bf16.msra.mxu0 %v10704_v37  ;;  %v8821_v37 = vld [vmem:[#allocation5 + $0x20] ss:$16 sps:$4 sm:$0xff]  }
 0xdc0   :  { %2782 = vmatprep.subr.bf16.mxu0 %v10705_v14  ;;  %v8824_v14 = vld [vmem:[#allocation5 + $0x44] ss:$16 sps:$4 sm:$0xff]  }
 0xdc3   :  { %2783 = vmatpush1.bf16.msra.mxu0 %v10706_v58  ;;  %v8827_v58 = vld [vmem:[#allocation5 + $0x40] ss:$16 sps:$4 sm:$0xff]  }
 0xdc4   :  { %2784 = vmatprep.subr.bf16.mxu0 %v10707_v59  ;;  %v8830_v59 = vld [vmem:[#allocation5 + $0x64] ss:$16 sps:$4 sm:$0xff]  }
 0xdc7   :  { %2785 = vmatpush1.bf16.msra.mxu0 %v10708_v17  ;;  %v8833_v17 = vld [vmem:[#allocation5 + $0x60] ss:$16 sps:$4 sm:$0xff]  }
 0xdc8   :  { %2786 = vmatprep.subr.bf16.mxu0 %v10709_v19  ;;  %v10712_v19 = vld [vmem:[#allocation47_spill] sm:$0xff] }
 0xdcb   :  { %2787 = vmatpush1.bf16.msra.mxu0 %v10710_v21  ;;  %v10713_v21 = vld [vmem:[#allocation48_spill] sm:$0xff] }
 0xdcc   :  { %2855 = vmatprep.subr.bf16.mxu0 %v10711_v23  ;;  %v10714_v23 = vld [vmem:[#allocation49_spill] sm:$0xff] }
 0xe01   :  { %v2531_v55 = vpop.permute.xlu1 %2530 }
 0xe61   :  { %v2452_v25 = vpop.f32.mrb[32].mxu0 }
 0xe62   :  { %v6117_v16 = vadd.f32 %v8780_v27, %v2452_v25  ;;  %v5846_v18 = vpop.f32.mrb[33].mxu0  ;;  %v10722_v25 = vld [vmem:[#allocation57_spill] sm:$0xff] }
 0xe63   :  { %v2455_v20 = vpop.f32.mrb[34].mxu0  ;;  %v10725_v18 = vld [vmem:[#allocation60_spill] sm:$0xff] }
 0xe64   :  { %6549 = vtanh.f32 %v6117_v16  ;;  %v5847_v29 = vpop.f32.mrb[35].mxu0  ;;  %v2459_v34 = vmul.f32 0.5, %v6117_v16  ;;  %v10724_v16 = vld [vmem:[#allocation59_spill] sm:$0xff]  ;;  %v10726_v20 = vld [vmem:[#allocation61_spill] sm:$0xff] }
 0xe65   :  { %v10727_v29 = vld [vmem:[#allocation62_spill] sm:$0xff] }
 0xe66   :  { %6551 = vtanh.f32 %v2459_v34  ;;  %v8863_v34 = vld [vmem:[#allocation19] ss:$0 sm:$0xff] }
 0xe6e   :  { %v6550_v3 = vpop.eup %6549 }
 0xe6f   :  { %2466 = vrot.lane.b32.xlu0 %v6550_v3, %s7440_s3  ;;  %v10728_v3 = vld [vmem:[#allocation63_spill] sm:$0xff] }
 0xe70   :  { %v6552_v48 = vpop.eup %6551 }
 0xe71   :  { %v2461_v30 = vmul.f32 0.5, %v6552_v48 }
 0xe73   :  { %v2462_v4 = vadd.f32 0.5, %v2461_v30 }
 0xe75   :  { %v2464_v26 = vmul.f32 %v2462_v4, %v8454_v10  ;;  %v8807_v10 = vld [vmem:[#allocation17 + $0x8] sm:$0xff]  }
 0xe81   :  { %v8784_v11 = vpop.f32.mrb[36].mxu0 }
 0xe82   :  { %v8786_v51 = vpop.f32.mrb[37].mxu0 }
 0xe83   :  { %v2687_v53 = vcombine.low %v8784_v11, %v8786_v51  ;;  %v2679_v63 = vpop.f32.mrb[38].mxu0 }
 0xe84   :  { %v2680_v31 = vpop.f32.mrb[39].mxu0  ;;  %v10729_v63 = vld [vmem:[#allocation64_spill] sm:$0xff] }
 0xee1   :  { %v2467_v42 = vpop.permute.xlu0 %2466 }
 0xee2   :  { %v2469_v24 = vmul.f32 %v2467_v42, %v2462_v4 }
 0xee4   :  { %2471 = vrot.lane.b32.xlu0 %v2469_v24, %s7461_s14 }
 0xf56   :  { %v2472_v40 = vpop.permute.xlu0 %2471 }
 0xf57   :  { %v8792_v28 = vadd.f32 %v2472_v40, %v2464_v26 }
 0xf59   :  { %6553 = vtanh.f32 %v8792_v28 }
 0xf63   :  { %v6554_v44 = vpop.eup %6553 }
 0xf64   :  { %2477 = vrot.lane.b32.xlu0 %v6554_v44, %s7440_s3 }
 0xfd6   :  { %v2478_v46 = vpop.permute.xlu0 %2477 }
 0xfd7   :  { %v2480_v8 = vmul.f32 %v2478_v46, %v2462_v4 }
 0xfd9   :  { %v2481_v54 = vpack.c.bf16 %v2480_v8, %v2480_v8 }
 0xfdb   :  { %2483 = vrot.lane.b32.xlu0 %v2481_v54, %s7461_s14  ;;  %v2701_v54 = vrot.slane %v2687_v53, %v10596_v36 }
0x104d   :  { %v8797_v0 = vpop.permute.xlu0 %2483 }
0x104e   :  { %5853 = vmatmul.mubr.msk.bf16.vlgmr.msra.gmra.mrb[32].mxu1 %vm1299_vm1, %v8797_v0 }
0x104f   :  { %5857 = vmatpush3.bf16.msra.mxu1 %v8801_v50  ;;  %5860 = vmatprep.mubr.msk.bf16.mxu1 %vm7460_vm0, %v10577_v13 }
0x1050   :  { %5858 = vmatprep.subr.bf16.mxu1 %v10577_v13 }
0x1053   :  { %5859 = vmatpush3.bf16.msra.mxu1 %v8807_v10 }
0x1054   :  { %2600 = vmatprep.subr.bf16.mxu1 %v8810_v43 }
0x105a   :  { %5861 = vmatmul.mubr.msk.bf16.vlgmr.msra.gmra.mrb[32].mxu1 %vm1299_vm1, %v2531_v55 }
0x105b   :  { %2601 = vmatpush1.bf16.msra.mxu1 %v8814_v47  ;;  %2632 = vmatprep.mubr.bf16.mxu1 %v10545_v57 }
0x105c   :  { %2602 = vmatprep.subr.bf16.mxu1 %v8818_v39 }
0x105f   :  { %2603 = vmatpush1.bf16.msra.mxu1 %v8821_v37 }
0x1060   :  { %2604 = vmatprep.subr.bf16.mxu1 %v8824_v14 }
0x1063   :  { %2605 = vmatpush1.bf16.msra.mxu1 %v8827_v58 }
0x1064   :  { %2606 = vmatprep.subr.bf16.mxu1 %v8830_v59 }
0x1067   :  { %2607 = vmatpush1.bf16.msra.mxu1 %v8833_v17 }
0x1068   :  { %2608 = vmatprep.subr.bf16.mxu1 %v8478_v56  ;;  %v10715_v56 = vld [vmem:[#allocation50_spill] sm:$0xff] }
0x106b   :  { %2609 = vmatpush1.bf16.msra.mxu1 %v8481_v60  ;;  %v10716_v60 = vld [vmem:[#allocation51_spill] sm:$0xff] }
0x106c   :  { %2610 = vmatprep.subr.bf16.mxu1 %v8484_v62  ;;  %v10717_v62 = vld [vmem:[#allocation52_spill] sm:$0xff] }
0x106f   :  { %2611 = vmatpush1.bf16.msra.mxu1 %v8487_v1  ;;  %v10718_v1 = vld [vmem:[#allocation53_spill] sm:$0xff] }
0x1070   :  { %2612 = vmatprep.subr.bf16.mxu1 %v8490_v5  ;;  %v10719_v5 = vld [vmem:[#allocation54_spill] sm:$0xff] }
0x1073   :  { %2613 = vmatpush1.bf16.msra.mxu1 %v8493_v61  ;;  %v10720_v61 = vld [vmem:[#allocation55_spill] sm:$0xff] }
0x1074   :  { %2614 = vmatprep.subr.bf16.mxu1 %v8496_v7  ;;  %v10721_v7 = vld [vmem:[#allocation56_spill] sm:$0xff] }
0x1077   :  { %2615 = vmatpush1.bf16.msra.mxu1 %v10712_v19  ;;  %v2599_v19 = vld [vmem:[#allocation2 + $0x18] sm:$0xff] }
0x1078   :  { %2731 = vmatprep.subr.bf16.mxu1 %v10713_v21 }
0x107a   :  { %2633 = vmatmul.mubr.bf16.vlgmr.msra.gmra.mrb[36].mxu1 %v8569_v22  ;;  %v10723_v22 = vld [vmem:[#allocation58_spill] sm:$0xff] }
0x107b   :  { %2732 = vmatpush1.bf16.msra.mxu1 %v10714_v23  ;;  %2763 = vmatprep.mubr.bf16.mxu1 %v10545_v57 }
0x107c   :  { %2733 = vmatprep.subr.bf16.mxu1 %v10715_v56 }
0x107f   :  { %2734 = vmatpush1.bf16.msra.mxu1 %v10716_v60 }
0x1080   :  { %2735 = vmatprep.subr.bf16.mxu1 %v10717_v62 }
0x1083   :  { %2736 = vmatpush1.bf16.msra.mxu1 %v10718_v1 }
0x1084   :  { %2737 = vmatprep.subr.bf16.mxu1 %v10719_v5 }
0x1087   :  { %2738 = vmatpush1.bf16.msra.mxu1 %v10720_v61 }
0x1088   :  { %2739 = vmatprep.subr.bf16.mxu1 %v10721_v7 }
0x108b   :  { %2740 = vmatpush1.bf16.msra.mxu1 %v10722_v25 }
0x108c   :  { %2741 = vmatprep.subr.bf16.mxu1 %v10723_v22 }
0x108f   :  { %2742 = vmatpush1.bf16.msra.mxu1 %v10724_v16 }
0x1090   :  { %2743 = vmatprep.subr.bf16.mxu1 %v10725_v18 }
0x1093   :  { %2744 = vmatpush1.bf16.msra.mxu1 %v10726_v20 }
0x1094   :  { %2745 = vmatprep.subr.bf16.mxu1 %v10727_v29 }
0x1097   :  { %2746 = vmatpush1.bf16.msra.mxu1 %v10728_v3 }
0x1098   :  { %2814 = vmatprep.subr.bf16.mxu1 %v10729_v63 }
0x112d   :  { %v2569_v31 = vpop.f32.mrb[32].mxu1 }
0x112e   :  { %v8866_v48 = vadd.f32 %v8863_v34, %v2569_v31  ;;  %v5862_v30 = vpop.f32.mrb[33].mxu1 }
0x112f   :  { %v2572_v4 = vpop.f32.mrb[34].mxu1 }
0x1130   :  { %6555 = vtanh.f32 %v8866_v48  ;;  %v5863_v42 = vpop.f32.mrb[35].mxu1 }
0x113a   :  { %v6556_v24 = vpop.eup %6555 }
0x113b   :  { %2583 = vrot.lane.b32.xlu1 %v6556_v24, %s7440_s3  ;;  %v10731_v24 = vld [vmem:[#allocation66_spill] sm:$0xff] }
0x114d   :  { %v2634_v26 = vpop.f32.mrb[36].mxu1 }
0x114e   :  { %v2636_v40 = vpop.f32.mrb[37].mxu1 }
0x114f   :  { %v2686_v44 = vcombine.low %v2634_v26, %v2636_v40  ;;  %v2638_v46 = vpop.f32.mrb[38].mxu1  ;;  %v10732_v26 = vld [vmem:[#allocation67_spill] sm:$0xff]  ;;  %v10733_v40 = vld [vmem:[#allocation68_spill] sm:$0xff] }
0x1150   :  { %v2639_v8 = vpop.f32.mrb[39].mxu1  ;;  %v10739_v46 = vld [vmem:[#allocation74_spill] sm:$0xff] }
0x1151   :  { %v2694_v55 = vrot.slane %v2686_v44, %v10596_v36  ;;  %v10738_v44 = vld [vmem:[#allocation73_spill] sm:$0xff]  ;;  %v10741_v8 = vld [vmem:[#allocation76_spill] sm:$0xff] }
0x1153   :  { %v2702_v21 = vcombine.low %v2694_v55, %v2701_v54  ;;  %v10742_v54 = vld [vmem:[#allocation77_spill] sm:$0xff]  ;;  %v10743_v55 = vld [vmem:[#allocation78_spill] sm:$0xff] }
0x1155   :  { %v2704_v23 = vadd.f32 %v2702_v21, %v2599_v19  ;;  %v10744_v19 = vld [vmem:[#allocation79_spill] sm:$0xff]  ;;  %v10745_v21 = vld [vmem:[#allocation80_spill] sm:$0xff] }
0x1157   :  { %v2705_v56 = vmul.f32 0.5, %v2704_v23  ;;  %v2710_v60 = vrot.slane %v2704_v23, 2  ;;  %v2716_v1 = vrot.slane %v2704_v23, 4  ;;  %v2719_v5 = vrot.slane %v2704_v23, 6  ;;  %v10746_v23 = vld [vmem:[#allocation81_spill] sm:$0xff] }
0x1159   :  { %6557 = vtanh.f32 %v2705_v56  ;;  %v2712_v62 = vmul.f32 0.5, %v2710_v60  ;;  %v2721_v61 = vmul.f32 0.5, %v2719_v5  ;;  %v10747_v56 = vld [vmem:[#allocation82_spill] sm:$0xff]  ;;  %v10748_v60 = vld [vmem:[#allocation83_spill] sm:$0xff]  ;;  %v2576_v5 = vmul.f32 0.5, %v8866_v48 }
0x115a   :  { %v8924_v48 = vld [vmem:[#allocation16] sm:$0xff]  }
0x115b   :  { %6559 = vtanh.f32 %v2712_v62  ;;  %v10749_v62 = vld [vmem:[#allocation84_spill] sm:$0xff] }
0x115c   :  { %6561 = vtanh.f32 %v2716_v1  ;;  %v10750_v1 = vld [vmem:[#allocation85_spill] sm:$0xff] }
0x115d   :  { %6563 = vtanh.f32 %v2721_v61  ;;  %v10751_v61 = vld [vmem:[#allocation86_spill] sm:$0xff] }
0x1163   :  { %v6558_v7 = vpop.eup %6557 }
0x1164   :  { %v2707_v25 = vmul.f32 0.5, %v6558_v7  ;;  %v10752_v7 = vld [vmem:[#allocation87_spill] sm:$0xff] }
0x1165   :  { %v6560_v22 = vpop.eup %6559 }
0x1166   :  { %v2708_v16 = vadd.f32 0.5, %v2707_v25  ;;  %v2714_v11 = vmul.f32 0.5, %v6560_v22  ;;  %v6562_v53 = vpop.eup %6561  ;;  %v10753_v25 = vld [vmem:[#allocation88_spill] sm:$0xff]  ;;  %v10754_v22 = vld [vmem:[#allocation89_spill] sm:$0xff] }
0x1167   :  { %v6564_v3 = vpop.eup %6563 }
0x1168   :  { %v2715_v51 = vadd.f32 0.5, %v2714_v11  ;;  %v2726_v20 = vmul.f32 %v6562_v53, %v2708_v16  ;;  %v2723_v63 = vmul.f32 0.5, %v6564_v3  ;;  %v2813_v16 = vpack.c.bf16 %v8728_v45, %v8728_v45  ;;  %v10755_v11 = vld [vmem:[#allocation90_spill] sm:$0xff]  ;;  %v10756_v45 = vld [vmem:[#allocation91_spill] sm:$0xff]  ;;  %v10758_v3 = vld [vmem:[#allocation93_spill] sm:$0xff] }
0x116a   :  { %v2725_v18 = vmul.f32 %v2715_v51, %v8566_v6  ;;  %v2724_v31 = vadd.f32 0.5, %v2723_v63  ;;  %v10730_v6 = vld [vmem:[#allocation65_spill] sm:$0xff]  ;;  %v8932_v51 = vld [vmem:[#allocation16 + $0x8] sm:$0xff]  }
0x116c   :  { %v8876_v29 = vadd.f32 %v2726_v20, %v2725_v18  ;;  %v10757_v18 = vld [vmem:[#allocation92_spill] sm:$0xff] }
0x116e   :  { %6565 = vtanh.f32 %v8876_v29 }
0x116f   :  { %6567 = vtanh.f32 %v2576_v5 }
0x1178   :  { %v6566_v30 = vpop.eup %6565 }
0x1179   :  { %v2729_v4 = vmul.f32 %v6566_v30, %v2724_v31  ;;  %v6568_v53 = vpop.eup %6567 }
0x117a   :  { %v2578_v20 = vmul.f32 0.5, %v6568_v53 }
0x117b   :  { %v8879_v42 = vpack.c.bf16 %v2729_v4, %v2729_v4  ;;  %v10759_v4 = vld [vmem:[#allocation95_spill] sm:$0xff] }
0x117c   :  { %v8940_v63 = vadd.f32 0.5, %v2578_v20 }
0x117d   :  { %2764 = vmatmul.mubr.bf16.vlgmr.msra.gmra.mrb[40].mxu1 %v8879_v42  ;;  %2805 = vmatmul.mubr.bf16.vlgmr.msra.gmra.mrb[40].mxu0 %v8879_v42 }
0x117e   :  { %2815 = vmatpush1.bf16.msra.mxu1 %v8573_v38  ;;  %2856 = vmatpush1.bf16.msra.mxu0 %v8576_v9  ;;  %v10734_v38 = vld [vmem:[#allocation69_spill] sm:$0xff]  ;;  %v10735_v9 = vld [vmem:[#allocation70_spill] sm:$0xff] }
0x117f   :  { %2816 = vmatprep.subr.bf16.mxu1 %v8579_v15  ;;  %2857 = vmatprep.subr.bf16.mxu0 %v8582_v52  ;;  %v10736_v15 = vld [vmem:[#allocation71_spill] sm:$0xff]  ;;  %v10737_v52 = vld [vmem:[#allocation72_spill] sm:$0xff] }
0x1180   :  { %2846 = vmatprep.mubr.bf16.mxu1 %v10545_v57  ;;  %2887 = vmatprep.mubr.bf16.mxu0 %v10545_v57 }
0x1182   :  { %2817 = vmatpush1.bf16.msra.mxu1 %v8587_v32  ;;  %2858 = vmatpush1.bf16.msra.mxu0 %v10730_v6  ;;  %v10740_v32 = vld [vmem:[#allocation75_spill] sm:$0xff]  ;;  %v10760_v6 = vld [vmem:[#allocation96_spill] sm:$0xff] }
0x1183   :  { %2818 = vmatprep.subr.bf16.mxu1 %v10731_v24  ;;  %2859 = vmatprep.subr.bf16.mxu0 %v10732_v26  ;;  %v10761_v24 = vld [vmem:[#allocation97_spill] sm:$0xff]  ;;  %v10762_v26 = vld [vmem:[#allocation98_spill] sm:$0xff] }
0x1186   :  { %2819 = vmatpush1.bf16.msra.mxu1 %v10733_v40  ;;  %2860 = vmatpush1.bf16.msra.mxu0 %v10734_v38  ;;  %v10763_v40 = vld [vmem:[#allocation99_spill] sm:$0xff] }
0x1187   :  { %2820 = vmatprep.subr.bf16.mxu1 %v10735_v9  ;;  %2861 = vmatprep.subr.bf16.mxu0 %v10736_v15  ;;  %v2581_v38 = vmul.f32 %v8940_v63, %v10763_v40 }
0x118a   :  { %2821 = vmatpush1.bf16.msra.mxu1 %v10737_v52  ;;  %2862 = vmatpush1.bf16.msra.mxu0 %v10738_v44 }
0x118b   :  { %2822 = vmatprep.subr.bf16.mxu1 %v10739_v46  ;;  %2863 = vmatprep.subr.bf16.mxu0 %v10740_v32  ;;  %v10764_v32 = vld [vmem:[#allocation94_spill] sm:$0xff] }
0x118e   :  { %2823 = vmatpush1.bf16.msra.mxu1 %v10741_v8  ;;  %2864 = vmatpush1.bf16.msra.mxu0 %v10742_v54 }
0x118f   :  { %2824 = vmatprep.subr.bf16.mxu1 %v10743_v55  ;;  %2865 = vmatprep.subr.bf16.mxu0 %v10744_v19 }
0x1192   :  { %2825 = vmatpush1.bf16.msra.mxu1 %v10745_v21  ;;  %2866 = vmatpush1.bf16.msra.mxu0 %v10746_v23 }
0x1193   :  { %2826 = vmatprep.subr.bf16.mxu1 %v10747_v56  ;;  %2867 = vmatprep.subr.bf16.mxu0 %v10748_v60 }
0x1196   :  { %2827 = vmatpush1.bf16.msra.mxu1 %v10749_v62  ;;  %2868 = vmatpush1.bf16.msra.mxu0 %v10750_v1 }
0x1197   :  { %2828 = vmatprep.subr.bf16.mxu1 %v10751_v61  ;;  %2869 = vmatprep.subr.bf16.mxu0 %v10752_v7 }
0x119a   :  { %2829 = vmatpush1.bf16.msra.mxu1 %v10753_v25  ;;  %2870 = vmatpush1.bf16.msra.mxu0 %v10754_v22 }
0x119b   :  { %5864 = vmatprep.subr.bf16.mxu1 %v10577_v13  ;;  %5892 = vmatprep.subr.bf16.mxu0 %v10577_v13 }
0x119d   :  { %2847 = vmatmul.mubr.bf16.vlgmr.msra.gmra.mrb[40].mxu1 %v2813_v16  ;;  %2888 = vmatmul.mubr.bf16.vlgmr.msra.gmra.mrb[40].mxu0 %v2813_v16 }
0x119e   :  { %5865 = vmatpush3.bf16.msra.mxu1 %v10755_v11  ;;  %5880 = vmatprep.mubr.msk.bf16.mxu1 %vm7460_vm0, %v10577_v13 }
0x119f   :  { %5866 = vmatprep.subr.bf16.mxu1 %v10577_v13  ;;  %5893 = vmatpush3.bf16.msra.mxu0 %v8924_v48 }
0x11a0   :  { %5894 = vmatprep.subr.bf16.mxu0 %v10577_v13  ;;  %5896 = vmatprep.mubr.msk.bf16.mxu0 %vm7460_vm0, %v10577_v13 }
0x11a2   :  { %5867 = vmatpush3.bf16.msra.mxu1 %v10756_v45 }
0x11a3   :  { %5868 = vmatprep.subr.bf16.mxu1 %v10577_v13  ;;  %5895 = vmatpush3.bf16.msra.mxu0 %v8932_v51 }
0x11a4   :  { %5900 = vmatprep.subr.bf16.mxu0 %v10577_v13 }
0x11a6   :  { %5869 = vmatpush3.bf16.msra.mxu1 %v10757_v18 }
0x11a7   :  { %5870 = vmatprep.subr.bf16.mxu1 %v10577_v13 }
0x11aa   :  { %5871 = vmatpush3.bf16.msra.mxu1 %v10758_v3 }
0x11ab   :  { %5872 = vmatprep.subr.bf16.mxu1 %v10577_v13 }
0x11ad   :  { %v2584_v31 = vpop.permute.xlu1 %2583 }
0x11ae   :  { %v2586_v30 = vmul.f32 %v2584_v31, %v8940_v63  ;;  %5873 = vmatpush3.bf16.msra.mxu1 %v10759_v4 }
0x11af   :  { %5874 = vmatprep.subr.bf16.mxu1 %v10577_v13 }
0x11b0   :  { %2588 = vrot.lane.b32.xlu1 %v2586_v30, %s7461_s14 }
0x11b2   :  { %5875 = vmatpush3.bf16.msra.mxu1 %v10760_v6  ;;  %v2919_v6 = vld [vmem:[#allocation20 + $0x3] sm:$0x1] }
0x11b3   :  { %5876 = vmatprep.subr.bf16.mxu1 %v10577_v13 }
0x11b6   :  { %5877 = vmatpush3.bf16.msra.mxu1 %v10761_v24 }
0x11b7   :  { %5878 = vmatprep.subr.bf16.mxu1 %v10577_v13 }
0x11ba   :  { %5879 = vmatpush3.bf16.msra.mxu1 %v10762_v26  ;;  %v2920_v26 = vunpack.c.l.bf16 %v2919_v6  ;;  %v9065_v6 = vld [vmem:[#allocation7 + $0xcc] ss:$16 sps:$4 sm:$0xff]  }
0x11bb   :  { %5884 = vmatprep.subr.bf16.mxu1 %v10577_v13  ;;  %10771 = vst [vmem:[#allocation42_spill] sm:$0xff] %v9065_v6 }
0x1222   :  { %v2589_v9 = vpop.permute.xlu1 %2588 }
0x1223   :  { %v8954_v15 = vadd.f32 %v2589_v9, %v2581_v38 }
0x1225   :  { %6569 = vtanh.f32 %v8954_v15 }
0x122f   :  { %v6570_v52 = vpop.eup %6569 }
0x1230   :  { %2594 = vrot.lane.b32.xlu1 %v6570_v52, %s7440_s3 }
0x1270   :  { %v2848_v44 = vpop.f32.mrb[40].mxu1  ;;  %v2889_v46 = vpop.f32.mrb[40].mxu0 }
0x1271   :  { %v6119_v8 = vadd.f32 %v2848_v44, %v10764_v32  ;;  %v2850_v54 = vpop.f32.mrb[41].mxu1  ;;  %v2891_v55 = vpop.f32.mrb[41].mxu0  ;;  %v6121_v5 = vadd.f32 %v2889_v46, %v8082_v49 }
0x1272   :  { %v6120_v19 = vadd.f32 %v2850_v54, %v8079_v41  ;;  %v2852_v21 = vpop.f32.mrb[42].mxu1  ;;  %v2893_v23 = vpop.f32.mrb[42].mxu0  ;;  %v6122_v61 = vadd.f32 %v2891_v55, %v8087_v33  ;;  %v8980_v54 = vld [vmem:[#allocation5 + $0x8] ss:$16 sps:$4 sm:$0xff]   ;;  %v8997_v55 = vld [vmem:[#allocation5 + $0x6c] ss:$16 sps:$4 sm:$0xff]  }
0x1273   :  { %v2900_v56 = vmul.f32 0.5, %v6119_v8  ;;  %v2853_v60 = vpop.f32.mrb[43].mxu1  ;;  %v2894_v62 = vpop.f32.mrb[43].mxu0  ;;  %v9003_v21 = vld [vmem:[#allocation5 + $0x8c] ss:$16 sps:$4 sm:$0xff]  }
0x1274   :  { %v2904_v1 = vmul.f32 0.5, %v6120_v19  ;;  %v2909_v7 = vmul.f32 0.5, %v6122_v61  ;;  %v9000_v19 = vld [vmem:[#allocation5 + $0x68] ss:$16 sps:$4 sm:$0xff]   ;;  %v9015_v62 = vld [vmem:[#allocation5 + $0xcc] ss:$16 sps:$4 sm:$0xff]  }
0x1275   :  { %6571 = vtanh.f32 %v2900_v56  ;;  %v9006_v23 = vld [vmem:[#allocation5 + $0x88] ss:$16 sps:$4 sm:$0xff]   ;;  %v9009_v56 = vld [vmem:[#allocation5 + $0xac] ss:$16 sps:$4 sm:$0xff]  }
0x1276   :  { %6573 = vtanh.f32 %v2904_v1  ;;  %v9012_v60 = vld [vmem:[#allocation5 + $0xa8] ss:$16 sps:$4 sm:$0xff]  }
0x1277   :  { %6575 = vtanh.f32 %v6121_v5  ;;  %v9018_v1 = vld [vmem:[#allocation5 + $0xc8] ss:$16 sps:$4 sm:$0xff]   ;;  %v9021_v5 = vld [vmem:[#allocation5 + $0xec] ss:$16 sps:$4 sm:$0xff]  }
0x1278   :  { %6577 = vtanh.f32 %v2909_v7  ;;  %v9024_v61 = vld [vmem:[#allocation5 + $0xe8] ss:$16 sps:$4 sm:$0xff]   ;;  %v9027_v7 = vld [vmem:[#allocation7 + $0xc] ss:$16 sps:$4 sm:$0xff]  }
0x127f   :  { %v6572_v25 = vpop.eup %6571 }
0x1280   :  { %v6574_v22 = vpop.eup %6573  ;;  %v2902_v16 = vmul.f32 0.5, %v6572_v25  ;;  %v9031_v25 = vld [vmem:[#allocation7 + $0x8] ss:$16 sps:$4 sm:$0xff]  }
0x1281   :  { %v2906_v11 = vmul.f32 0.5, %v6574_v22  ;;  %v6576_v53 = vpop.eup %6575  ;;  %v9035_v22 = vld [vmem:[#allocation7 + $0x2c] ss:$16 sps:$4 sm:$0xff]  }
0x1282   :  { %v2903_v45 = vadd.f32 0.5, %v2902_v16  ;;  %v6578_v30 = vpop.eup %6577  ;;  %v9038_v16 = vld [vmem:[#allocation7 + $0x28] ss:$16 sps:$4 sm:$0xff]  }
0x1283   :  { %v2907_v18 = vadd.f32 0.5, %v2906_v11  ;;  %v2911_v4 = vmul.f32 0.5, %v6578_v30  ;;  %v9041_v11 = vld [vmem:[#allocation7 + $0x4c] ss:$16 sps:$4 sm:$0xff]  }
0x1284   :  { %v2914_v20 = vmul.f32 %v6576_v53, %v2903_v45  ;;  %v9044_v45 = vld [vmem:[#allocation7 + $0x48] ss:$16 sps:$4 sm:$0xff]   ;;  %v9047_v53 = vld [vmem:[#allocation7 + $0x6c] ss:$16 sps:$4 sm:$0xff]  }
0x1285   :  { %v2913_v3 = vmul.f32 %v2907_v18, %v8725_v35  ;;  %v2912_v24 = vadd.f32 0.5, %v2911_v4  ;;  %v8974_v35 = vld [vmem:[#allocation5 + $0xc] ss:$16 sps:$4 sm:$0xff]   ;;  %10765 = vst [vmem:[#allocation36_spill] sm:$0xff] %v9047_v53  ;;  %v9050_v18 = vld [vmem:[#allocation7 + $0x68] ss:$16 sps:$4 sm:$0xff]  }
0x1286   :  { %10766 = vst [vmem:[#allocation37_spill] sm:$0xff] %v9050_v18  ;;  %v9059_v30 = vld [vmem:[#allocation7 + $0xac] ss:$16 sps:$4 sm:$0xff]   ;;  %v9062_v4 = vld [vmem:[#allocation7 + $0xa8] ss:$16 sps:$4 sm:$0xff]  }
0x1287   :  { %v8963_v31 = vadd.f32 %v2914_v20, %v2913_v3  ;;  %v9053_v20 = vld [vmem:[#allocation7 + $0x8c] ss:$16 sps:$4 sm:$0xff]   ;;  %v9056_v3 = vld [vmem:[#allocation7 + $0x88] ss:$16 sps:$4 sm:$0xff]   ;;  %10769 = vst [vmem:[#allocation40_spill] sm:$0xff] %v9059_v30  ;;  %10770 = vst [vmem:[#allocation41_spill] sm:$0xff] %v9062_v4 }
0x1288   :  { %10767 = vst [vmem:[#allocation38_spill] sm:$0xff] %v9053_v20  ;;  %10768 = vst [vmem:[#allocation39_spill] sm:$0xff] %v9056_v3 }
0x1289   :  { %6579 = vtanh.f32 %v8963_v31 }
0x1293   :  { %v6580_v40 = vpop.eup %6579 }
0x1294   :  { %v8966_v38 = vmul.f32 %v6580_v40, %v2912_v24  ;;  %v9068_v24 = vld [vmem:[#allocation7 + $0xc8] ss:$16 sps:$4 sm:$0xff]  }
0x1295   :  { %10772 = vst [vmem:[#allocation43_spill] sm:$0xff] %v9068_v24  ;;  %v9074_v40 = vld [vmem:[#allocation7 + $0xe8] ss:$16 sps:$4 sm:$0xff]  }
0x1296   :  { %v2921_v9 = vmul.f32 %v2920_v26, %v8966_v38  ;;  %v9071_v26 = vld [vmem:[#allocation7 + $0xec] ss:$16 sps:$4 sm:$0xff]   ;;  %10774 = vst [vmem:[#allocation45_spill] sm:$0xff] %v9074_v40 }
0x1297   :  { %10773 = vst [vmem:[#allocation44_spill] sm:$0xff] %v9071_v26 }
0x1298   :  { %v2922_v52 = vpack.c.bf16 %v2921_v9, %v2921_v9  ;;  %v9077_v9 = vld [vmem:[#allocation8 + $0xc] ss:$16 sps:$4 sm:$0xff]  }
0x1299   :  { %10775 = vst [vmem:[#allocation46_spill] sm:$0xff] %v9077_v9 }
0x129a   :  { %5881 = vmatmul.mubr.bf16.vlgmr.msra.gmra.mrb[44].mxu1 %v2922_v52 }
0x129b   :  { %5885 = vmatpush3.bf16.msra.mxu1 %v8731_v2  ;;  %5888 = vmatprep.mubr.msk.bf16.mxu1 %vm7460_vm0, %v10577_v13  ;;  %v8984_v2 = vld [vmem:[#allocation5 + $0x2c] ss:$16 sps:$4 sm:$0xff]  }
0x129c   :  { %5886 = vmatprep.subr.bf16.mxu1 %v10577_v13 }
0x129f   :  { %5887 = vmatpush3.bf16.msra.mxu1 %v8737_v12  ;;  %v8988_v12 = vld [vmem:[#allocation5 + $0x28] ss:$16 sps:$4 sm:$0xff]  }
0x12a0   :  { %3186 = vmatprep.subr.bf16.mxu1 %v8974_v35 }
0x12a2   :  { %v2595_v44 = vpop.permute.xlu1 %2594 }
0x12a3   :  { %v2597_v46 = vmul.f32 %v2595_v44, %v8940_v63  ;;  %v8991_v63 = vld [vmem:[#allocation5 + $0x4c] ss:$16 sps:$4 sm:$0xff]  }
0x12a5   :  { %v3073_v8 = vpack.c.bf16 %v2597_v46, %v2597_v46 }
0x12a6   :  { %5889 = vmatmul.mubr.msk.bf16.vlgmr.msra.gmra.mrb[44].mxu1 %vm1299_vm1, %v8797_v0  ;;  %v8994_v0 = vld [vmem:[#allocation5 + $0x48] ss:$16 sps:$4 sm:$0xff]  }
0x12a7   :  { %3187 = vmatpush1.bf16.msra.mxu1 %v8980_v54  ;;  %3075 = vrot.lane.b32.xlu1 %v3073_v8, %s7461_s14 }
0x12a8   :  { %3188 = vmatprep.subr.bf16.mxu1 %v8984_v2  ;;  %3218 = vmatprep.mubr.bf16.mxu1 %v10545_v57 }
0x12ab   :  { %3189 = vmatpush1.bf16.msra.mxu1 %v8988_v12 }
0x12ac   :  { %3190 = vmatprep.subr.bf16.mxu1 %v8991_v63 }
0x12af   :  { %3191 = vmatpush1.bf16.msra.mxu1 %v8994_v0 }
0x12b0   :  { %3192 = vmatprep.subr.bf16.mxu1 %v8997_v55 }
0x12b3   :  { %3193 = vmatpush1.bf16.msra.mxu1 %v9000_v19 }
0x12b4   :  { %3194 = vmatprep.subr.bf16.mxu1 %v9003_v21 }
0x12b7   :  { %3195 = vmatpush1.bf16.msra.mxu1 %v9006_v23 }
0x12b8   :  { %3196 = vmatprep.subr.bf16.mxu1 %v9009_v56 }
0x12bb   :  { %3197 = vmatpush1.bf16.msra.mxu1 %v9012_v60 }
0x12bc   :  { %3198 = vmatprep.subr.bf16.mxu1 %v9015_v62 }
0x12bf   :  { %3199 = vmatpush1.bf16.msra.mxu1 %v9018_v1 }
0x12c0   :  { %3200 = vmatprep.subr.bf16.mxu1 %v9021_v5 }
0x12c3   :  { %3201 = vmatpush1.bf16.msra.mxu1 %v9024_v61 }
0x12c4   :  { %3317 = vmatprep.subr.bf16.mxu1 %v9027_v7 }
0x12c6   :  { %3219 = vmatmul.mubr.bf16.vlgmr.msra.gmra.mrb[48].mxu1 %v8879_v42 }
0x12c7   :  { %3318 = vmatpush1.bf16.msra.mxu1 %v9031_v25  ;;  %3349 = vmatprep.mubr.bf16.mxu1 %v10545_v57 }
0x12c8   :  { %3319 = vmatprep.subr.bf16.mxu1 %v9035_v22 }
0x12cb   :  { %3320 = vmatpush1.bf16.msra.mxu1 %v9038_v16 }
0x12cc   :  { %3321 = vmatprep.subr.bf16.mxu1 %v9041_v11 }
0x12cf   :  { %3322 = vmatpush1.bf16.msra.mxu1 %v9044_v45 }
0x12d0   :  { %3323 = vmatprep.subr.bf16.mxu1 %v9047_v53 }
0x12d3   :  { %3324 = vmatpush1.bf16.msra.mxu1 %v9050_v18 }
0x12d4   :  { %3325 = vmatprep.subr.bf16.mxu1 %v9053_v20 }
0x12d7   :  { %3326 = vmatpush1.bf16.msra.mxu1 %v9056_v3 }
0x12d8   :  { %3327 = vmatprep.subr.bf16.mxu1 %v9059_v30 }
0x12db   :  { %3328 = vmatpush1.bf16.msra.mxu1 %v9062_v4 }
0x12dc   :  { %3329 = vmatprep.subr.bf16.mxu1 %v9065_v6 }
0x12df   :  { %3330 = vmatpush1.bf16.msra.mxu1 %v9068_v24 }
0x12e0   :  { %3331 = vmatprep.subr.bf16.mxu1 %v9071_v26 }
0x12e3   :  { %3332 = vmatpush1.bf16.msra.mxu1 %v9074_v40  ;;  %v9185_v40 = vld [vmem:[#allocation7 + $0xe0] ss:$16 sps:$4 sm:$0xff]  }
0x12e4   :  { %3400 = vmatprep.subr.bf16.mxu1 %v9077_v9  ;;  %10792 = vst [vmem:[#allocation63_spill] sm:$0xff] %v9185_v40 }
0x1379   :  { %v2997_v52 = vpop.f32.mrb[44].mxu1 }
0x137a   :  { %v6123_v44 = vadd.f32 %v8780_v27, %v2997_v52  ;;  %v5890_v46 = vpop.f32.mrb[45].mxu1 }
0x137b   :  { %v3000_v8 = vpop.f32.mrb[46].mxu1 }
0x137c   :  { %6581 = vtanh.f32 %v6123_v44  ;;  %v5891_v6 = vpop.f32.mrb[47].mxu1  ;;  %v3004_v9 = vmul.f32 0.5, %v6123_v44  ;;  %v9149_v44 = vld [vmem:[#allocation7 + $0x20] ss:$16 sps:$4 sm:$0xff]  }
0x137d   :  { %10780 = vst [vmem:[#allocation51_spill] sm:$0xff] %v9149_v44 }
0x137e   :  { %6583 = vtanh.f32 %v3004_v9 }
0x1386   :  { %v6582_v24 = vpop.eup %6581 }
0x1387   :  { %3011 = vrot.lane.b32.xlu0 %v6582_v24, %s7440_s3 }
0x1388   :  { %v6584_v20 = vpop.eup %6583 }
0x1389   :  { %v3006_v27 = vmul.f32 0.5, %v6584_v20 }
0x138b   :  { %v3007_v52 = vadd.f32 0.5, %v3006_v27  ;;  %v9152_v27 = vld [vmem:[#allocation7 + $0x44] ss:$16 sps:$4 sm:$0xff]  }
0x138c   :  { %10781 = vst [vmem:[#allocation52_spill] sm:$0xff] %v9152_v27 }
0x138d   :  { %v3009_v6 = vmul.f32 %v3007_v52, %v8792_v28  ;;  %v3076_v28 = vpop.permute.xlu1 %3075 }
0x1399   :  { %v9082_v4 = vpop.f32.mrb[48].mxu1 }
0x139a   :  { %v9084_v26 = vpop.f32.mrb[49].mxu1 }
0x139b   :  { %v3224_v30 = vpop.f32.mrb[50].mxu1 }
0x139c   :  { %v3225_v3 = vpop.f32.mrb[51].mxu1 }
0x13f9   :  { %v3012_v46 = vpop.permute.xlu0 %3011 }
0x13fa   :  { %v3014_v8 = vmul.f32 %v3012_v46, %v3007_v52  ;;  %v9161_v46 = vld [vmem:[#allocation7 + $0x60] ss:$16 sps:$4 sm:$0xff]  }
0x13fb   :  { %10784 = vst [vmem:[#allocation55_spill] sm:$0xff] %v9161_v46 }
0x13fc   :  { %3016 = vrot.lane.b32.xlu0 %v3014_v8, %s7461_s14  ;;  %v9164_v8 = vld [vmem:[#allocation7 + $0x84] ss:$16 sps:$4 sm:$0xff]  }
0x13fd   :  { %10785 = vst [vmem:[#allocation56_spill] sm:$0xff] %v9164_v8 }
0x146e   :  { %v3017_v24 = vpop.permute.xlu0 %3016 }
0x146f   :  { %v9090_v18 = vadd.f32 %v3017_v24, %v3009_v6  ;;  %v9167_v6 = vld [vmem:[#allocation7 + $0x80] ss:$16 sps:$4 sm:$0xff]   ;;  %v9170_v24 = vld [vmem:[#allocation7 + $0xa4] ss:$16 sps:$4 sm:$0xff]  }
0x1470   :  { %10786 = vst [vmem:[#allocation57_spill] sm:$0xff] %v9167_v6  ;;  %10787 = vst [vmem:[#allocation58_spill] sm:$0xff] %v9170_v24 }
0x1471   :  { %6585 = vtanh.f32 %v9090_v18 }
0x147b   :  { %v6586_v53 = vpop.eup %6585 }
0x147c   :  { %3022 = vrot.lane.b32.xlu0 %v6586_v53, %s7440_s3  ;;  %v9146_v53 = vld [vmem:[#allocation7 + $0x24] ss:$16 sps:$4 sm:$0xff]  }
0x147d   :  { %10779 = vst [vmem:[#allocation50_spill] sm:$0xff] %v9146_v53 }
0x14ee   :  { %v3023_v3 = vpop.permute.xlu0 %3022 }
0x14ef   :  { %v3025_v30 = vmul.f32 %v3023_v3, %v3007_v52  ;;  %v9155_v52 = vld [vmem:[#allocation7 + $0x40] ss:$16 sps:$4 sm:$0xff]  }
0x14f0   :  { %10782 = vst [vmem:[#allocation53_spill] sm:$0xff] %v9155_v52  ;;  %v9173_v3 = vld [vmem:[#allocation7 + $0xa0] ss:$16 sps:$4 sm:$0xff]  }
0x14f1   :  { %v3026_v9 = vpack.c.bf16 %v3025_v30, %v3025_v30  ;;  %10788 = vst [vmem:[#allocation59_spill] sm:$0xff] %v9173_v3  ;;  %v9176_v30 = vld [vmem:[#allocation7 + $0xc4] ss:$16 sps:$4 sm:$0xff]  }
0x14f2   :  { %10789 = vst [vmem:[#allocation60_spill] sm:$0xff] %v9176_v30 }
0x14f3   :  { %3028 = vrot.lane.b32.xlu0 %v3026_v9, %s7461_s14  ;;  %v9179_v9 = vld [vmem:[#allocation7 + $0xc0] ss:$16 sps:$4 sm:$0xff]  }
0x14f4   :  { %10790 = vst [vmem:[#allocation61_spill] sm:$0xff] %v9179_v9 }
0x1565   :  { %v9095_v20 = vpop.permute.xlu0 %3028 }
0x1566   :  { %5897 = vmatmul.mubr.msk.bf16.vlgmr.msra.gmra.mrb[44].mxu0 %vm1299_vm1, %v9095_v20 }
0x1567   :  { %5901 = vmatpush3.bf16.msra.mxu0 %v8801_v50  ;;  %5904 = vmatprep.mubr.msk.bf16.mxu0 %vm7460_vm0, %v10577_v13  ;;  %v9114_v50 = vld [vmem:[#allocation5 + $0x84] ss:$16 sps:$4 sm:$0xff]  }
0x1568   :  { %5902 = vmatprep.subr.bf16.mxu0 %v10577_v13 }
0x156b   :  { %5903 = vmatpush3.bf16.msra.mxu0 %v8807_v10  ;;  %v9117_v10 = vld [vmem:[#allocation5 + $0x80] ss:$16 sps:$4 sm:$0xff]  }
0x156c   :  { %3145 = vmatprep.subr.bf16.mxu0 %v8810_v43  ;;  %v9120_v43 = vld [vmem:[#allocation5 + $0xa4] ss:$16 sps:$4 sm:$0xff]  }
0x1572   :  { %5905 = vmatmul.mubr.msk.bf16.vlgmr.msra.gmra.mrb[44].mxu0 %vm1299_vm1, %v3076_v28  ;;  %v9182_v28 = vld [vmem:[#allocation7 + $0xe4] ss:$16 sps:$4 sm:$0xff]  }
0x1573   :  { %3146 = vmatpush1.bf16.msra.mxu0 %v8814_v47  ;;  %3177 = vmatprep.mubr.bf16.mxu0 %v10545_v57  ;;  %v9123_v47 = vld [vmem:[#allocation5 + $0xa0] ss:$16 sps:$4 sm:$0xff]   ;;  %10791 = vst [vmem:[#allocation62_spill] sm:$0xff] %v9182_v28 }
0x1574   :  { %3147 = vmatprep.subr.bf16.mxu0 %v8818_v39  ;;  %v9126_v39 = vld [vmem:[#allocation5 + $0xc4] ss:$16 sps:$4 sm:$0xff]  }
0x1577   :  { %3148 = vmatpush1.bf16.msra.mxu0 %v8821_v37  ;;  %v9129_v37 = vld [vmem:[#allocation5 + $0xc0] ss:$16 sps:$4 sm:$0xff]  }
0x1578   :  { %3149 = vmatprep.subr.bf16.mxu0 %v8824_v14  ;;  %v9132_v14 = vld [vmem:[#allocation5 + $0xe4] ss:$16 sps:$4 sm:$0xff]  }
0x157b   :  { %3150 = vmatpush1.bf16.msra.mxu0 %v8827_v58  ;;  %v9135_v58 = vld [vmem:[#allocation5 + $0xe0] ss:$16 sps:$4 sm:$0xff]  }
0x157c   :  { %3151 = vmatprep.subr.bf16.mxu0 %v8830_v59  ;;  %10776 = vst [vmem:[#allocation47_spill] sm:$0xff] %v9135_v58  ;;  %v9138_v59 = vld [vmem:[#allocation7 + $0x4] ss:$16 sps:$4 sm:$0xff]  }
0x157d   :  { %10777 = vst [vmem:[#allocation48_spill] sm:$0xff] %v9138_v59 }
0x157f   :  { %3152 = vmatpush1.bf16.msra.mxu0 %v8833_v17  ;;  %v9142_v17 = vld [vmem:[#allocation7] ss:$16 sps:$4 sm:$0xff]  }
0x1580   :  { %3153 = vmatprep.subr.bf16.mxu0 %v9114_v50  ;;  %10778 = vst [vmem:[#allocation49_spill] sm:$0xff] %v9142_v17 }
0x1583   :  { %3154 = vmatpush1.bf16.msra.mxu0 %v9117_v10 }
0x1584   :  { %3155 = vmatprep.subr.bf16.mxu0 %v9120_v43 }
0x1587   :  { %3156 = vmatpush1.bf16.msra.mxu0 %v9123_v47 }
0x1588   :  { %3157 = vmatprep.subr.bf16.mxu0 %v9126_v39 }
0x158b   :  { %3158 = vmatpush1.bf16.msra.mxu0 %v9129_v37 }
0x158c   :  { %3159 = vmatprep.subr.bf16.mxu0 %v9132_v14 }
0x158f   :  { %3160 = vmatpush1.bf16.msra.mxu0 %v9135_v58 }
0x1590   :  { %3276 = vmatprep.subr.bf16.mxu0 %v9138_v59 }
0x1592   :  { %3178 = vmatmul.mubr.bf16.vlgmr.msra.gmra.mrb[48].mxu0 %v8879_v42  ;;  %v9158_v42 = vld [vmem:[#allocation7 + $0x64] ss:$16 sps:$4 sm:$0xff]  }
0x1593   :  { %3277 = vmatpush1.bf16.msra.mxu0 %v9142_v17  ;;  %3308 = vmatprep.mubr.bf16.mxu0 %v10545_v57  ;;  %10783 = vst [vmem:[#allocation54_spill] sm:$0xff] %v9158_v42 }
0x1594   :  { %3278 = vmatprep.subr.bf16.mxu0 %v9146_v53 }
0x1597   :  { %3279 = vmatpush1.bf16.msra.mxu0 %v9149_v44 }
0x1598   :  { %3280 = vmatprep.subr.bf16.mxu0 %v9152_v27 }
0x159b   :  { %3281 = vmatpush1.bf16.msra.mxu0 %v9155_v52 }
0x159c   :  { %3282 = vmatprep.subr.bf16.mxu0 %v9158_v42 }
0x159f   :  { %3283 = vmatpush1.bf16.msra.mxu0 %v9161_v46 }
0x15a0   :  { %3284 = vmatprep.subr.bf16.mxu0 %v9164_v8 }
0x15a3   :  { %3285 = vmatpush1.bf16.msra.mxu0 %v9167_v6 }
0x15a4   :  { %3286 = vmatprep.subr.bf16.mxu0 %v9170_v24  ;;  %v9188_v24 = vld [vmem:[#allocation8 + $0x4] ss:$16 sps:$4 sm:$0xff]  }
0x15a5   :  { %10793 = vst [vmem:[#allocation64_spill] sm:$0xff] %v9188_v24 }
0x15a7   :  { %3287 = vmatpush1.bf16.msra.mxu0 %v9173_v3 }
0x15a8   :  { %3288 = vmatprep.subr.bf16.mxu0 %v9176_v30 }
0x15ab   :  { %3289 = vmatpush1.bf16.msra.mxu0 %v9179_v9 }
0x15ac   :  { %3290 = vmatprep.subr.bf16.mxu0 %v9182_v28 }
0x15af   :  { %3291 = vmatpush1.bf16.msra.mxu0 %v9185_v40 }
0x15b0   :  { %3359 = vmatprep.subr.bf16.mxu0 %v9188_v24  ;;  %v10794_v24 = vcombine.low %v9082_v4, %v9084_v26 }
0x15b2   :  { %v3246_v44 = vrot.slane %v10794_v24, %v10596_v36 }
0x1645   :  { %v3114_v3 = vpop.f32.mrb[44].mxu0 }
0x1646   :  { %v9192_v6 = vadd.f32 %v8863_v34, %v3114_v3  ;;  %v5906_v30 = vpop.f32.mrb[45].mxu0  ;;  %v3144_v3 = vld [vmem:[#allocation2 + $0x20] sm:$0xff] }
0x1647   :  { %v3117_v8 = vpop.f32.mrb[46].mxu0 }
0x1648   :  { %6587 = vtanh.f32 %v9192_v6  ;;  %v5907_v9 = vpop.f32.mrb[47].mxu0 }
0x1652   :  { %v6588_v46 = vpop.eup %6587 }
0x1653   :  { %3128 = vrot.lane.b32.xlu1 %v6588_v46, %s7440_s3 }
0x1665   :  { %v3179_v28 = vpop.f32.mrb[48].mxu0 }
0x1666   :  { %v3181_v42 = vpop.f32.mrb[49].mxu0 }
0x1667   :  { %v3231_v52 = vcombine.low %v3179_v28, %v3181_v42  ;;  %v3183_v40 = vpop.f32.mrb[50].mxu0 }
0x1668   :  { %v3184_v27 = vpop.f32.mrb[51].mxu0 }
0x1669   :  { %v3239_v34 = vrot.slane %v3231_v52, %v10596_v36 }
0x166b   :  { %v3247_v8 = vcombine.low %v3239_v34, %v3246_v44 }
0x166d   :  { %v3249_v30 = vadd.f32 %v3247_v8, %v3144_v3 }
0x166f   :  { %v3250_v53 = vmul.f32 0.5, %v3249_v30  ;;  %v3255_v9 = vrot.slane %v3249_v30, 2  ;;  %v3261_v46 = vrot.slane %v3249_v30, 4  ;;  %v3264_v59 = vrot.slane %v3249_v30, 6 }
0x1671   :  { %6589 = vtanh.f32 %v3250_v53  ;;  %v3257_v17 = vmul.f32 0.5, %v3255_v9  ;;  %v3266_v40 = vmul.f32 0.5, %v3264_v59  ;;  %v9209_v9 = vld [vmem:[#allocation8] ss:$16 sps:$4 sm:$0xff]  }
0x1673   :  { %6591 = vtanh.f32 %v3257_v17 }
0x1674   :  { %6593 = vtanh.f32 %v3261_v46  ;;  %v9218_v46 = vld [vmem:[#allocation8 + $0x2c] ss:$16 sps:$4 sm:$0xff]  }
0x1675   :  { %6595 = vtanh.f32 %v3266_v40  ;;  %v9223_v40 = vld [vmem:[#allocation8 + $0x20] ss:$16 sps:$4 sm:$0xff]  }
0x167b   :  { %v6590_v27 = vpop.eup %6589 }
0x167c   :  { %v3252_v42 = vmul.f32 0.5, %v6590_v27  ;;  %v9226_v27 = vld [vmem:[#allocation8 + $0x28] ss:$16 sps:$4 sm:$0xff]  }
0x167d   :  { %v6592_v28 = vpop.eup %6591  ;;  %10795 = vst [vmem:[#allocation65_spill] sm:$0xff] %v9226_v27 }
0x167e   :  { %v3253_v58 = vadd.f32 0.5, %v3252_v42  ;;  %v3259_v4 = vmul.f32 0.5, %v6592_v28  ;;  %v6594_v52 = vpop.eup %6593  ;;  %v9229_v42 = vld [vmem:[#allocation8 + $0x44] ss:$16 sps:$4 sm:$0xff]   ;;  %v9232_v28 = vld [vmem:[#allocation8 + $0x4c] ss:$16 sps:$4 sm:$0xff]  }
0x167f   :  { %v6596_v17 = vpop.eup %6595  ;;  %10796 = vst [vmem:[#allocation66_spill] sm:$0xff] %v9229_v42  ;;  %10797 = vst [vmem:[#allocation67_spill] sm:$0xff] %v9232_v28 }
0x1680   :  { %v3260_v26 = vadd.f32 0.5, %v3259_v4  ;;  %v3271_v24 = vmul.f32 %v6594_v52, %v3253_v58  ;;  %v3268_v53 = vmul.f32 0.5, %v6596_v17  ;;  %v9215_v58 = vld [vmem:[#allocation8 + $0x24] ss:$16 sps:$4 sm:$0xff]   ;;  %v9235_v4 = vld [vmem:[#allocation8 + $0x40] ss:$16 sps:$4 sm:$0xff]  }
0x1681   :  { %10798 = vst [vmem:[#allocation68_spill] sm:$0xff] %v9235_v4  ;;  %v9241_v52 = vld [vmem:[#allocation8 + $0x64] ss:$16 sps:$4 sm:$0xff]   ;;  %v9250_v17 = vld [vmem:[#allocation8 + $0x68] ss:$16 sps:$4 sm:$0xff]  }
0x1682   :  { %v3270_v44 = vmul.f32 %v3260_v26, %v8876_v29  ;;  %v3269_v3 = vadd.f32 0.5, %v3268_v53  ;;  %v9212_v29 = vld [vmem:[#allocation8 + $0x8] ss:$16 sps:$4 sm:$0xff]   ;;  %10800 = vst [vmem:[#allocation70_spill] sm:$0xff] %v9241_v52  ;;  %10803 = vst [vmem:[#allocation73_spill] sm:$0xff] %v9250_v17 }
0x1683   :  { %v9238_v26 = vld [vmem:[#allocation8 + $0x48] ss:$16 sps:$4 sm:$0xff]   ;;  %v9253_v53 = vld [vmem:[#allocation8 + $0x84] ss:$16 sps:$4 sm:$0xff]  }
0x1684   :  { %v9202_v34 = vadd.f32 %v3271_v24, %v3270_v44  ;;  %10799 = vst [vmem:[#allocation69_spill] sm:$0xff] %v9238_v26  ;;  %v9244_v44 = vld [vmem:[#allocation8 + $0x6c] ss:$16 sps:$4 sm:$0xff]   ;;  %v9247_v24 = vld [vmem:[#allocation8 + $0x60] ss:$16 sps:$4 sm:$0xff]   ;;  %10804 = vst [vmem:[#allocation74_spill] sm:$0xff] %v9253_v53 }
0x1685   :  { %10801 = vst [vmem:[#allocation71_spill] sm:$0xff] %v9244_v44  ;;  %10802 = vst [vmem:[#allocation72_spill] sm:$0xff] %v9247_v24 }
0x1686   :  { %6597 = vtanh.f32 %v9202_v34 }
0x1690   :  { %v6598_v8 = vpop.eup %6597 }
0x1691   :  { %v3274_v59 = vmul.f32 %v6598_v8, %v3269_v3  ;;  %v9256_v3 = vld [vmem:[#allocation8 + $0x8c] ss:$16 sps:$4 sm:$0xff]   ;;  %v9259_v8 = vld [vmem:[#allocation8 + $0x80] ss:$16 sps:$4 sm:$0xff]  }
0x1692   :  { %10805 = vst [vmem:[#allocation75_spill] sm:$0xff] %v9256_v3  ;;  %10806 = vst [vmem:[#allocation76_spill] sm:$0xff] %v9259_v8 }
0x1693   :  { %v9205_v30 = vpack.c.bf16 %v3274_v59, %v3274_v59  ;;  %v9262_v59 = vld [vmem:[#allocation8 + $0x88] ss:$16 sps:$4 sm:$0xff]  }
0x1694   :  { %10807 = vst [vmem:[#allocation77_spill] sm:$0xff] %v9262_v59 }
0x1695   :  { %3309 = vmatmul.mubr.bf16.vlgmr.msra.gmra.mrb[52].mxu0 %v9205_v30  ;;  %3350 = vmatmul.mubr.bf16.vlgmr.msra.gmra.mrb[52].mxu1 %v9205_v30 }
0x1696   :  { %3360 = vmatpush1.bf16.msra.mxu0 %v9209_v9  ;;  %3401 = vmatpush1.bf16.msra.mxu1 %v9212_v29 }
0x1697   :  { %3361 = vmatprep.subr.bf16.mxu0 %v9215_v58  ;;  %3402 = vmatprep.subr.bf16.mxu1 %v9218_v46 }
0x1698   :  { %3391 = vmatprep.mubr.bf16.mxu0 %v10545_v57  ;;  %3432 = vmatprep.mubr.bf16.mxu1 %v10545_v57 }
0x169a   :  { %3362 = vmatpush1.bf16.msra.mxu0 %v9223_v40  ;;  %3403 = vmatpush1.bf16.msra.mxu1 %v9226_v27 }
0x169b   :  { %3363 = vmatprep.subr.bf16.mxu0 %v9229_v42  ;;  %3404 = vmatprep.subr.bf16.mxu1 %v9232_v28 }
0x169e   :  { %3364 = vmatpush1.bf16.msra.mxu0 %v9235_v4  ;;  %3405 = vmatpush1.bf16.msra.mxu1 %v9238_v26 }
0x169f   :  { %3365 = vmatprep.subr.bf16.mxu0 %v9241_v52  ;;  %3406 = vmatprep.subr.bf16.mxu1 %v9244_v44  ;;  %v9290_v44 = vld [vmem:[#allocation8 + $0xe4] ss:$16 sps:$4 sm:$0xff]  }
0x16a0   :  { %10816 = vst [vmem:[#allocation86_spill] sm:$0xff] %v9290_v44 }
0x16a2   :  { %3366 = vmatpush1.bf16.msra.mxu0 %v9247_v24  ;;  %3407 = vmatpush1.bf16.msra.mxu1 %v9250_v17  ;;  %v9265_v24 = vld [vmem:[#allocation8 + $0xa4] ss:$16 sps:$4 sm:$0xff]   ;;  %v9268_v17 = vld [vmem:[#allocation8 + $0xac] ss:$16 sps:$4 sm:$0xff]  }
0x16a3   :  { %3367 = vmatprep.subr.bf16.mxu0 %v9253_v53  ;;  %3408 = vmatprep.subr.bf16.mxu1 %v9256_v3  ;;  %10808 = vst [vmem:[#allocation78_spill] sm:$0xff] %v9265_v24  ;;  %10809 = vst [vmem:[#allocation79_spill] sm:$0xff] %v9268_v17  ;;  %v9271_v53 = vld [vmem:[#allocation8 + $0xa0] ss:$16 sps:$4 sm:$0xff]   ;;  %v9274_v3 = vld [vmem:[#allocation8 + $0xa8] ss:$16 sps:$4 sm:$0xff]  }
0x16a4   :  { %10810 = vst [vmem:[#allocation80_spill] sm:$0xff] %v9271_v53  ;;  %10811 = vst [vmem:[#allocation81_spill] sm:$0xff] %v9274_v3 }
0x16a6   :  { %3368 = vmatpush1.bf16.msra.mxu0 %v9259_v8  ;;  %3409 = vmatpush1.bf16.msra.mxu1 %v9262_v59  ;;  %v9277_v8 = vld [vmem:[#allocation8 + $0xc4] ss:$16 sps:$4 sm:$0xff]   ;;  %v9280_v59 = vld [vmem:[#allocation8 + $0xcc] ss:$16 sps:$4 sm:$0xff]  }
0x16a7   :  { %3369 = vmatprep.subr.bf16.mxu0 %v9265_v24  ;;  %3410 = vmatprep.subr.bf16.mxu1 %v9268_v17  ;;  %10812 = vst [vmem:[#allocation82_spill] sm:$0xff] %v9277_v8  ;;  %10813 = vst [vmem:[#allocation83_spill] sm:$0xff] %v9280_v59  ;;  %v9283_v24 = vld [vmem:[#allocation8 + $0xc0] ss:$16 sps:$4 sm:$0xff]   ;;  %v9286_v17 = vld [vmem:[#allocation8 + $0xc8] ss:$16 sps:$4 sm:$0xff]  }
0x16a8   :  { %10814 = vst [vmem:[#allocation84_spill] sm:$0xff] %v9283_v24  ;;  %10815 = vst [vmem:[#allocation85_spill] sm:$0xff] %v9286_v17 }
0x16aa   :  { %3370 = vmatpush1.bf16.msra.mxu0 %v9271_v53  ;;  %3411 = vmatpush1.bf16.msra.mxu1 %v9274_v3  ;;  %v3121_v53 = vmul.f32 0.5, %v9192_v6  ;;  %v9293_v3 = vld [vmem:[#allocation8 + $0xec] ss:$16 sps:$4 sm:$0xff]   ;;  %v3358_v6 = vpack.c.bf16 %v8966_v38, %v8966_v38 }
0x16ab   :  { %3371 = vmatprep.subr.bf16.mxu0 %v9277_v8  ;;  %3412 = vmatprep.subr.bf16.mxu1 %v9280_v59  ;;  %10817 = vst [vmem:[#allocation87_spill] sm:$0xff] %v9293_v3  ;;  %v9296_v8 = vld [vmem:[#allocation8 + $0xe0] ss:$16 sps:$4 sm:$0xff]   ;;  %v9299_v59 = vld [vmem:[#allocation8 + $0xe8] ss:$16 sps:$4 sm:$0xff]  }
0x16ac   :  { %10818 = vst [vmem:[#allocation88_spill] sm:$0xff] %v9296_v8  ;;  %10819 = vst [vmem:[#allocation89_spill] sm:$0xff] %v9299_v59  ;;  %6599 = vtanh.f32 %v3121_v53  ;;  %v9316_v38 = vld [vmem:[#allocation11 + $0x8] sm:$0xff]  }
0x16ad   :  { %10821 = vst [vmem:[#allocation91_spill] sm:$0xff] %v9316_v38 }
0x16ae   :  { %3372 = vmatpush1.bf16.msra.mxu0 %v9283_v24  ;;  %3413 = vmatpush1.bf16.msra.mxu1 %v9286_v17 }
0x16af   :  { %3373 = vmatprep.subr.bf16.mxu0 %v9290_v44  ;;  %3414 = vmatprep.subr.bf16.mxu1 %v9293_v3  ;;  %v9306_v44 = vld [vmem:[#allocation11] sm:$0xff]  }
0x16b0   :  { %10820 = vst [vmem:[#allocation90_spill] sm:$0xff] %v9306_v44 }
0x16b2   :  { %3374 = vmatpush1.bf16.msra.mxu0 %v9296_v8  ;;  %3415 = vmatpush1.bf16.msra.mxu1 %v9299_v59  ;;  %v9333_v8 = vld [vmem:[#allocation11 + $0x20] sm:$0xff]  }
0x16b3   :  { %5908 = vmatprep.subr.bf16.mxu0 %v10577_v13  ;;  %5936 = vmatprep.subr.bf16.mxu1 %v10577_v13  ;;  %10824 = vst [vmem:[#allocation95_spill] sm:$0xff] %v9333_v8 }
0x16b5   :  { %3392 = vmatmul.mubr.bf16.vlgmr.msra.gmra.mrb[52].mxu0 %v3358_v6  ;;  %3433 = vmatmul.mubr.bf16.vlgmr.msra.gmra.mrb[52].mxu1 %v3358_v6  ;;  %v9322_v6 = vld [vmem:[#allocation11 + $0x10] sm:$0xff]  }
0x16b6   :  { %5909 = vmatpush3.bf16.msra.mxu0 %v9306_v44  ;;  %5924 = vmatprep.mubr.msk.bf16.mxu0 %vm7460_vm0, %v10577_v13  ;;  %v6600_v53 = vpop.eup %6599  ;;  %10822 = vst [vmem:[#allocation92_spill] sm:$0xff] %v9322_v6  ;;  %v9326_v44 = vld [vmem:[#allocation11 + $0x18] sm:$0xff]  }
0x16b7   :  { %5910 = vmatprep.subr.bf16.mxu0 %v10577_v13  ;;  %5937 = vmatpush3.bf16.msra.mxu1 %v8924_v48  ;;  %v3123_v48 = vmul.f32 0.5, %v6600_v53  ;;  %10823 = vst [vmem:[#allocation93_spill] sm:$0xff] %v9326_v44  ;;  %v9338_v53 = vld [vmem:[#allocation11 + $0x28] sm:$0xff]  }
0x16b8   :  { %5938 = vmatprep.subr.bf16.mxu1 %v10577_v13  ;;  %5940 = vmatprep.mubr.msk.bf16.mxu1 %vm7460_vm0, %v10577_v13  ;;  %10825 = vst [vmem:[#allocation96_spill] sm:$0xff] %v9338_v53 }
0x16ba   :  { %5911 = vmatpush3.bf16.msra.mxu0 %v9316_v38  ;;  %v9330_v38 = vadd.f32 0.5, %v3123_v48 }
0x16bb   :  { %5912 = vmatprep.subr.bf16.mxu0 %v10577_v13  ;;  %5939 = vmatpush3.bf16.msra.mxu1 %v8932_v51 }
0x16bc   :  { %5944 = vmatprep.subr.bf16.mxu1 %v10577_v13  ;;  %v3126_v48 = vmul.f32 %v9330_v38, %v8954_v15 }
0x16be   :  { %5913 = vmatpush3.bf16.msra.mxu0 %v9322_v6 }
0x16bf   :  { %5914 = vmatprep.subr.bf16.mxu0 %v10577_v13 }
0x16c2   :  { %5915 = vmatpush3.bf16.msra.mxu0 %v9326_v44  ;;  %v9342_v44 = vld [vmem:[#allocation11 + $0x30] sm:$0xff]  }
0x16c3   :  { %5916 = vmatprep.subr.bf16.mxu0 %v10577_v13  ;;  %10826 = vst [vmem:[#allocation97_spill] sm:$0xff] %v9342_v44 }
0x16c5   :  { %v3129_v59 = vpop.permute.xlu1 %3128 }
0x16c6   :  { %v3131_v51 = vmul.f32 %v3129_v59, %v9330_v38  ;;  %5917 = vmatpush3.bf16.msra.mxu0 %v9333_v8  ;;  %v9346_v59 = vld [vmem:[#allocation11 + $0x38] sm:$0xff]  }
0x16c7   :  { %5918 = vmatprep.subr.bf16.mxu0 %v10577_v13  ;;  %10827 = vst [vmem:[#allocation98_spill] sm:$0xff] %v9346_v59 }
0x16c8   :  { %3133 = vrot.lane.b32.xlu1 %v3131_v51, %s7461_s14 }
0x16ca   :  { %5919 = vmatpush3.bf16.msra.mxu0 %v9338_v53 }
0x16cb   :  { %5920 = vmatprep.subr.bf16.mxu0 %v10577_v13 }
0x16ce   :  { %5921 = vmatpush3.bf16.msra.mxu0 %v9342_v44 }
0x16cf   :  { %5922 = vmatprep.subr.bf16.mxu0 %v10577_v13 }
0x16d2   :  { %5923 = vmatpush3.bf16.msra.mxu0 %v9346_v59 }
0x16d3   :  { %5928 = vmatprep.subr.bf16.mxu0 %v10577_v13 }
0x173a   :  { %v3134_v51 = vpop.permute.xlu1 %3133 }
0x173b   :  { %v9352_v8 = vadd.f32 %v3134_v51, %v3126_v48 }
0x173d   :  { %10828 = vst [vmem:[#allocation99_spill] sm:$0xff] %v9352_v8  ;;  %6601 = vtanh.f32 %v9352_v8 }
0x1747   :  { %v6602_v53 = vpop.eup %6601 }
0x1748   :  { %3139 = vrot.lane.b32.xlu1 %v6602_v53, %s7440_s3 }
0x1788   :  { %v3393_v44 = vpop.f32.mrb[52].mxu0  ;;  %v3434_v6 = vpop.f32.mrb[52].mxu1 }
0x1789   :  { %v6125_v3 = vadd.f32 %v3393_v44, %v10764_v32  ;;  %v3395_v17 = vpop.f32.mrb[53].mxu0  ;;  %v3436_v24 = vpop.f32.mrb[53].mxu1  ;;  %v6127_v51 = vadd.f32 %v3434_v6, %v8082_v49 }
0x178a   :  { %v6126_v59 = vadd.f32 %v3395_v17, %v8079_v41  ;;  %v3397_v52 = vpop.f32.mrb[54].mxu0  ;;  %v3438_v26 = vpop.f32.mrb[54].mxu1  ;;  %v6128_v53 = vadd.f32 %v3436_v24, %v8087_v33 }
0x178b   :  { %v3445_v4 = vmul.f32 0.5, %v6125_v3  ;;  %v3398_v15 = vpop.f32.mrb[55].mxu0  ;;  %v3439_v28 = vpop.f32.mrb[55].mxu1 }
0x178c   :  { %v3449_v48 = vmul.f32 0.5, %v6126_v59  ;;  %v3454_v8 = vmul.f32 0.5, %v6128_v53  ;;  %v3464_v15 = vld [vmem:[#allocation20 + $0x4] sm:$0x1] }
0x178d   :  { %6603 = vtanh.f32 %v3445_v4 }
0x178e   :  { %6605 = vtanh.f32 %v3449_v48  ;;  %v3465_v48 = vunpack.c.l.bf16 %v3464_v15 }
0x178f   :  { %6607 = vtanh.f32 %v6127_v51 }
0x1790   :  { %6609 = vtanh.f32 %v3454_v8 }
0x1797   :  { %v6604_v42 = vpop.eup %6603 }
0x1798   :  { %v6606_v44 = vpop.eup %6605  ;;  %v3447_v32 = vmul.f32 0.5, %v6604_v42 }
0x1799   :  { %v3451_v27 = vmul.f32 0.5, %v6606_v44  ;;  %v6608_v52 = vpop.eup %6607 }
0x179a   :  { %v3448_v17 = vadd.f32 0.5, %v3447_v32  ;;  %v6610_v4 = vpop.eup %6609 }
0x179b   :  { %v3452_v26 = vadd.f32 0.5, %v3451_v27  ;;  %v3456_v6 = vmul.f32 0.5, %v6610_v4  ;;  %v9367_v27 = vld [vmem:[#allocation13] sm:$0xff]  }
0x179c   :  { %v3459_v3 = vmul.f32 %v6608_v52, %v3448_v17 }
0x179d   :  { %v3458_v28 = vmul.f32 %v3452_v26, %v8963_v31  ;;  %v3457_v24 = vadd.f32 0.5, %v3456_v6  ;;  %v9373_v31 = vld [vmem:[#allocation13 + $0x8] sm:$0xff]  }
0x179f   :  { %v9361_v59 = vadd.f32 %v3459_v3, %v3458_v28 }
0x17a1   :  { %6611 = vtanh.f32 %v9361_v59 }
0x17ab   :  { %v6612_v51 = vpop.eup %6611 }
0x17ac   :  { %v9364_v53 = vmul.f32 %v6612_v51, %v3457_v24 }
0x17ae   :  { %v3466_v42 = vmul.f32 %v3465_v48, %v9364_v53 }
0x17b0   :  { %v3467_v32 = vpack.c.bf16 %v3466_v42, %v3466_v42 }
0x17b2   :  { %5925 = vmatmul.mubr.bf16.vlgmr.msra.gmra.mrb[56].mxu0 %v3467_v32 }
0x17b3   :  { %5929 = vmatpush3.bf16.msra.mxu0 %v9367_v27  ;;  %5932 = vmatprep.mubr.msk.bf16.mxu0 %vm7460_vm0, %v10577_v13 }
0x17b4   :  { %5930 = vmatprep.subr.bf16.mxu0 %v10577_v13 }
0x17b7   :  { %5931 = vmatpush3.bf16.msra.mxu0 %v9373_v31 }
0x17b8   :  { %3731 = vmatprep.subr.bf16.mxu0 %v8974_v35  ;;  %v10829_v35 = vld [vmem:[#allocation36_spill] sm:$0xff] }
0x17ba   :  { %v3140_v8 = vpop.permute.xlu1 %3139 }
0x17bb   :  { %v3142_v44 = vmul.f32 %v3140_v8, %v9330_v38 }
0x17bd   :  { %v3618_v17 = vpack.c.bf16 %v3142_v44, %v3142_v44  ;;  %v9437_v44 = vld [vmem:[#allocation17] sm:$0xff]  }
0x17be   :  { %5933 = vmatmul.mubr.msk.bf16.vlgmr.msra.gmra.mrb[56].mxu0 %vm1299_vm1, %v9095_v20 }
0x17bf   :  { %3732 = vmatpush1.bf16.msra.mxu0 %v8980_v54  ;;  %3620 = vrot.lane.b32.xlu1 %v3618_v17, %s7461_s14  ;;  %v10830_v54 = vld [vmem:[#allocation37_spill] sm:$0xff] }
0x17c0   :  { %3733 = vmatprep.subr.bf16.mxu0 %v8984_v2  ;;  %3763 = vmatprep.mubr.bf16.mxu0 %v10545_v57  ;;  %v10831_v2 = vld [vmem:[#allocation38_spill] sm:$0xff] }
0x17c1   :  { %v9446_v17 = vld [vmem:[#allocation5 + $0x4] ss:$16 sps:$4 sm:$0xff]  }
0x17c3   :  { %3734 = vmatpush1.bf16.msra.mxu0 %v8988_v12  ;;  %v10832_v12 = vld [vmem:[#allocation39_spill] sm:$0xff] }
0x17c4   :  { %3735 = vmatprep.subr.bf16.mxu0 %v8991_v63  ;;  %v10833_v63 = vld [vmem:[#allocation40_spill] sm:$0xff] }
0x17c7   :  { %3736 = vmatpush1.bf16.msra.mxu0 %v8994_v0  ;;  %v10834_v0 = vld [vmem:[#allocation41_spill] sm:$0xff] }
0x17c8   :  { %3737 = vmatprep.subr.bf16.mxu0 %v8997_v55  ;;  %v10835_v55 = vld [vmem:[#allocation42_spill] sm:$0xff] }
0x17cb   :  { %3738 = vmatpush1.bf16.msra.mxu0 %v9000_v19  ;;  %v10836_v19 = vld [vmem:[#allocation43_spill] sm:$0xff] }
0x17cc   :  { %3739 = vmatprep.subr.bf16.mxu0 %v9003_v21  ;;  %v10837_v21 = vld [vmem:[#allocation44_spill] sm:$0xff] }
0x17cf   :  { %3740 = vmatpush1.bf16.msra.mxu0 %v9006_v23  ;;  %v10838_v23 = vld [vmem:[#allocation45_spill] sm:$0xff] }
0x17d0   :  { %3741 = vmatprep.subr.bf16.mxu0 %v9009_v56  ;;  %v10839_v56 = vld [vmem:[#allocation46_spill] sm:$0xff] }
0x17d3   :  { %3742 = vmatpush1.bf16.msra.mxu0 %v9012_v60 }
0x17d4   :  { %3743 = vmatprep.subr.bf16.mxu0 %v9015_v62  ;;  %v9416_v62 = vld [vmem:[#allocation14] ss:$0 sm:$0xff] }
0x17d7   :  { %3744 = vmatpush1.bf16.msra.mxu0 %v9018_v1 }
0x17d8   :  { %3745 = vmatprep.subr.bf16.mxu0 %v9021_v5 }
0x17db   :  { %3746 = vmatpush1.bf16.msra.mxu0 %v9024_v61 }
0x17dc   :  { %3862 = vmatprep.subr.bf16.mxu0 %v9027_v7 }
0x17de   :  { %3764 = vmatmul.mubr.bf16.vlgmr.msra.gmra.mrb[60].mxu0 %v9205_v30 }
0x17df   :  { %3863 = vmatpush1.bf16.msra.mxu0 %v9031_v25  ;;  %3894 = vmatprep.mubr.bf16.mxu0 %v10545_v57 }
0x17e0   :  { %3864 = vmatprep.subr.bf16.mxu0 %v9035_v22 }
0x17e3   :  { %3865 = vmatpush1.bf16.msra.mxu0 %v9038_v16 }
0x17e4   :  { %3866 = vmatprep.subr.bf16.mxu0 %v9041_v11 }
0x17e7   :  { %3867 = vmatpush1.bf16.msra.mxu0 %v9044_v45 }
0x17e8   :  { %3868 = vmatprep.subr.bf16.mxu0 %v10829_v35 }
0x17eb   :  { %3869 = vmatpush1.bf16.msra.mxu0 %v10830_v54  ;;  %v9450_v54 = vld [vmem:[#allocation5] ss:$16 sps:$4 sm:$0xff]  }
0x17ec   :  { %3870 = vmatprep.subr.bf16.mxu0 %v10831_v2  ;;  %v9454_v2 = vld [vmem:[#allocation5 + $0x24] ss:$16 sps:$4 sm:$0xff]  }
0x17ef   :  { %3871 = vmatpush1.bf16.msra.mxu0 %v10832_v12  ;;  %v9457_v12 = vld [vmem:[#allocation5 + $0x20] ss:$16 sps:$4 sm:$0xff]  }
0x17f0   :  { %3872 = vmatprep.subr.bf16.mxu0 %v10833_v63  ;;  %v9460_v63 = vld [vmem:[#allocation5 + $0x44] ss:$16 sps:$4 sm:$0xff]  }
0x17f3   :  { %3873 = vmatpush1.bf16.msra.mxu0 %v10834_v0  ;;  %v9463_v0 = vld [vmem:[#allocation5 + $0x40] ss:$16 sps:$4 sm:$0xff]  }
0x17f4   :  { %3874 = vmatprep.subr.bf16.mxu0 %v10835_v55  ;;  %v9466_v55 = vld [vmem:[#allocation5 + $0x64] ss:$16 sps:$4 sm:$0xff]  }
0x17f7   :  { %3875 = vmatpush1.bf16.msra.mxu0 %v10836_v19  ;;  %v9469_v19 = vld [vmem:[#allocation5 + $0x60] ss:$16 sps:$4 sm:$0xff]  }
0x17f8   :  { %3876 = vmatprep.subr.bf16.mxu0 %v10837_v21  ;;  %v10840_v21 = vld [vmem:[#allocation47_spill] sm:$0xff] }
0x17fb   :  { %3877 = vmatpush1.bf16.msra.mxu0 %v10838_v23  ;;  %v10841_v23 = vld [vmem:[#allocation48_spill] sm:$0xff] }
0x17fc   :  { %3945 = vmatprep.subr.bf16.mxu0 %v10839_v56  ;;  %v10842_v56 = vld [vmem:[#allocation49_spill] sm:$0xff] }
0x1831   :  { %v3621_v35 = vpop.permute.xlu1 %3620 }
0x1891   :  { %v3542_v60 = vpop.f32.mrb[56].mxu0 }
0x1892   :  { %v6129_v1 = vadd.f32 %v9416_v62, %v3542_v60  ;;  %v5934_v5 = vpop.f32.mrb[57].mxu0  ;;  %v10850_v60 = vld [vmem:[#allocation57_spill] sm:$0xff] }
0x1893   :  { %v3545_v61 = vpop.f32.mrb[58].mxu0  ;;  %v10853_v5 = vld [vmem:[#allocation60_spill] sm:$0xff] }
0x1894   :  { %6613 = vtanh.f32 %v6129_v1  ;;  %v5935_v7 = vpop.f32.mrb[59].mxu0  ;;  %v3549_v38 = vmul.f32 0.5, %v6129_v1  ;;  %v10852_v1 = vld [vmem:[#allocation59_spill] sm:$0xff]  ;;  %v10854_v61 = vld [vmem:[#allocation61_spill] sm:$0xff] }
0x1895   :  { %v10855_v7 = vld [vmem:[#allocation62_spill] sm:$0xff] }
0x1896   :  { %6615 = vtanh.f32 %v3549_v38  ;;  %v9499_v38 = vld [vmem:[#allocation19] ss:$0 sm:$0xff] }
0x189e   :  { %v6614_v25 = vpop.eup %6613 }
0x189f   :  { %3556 = vrot.lane.b32.xlu0 %v6614_v25, %s7440_s3  ;;  %v10856_v25 = vld [vmem:[#allocation63_spill] sm:$0xff] }
0x18a0   :  { %v6616_v52 = vpop.eup %6615 }
0x18a1   :  { %v3551_v26 = vmul.f32 0.5, %v6616_v52 }
0x18a3   :  { %v3552_v3 = vadd.f32 0.5, %v3551_v26 }
0x18a5   :  { %v3554_v6 = vmul.f32 %v3552_v3, %v9090_v18  ;;  %v9443_v18 = vld [vmem:[#allocation17 + $0x8] sm:$0xff]  }
0x18b1   :  { %v9420_v22 = vpop.f32.mrb[60].mxu0 }
0x18b2   :  { %v9422_v16 = vpop.f32.mrb[61].mxu0 }
0x18b3   :  { %v3777_v11 = vcombine.low %v9420_v22, %v9422_v16  ;;  %v3769_v45 = vpop.f32.mrb[62].mxu0 }
0x18b4   :  { %v3770_v20 = vpop.f32.mrb[63].mxu0  ;;  %v10857_v45 = vld [vmem:[#allocation64_spill] sm:$0xff] }
0x1911   :  { %v3557_v28 = vpop.permute.xlu0 %3556 }
0x1912   :  { %v3559_v4 = vmul.f32 %v3557_v28, %v3552_v3 }
0x1914   :  { %3561 = vrot.lane.b32.xlu0 %v3559_v4, %s7461_s14 }
0x1986   :  { %v3562_v15 = vpop.permute.xlu0 %3561 }
0x1987   :  { %v9428_v24 = vadd.f32 %v3562_v15, %v3554_v6 }
0x1989   :  { %6617 = vtanh.f32 %v9428_v24 }
0x1993   :  { %v6618_v48 = vpop.eup %6617 }
0x1994   :  { %3567 = vrot.lane.b32.xlu0 %v6618_v48, %s7440_s3 }
0x1a06   :  { %v3568_v51 = vpop.permute.xlu0 %3567 }
0x1a07   :  { %v3570_v42 = vmul.f32 %v3568_v51, %v3552_v3 }
0x1a09   :  { %v3571_v32 = vpack.c.bf16 %v3570_v42, %v3570_v42 }
0x1a0b   :  { %3573 = vrot.lane.b32.xlu0 %v3571_v32, %s7461_s14  ;;  %v3791_v32 = vrot.slane %v3777_v11, %v10596_v36 }
0x1a7d   :  { %v9433_v8 = vpop.permute.xlu0 %3573 }
0x1a7e   :  { %5941 = vmatmul.mubr.msk.bf16.vlgmr.msra.gmra.mrb[56].mxu1 %vm1299_vm1, %v9433_v8 }
0x1a7f   :  { %5945 = vmatpush3.bf16.msra.mxu1 %v9437_v44  ;;  %5948 = vmatprep.mubr.msk.bf16.mxu1 %vm7460_vm0, %v10577_v13 }
0x1a80   :  { %5946 = vmatprep.subr.bf16.mxu1 %v10577_v13 }
0x1a83   :  { %5947 = vmatpush3.bf16.msra.mxu1 %v9443_v18 }
0x1a84   :  { %3690 = vmatprep.subr.bf16.mxu1 %v9446_v17 }
0x1a8a   :  { %5949 = vmatmul.mubr.msk.bf16.vlgmr.msra.gmra.mrb[56].mxu1 %vm1299_vm1, %v3621_v35 }
0x1a8b   :  { %3691 = vmatpush1.bf16.msra.mxu1 %v9450_v54  ;;  %3722 = vmatprep.mubr.bf16.mxu1 %v10545_v57 }
0x1a8c   :  { %3692 = vmatprep.subr.bf16.mxu1 %v9454_v2 }
0x1a8f   :  { %3693 = vmatpush1.bf16.msra.mxu1 %v9457_v12 }
0x1a90   :  { %3694 = vmatprep.subr.bf16.mxu1 %v9460_v63 }
0x1a93   :  { %3695 = vmatpush1.bf16.msra.mxu1 %v9463_v0 }
0x1a94   :  { %3696 = vmatprep.subr.bf16.mxu1 %v9466_v55 }
0x1a97   :  { %3697 = vmatpush1.bf16.msra.mxu1 %v9469_v19 }
0x1a98   :  { %3698 = vmatprep.subr.bf16.mxu1 %v9114_v50  ;;  %v10843_v50 = vld [vmem:[#allocation50_spill] sm:$0xff] }
0x1a9b   :  { %3699 = vmatpush1.bf16.msra.mxu1 %v9117_v10  ;;  %v10844_v10 = vld [vmem:[#allocation51_spill] sm:$0xff] }
0x1a9c   :  { %3700 = vmatprep.subr.bf16.mxu1 %v9120_v43  ;;  %v10845_v43 = vld [vmem:[#allocation52_spill] sm:$0xff] }
0x1a9f   :  { %3701 = vmatpush1.bf16.msra.mxu1 %v9123_v47  ;;  %v10846_v47 = vld [vmem:[#allocation53_spill] sm:$0xff] }
0x1aa0   :  { %3702 = vmatprep.subr.bf16.mxu1 %v9126_v39  ;;  %v10847_v39 = vld [vmem:[#allocation54_spill] sm:$0xff] }
0x1aa3   :  { %3703 = vmatpush1.bf16.msra.mxu1 %v9129_v37  ;;  %v10848_v37 = vld [vmem:[#allocation55_spill] sm:$0xff] }
0x1aa4   :  { %3704 = vmatprep.subr.bf16.mxu1 %v9132_v14  ;;  %v10849_v14 = vld [vmem:[#allocation56_spill] sm:$0xff] }
0x1aa7   :  { %3705 = vmatpush1.bf16.msra.mxu1 %v10840_v21  ;;  %v3689_v21 = vld [vmem:[#allocation2 + $0x28] sm:$0xff] }
0x1aa8   :  { %3821 = vmatprep.subr.bf16.mxu1 %v10841_v23 }
0x1aaa   :  { %3723 = vmatmul.mubr.bf16.vlgmr.msra.gmra.mrb[60].mxu1 %v9205_v30  ;;  %v10851_v30 = vld [vmem:[#allocation58_spill] sm:$0xff] }
0x1aab   :  { %3822 = vmatpush1.bf16.msra.mxu1 %v10842_v56  ;;  %3853 = vmatprep.mubr.bf16.mxu1 %v10545_v57 }
0x1aac   :  { %3823 = vmatprep.subr.bf16.mxu1 %v10843_v50 }
0x1aaf   :  { %3824 = vmatpush1.bf16.msra.mxu1 %v10844_v10 }
0x1ab0   :  { %3825 = vmatprep.subr.bf16.mxu1 %v10845_v43 }
0x1ab3   :  { %3826 = vmatpush1.bf16.msra.mxu1 %v10846_v47 }
0x1ab4   :  { %3827 = vmatprep.subr.bf16.mxu1 %v10847_v39 }
0x1ab7   :  { %3828 = vmatpush1.bf16.msra.mxu1 %v10848_v37 }
0x1ab8   :  { %3829 = vmatprep.subr.bf16.mxu1 %v10849_v14 }
0x1abb   :  { %3830 = vmatpush1.bf16.msra.mxu1 %v10850_v60 }
0x1abc   :  { %3831 = vmatprep.subr.bf16.mxu1 %v10851_v30 }
0x1abf   :  { %3832 = vmatpush1.bf16.msra.mxu1 %v10852_v1 }
0x1ac0   :  { %3833 = vmatprep.subr.bf16.mxu1 %v10853_v5 }
0x1ac3   :  { %3834 = vmatpush1.bf16.msra.mxu1 %v10854_v61 }
0x1ac4   :  { %3835 = vmatprep.subr.bf16.mxu1 %v10855_v7 }
0x1ac7   :  { %3836 = vmatpush1.bf16.msra.mxu1 %v10856_v25 }
0x1ac8   :  { %3904 = vmatprep.subr.bf16.mxu1 %v10857_v45 }
0x1b5d   :  { %v3659_v20 = vpop.f32.mrb[56].mxu1 }
0x1b5e   :  { %v9502_v52 = vadd.f32 %v9499_v38, %v3659_v20  ;;  %v5950_v26 = vpop.f32.mrb[57].mxu1 }
0x1b5f   :  { %v3662_v3 = vpop.f32.mrb[58].mxu1 }
0x1b60   :  { %6619 = vtanh.f32 %v9502_v52  ;;  %v5951_v28 = vpop.f32.mrb[59].mxu1 }
0x1b6a   :  { %v6620_v4 = vpop.eup %6619 }
0x1b6b   :  { %3673 = vrot.lane.b32.xlu1 %v6620_v4, %s7440_s3  ;;  %v10859_v4 = vld [vmem:[#allocation66_spill] sm:$0xff] }
0x1b7d   :  { %v3724_v6 = vpop.f32.mrb[60].mxu1 }
0x1b7e   :  { %v3726_v15 = vpop.f32.mrb[61].mxu1 }
0x1b7f   :  { %v3776_v48 = vcombine.low %v3724_v6, %v3726_v15  ;;  %v3728_v51 = vpop.f32.mrb[62].mxu1  ;;  %v10860_v6 = vld [vmem:[#allocation67_spill] sm:$0xff]  ;;  %v10861_v15 = vld [vmem:[#allocation68_spill] sm:$0xff] }
0x1b80   :  { %v3729_v42 = vpop.f32.mrb[63].mxu1  ;;  %v10867_v51 = vld [vmem:[#allocation74_spill] sm:$0xff] }
0x1b81   :  { %v3784_v35 = vrot.slane %v3776_v48, %v10596_v36  ;;  %v10866_v48 = vld [vmem:[#allocation73_spill] sm:$0xff]  ;;  %v10869_v42 = vld [vmem:[#allocation76_spill] sm:$0xff] }
0x1b83   :  { %v3792_v23 = vcombine.low %v3784_v35, %v3791_v32  ;;  %v10870_v32 = vld [vmem:[#allocation77_spill] sm:$0xff]  ;;  %v10871_v35 = vld [vmem:[#allocation78_spill] sm:$0xff] }
0x1b85   :  { %v3794_v56 = vadd.f32 %v3792_v23, %v3689_v21  ;;  %v10872_v21 = vld [vmem:[#allocation79_spill] sm:$0xff]  ;;  %v10873_v23 = vld [vmem:[#allocation80_spill] sm:$0xff] }
0x1b87   :  { %v3795_v50 = vmul.f32 0.5, %v3794_v56  ;;  %v3800_v10 = vrot.slane %v3794_v56, 2  ;;  %v3806_v47 = vrot.slane %v3794_v56, 4  ;;  %v3809_v39 = vrot.slane %v3794_v56, 6  ;;  %v10874_v56 = vld [vmem:[#allocation81_spill] sm:$0xff] }
0x1b89   :  { %6621 = vtanh.f32 %v3795_v50  ;;  %v3802_v43 = vmul.f32 0.5, %v3800_v10  ;;  %v3811_v37 = vmul.f32 0.5, %v3809_v39  ;;  %v10875_v50 = vld [vmem:[#allocation82_spill] sm:$0xff]  ;;  %v10876_v10 = vld [vmem:[#allocation83_spill] sm:$0xff]  ;;  %v3666_v39 = vmul.f32 0.5, %v9502_v52 }
0x1b8a   :  { %v9560_v52 = vld [vmem:[#allocation16] sm:$0xff]  }
0x1b8b   :  { %6623 = vtanh.f32 %v3802_v43  ;;  %v10877_v43 = vld [vmem:[#allocation84_spill] sm:$0xff] }
0x1b8c   :  { %6625 = vtanh.f32 %v3806_v47  ;;  %v10878_v47 = vld [vmem:[#allocation85_spill] sm:$0xff] }
0x1b8d   :  { %6627 = vtanh.f32 %v3811_v37  ;;  %v10879_v37 = vld [vmem:[#allocation86_spill] sm:$0xff] }
0x1b93   :  { %v6622_v14 = vpop.eup %6621 }
0x1b94   :  { %v3797_v60 = vmul.f32 0.5, %v6622_v14  ;;  %v10880_v14 = vld [vmem:[#allocation87_spill] sm:$0xff] }
0x1b95   :  { %v6624_v30 = vpop.eup %6623 }
0x1b96   :  { %v3798_v1 = vadd.f32 0.5, %v3797_v60  ;;  %v3804_v22 = vmul.f32 0.5, %v6624_v30  ;;  %v6626_v11 = vpop.eup %6625  ;;  %v10881_v60 = vld [vmem:[#allocation88_spill] sm:$0xff]  ;;  %v10882_v30 = vld [vmem:[#allocation89_spill] sm:$0xff] }
0x1b97   :  { %v6628_v25 = vpop.eup %6627 }
0x1b98   :  { %v3805_v16 = vadd.f32 0.5, %v3804_v22  ;;  %v3816_v61 = vmul.f32 %v6626_v11, %v3798_v1  ;;  %v3813_v45 = vmul.f32 0.5, %v6628_v25  ;;  %v3903_v1 = vpack.c.bf16 %v9364_v53, %v9364_v53  ;;  %v10883_v22 = vld [vmem:[#allocation90_spill] sm:$0xff]  ;;  %v10884_v53 = vld [vmem:[#allocation91_spill] sm:$0xff]  ;;  %v10886_v25 = vld [vmem:[#allocation93_spill] sm:$0xff] }
0x1b9a   :  { %v3815_v5 = vmul.f32 %v3805_v16, %v9202_v34  ;;  %v3814_v20 = vadd.f32 0.5, %v3813_v45  ;;  %v10858_v34 = vld [vmem:[#allocation65_spill] sm:$0xff]  ;;  %v9568_v16 = vld [vmem:[#allocation16 + $0x8] sm:$0xff]  }
0x1b9c   :  { %v9512_v7 = vadd.f32 %v3816_v61, %v3815_v5  ;;  %v10885_v5 = vld [vmem:[#allocation92_spill] sm:$0xff] }
0x1b9e   :  { %6629 = vtanh.f32 %v9512_v7 }
0x1b9f   :  { %6631 = vtanh.f32 %v3666_v39 }
0x1ba8   :  { %v6630_v26 = vpop.eup %6629 }
0x1ba9   :  { %v3819_v3 = vmul.f32 %v6630_v26, %v3814_v20  ;;  %v6632_v11 = vpop.eup %6631 }
0x1baa   :  { %v3668_v61 = vmul.f32 0.5, %v6632_v11 }
0x1bab   :  { %v9515_v28 = vpack.c.bf16 %v3819_v3, %v3819_v3  ;;  %v10887_v3 = vld [vmem:[#allocation95_spill] sm:$0xff] }
0x1bac   :  { %v9576_v45 = vadd.f32 0.5, %v3668_v61 }
0x1bad   :  { %3854 = vmatmul.mubr.bf16.vlgmr.msra.gmra.mrb[64].mxu1 %v9515_v28  ;;  %3895 = vmatmul.mubr.bf16.vlgmr.msra.gmra.mrb[64].mxu0 %v9515_v28 }
0x1bae   :  { %3905 = vmatpush1.bf16.msra.mxu1 %v9209_v9  ;;  %3946 = vmatpush1.bf16.msra.mxu0 %v9212_v29  ;;  %v10862_v9 = vld [vmem:[#allocation69_spill] sm:$0xff]  ;;  %v10863_v29 = vld [vmem:[#allocation70_spill] sm:$0xff] }
0x1baf   :  { %3906 = vmatprep.subr.bf16.mxu1 %v9215_v58  ;;  %3947 = vmatprep.subr.bf16.mxu0 %v9218_v46  ;;  %v10864_v58 = vld [vmem:[#allocation71_spill] sm:$0xff]  ;;  %v10865_v46 = vld [vmem:[#allocation72_spill] sm:$0xff] }
0x1bb0   :  { %3936 = vmatprep.mubr.bf16.mxu1 %v10545_v57  ;;  %3977 = vmatprep.mubr.bf16.mxu0 %v10545_v57 }
0x1bb2   :  { %3907 = vmatpush1.bf16.msra.mxu1 %v9223_v40  ;;  %3948 = vmatpush1.bf16.msra.mxu0 %v10858_v34  ;;  %v10868_v40 = vld [vmem:[#allocation75_spill] sm:$0xff]  ;;  %v10888_v34 = vld [vmem:[#allocation96_spill] sm:$0xff] }
0x1bb3   :  { %3908 = vmatprep.subr.bf16.mxu1 %v10859_v4  ;;  %3949 = vmatprep.subr.bf16.mxu0 %v10860_v6  ;;  %v10889_v4 = vld [vmem:[#allocation97_spill] sm:$0xff]  ;;  %v10890_v6 = vld [vmem:[#allocation98_spill] sm:$0xff] }
0x1bb6   :  { %3909 = vmatpush1.bf16.msra.mxu1 %v10861_v15  ;;  %3950 = vmatpush1.bf16.msra.mxu0 %v10862_v9  ;;  %v10891_v15 = vld [vmem:[#allocation99_spill] sm:$0xff] }
0x1bb7   :  { %3910 = vmatprep.subr.bf16.mxu1 %v10863_v29  ;;  %3951 = vmatprep.subr.bf16.mxu0 %v10864_v58  ;;  %v3671_v9 = vmul.f32 %v9576_v45, %v10891_v15 }
0x1bba   :  { %3911 = vmatpush1.bf16.msra.mxu1 %v10865_v46  ;;  %3952 = vmatpush1.bf16.msra.mxu0 %v10866_v48 }
0x1bbb   :  { %3912 = vmatprep.subr.bf16.mxu1 %v10867_v51  ;;  %3953 = vmatprep.subr.bf16.mxu0 %v10868_v40  ;;  %v10892_v40 = vld [vmem:[#allocation94_spill] sm:$0xff] }
0x1bbe   :  { %3913 = vmatpush1.bf16.msra.mxu1 %v10869_v42  ;;  %3954 = vmatpush1.bf16.msra.mxu0 %v10870_v32 }
0x1bbf   :  { %3914 = vmatprep.subr.bf16.mxu1 %v10871_v35  ;;  %3955 = vmatprep.subr.bf16.mxu0 %v10872_v21 }
0x1bc2   :  { %3915 = vmatpush1.bf16.msra.mxu1 %v10873_v23  ;;  %3956 = vmatpush1.bf16.msra.mxu0 %v10874_v56 }
0x1bc3   :  { %3916 = vmatprep.subr.bf16.mxu1 %v10875_v50  ;;  %3957 = vmatprep.subr.bf16.mxu0 %v10876_v10 }
0x1bc6   :  { %3917 = vmatpush1.bf16.msra.mxu1 %v10877_v43  ;;  %3958 = vmatpush1.bf16.msra.mxu0 %v10878_v47 }
0x1bc7   :  { %3918 = vmatprep.subr.bf16.mxu1 %v10879_v37  ;;  %3959 = vmatprep.subr.bf16.mxu0 %v10880_v14 }
0x1bca   :  { %3919 = vmatpush1.bf16.msra.mxu1 %v10881_v60  ;;  %3960 = vmatpush1.bf16.msra.mxu0 %v10882_v30 }
0x1bcb   :  { %5952 = vmatprep.subr.bf16.mxu1 %v10577_v13  ;;  %5980 = vmatprep.subr.bf16.mxu0 %v10577_v13 }
0x1bcd   :  { %3937 = vmatmul.mubr.bf16.vlgmr.msra.gmra.mrb[64].mxu1 %v3903_v1  ;;  %3978 = vmatmul.mubr.bf16.vlgmr.msra.gmra.mrb[64].mxu0 %v3903_v1 }
0x1bce   :  { %5953 = vmatpush3.bf16.msra.mxu1 %v10883_v22  ;;  %5968 = vmatprep.mubr.msk.bf16.mxu1 %vm7460_vm0, %v10577_v13 }
0x1bcf   :  { %5954 = vmatprep.subr.bf16.mxu1 %v10577_v13  ;;  %5981 = vmatpush3.bf16.msra.mxu0 %v9560_v52 }
0x1bd0   :  { %5982 = vmatprep.subr.bf16.mxu0 %v10577_v13  ;;  %5984 = vmatprep.mubr.msk.bf16.mxu0 %vm7460_vm0, %v10577_v13 }
0x1bd2   :  { %5955 = vmatpush3.bf16.msra.mxu1 %v10884_v53 }
0x1bd3   :  { %5956 = vmatprep.subr.bf16.mxu1 %v10577_v13  ;;  %5983 = vmatpush3.bf16.msra.mxu0 %v9568_v16 }
0x1bd4   :  { %5988 = vmatprep.subr.bf16.mxu0 %v10577_v13 }
0x1bd6   :  { %5957 = vmatpush3.bf16.msra.mxu1 %v10885_v5 }
0x1bd7   :  { %5958 = vmatprep.subr.bf16.mxu1 %v10577_v13 }
0x1bda   :  { %5959 = vmatpush3.bf16.msra.mxu1 %v10886_v25 }
0x1bdb   :  { %5960 = vmatprep.subr.bf16.mxu1 %v10577_v13 }
0x1bdd   :  { %v3674_v20 = vpop.permute.xlu1 %3673 }
0x1bde   :  { %v3676_v26 = vmul.f32 %v3674_v20, %v9576_v45  ;;  %5961 = vmatpush3.bf16.msra.mxu1 %v10887_v3 }
0x1bdf   :  { %5962 = vmatprep.subr.bf16.mxu1 %v10577_v13 }
0x1be0   :  { %3678 = vrot.lane.b32.xlu1 %v3676_v26, %s7461_s14 }
0x1be2   :  { %5963 = vmatpush3.bf16.msra.mxu1 %v10888_v34  ;;  %v4009_v34 = vld [vmem:[#allocation20 + $0x5] sm:$0x1] }
0x1be3   :  { %5964 = vmatprep.subr.bf16.mxu1 %v10577_v13 }
0x1be6   :  { %5965 = vmatpush3.bf16.msra.mxu1 %v10889_v4 }
0x1be7   :  { %5966 = vmatprep.subr.bf16.mxu1 %v10577_v13 }
0x1bea   :  { %5967 = vmatpush3.bf16.msra.mxu1 %v10890_v6  ;;  %v4010_v6 = vunpack.c.l.bf16 %v4009_v34  ;;  %v9701_v34 = vld [vmem:[#allocation7 + $0xcc] ss:$16 sps:$4 sm:$0xff]  }
0x1beb   :  { %5972 = vmatprep.subr.bf16.mxu1 %v10577_v13  ;;  %10899 = vst [vmem:[#allocation42_spill] sm:$0xff] %v9701_v34 }
0x1c52   :  { %v3679_v29 = vpop.permute.xlu1 %3678 }
0x1c53   :  { %v9590_v58 = vadd.f32 %v3679_v29, %v3671_v9 }
0x1c55   :  { %6633 = vtanh.f32 %v9590_v58 }
0x1c5f   :  { %v6634_v46 = vpop.eup %6633 }
0x1c60   :  { %3684 = vrot.lane.b32.xlu1 %v6634_v46, %s7440_s3 }
0x1ca0   :  { %v3938_v48 = vpop.f32.mrb[64].mxu1  ;;  %v3979_v51 = vpop.f32.mrb[64].mxu0 }
0x1ca1   :  { %v6131_v42 = vadd.f32 %v3938_v48, %v10892_v40  ;;  %v3940_v32 = vpop.f32.mrb[65].mxu1  ;;  %v3981_v35 = vpop.f32.mrb[65].mxu0  ;;  %v6133_v39 = vadd.f32 %v3979_v51, %v8082_v49 }
0x1ca2   :  { %v6132_v21 = vadd.f32 %v3940_v32, %v8079_v41  ;;  %v3942_v23 = vpop.f32.mrb[66].mxu1  ;;  %v3983_v56 = vpop.f32.mrb[66].mxu0  ;;  %v6134_v37 = vadd.f32 %v3981_v35, %v8087_v33  ;;  %v9616_v32 = vld [vmem:[#allocation5 + $0x8] ss:$16 sps:$4 sm:$0xff]   ;;  %v9633_v35 = vld [vmem:[#allocation5 + $0x6c] ss:$16 sps:$4 sm:$0xff]  }
0x1ca3   :  { %v3990_v50 = vmul.f32 0.5, %v6131_v42  ;;  %v3943_v10 = vpop.f32.mrb[67].mxu1  ;;  %v3984_v43 = vpop.f32.mrb[67].mxu0  ;;  %v9639_v23 = vld [vmem:[#allocation5 + $0x8c] ss:$16 sps:$4 sm:$0xff]  }
0x1ca4   :  { %v3994_v47 = vmul.f32 0.5, %v6132_v21  ;;  %v3999_v14 = vmul.f32 0.5, %v6134_v37  ;;  %v9636_v21 = vld [vmem:[#allocation5 + $0x68] ss:$16 sps:$4 sm:$0xff]   ;;  %v9651_v43 = vld [vmem:[#allocation5 + $0xcc] ss:$16 sps:$4 sm:$0xff]  }
0x1ca5   :  { %6635 = vtanh.f32 %v3990_v50  ;;  %v9642_v56 = vld [vmem:[#allocation5 + $0x88] ss:$16 sps:$4 sm:$0xff]   ;;  %v9645_v50 = vld [vmem:[#allocation5 + $0xac] ss:$16 sps:$4 sm:$0xff]  }
0x1ca6   :  { %6637 = vtanh.f32 %v3994_v47  ;;  %v9648_v10 = vld [vmem:[#allocation5 + $0xa8] ss:$16 sps:$4 sm:$0xff]  }
0x1ca7   :  { %6639 = vtanh.f32 %v6133_v39  ;;  %v9654_v47 = vld [vmem:[#allocation5 + $0xc8] ss:$16 sps:$4 sm:$0xff]   ;;  %v9657_v39 = vld [vmem:[#allocation5 + $0xec] ss:$16 sps:$4 sm:$0xff]  }
0x1ca8   :  { %6641 = vtanh.f32 %v3999_v14  ;;  %v9660_v37 = vld [vmem:[#allocation5 + $0xe8] ss:$16 sps:$4 sm:$0xff]   ;;  %v9663_v14 = vld [vmem:[#allocation7 + $0xc] ss:$16 sps:$4 sm:$0xff]  }
0x1caf   :  { %v6636_v60 = vpop.eup %6635 }
0x1cb0   :  { %v6638_v30 = vpop.eup %6637  ;;  %v3992_v1 = vmul.f32 0.5, %v6636_v60  ;;  %v9667_v60 = vld [vmem:[#allocation7 + $0x8] ss:$16 sps:$4 sm:$0xff]  }
0x1cb1   :  { %v3996_v22 = vmul.f32 0.5, %v6638_v30  ;;  %v6640_v11 = vpop.eup %6639  ;;  %v9671_v30 = vld [vmem:[#allocation7 + $0x2c] ss:$16 sps:$4 sm:$0xff]  }
0x1cb2   :  { %v3993_v53 = vadd.f32 0.5, %v3992_v1  ;;  %v6642_v26 = vpop.eup %6641  ;;  %v9674_v1 = vld [vmem:[#allocation7 + $0x28] ss:$16 sps:$4 sm:$0xff]  }
0x1cb3   :  { %v3997_v5 = vadd.f32 0.5, %v3996_v22  ;;  %v4001_v3 = vmul.f32 0.5, %v6642_v26  ;;  %v9677_v22 = vld [vmem:[#allocation7 + $0x4c] ss:$16 sps:$4 sm:$0xff]  }
0x1cb4   :  { %v4004_v61 = vmul.f32 %v6640_v11, %v3993_v53  ;;  %v9680_v53 = vld [vmem:[#allocation7 + $0x48] ss:$16 sps:$4 sm:$0xff]   ;;  %v9683_v11 = vld [vmem:[#allocation7 + $0x6c] ss:$16 sps:$4 sm:$0xff]  }
0x1cb5   :  { %v4003_v25 = vmul.f32 %v3997_v5, %v9361_v59  ;;  %v4002_v4 = vadd.f32 0.5, %v4001_v3  ;;  %v9610_v59 = vld [vmem:[#allocation5 + $0xc] ss:$16 sps:$4 sm:$0xff]   ;;  %10893 = vst [vmem:[#allocation36_spill] sm:$0xff] %v9683_v11  ;;  %v9686_v5 = vld [vmem:[#allocation7 + $0x68] ss:$16 sps:$4 sm:$0xff]  }
0x1cb6   :  { %10894 = vst [vmem:[#allocation37_spill] sm:$0xff] %v9686_v5  ;;  %v9695_v26 = vld [vmem:[#allocation7 + $0xac] ss:$16 sps:$4 sm:$0xff]   ;;  %v9698_v3 = vld [vmem:[#allocation7 + $0xa8] ss:$16 sps:$4 sm:$0xff]  }
0x1cb7   :  { %v9599_v20 = vadd.f32 %v4004_v61, %v4003_v25  ;;  %v9689_v61 = vld [vmem:[#allocation7 + $0x8c] ss:$16 sps:$4 sm:$0xff]   ;;  %v9692_v25 = vld [vmem:[#allocation7 + $0x88] ss:$16 sps:$4 sm:$0xff]   ;;  %10897 = vst [vmem:[#allocation40_spill] sm:$0xff] %v9695_v26  ;;  %10898 = vst [vmem:[#allocation41_spill] sm:$0xff] %v9698_v3 }
0x1cb8   :  { %10895 = vst [vmem:[#allocation38_spill] sm:$0xff] %v9689_v61  ;;  %10896 = vst [vmem:[#allocation39_spill] sm:$0xff] %v9692_v25 }
0x1cb9   :  { %6643 = vtanh.f32 %v9599_v20 }
0x1cc3   :  { %v6644_v15 = vpop.eup %6643 }
0x1cc4   :  { %v9602_v9 = vmul.f32 %v6644_v15, %v4002_v4  ;;  %v9704_v4 = vld [vmem:[#allocation7 + $0xc8] ss:$16 sps:$4 sm:$0xff]  }
0x1cc5   :  { %10900 = vst [vmem:[#allocation43_spill] sm:$0xff] %v9704_v4  ;;  %v9710_v15 = vld [vmem:[#allocation7 + $0xe8] ss:$16 sps:$4 sm:$0xff]  }
0x1cc6   :  { %v4011_v29 = vmul.f32 %v4010_v6, %v9602_v9  ;;  %v9707_v6 = vld [vmem:[#allocation7 + $0xec] ss:$16 sps:$4 sm:$0xff]   ;;  %10902 = vst [vmem:[#allocation45_spill] sm:$0xff] %v9710_v15 }
0x1cc7   :  { %10901 = vst [vmem:[#allocation44_spill] sm:$0xff] %v9707_v6 }
0x1cc8   :  { %v4012_v46 = vpack.c.bf16 %v4011_v29, %v4011_v29  ;;  %v9713_v29 = vld [vmem:[#allocation8 + $0xc] ss:$16 sps:$4 sm:$0xff]  }
0x1cc9   :  { %10903 = vst [vmem:[#allocation46_spill] sm:$0xff] %v9713_v29 }
0x1cca   :  { %5969 = vmatmul.mubr.bf16.vlgmr.msra.gmra.mrb[68].mxu1 %v4012_v46 }
0x1ccb   :  { %5973 = vmatpush3.bf16.msra.mxu1 %v9367_v27  ;;  %5976 = vmatprep.mubr.msk.bf16.mxu1 %vm7460_vm0, %v10577_v13  ;;  %v9620_v27 = vld [vmem:[#allocation5 + $0x2c] ss:$16 sps:$4 sm:$0xff]  }
0x1ccc   :  { %5974 = vmatprep.subr.bf16.mxu1 %v10577_v13 }
0x1ccf   :  { %5975 = vmatpush3.bf16.msra.mxu1 %v9373_v31  ;;  %v9624_v31 = vld [vmem:[#allocation5 + $0x28] ss:$16 sps:$4 sm:$0xff]  }
0x1cd0   :  { %4276 = vmatprep.subr.bf16.mxu1 %v9610_v59 }
0x1cd2   :  { %v3685_v48 = vpop.permute.xlu1 %3684 }
0x1cd3   :  { %v3687_v51 = vmul.f32 %v3685_v48, %v9576_v45  ;;  %v9627_v45 = vld [vmem:[#allocation5 + $0x4c] ss:$16 sps:$4 sm:$0xff]  }
0x1cd5   :  { %v4163_v42 = vpack.c.bf16 %v3687_v51, %v3687_v51 }
0x1cd6   :  { %5977 = vmatmul.mubr.msk.bf16.vlgmr.msra.gmra.mrb[68].mxu1 %vm1299_vm1, %v9433_v8  ;;  %v9630_v8 = vld [vmem:[#allocation5 + $0x48] ss:$16 sps:$4 sm:$0xff]  }
0x1cd7   :  { %4277 = vmatpush1.bf16.msra.mxu1 %v9616_v32  ;;  %4165 = vrot.lane.b32.xlu1 %v4163_v42, %s7461_s14 }
0x1cd8   :  { %4278 = vmatprep.subr.bf16.mxu1 %v9620_v27  ;;  %4308 = vmatprep.mubr.bf16.mxu1 %v10545_v57 }
0x1cdb   :  { %4279 = vmatpush1.bf16.msra.mxu1 %v9624_v31 }
0x1cdc   :  { %4280 = vmatprep.subr.bf16.mxu1 %v9627_v45 }
0x1cdf   :  { %4281 = vmatpush1.bf16.msra.mxu1 %v9630_v8 }
0x1ce0   :  { %4282 = vmatprep.subr.bf16.mxu1 %v9633_v35 }
0x1ce3   :  { %4283 = vmatpush1.bf16.msra.mxu1 %v9636_v21 }
0x1ce4   :  { %4284 = vmatprep.subr.bf16.mxu1 %v9639_v23 }
0x1ce7   :  { %4285 = vmatpush1.bf16.msra.mxu1 %v9642_v56 }
0x1ce8   :  { %4286 = vmatprep.subr.bf16.mxu1 %v9645_v50 }
0x1ceb   :  { %4287 = vmatpush1.bf16.msra.mxu1 %v9648_v10 }
0x1cec   :  { %4288 = vmatprep.subr.bf16.mxu1 %v9651_v43 }
0x1cef   :  { %4289 = vmatpush1.bf16.msra.mxu1 %v9654_v47 }
0x1cf0   :  { %4290 = vmatprep.subr.bf16.mxu1 %v9657_v39 }
0x1cf3   :  { %4291 = vmatpush1.bf16.msra.mxu1 %v9660_v37 }
0x1cf4   :  { %4407 = vmatprep.subr.bf16.mxu1 %v9663_v14 }
0x1cf6   :  { %4309 = vmatmul.mubr.bf16.vlgmr.msra.gmra.mrb[72].mxu1 %v9515_v28 }
0x1cf7   :  { %4408 = vmatpush1.bf16.msra.mxu1 %v9667_v60  ;;  %4439 = vmatprep.mubr.bf16.mxu1 %v10545_v57 }
0x1cf8   :  { %4409 = vmatprep.subr.bf16.mxu1 %v9671_v30 }
0x1cfb   :  { %4410 = vmatpush1.bf16.msra.mxu1 %v9674_v1 }
0x1cfc   :  { %4411 = vmatprep.subr.bf16.mxu1 %v9677_v22 }
0x1cff   :  { %4412 = vmatpush1.bf16.msra.mxu1 %v9680_v53 }
0x1d00   :  { %4413 = vmatprep.subr.bf16.mxu1 %v9683_v11 }
0x1d03   :  { %4414 = vmatpush1.bf16.msra.mxu1 %v9686_v5 }
0x1d04   :  { %4415 = vmatprep.subr.bf16.mxu1 %v9689_v61 }
0x1d07   :  { %4416 = vmatpush1.bf16.msra.mxu1 %v9692_v25 }
0x1d08   :  { %4417 = vmatprep.subr.bf16.mxu1 %v9695_v26 }
0x1d0b   :  { %4418 = vmatpush1.bf16.msra.mxu1 %v9698_v3 }
0x1d0c   :  { %4419 = vmatprep.subr.bf16.mxu1 %v9701_v34 }
0x1d0f   :  { %4420 = vmatpush1.bf16.msra.mxu1 %v9704_v4 }
0x1d10   :  { %4421 = vmatprep.subr.bf16.mxu1 %v9707_v6 }
0x1d13   :  { %4422 = vmatpush1.bf16.msra.mxu1 %v9710_v15  ;;  %v9821_v15 = vld [vmem:[#allocation7 + $0xe0] ss:$16 sps:$4 sm:$0xff]  }
0x1d14   :  { %4490 = vmatprep.subr.bf16.mxu1 %v9713_v29  ;;  %10920 = vst [vmem:[#allocation63_spill] sm:$0xff] %v9821_v15 }
0x1da9   :  { %v4087_v46 = vpop.f32.mrb[68].mxu1 }
0x1daa   :  { %v6135_v48 = vadd.f32 %v9416_v62, %v4087_v46  ;;  %v5978_v51 = vpop.f32.mrb[69].mxu1 }
0x1dab   :  { %v4090_v42 = vpop.f32.mrb[70].mxu1 }
0x1dac   :  { %6645 = vtanh.f32 %v6135_v48  ;;  %v5979_v34 = vpop.f32.mrb[71].mxu1  ;;  %v4094_v29 = vmul.f32 0.5, %v6135_v48  ;;  %v9785_v48 = vld [vmem:[#allocation7 + $0x20] ss:$16 sps:$4 sm:$0xff]  }
0x1dad   :  { %10908 = vst [vmem:[#allocation51_spill] sm:$0xff] %v9785_v48 }
0x1dae   :  { %6647 = vtanh.f32 %v4094_v29 }
0x1db6   :  { %v6646_v4 = vpop.eup %6645 }
0x1db7   :  { %4101 = vrot.lane.b32.xlu0 %v6646_v4, %s7440_s3 }
0x1db8   :  { %v6648_v61 = vpop.eup %6647 }
0x1db9   :  { %v4096_v62 = vmul.f32 0.5, %v6648_v61 }
0x1dbb   :  { %v4097_v46 = vadd.f32 0.5, %v4096_v62  ;;  %v9788_v62 = vld [vmem:[#allocation7 + $0x44] ss:$16 sps:$4 sm:$0xff]  }
0x1dbc   :  { %10909 = vst [vmem:[#allocation52_spill] sm:$0xff] %v9788_v62 }
0x1dbd   :  { %v4099_v34 = vmul.f32 %v4097_v46, %v9428_v24  ;;  %v4166_v24 = vpop.permute.xlu1 %4165 }
0x1dc9   :  { %v9718_v3 = vpop.f32.mrb[72].mxu1 }
0x1dca   :  { %v9720_v6 = vpop.f32.mrb[73].mxu1 }
0x1dcb   :  { %v4314_v26 = vpop.f32.mrb[74].mxu1 }
0x1dcc   :  { %v4315_v25 = vpop.f32.mrb[75].mxu1 }
0x1e29   :  { %v4102_v51 = vpop.permute.xlu0 %4101 }
0x1e2a   :  { %v4104_v42 = vmul.f32 %v4102_v51, %v4097_v46  ;;  %v9797_v51 = vld [vmem:[#allocation7 + $0x60] ss:$16 sps:$4 sm:$0xff]  }
0x1e2b   :  { %10912 = vst [vmem:[#allocation55_spill] sm:$0xff] %v9797_v51 }
0x1e2c   :  { %4106 = vrot.lane.b32.xlu0 %v4104_v42, %s7461_s14  ;;  %v9800_v42 = vld [vmem:[#allocation7 + $0x84] ss:$16 sps:$4 sm:$0xff]  }
0x1e2d   :  { %10913 = vst [vmem:[#allocation56_spill] sm:$0xff] %v9800_v42 }
0x1e9e   :  { %v4107_v4 = vpop.permute.xlu0 %4106 }
0x1e9f   :  { %v9726_v5 = vadd.f32 %v4107_v4, %v4099_v34  ;;  %v9803_v34 = vld [vmem:[#allocation7 + $0x80] ss:$16 sps:$4 sm:$0xff]   ;;  %v9806_v4 = vld [vmem:[#allocation7 + $0xa4] ss:$16 sps:$4 sm:$0xff]  }
0x1ea0   :  { %10914 = vst [vmem:[#allocation57_spill] sm:$0xff] %v9803_v34  ;;  %10915 = vst [vmem:[#allocation58_spill] sm:$0xff] %v9806_v4 }
0x1ea1   :  { %6649 = vtanh.f32 %v9726_v5 }
0x1eab   :  { %v6650_v11 = vpop.eup %6649 }
0x1eac   :  { %4112 = vrot.lane.b32.xlu0 %v6650_v11, %s7440_s3  ;;  %v9782_v11 = vld [vmem:[#allocation7 + $0x24] ss:$16 sps:$4 sm:$0xff]  }
0x1ead   :  { %10907 = vst [vmem:[#allocation50_spill] sm:$0xff] %v9782_v11 }
0x1f1e   :  { %v4113_v25 = vpop.permute.xlu0 %4112 }
0x1f1f   :  { %v4115_v26 = vmul.f32 %v4113_v25, %v4097_v46  ;;  %v9791_v46 = vld [vmem:[#allocation7 + $0x40] ss:$16 sps:$4 sm:$0xff]  }
0x1f20   :  { %10910 = vst [vmem:[#allocation53_spill] sm:$0xff] %v9791_v46  ;;  %v9809_v25 = vld [vmem:[#allocation7 + $0xa0] ss:$16 sps:$4 sm:$0xff]  }
0x1f21   :  { %v4116_v29 = vpack.c.bf16 %v4115_v26, %v4115_v26  ;;  %10916 = vst [vmem:[#allocation59_spill] sm:$0xff] %v9809_v25  ;;  %v9812_v26 = vld [vmem:[#allocation7 + $0xc4] ss:$16 sps:$4 sm:$0xff]  }
0x1f22   :  { %10917 = vst [vmem:[#allocation60_spill] sm:$0xff] %v9812_v26 }
0x1f23   :  { %4118 = vrot.lane.b32.xlu0 %v4116_v29, %s7461_s14  ;;  %v9815_v29 = vld [vmem:[#allocation7 + $0xc0] ss:$16 sps:$4 sm:$0xff]  }
0x1f24   :  { %10918 = vst [vmem:[#allocation61_spill] sm:$0xff] %v9815_v29 }
0x1f95   :  { %v9731_v61 = vpop.permute.xlu0 %4118 }
0x1f96   :  { %5985 = vmatmul.mubr.msk.bf16.vlgmr.msra.gmra.mrb[68].mxu0 %vm1299_vm1, %v9731_v61 }
0x1f97   :  { %5989 = vmatpush3.bf16.msra.mxu0 %v9437_v44  ;;  %5992 = vmatprep.mubr.msk.bf16.mxu0 %vm7460_vm0, %v10577_v13  ;;  %v9750_v44 = vld [vmem:[#allocation5 + $0x84] ss:$16 sps:$4 sm:$0xff]  }
0x1f98   :  { %5990 = vmatprep.subr.bf16.mxu0 %v10577_v13 }
0x1f9b   :  { %5991 = vmatpush3.bf16.msra.mxu0 %v9443_v18  ;;  %v9753_v18 = vld [vmem:[#allocation5 + $0x80] ss:$16 sps:$4 sm:$0xff]  }
0x1f9c   :  { %4235 = vmatprep.subr.bf16.mxu0 %v9446_v17  ;;  %v9756_v17 = vld [vmem:[#allocation5 + $0xa4] ss:$16 sps:$4 sm:$0xff]  }
0x1fa2   :  { %5993 = vmatmul.mubr.msk.bf16.vlgmr.msra.gmra.mrb[68].mxu0 %vm1299_vm1, %v4166_v24  ;;  %v9818_v24 = vld [vmem:[#allocation7 + $0xe4] ss:$16 sps:$4 sm:$0xff]  }
0x1fa3   :  { %4236 = vmatpush1.bf16.msra.mxu0 %v9450_v54  ;;  %4267 = vmatprep.mubr.bf16.mxu0 %v10545_v57  ;;  %v9759_v54 = vld [vmem:[#allocation5 + $0xa0] ss:$16 sps:$4 sm:$0xff]   ;;  %10919 = vst [vmem:[#allocation62_spill] sm:$0xff] %v9818_v24 }
0x1fa4   :  { %4237 = vmatprep.subr.bf16.mxu0 %v9454_v2  ;;  %v9762_v2 = vld [vmem:[#allocation5 + $0xc4] ss:$16 sps:$4 sm:$0xff]  }
0x1fa7   :  { %4238 = vmatpush1.bf16.msra.mxu0 %v9457_v12  ;;  %v9765_v12 = vld [vmem:[#allocation5 + $0xc0] ss:$16 sps:$4 sm:$0xff]  }
0x1fa8   :  { %4239 = vmatprep.subr.bf16.mxu0 %v9460_v63  ;;  %v9768_v63 = vld [vmem:[#allocation5 + $0xe4] ss:$16 sps:$4 sm:$0xff]  }
0x1fab   :  { %4240 = vmatpush1.bf16.msra.mxu0 %v9463_v0  ;;  %v9771_v0 = vld [vmem:[#allocation5 + $0xe0] ss:$16 sps:$4 sm:$0xff]  }
0x1fac   :  { %4241 = vmatprep.subr.bf16.mxu0 %v9466_v55  ;;  %10904 = vst [vmem:[#allocation47_spill] sm:$0xff] %v9771_v0  ;;  %v9774_v55 = vld [vmem:[#allocation7 + $0x4] ss:$16 sps:$4 sm:$0xff]  }
0x1fad   :  { %10905 = vst [vmem:[#allocation48_spill] sm:$0xff] %v9774_v55 }
0x1faf   :  { %4242 = vmatpush1.bf16.msra.mxu0 %v9469_v19  ;;  %v9778_v19 = vld [vmem:[#allocation7] ss:$16 sps:$4 sm:$0xff]  }
0x1fb0   :  { %4243 = vmatprep.subr.bf16.mxu0 %v9750_v44  ;;  %10906 = vst [vmem:[#allocation49_spill] sm:$0xff] %v9778_v19 }
0x1fb3   :  { %4244 = vmatpush1.bf16.msra.mxu0 %v9753_v18 }
0x1fb4   :  { %4245 = vmatprep.subr.bf16.mxu0 %v9756_v17 }
0x1fb7   :  { %4246 = vmatpush1.bf16.msra.mxu0 %v9759_v54 }
0x1fb8   :  { %4247 = vmatprep.subr.bf16.mxu0 %v9762_v2 }
0x1fbb   :  { %4248 = vmatpush1.bf16.msra.mxu0 %v9765_v12 }
0x1fbc   :  { %4249 = vmatprep.subr.bf16.mxu0 %v9768_v63 }
0x1fbf   :  { %4250 = vmatpush1.bf16.msra.mxu0 %v9771_v0 }
0x1fc0   :  { %4366 = vmatprep.subr.bf16.mxu0 %v9774_v55 }
0x1fc2   :  { %4268 = vmatmul.mubr.bf16.vlgmr.msra.gmra.mrb[72].mxu0 %v9515_v28  ;;  %v9794_v28 = vld [vmem:[#allocation7 + $0x64] ss:$16 sps:$4 sm:$0xff]  }
0x1fc3   :  { %4367 = vmatpush1.bf16.msra.mxu0 %v9778_v19  ;;  %4398 = vmatprep.mubr.bf16.mxu0 %v10545_v57  ;;  %10911 = vst [vmem:[#allocation54_spill] sm:$0xff] %v9794_v28 }
0x1fc4   :  { %4368 = vmatprep.subr.bf16.mxu0 %v9782_v11 }
0x1fc7   :  { %4369 = vmatpush1.bf16.msra.mxu0 %v9785_v48 }
0x1fc8   :  { %4370 = vmatprep.subr.bf16.mxu0 %v9788_v62 }
0x1fcb   :  { %4371 = vmatpush1.bf16.msra.mxu0 %v9791_v46 }
0x1fcc   :  { %4372 = vmatprep.subr.bf16.mxu0 %v9794_v28 }
0x1fcf   :  { %4373 = vmatpush1.bf16.msra.mxu0 %v9797_v51 }
0x1fd0   :  { %4374 = vmatprep.subr.bf16.mxu0 %v9800_v42 }
0x1fd3   :  { %4375 = vmatpush1.bf16.msra.mxu0 %v9803_v34 }
0x1fd4   :  { %4376 = vmatprep.subr.bf16.mxu0 %v9806_v4  ;;  %v9824_v4 = vld [vmem:[#allocation8 + $0x4] ss:$16 sps:$4 sm:$0xff]  }
0x1fd5   :  { %10921 = vst [vmem:[#allocation64_spill] sm:$0xff] %v9824_v4 }
0x1fd7   :  { %4377 = vmatpush1.bf16.msra.mxu0 %v9809_v25 }
0x1fd8   :  { %4378 = vmatprep.subr.bf16.mxu0 %v9812_v26 }
0x1fdb   :  { %4379 = vmatpush1.bf16.msra.mxu0 %v9815_v29 }
0x1fdc   :  { %4380 = vmatprep.subr.bf16.mxu0 %v9818_v24 }
0x1fdf   :  { %4381 = vmatpush1.bf16.msra.mxu0 %v9821_v15 }
0x1fe0   :  { %4449 = vmatprep.subr.bf16.mxu0 %v9824_v4  ;;  %v10922_v4 = vcombine.low %v9718_v3, %v9720_v6 }
0x1fe2   :  { %v4336_v48 = vrot.slane %v10922_v4, %v10596_v36 }
0x2075   :  { %v4204_v25 = vpop.f32.mrb[68].mxu0 }
0x2076   :  { %v9828_v34 = vadd.f32 %v9499_v38, %v4204_v25  ;;  %v5994_v26 = vpop.f32.mrb[69].mxu0  ;;  %v4234_v25 = vld [vmem:[#allocation2 + $0x30] sm:$0xff] }
0x2077   :  { %v4207_v42 = vpop.f32.mrb[70].mxu0 }
0x2078   :  { %6651 = vtanh.f32 %v9828_v34  ;;  %v5995_v29 = vpop.f32.mrb[71].mxu0 }
0x2082   :  { %v6652_v51 = vpop.eup %6651 }
0x2083   :  { %4218 = vrot.lane.b32.xlu1 %v6652_v51, %s7440_s3 }
0x2095   :  { %v4269_v24 = vpop.f32.mrb[72].mxu0 }
0x2096   :  { %v4271_v28 = vpop.f32.mrb[73].mxu0 }
0x2097   :  { %v4321_v46 = vcombine.low %v4269_v24, %v4271_v28  ;;  %v4273_v15 = vpop.f32.mrb[74].mxu0 }
0x2098   :  { %v4274_v62 = vpop.f32.mrb[75].mxu0 }
0x2099   :  { %v4329_v38 = vrot.slane %v4321_v46, %v10596_v36 }
0x209b   :  { %v4337_v42 = vcombine.low %v4329_v38, %v4336_v48 }
0x209d   :  { %v4339_v26 = vadd.f32 %v4337_v42, %v4234_v25 }
0x209f   :  { %v4340_v11 = vmul.f32 0.5, %v4339_v26  ;;  %v4345_v29 = vrot.slane %v4339_v26, 2  ;;  %v4351_v51 = vrot.slane %v4339_v26, 4  ;;  %v4354_v55 = vrot.slane %v4339_v26, 6 }
0x20a1   :  { %6653 = vtanh.f32 %v4340_v11  ;;  %v4347_v19 = vmul.f32 0.5, %v4345_v29  ;;  %v4356_v15 = vmul.f32 0.5, %v4354_v55  ;;  %v9845_v29 = vld [vmem:[#allocation8] ss:$16 sps:$4 sm:$0xff]  }
0x20a3   :  { %6655 = vtanh.f32 %v4347_v19 }
0x20a4   :  { %6657 = vtanh.f32 %v4351_v51  ;;  %v9854_v51 = vld [vmem:[#allocation8 + $0x2c] ss:$16 sps:$4 sm:$0xff]  }
0x20a5   :  { %6659 = vtanh.f32 %v4356_v15  ;;  %v9859_v15 = vld [vmem:[#allocation8 + $0x20] ss:$16 sps:$4 sm:$0xff]  }
0x20ab   :  { %v6654_v62 = vpop.eup %6653 }
0x20ac   :  { %v4342_v28 = vmul.f32 0.5, %v6654_v62  ;;  %v9862_v62 = vld [vmem:[#allocation8 + $0x28] ss:$16 sps:$4 sm:$0xff]  }
0x20ad   :  { %v6656_v24 = vpop.eup %6655  ;;  %10923 = vst [vmem:[#allocation65_spill] sm:$0xff] %v9862_v62 }
0x20ae   :  { %v4343_v0 = vadd.f32 0.5, %v4342_v28  ;;  %v4349_v3 = vmul.f32 0.5, %v6656_v24  ;;  %v6658_v46 = vpop.eup %6657  ;;  %v9865_v28 = vld [vmem:[#allocation8 + $0x44] ss:$16 sps:$4 sm:$0xff]   ;;  %v9868_v24 = vld [vmem:[#allocation8 + $0x4c] ss:$16 sps:$4 sm:$0xff]  }
0x20af   :  { %v6660_v19 = vpop.eup %6659  ;;  %10924 = vst [vmem:[#allocation66_spill] sm:$0xff] %v9865_v28  ;;  %10925 = vst [vmem:[#allocation67_spill] sm:$0xff] %v9868_v24 }
0x20b0   :  { %v4350_v6 = vadd.f32 0.5, %v4349_v3  ;;  %v4361_v4 = vmul.f32 %v6658_v46, %v4343_v0  ;;  %v4358_v11 = vmul.f32 0.5, %v6660_v19  ;;  %v9851_v0 = vld [vmem:[#allocation8 + $0x24] ss:$16 sps:$4 sm:$0xff]   ;;  %v9871_v3 = vld [vmem:[#allocation8 + $0x40] ss:$16 sps:$4 sm:$0xff]  }
0x20b1   :  { %10926 = vst [vmem:[#allocation68_spill] sm:$0xff] %v9871_v3  ;;  %v9877_v46 = vld [vmem:[#allocation8 + $0x64] ss:$16 sps:$4 sm:$0xff]   ;;  %v9886_v19 = vld [vmem:[#allocation8 + $0x68] ss:$16 sps:$4 sm:$0xff]  }
0x20b2   :  { %v4360_v48 = vmul.f32 %v4350_v6, %v9512_v7  ;;  %v4359_v25 = vadd.f32 0.5, %v4358_v11  ;;  %v9848_v7 = vld [vmem:[#allocation8 + $0x8] ss:$16 sps:$4 sm:$0xff]   ;;  %10928 = vst [vmem:[#allocation70_spill] sm:$0xff] %v9877_v46  ;;  %10931 = vst [vmem:[#allocation73_spill] sm:$0xff] %v9886_v19 }
0x20b3   :  { %v9874_v6 = vld [vmem:[#allocation8 + $0x48] ss:$16 sps:$4 sm:$0xff]   ;;  %v9889_v11 = vld [vmem:[#allocation8 + $0x84] ss:$16 sps:$4 sm:$0xff]  }
0x20b4   :  { %v9838_v38 = vadd.f32 %v4361_v4, %v4360_v48  ;;  %10927 = vst [vmem:[#allocation69_spill] sm:$0xff] %v9874_v6  ;;  %v9880_v48 = vld [vmem:[#allocation8 + $0x6c] ss:$16 sps:$4 sm:$0xff]   ;;  %v9883_v4 = vld [vmem:[#allocation8 + $0x60] ss:$16 sps:$4 sm:$0xff]   ;;  %10932 = vst [vmem:[#allocation74_spill] sm:$0xff] %v9889_v11 }
0x20b5   :  { %10929 = vst [vmem:[#allocation71_spill] sm:$0xff] %v9880_v48  ;;  %10930 = vst [vmem:[#allocation72_spill] sm:$0xff] %v9883_v4 }
0x20b6   :  { %6661 = vtanh.f32 %v9838_v38 }
0x20c0   :  { %v6662_v42 = vpop.eup %6661 }
0x20c1   :  { %v4364_v55 = vmul.f32 %v6662_v42, %v4359_v25  ;;  %v9892_v25 = vld [vmem:[#allocation8 + $0x8c] ss:$16 sps:$4 sm:$0xff]   ;;  %v9895_v42 = vld [vmem:[#allocation8 + $0x80] ss:$16 sps:$4 sm:$0xff]  }
0x20c2   :  { %10933 = vst [vmem:[#allocation75_spill] sm:$0xff] %v9892_v25  ;;  %10934 = vst [vmem:[#allocation76_spill] sm:$0xff] %v9895_v42 }
0x20c3   :  { %v9841_v26 = vpack.c.bf16 %v4364_v55, %v4364_v55  ;;  %v9898_v55 = vld [vmem:[#allocation8 + $0x88] ss:$16 sps:$4 sm:$0xff]  }
0x20c4   :  { %10935 = vst [vmem:[#allocation77_spill] sm:$0xff] %v9898_v55 }
0x20c5   :  { %4399 = vmatmul.mubr.bf16.vlgmr.msra.gmra.mrb[76].mxu0 %v9841_v26  ;;  %4440 = vmatmul.mubr.bf16.vlgmr.msra.gmra.mrb[76].mxu1 %v9841_v26 }
0x20c6   :  { %4450 = vmatpush1.bf16.msra.mxu0 %v9845_v29  ;;  %4491 = vmatpush1.bf16.msra.mxu1 %v9848_v7 }
0x20c7   :  { %4451 = vmatprep.subr.bf16.mxu0 %v9851_v0  ;;  %4492 = vmatprep.subr.bf16.mxu1 %v9854_v51 }
0x20c8   :  { %4481 = vmatprep.mubr.bf16.mxu0 %v10545_v57  ;;  %4522 = vmatprep.mubr.bf16.mxu1 %v10545_v57 }
0x20ca   :  { %4452 = vmatpush1.bf16.msra.mxu0 %v9859_v15  ;;  %4493 = vmatpush1.bf16.msra.mxu1 %v9862_v62 }
0x20cb   :  { %4453 = vmatprep.subr.bf16.mxu0 %v9865_v28  ;;  %4494 = vmatprep.subr.bf16.mxu1 %v9868_v24 }
0x20ce   :  { %4454 = vmatpush1.bf16.msra.mxu0 %v9871_v3  ;;  %4495 = vmatpush1.bf16.msra.mxu1 %v9874_v6 }
0x20cf   :  { %4455 = vmatprep.subr.bf16.mxu0 %v9877_v46  ;;  %4496 = vmatprep.subr.bf16.mxu1 %v9880_v48  ;;  %v9926_v48 = vld [vmem:[#allocation8 + $0xe4] ss:$16 sps:$4 sm:$0xff]  }
0x20d0   :  { %10944 = vst [vmem:[#allocation86_spill] sm:$0xff] %v9926_v48 }
0x20d2   :  { %4456 = vmatpush1.bf16.msra.mxu0 %v9883_v4  ;;  %4497 = vmatpush1.bf16.msra.mxu1 %v9886_v19  ;;  %v9901_v4 = vld [vmem:[#allocation8 + $0xa4] ss:$16 sps:$4 sm:$0xff]   ;;  %v9904_v19 = vld [vmem:[#allocation8 + $0xac] ss:$16 sps:$4 sm:$0xff]  }
0x20d3   :  { %4457 = vmatprep.subr.bf16.mxu0 %v9889_v11  ;;  %4498 = vmatprep.subr.bf16.mxu1 %v9892_v25  ;;  %10936 = vst [vmem:[#allocation78_spill] sm:$0xff] %v9901_v4  ;;  %10937 = vst [vmem:[#allocation79_spill] sm:$0xff] %v9904_v19  ;;  %v9907_v11 = vld [vmem:[#allocation8 + $0xa0] ss:$16 sps:$4 sm:$0xff]   ;;  %v9910_v25 = vld [vmem:[#allocation8 + $0xa8] ss:$16 sps:$4 sm:$0xff]  }
0x20d4   :  { %10938 = vst [vmem:[#allocation80_spill] sm:$0xff] %v9907_v11  ;;  %10939 = vst [vmem:[#allocation81_spill] sm:$0xff] %v9910_v25 }
0x20d6   :  { %4458 = vmatpush1.bf16.msra.mxu0 %v9895_v42  ;;  %4499 = vmatpush1.bf16.msra.mxu1 %v9898_v55  ;;  %v9913_v42 = vld [vmem:[#allocation8 + $0xc4] ss:$16 sps:$4 sm:$0xff]   ;;  %v9916_v55 = vld [vmem:[#allocation8 + $0xcc] ss:$16 sps:$4 sm:$0xff]  }
0x20d7   :  { %4459 = vmatprep.subr.bf16.mxu0 %v9901_v4  ;;  %4500 = vmatprep.subr.bf16.mxu1 %v9904_v19  ;;  %10940 = vst [vmem:[#allocation82_spill] sm:$0xff] %v9913_v42  ;;  %10941 = vst [vmem:[#allocation83_spill] sm:$0xff] %v9916_v55  ;;  %v9919_v4 = vld [vmem:[#allocation8 + $0xc0] ss:$16 sps:$4 sm:$0xff]   ;;  %v9922_v19 = vld [vmem:[#allocation8 + $0xc8] ss:$16 sps:$4 sm:$0xff]  }
0x20d8   :  { %10942 = vst [vmem:[#allocation84_spill] sm:$0xff] %v9919_v4  ;;  %10943 = vst [vmem:[#allocation85_spill] sm:$0xff] %v9922_v19 }
0x20da   :  { %4460 = vmatpush1.bf16.msra.mxu0 %v9907_v11  ;;  %4501 = vmatpush1.bf16.msra.mxu1 %v9910_v25  ;;  %v4211_v11 = vmul.f32 0.5, %v9828_v34  ;;  %v9929_v25 = vld [vmem:[#allocation8 + $0xec] ss:$16 sps:$4 sm:$0xff]   ;;  %v4448_v34 = vpack.c.bf16 %v9602_v9, %v9602_v9 }
0x20db   :  { %4461 = vmatprep.subr.bf16.mxu0 %v9913_v42  ;;  %4502 = vmatprep.subr.bf16.mxu1 %v9916_v55  ;;  %10945 = vst [vmem:[#allocation87_spill] sm:$0xff] %v9929_v25  ;;  %v9932_v42 = vld [vmem:[#allocation8 + $0xe0] ss:$16 sps:$4 sm:$0xff]   ;;  %v9935_v55 = vld [vmem:[#allocation8 + $0xe8] ss:$16 sps:$4 sm:$0xff]  }
0x20dc   :  { %10946 = vst [vmem:[#allocation88_spill] sm:$0xff] %v9932_v42  ;;  %10947 = vst [vmem:[#allocation89_spill] sm:$0xff] %v9935_v55  ;;  %6663 = vtanh.f32 %v4211_v11  ;;  %v9952_v9 = vld [vmem:[#allocation11 + $0x8] sm:$0xff]  }
0x20dd   :  { %10949 = vst [vmem:[#allocation91_spill] sm:$0xff] %v9952_v9 }
0x20de   :  { %4462 = vmatpush1.bf16.msra.mxu0 %v9919_v4  ;;  %4503 = vmatpush1.bf16.msra.mxu1 %v9922_v19 }
0x20df   :  { %4463 = vmatprep.subr.bf16.mxu0 %v9926_v48  ;;  %4504 = vmatprep.subr.bf16.mxu1 %v9929_v25  ;;  %v9942_v48 = vld [vmem:[#allocation11] sm:$0xff]  }
0x20e0   :  { %10948 = vst [vmem:[#allocation90_spill] sm:$0xff] %v9942_v48 }
0x20e2   :  { %4464 = vmatpush1.bf16.msra.mxu0 %v9932_v42  ;;  %4505 = vmatpush1.bf16.msra.mxu1 %v9935_v55  ;;  %v9969_v42 = vld [vmem:[#allocation11 + $0x20] sm:$0xff]  }
0x20e3   :  { %5996 = vmatprep.subr.bf16.mxu0 %v10577_v13  ;;  %6024 = vmatprep.subr.bf16.mxu1 %v10577_v13  ;;  %10952 = vst [vmem:[#allocation95_spill] sm:$0xff] %v9969_v42 }
0x20e5   :  { %4482 = vmatmul.mubr.bf16.vlgmr.msra.gmra.mrb[76].mxu0 %v4448_v34  ;;  %4523 = vmatmul.mubr.bf16.vlgmr.msra.gmra.mrb[76].mxu1 %v4448_v34  ;;  %v9958_v34 = vld [vmem:[#allocation11 + $0x10] sm:$0xff]  }
0x20e6   :  { %5997 = vmatpush3.bf16.msra.mxu0 %v9942_v48  ;;  %6012 = vmatprep.mubr.msk.bf16.mxu0 %vm7460_vm0, %v10577_v13  ;;  %v6664_v11 = vpop.eup %6663  ;;  %10950 = vst [vmem:[#allocation92_spill] sm:$0xff] %v9958_v34  ;;  %v9962_v48 = vld [vmem:[#allocation11 + $0x18] sm:$0xff]  }
0x20e7   :  { %5998 = vmatprep.subr.bf16.mxu0 %v10577_v13  ;;  %6025 = vmatpush3.bf16.msra.mxu1 %v9560_v52  ;;  %v4213_v52 = vmul.f32 0.5, %v6664_v11  ;;  %10951 = vst [vmem:[#allocation93_spill] sm:$0xff] %v9962_v48  ;;  %v9974_v11 = vld [vmem:[#allocation11 + $0x28] sm:$0xff]  }
0x20e8   :  { %6026 = vmatprep.subr.bf16.mxu1 %v10577_v13  ;;  %6028 = vmatprep.mubr.msk.bf16.mxu1 %vm7460_vm0, %v10577_v13  ;;  %10953 = vst [vmem:[#allocation96_spill] sm:$0xff] %v9974_v11 }
0x20ea   :  { %5999 = vmatpush3.bf16.msra.mxu0 %v9952_v9  ;;  %v9966_v9 = vadd.f32 0.5, %v4213_v52 }
0x20eb   :  { %6000 = vmatprep.subr.bf16.mxu0 %v10577_v13  ;;  %6027 = vmatpush3.bf16.msra.mxu1 %v9568_v16 }
0x20ec   :  { %6032 = vmatprep.subr.bf16.mxu1 %v10577_v13  ;;  %v4216_v52 = vmul.f32 %v9966_v9, %v9590_v58 }
0x20ee   :  { %6001 = vmatpush3.bf16.msra.mxu0 %v9958_v34 }
0x20ef   :  { %6002 = vmatprep.subr.bf16.mxu0 %v10577_v13 }
0x20f2   :  { %6003 = vmatpush3.bf16.msra.mxu0 %v9962_v48  ;;  %v9978_v48 = vld [vmem:[#allocation11 + $0x30] sm:$0xff]  }
0x20f3   :  { %6004 = vmatprep.subr.bf16.mxu0 %v10577_v13  ;;  %10954 = vst [vmem:[#allocation97_spill] sm:$0xff] %v9978_v48 }
0x20f5   :  { %v4219_v55 = vpop.permute.xlu1 %4218 }
0x20f6   :  { %v4221_v16 = vmul.f32 %v4219_v55, %v9966_v9  ;;  %6005 = vmatpush3.bf16.msra.mxu0 %v9969_v42  ;;  %v9982_v55 = vld [vmem:[#allocation11 + $0x38] sm:$0xff]  }
0x20f7   :  { %6006 = vmatprep.subr.bf16.mxu0 %v10577_v13  ;;  %10955 = vst [vmem:[#allocation98_spill] sm:$0xff] %v9982_v55 }
0x20f8   :  { %4223 = vrot.lane.b32.xlu1 %v4221_v16, %s7461_s14 }
0x20fa   :  { %6007 = vmatpush3.bf16.msra.mxu0 %v9974_v11 }
0x20fb   :  { %6008 = vmatprep.subr.bf16.mxu0 %v10577_v13 }
0x20fe   :  { %6009 = vmatpush3.bf16.msra.mxu0 %v9978_v48 }
0x20ff   :  { %6010 = vmatprep.subr.bf16.mxu0 %v10577_v13 }
0x2102   :  { %6011 = vmatpush3.bf16.msra.mxu0 %v9982_v55 }
0x2103   :  { %6016 = vmatprep.subr.bf16.mxu0 %v10577_v13 }
0x216a   :  { %v4224_v16 = vpop.permute.xlu1 %4223 }
0x216b   :  { %v9988_v42 = vadd.f32 %v4224_v16, %v4216_v52 }
0x216d   :  { %10956 = vst [vmem:[#allocation99_spill] sm:$0xff] %v9988_v42  ;;  %6665 = vtanh.f32 %v9988_v42 }
0x2177   :  { %v6666_v11 = vpop.eup %6665 }
0x2178   :  { %4229 = vrot.lane.b32.xlu1 %v6666_v11, %s7440_s3 }
0x21b8   :  { %v4483_v48 = vpop.f32.mrb[76].mxu0  ;;  %v4524_v34 = vpop.f32.mrb[76].mxu1 }
0x21b9   :  { %v6137_v25 = vadd.f32 %v4483_v48, %v10892_v40  ;;  %v4485_v19 = vpop.f32.mrb[77].mxu0  ;;  %v4526_v4 = vpop.f32.mrb[77].mxu1  ;;  %v6139_v16 = vadd.f32 %v4524_v34, %v8082_v49 }
0x21ba   :  { %v6138_v55 = vadd.f32 %v4485_v19, %v8079_v41  ;;  %v4487_v46 = vpop.f32.mrb[78].mxu0  ;;  %v4528_v6 = vpop.f32.mrb[78].mxu1  ;;  %v6140_v11 = vadd.f32 %v4526_v4, %v8087_v33 }
0x21bb   :  { %v4535_v3 = vmul.f32 0.5, %v6137_v25  ;;  %v4488_v58 = vpop.f32.mrb[79].mxu0  ;;  %v4529_v24 = vpop.f32.mrb[79].mxu1 }
0x21bc   :  { %v4539_v52 = vmul.f32 0.5, %v6138_v55  ;;  %v4544_v42 = vmul.f32 0.5, %v6140_v11  ;;  %v4554_v58 = vld [vmem:[#allocation20 + $0x6] sm:$0x1] }
0x21bd   :  { %6667 = vtanh.f32 %v4535_v3 }
0x21be   :  { %6669 = vtanh.f32 %v4539_v52  ;;  %v4555_v52 = vunpack.c.l.bf16 %v4554_v58 }
0x21bf   :  { %6671 = vtanh.f32 %v6139_v16 }
0x21c0   :  { %6673 = vtanh.f32 %v4544_v42 }
0x21c7   :  { %v6668_v28 = vpop.eup %6667 }
0x21c8   :  { %v6670_v48 = vpop.eup %6669  ;;  %v4537_v40 = vmul.f32 0.5, %v6668_v28 }
0x21c9   :  { %v4541_v62 = vmul.f32 0.5, %v6670_v48  ;;  %v6672_v46 = vpop.eup %6671 }
0x21ca   :  { %v4538_v19 = vadd.f32 0.5, %v4537_v40  ;;  %v6674_v3 = vpop.eup %6673 }
0x21cb   :  { %v4542_v6 = vadd.f32 0.5, %v4541_v62  ;;  %v4546_v34 = vmul.f32 0.5, %v6674_v3  ;;  %v10003_v62 = vld [vmem:[#allocation13] sm:$0xff]  }
0x21cc   :  { %v4549_v25 = vmul.f32 %v6672_v46, %v4538_v19 }
0x21cd   :  { %v4548_v24 = vmul.f32 %v4542_v6, %v9599_v20  ;;  %v4547_v4 = vadd.f32 0.5, %v4546_v34  ;;  %v10009_v20 = vld [vmem:[#allocation13 + $0x8] sm:$0xff]  }
0x21cf   :  { %v9997_v55 = vadd.f32 %v4549_v25, %v4548_v24 }
0x21d1   :  { %6675 = vtanh.f32 %v9997_v55 }
0x21db   :  { %v6676_v16 = vpop.eup %6675 }
0x21dc   :  { %v10000_v11 = vmul.f32 %v6676_v16, %v4547_v4 }
0x21de   :  { %v4556_v28 = vmul.f32 %v4555_v52, %v10000_v11 }
0x21e0   :  { %v4557_v40 = vpack.c.bf16 %v4556_v28, %v4556_v28 }
0x21e2   :  { %6013 = vmatmul.mubr.bf16.vlgmr.msra.gmra.mrb[80].mxu0 %v4557_v40 }
0x21e3   :  { %6017 = vmatpush3.bf16.msra.mxu0 %v10003_v62  ;;  %6020 = vmatprep.mubr.msk.bf16.mxu0 %vm7460_vm0, %v10577_v13 }
0x21e4   :  { %6018 = vmatprep.subr.bf16.mxu0 %v10577_v13 }
0x21e7   :  { %6019 = vmatpush3.bf16.msra.mxu0 %v10009_v20 }
0x21e8   :  { %4821 = vmatprep.subr.bf16.mxu0 %v9610_v59  ;;  %v10957_v59 = vld [vmem:[#allocation36_spill] sm:$0xff] }
0x21ea   :  { %v4230_v42 = vpop.permute.xlu1 %4229 }
0x21eb   :  { %v4232_v48 = vmul.f32 %v4230_v42, %v9966_v9 }
0x21ed   :  { %v4708_v19 = vpack.c.bf16 %v4232_v48, %v4232_v48  ;;  %v10073_v48 = vld [vmem:[#allocation17] sm:$0xff]  }
0x21ee   :  { %6021 = vmatmul.mubr.msk.bf16.vlgmr.msra.gmra.mrb[80].mxu0 %vm1299_vm1, %v9731_v61 }
0x21ef   :  { %4822 = vmatpush1.bf16.msra.mxu0 %v9616_v32  ;;  %4710 = vrot.lane.b32.xlu1 %v4708_v19, %s7461_s14  ;;  %v10958_v32 = vld [vmem:[#allocation37_spill] sm:$0xff] }
0x21f0   :  { %4823 = vmatprep.subr.bf16.mxu0 %v9620_v27  ;;  %4853 = vmatprep.mubr.bf16.mxu0 %v10545_v57  ;;  %v10959_v27 = vld [vmem:[#allocation38_spill] sm:$0xff] }
0x21f1   :  { %v7054_v19 = vld [vmem:[#allocation5 + $0x4] ss:$16 sps:$4 sm:$0xff]  }
0x21f3   :  { %4824 = vmatpush1.bf16.msra.mxu0 %v9624_v31  ;;  %v10960_v31 = vld [vmem:[#allocation39_spill] sm:$0xff] }
0x21f4   :  { %4825 = vmatprep.subr.bf16.mxu0 %v9627_v45  ;;  %v10961_v45 = vld [vmem:[#allocation40_spill] sm:$0xff] }
0x21f7   :  { %4826 = vmatpush1.bf16.msra.mxu0 %v9630_v8  ;;  %v10962_v8 = vld [vmem:[#allocation41_spill] sm:$0xff] }
0x21f8   :  { %4827 = vmatprep.subr.bf16.mxu0 %v9633_v35  ;;  %v10963_v35 = vld [vmem:[#allocation42_spill] sm:$0xff] }
0x21fb   :  { %4828 = vmatpush1.bf16.msra.mxu0 %v9636_v21  ;;  %v10964_v21 = vld [vmem:[#allocation43_spill] sm:$0xff] }
0x21fc   :  { %4829 = vmatprep.subr.bf16.mxu0 %v9639_v23  ;;  %v10965_v23 = vld [vmem:[#allocation44_spill] sm:$0xff] }
0x21ff   :  { %4830 = vmatpush1.bf16.msra.mxu0 %v9642_v56  ;;  %v10966_v56 = vld [vmem:[#allocation45_spill] sm:$0xff] }
0x2200   :  { %4831 = vmatprep.subr.bf16.mxu0 %v9645_v50  ;;  %v10967_v50 = vld [vmem:[#allocation46_spill] sm:$0xff] }
0x2203   :  { %4832 = vmatpush1.bf16.msra.mxu0 %v9648_v10 }
0x2204   :  { %4833 = vmatprep.subr.bf16.mxu0 %v9651_v43  ;;  %v10052_v43 = vld [vmem:[#allocation14] ss:$0 sm:$0xff] }
0x2207   :  { %4834 = vmatpush1.bf16.msra.mxu0 %v9654_v47 }
0x2208   :  { %4835 = vmatprep.subr.bf16.mxu0 %v9657_v39 }
0x220b   :  { %4836 = vmatpush1.bf16.msra.mxu0 %v9660_v37 }
0x220c   :  { %4952 = vmatprep.subr.bf16.mxu0 %v9663_v14 }
0x220e   :  { %4854 = vmatmul.mubr.bf16.vlgmr.msra.gmra.mrb[84].mxu0 %v9841_v26 }
0x220f   :  { %4953 = vmatpush1.bf16.msra.mxu0 %v9667_v60  ;;  %4984 = vmatprep.mubr.bf16.mxu0 %v10545_v57 }
0x2210   :  { %4954 = vmatprep.subr.bf16.mxu0 %v9671_v30 }
0x2213   :  { %4955 = vmatpush1.bf16.msra.mxu0 %v9674_v1 }
0x2214   :  { %4956 = vmatprep.subr.bf16.mxu0 %v9677_v22 }
0x2217   :  { %4957 = vmatpush1.bf16.msra.mxu0 %v9680_v53 }
0x2218   :  { %4958 = vmatprep.subr.bf16.mxu0 %v10957_v59 }
0x221b   :  { %4959 = vmatpush1.bf16.msra.mxu0 %v10958_v32  ;;  %v7055_v32 = vld [vmem:[#allocation5] ss:$16 sps:$4 sm:$0xff]  }
0x221c   :  { %4960 = vmatprep.subr.bf16.mxu0 %v10959_v27  ;;  %v7056_v27 = vld [vmem:[#allocation5 + $0x24] ss:$16 sps:$4 sm:$0xff]  }
0x221f   :  { %4961 = vmatpush1.bf16.msra.mxu0 %v10960_v31  ;;  %v7057_v31 = vld [vmem:[#allocation5 + $0x20] ss:$16 sps:$4 sm:$0xff]  }
0x2220   :  { %4962 = vmatprep.subr.bf16.mxu0 %v10961_v45  ;;  %v7058_v45 = vld [vmem:[#allocation5 + $0x44] ss:$16 sps:$4 sm:$0xff]  }
0x2223   :  { %4963 = vmatpush1.bf16.msra.mxu0 %v10962_v8  ;;  %v7059_v8 = vld [vmem:[#allocation5 + $0x40] ss:$16 sps:$4 sm:$0xff]  }
0x2224   :  { %4964 = vmatprep.subr.bf16.mxu0 %v10963_v35  ;;  %v7060_v35 = vld [vmem:[#allocation5 + $0x64] ss:$16 sps:$4 sm:$0xff]  }
0x2227   :  { %4965 = vmatpush1.bf16.msra.mxu0 %v10964_v21  ;;  %v7061_v21 = vld [vmem:[#allocation5 + $0x60] ss:$16 sps:$4 sm:$0xff]  }
0x2228   :  { %4966 = vmatprep.subr.bf16.mxu0 %v10965_v23  ;;  %v10968_v23 = vld [vmem:[#allocation47_spill] sm:$0xff] }
0x222b   :  { %4967 = vmatpush1.bf16.msra.mxu0 %v10966_v56  ;;  %v10969_v56 = vld [vmem:[#allocation48_spill] sm:$0xff] }
0x222c   :  { %5035 = vmatprep.subr.bf16.mxu0 %v10967_v50  ;;  %v10970_v50 = vld [vmem:[#allocation49_spill] sm:$0xff] }
0x2261   :  { %v4711_v59 = vpop.permute.xlu1 %4710 }
0x22c1   :  { %v4632_v10 = vpop.f32.mrb[80].mxu0 }
0x22c2   :  { %v6141_v47 = vadd.f32 %v10052_v43, %v4632_v10  ;;  %v6022_v39 = vpop.f32.mrb[81].mxu0  ;;  %v10978_v10 = vld [vmem:[#allocation57_spill] sm:$0xff] }
0x22c3   :  { %v4635_v37 = vpop.f32.mrb[82].mxu0  ;;  %v10981_v39 = vld [vmem:[#allocation60_spill] sm:$0xff] }
0x22c4   :  { %6677 = vtanh.f32 %v6141_v47  ;;  %v6023_v14 = vpop.f32.mrb[83].mxu0  ;;  %v4639_v9 = vmul.f32 0.5, %v6141_v47  ;;  %v10980_v47 = vld [vmem:[#allocation59_spill] sm:$0xff]  ;;  %v10982_v37 = vld [vmem:[#allocation61_spill] sm:$0xff] }
0x22c5   :  { %v10983_v14 = vld [vmem:[#allocation62_spill] sm:$0xff] }
0x22c6   :  { %6679 = vtanh.f32 %v4639_v9  ;;  %v10111_v9 = vld [vmem:[#allocation19] ss:$0 sm:$0xff] }
0x22ce   :  { %v6678_v60 = vpop.eup %6677 }
0x22cf   :  { %4646 = vrot.lane.b32.xlu0 %v6678_v60, %s7440_s3  ;;  %v10984_v60 = vld [vmem:[#allocation63_spill] sm:$0xff] }
0x22d0   :  { %v6680_v46 = vpop.eup %6679 }
0x22d1   :  { %v4641_v6 = vmul.f32 0.5, %v6680_v46 }
0x22d3   :  { %v4642_v25 = vadd.f32 0.5, %v4641_v6 }
0x22d5   :  { %v4644_v34 = vmul.f32 %v4642_v25, %v9726_v5  ;;  %v10079_v5 = vld [vmem:[#allocation17 + $0x8] sm:$0xff]  }
0x22e1   :  { %v10056_v30 = vpop.f32.mrb[84].mxu0 }
0x22e2   :  { %v10058_v1 = vpop.f32.mrb[85].mxu0 }
0x22e3   :  { %v4867_v22 = vcombine.low %v10056_v30, %v10058_v1  ;;  %v4859_v53 = vpop.f32.mrb[86].mxu0 }
0x22e4   :  { %v4860_v61 = vpop.f32.mrb[87].mxu0  ;;  %v10985_v53 = vld [vmem:[#allocation64_spill] sm:$0xff] }
0x2341   :  { %v4647_v24 = vpop.permute.xlu0 %4646 }
0x2342   :  { %v4649_v3 = vmul.f32 %v4647_v24, %v4642_v25 }
0x2344   :  { %4651 = vrot.lane.b32.xlu0 %v4649_v3, %s7461_s14 }
0x23b6   :  { %v4652_v58 = vpop.permute.xlu0 %4651 }
0x23b7   :  { %v10064_v4 = vadd.f32 %v4652_v58, %v4644_v34 }
0x23b9   :  { %6681 = vtanh.f32 %v10064_v4 }
0x23c3   :  { %v6682_v52 = vpop.eup %6681 }
0x23c4   :  { %4657 = vrot.lane.b32.xlu0 %v6682_v52, %s7440_s3 }
0x2436   :  { %v4658_v16 = vpop.permute.xlu0 %4657 }
0x2437   :  { %v4660_v28 = vmul.f32 %v4658_v16, %v4642_v25 }
0x2439   :  { %v4661_v40 = vpack.c.bf16 %v4660_v28, %v4660_v28 }
0x243b   :  { %4663 = vrot.lane.b32.xlu0 %v4661_v40, %s7461_s14  ;;  %v4881_v40 = vrot.slane %v4867_v22, %v10596_v36 }
0x24ad   :  { %v10069_v42 = vpop.permute.xlu0 %4663 }
0x24ae   :  { %6029 = vmatmul.mubr.msk.bf16.vlgmr.msra.gmra.mrb[80].mxu1 %vm1299_vm1, %v10069_v42 }
0x24af   :  { %6033 = vmatpush3.bf16.msra.mxu1 %v10073_v48  ;;  %6036 = vmatprep.mubr.msk.bf16.mxu1 %vm7460_vm0, %v10577_v13 }
0x24b0   :  { %6034 = vmatprep.subr.bf16.mxu1 %v10577_v13 }
0x24b3   :  { %6035 = vmatpush3.bf16.msra.mxu1 %v10079_v5 }
0x24b4   :  { %4780 = vmatprep.subr.bf16.mxu1 %v7054_v19 }
0x24ba   :  { %6037 = vmatmul.mubr.msk.bf16.vlgmr.msra.gmra.mrb[80].mxu1 %vm1299_vm1, %v4711_v59  ;;  %v4779_v59 = vld [vmem:[#allocation2 + $0x38] sm:$0xff] }
0x24bb   :  { %4781 = vmatpush1.bf16.msra.mxu1 %v7055_v32  ;;  %4812 = vmatprep.mubr.bf16.mxu1 %v10545_v57 }
0x24bc   :  { %4782 = vmatprep.subr.bf16.mxu1 %v7056_v27 }
0x24bf   :  { %4783 = vmatpush1.bf16.msra.mxu1 %v7057_v31 }
0x24c0   :  { %4784 = vmatprep.subr.bf16.mxu1 %v7058_v45 }
0x24c3   :  { %4785 = vmatpush1.bf16.msra.mxu1 %v7059_v8 }
0x24c4   :  { %4786 = vmatprep.subr.bf16.mxu1 %v7060_v35 }
0x24c7   :  { %4787 = vmatpush1.bf16.msra.mxu1 %v7061_v21 }
0x24c8   :  { %4788 = vmatprep.subr.bf16.mxu1 %v9750_v44  ;;  %v10971_v44 = vld [vmem:[#allocation50_spill] sm:$0xff] }
0x24cb   :  { %4789 = vmatpush1.bf16.msra.mxu1 %v9753_v18  ;;  %v10972_v18 = vld [vmem:[#allocation51_spill] sm:$0xff] }
0x24cc   :  { %4790 = vmatprep.subr.bf16.mxu1 %v9756_v17  ;;  %v10973_v17 = vld [vmem:[#allocation52_spill] sm:$0xff] }
0x24cf   :  { %4791 = vmatpush1.bf16.msra.mxu1 %v9759_v54  ;;  %v10974_v54 = vld [vmem:[#allocation53_spill] sm:$0xff] }
0x24d0   :  { %4792 = vmatprep.subr.bf16.mxu1 %v9762_v2  ;;  %v10975_v2 = vld [vmem:[#allocation54_spill] sm:$0xff] }
0x24d3   :  { %4793 = vmatpush1.bf16.msra.mxu1 %v9765_v12  ;;  %v10976_v12 = vld [vmem:[#allocation55_spill] sm:$0xff] }
0x24d4   :  { %4794 = vmatprep.subr.bf16.mxu1 %v9768_v63  ;;  %v10977_v63 = vld [vmem:[#allocation56_spill] sm:$0xff] }
0x24d7   :  { %4795 = vmatpush1.bf16.msra.mxu1 %v10968_v23 }
0x24d8   :  { %4911 = vmatprep.subr.bf16.mxu1 %v10969_v56 }
0x24da   :  { %4813 = vmatmul.mubr.bf16.vlgmr.msra.gmra.mrb[84].mxu1 %v9841_v26  ;;  %v10979_v26 = vld [vmem:[#allocation58_spill] sm:$0xff] }
0x24db   :  { %4912 = vmatpush1.bf16.msra.mxu1 %v10970_v50  ;;  %4943 = vmatprep.mubr.bf16.mxu1 %v10545_v57 }
0x24dc   :  { %4913 = vmatprep.subr.bf16.mxu1 %v10971_v44 }
0x24df   :  { %4914 = vmatpush1.bf16.msra.mxu1 %v10972_v18 }
0x24e0   :  { %4915 = vmatprep.subr.bf16.mxu1 %v10973_v17 }
0x24e3   :  { %4916 = vmatpush1.bf16.msra.mxu1 %v10974_v54 }
0x24e4   :  { %4917 = vmatprep.subr.bf16.mxu1 %v10975_v2 }
0x24e7   :  { %4918 = vmatpush1.bf16.msra.mxu1 %v10976_v12 }
0x24e8   :  { %4919 = vmatprep.subr.bf16.mxu1 %v10977_v63 }
0x24eb   :  { %4920 = vmatpush1.bf16.msra.mxu1 %v10978_v10 }
0x24ec   :  { %4921 = vmatprep.subr.bf16.mxu1 %v10979_v26 }
0x24ef   :  { %4922 = vmatpush1.bf16.msra.mxu1 %v10980_v47 }
0x24f0   :  { %4923 = vmatprep.subr.bf16.mxu1 %v10981_v39 }
0x24f3   :  { %4924 = vmatpush1.bf16.msra.mxu1 %v10982_v37  ;;  %v10987_v37 = vld [vmem:[#allocation66_spill] sm:$0xff] }
0x24f4   :  { %4925 = vmatprep.subr.bf16.mxu1 %v10983_v14  ;;  %v10988_v14 = vld [vmem:[#allocation67_spill] sm:$0xff] }
0x24f7   :  { %4926 = vmatpush1.bf16.msra.mxu1 %v10984_v60  ;;  %v10989_v60 = vld [vmem:[#allocation68_spill] sm:$0xff] }
0x24f8   :  { %4994 = vmatprep.subr.bf16.mxu1 %v10985_v53  ;;  %v10994_v53 = vld [vmem:[#allocation73_spill] sm:$0xff] }
0x258d   :  { %v4749_v61 = vpop.f32.mrb[80].mxu1 }
0x258e   :  { %v10114_v46 = vadd.f32 %v10111_v9, %v4749_v61  ;;  %v6038_v6 = vpop.f32.mrb[81].mxu1  ;;  %v10997_v61 = vld [vmem:[#allocation76_spill] sm:$0xff] }
0x258f   :  { %v4752_v25 = vpop.f32.mrb[82].mxu1  ;;  %v10998_v6 = vld [vmem:[#allocation77_spill] sm:$0xff] }
0x2590   :  { %6683 = vtanh.f32 %v10114_v46  ;;  %v6039_v24 = vpop.f32.mrb[83].mxu1  ;;  %v10999_v25 = vld [vmem:[#allocation78_spill] sm:$0xff] }
0x2591   :  { %v11000_v24 = vld [vmem:[#allocation79_spill] sm:$0xff] }
0x259a   :  { %v6684_v3 = vpop.eup %6683 }
0x259b   :  { %4763 = vrot.lane.b32.xlu1 %v6684_v3, %s7440_s3  ;;  %v11001_v3 = vld [vmem:[#allocation80_spill] sm:$0xff] }
0x25ad   :  { %v4814_v34 = vpop.f32.mrb[84].mxu1 }
0x25ae   :  { %v4816_v58 = vpop.f32.mrb[85].mxu1 }
0x25af   :  { %v4866_v52 = vcombine.low %v4814_v34, %v4816_v58  ;;  %v4818_v16 = vpop.f32.mrb[86].mxu1  ;;  %v11002_v34 = vld [vmem:[#allocation81_spill] sm:$0xff]  ;;  %v11003_v58 = vld [vmem:[#allocation82_spill] sm:$0xff] }
0x25b0   :  { %v4819_v28 = vpop.f32.mrb[87].mxu1  ;;  %v11005_v16 = vld [vmem:[#allocation84_spill] sm:$0xff] }
0x25b1   :  { %v4874_v19 = vrot.slane %v4866_v52, %v10596_v36  ;;  %v11004_v52 = vld [vmem:[#allocation83_spill] sm:$0xff]  ;;  %v11006_v28 = vld [vmem:[#allocation85_spill] sm:$0xff] }
0x25b3   :  { %v4882_v32 = vcombine.low %v4874_v19, %v4881_v40  ;;  %v4756_v40 = vmul.f32 0.5, %v10114_v46  ;;  %v11007_v19 = vld [vmem:[#allocation86_spill] sm:$0xff] }
0x25b4   :  { %v7063_v46 = vld [vmem:[#allocation16] sm:$0xff]  }
0x25b5   :  { %v4884_v27 = vadd.f32 %v4882_v32, %v4779_v59  ;;  %v11008_v59 = vld [vmem:[#allocation87_spill] sm:$0xff]  ;;  %v11009_v32 = vld [vmem:[#allocation88_spill] sm:$0xff] }
0x25b7   :  { %v4885_v31 = vmul.f32 0.5, %v4884_v27  ;;  %v4890_v45 = vrot.slane %v4884_v27, 2  ;;  %v4896_v35 = vrot.slane %v4884_v27, 4  ;;  %v4899_v21 = vrot.slane %v4884_v27, 6  ;;  %v11010_v27 = vld [vmem:[#allocation89_spill] sm:$0xff] }
0x25b9   :  { %6685 = vtanh.f32 %v4885_v31  ;;  %v4892_v8 = vmul.f32 0.5, %v4890_v45  ;;  %v4901_v23 = vmul.f32 0.5, %v4899_v21  ;;  %v4993_v31 = vpack.c.bf16 %v10000_v11, %v10000_v11  ;;  %v11011_v45 = vld [vmem:[#allocation90_spill] sm:$0xff]  ;;  %v11012_v11 = vld [vmem:[#allocation91_spill] sm:$0xff]  ;;  %v11013_v21 = vld [vmem:[#allocation92_spill] sm:$0xff] }
0x25bb   :  { %6687 = vtanh.f32 %v4892_v8  ;;  %v7064_v8 = vld [vmem:[#allocation16 + $0x8] sm:$0xff]  }
0x25bc   :  { %6689 = vtanh.f32 %v4896_v35 }
0x25bd   :  { %6691 = vtanh.f32 %v4901_v23 }
0x25c3   :  { %v6686_v56 = vpop.eup %6685 }
0x25c4   :  { %v4887_v50 = vmul.f32 0.5, %v6686_v56  ;;  %v11014_v56 = vld [vmem:[#allocation93_spill] sm:$0xff] }
0x25c5   :  { %v6688_v44 = vpop.eup %6687 }
0x25c6   :  { %v4888_v18 = vadd.f32 0.5, %v4887_v50  ;;  %v4894_v30 = vmul.f32 0.5, %v6688_v44  ;;  %v6690_v22 = vpop.eup %6689 }
0x25c7   :  { %v6692_v12 = vpop.eup %6691 }
0x25c8   :  { %v4895_v1 = vadd.f32 0.5, %v4894_v30  ;;  %v4906_v54 = vmul.f32 %v6690_v22, %v4888_v18  ;;  %v4903_v63 = vmul.f32 0.5, %v6692_v12  ;;  %v11015_v30 = vld [vmem:[#allocation95_spill] sm:$0xff]  ;;  %v11017_v22 = vld [vmem:[#allocation97_spill] sm:$0xff] }
0x25ca   :  { %v4905_v17 = vmul.f32 %v4895_v1, %v9838_v38  ;;  %v4904_v10 = vadd.f32 0.5, %v4903_v63  ;;  %v10986_v38 = vld [vmem:[#allocation65_spill] sm:$0xff]  ;;  %v11016_v1 = vld [vmem:[#allocation96_spill] sm:$0xff] }
0x25cc   :  { %v4907_v2 = vadd.f32 %v4906_v54, %v4905_v17  ;;  %v11018_v17 = vld [vmem:[#allocation98_spill] sm:$0xff]  ;;  %v11019_v54 = vld [vmem:[#allocation99_spill] sm:$0xff] }
0x25ce   :  { %6693 = vtanh.f32 %v4907_v2 }
0x25cf   :  { %6695 = vtanh.f32 %v4756_v40 }
0x25d8   :  { %v6694_v26 = vpop.eup %6693 }
0x25d9   :  { %v4909_v47 = vmul.f32 %v6694_v26, %v4904_v10  ;;  %v6696_v35 = vpop.eup %6695 }
0x25da   :  { %v4758_v23 = vmul.f32 0.5, %v6696_v35 }
0x25db   :  { %v4910_v39 = vpack.c.bf16 %v4909_v47, %v4909_v47 }
0x25dc   :  { %v10175_v50 = vadd.f32 0.5, %v4758_v23 }
0x25dd   :  { %4944 = vmatmul.mubr.bf16.vlgmr.msra.gmra.mrb[88].mxu1 %v4910_v39  ;;  %4985 = vmatmul.mubr.bf16.vlgmr.msra.gmra.mrb[88].mxu0 %v4910_v39  ;;  %v11020_v39 = vld [vmem:[#allocation94_spill] sm:$0xff] }
0x25de   :  { %4995 = vmatpush1.bf16.msra.mxu1 %v9845_v29  ;;  %5036 = vmatpush1.bf16.msra.mxu0 %v9848_v7  ;;  %v10990_v29 = vld [vmem:[#allocation69_spill] sm:$0xff]  ;;  %v10991_v7 = vld [vmem:[#allocation70_spill] sm:$0xff]  ;;  %v4761_v2 = vmul.f32 %v10175_v50, %v11019_v54 }
0x25df   :  { %4996 = vmatprep.subr.bf16.mxu1 %v9851_v0  ;;  %5037 = vmatprep.subr.bf16.mxu0 %v9854_v51  ;;  %v10992_v0 = vld [vmem:[#allocation71_spill] sm:$0xff]  ;;  %v10993_v51 = vld [vmem:[#allocation72_spill] sm:$0xff] }
0x25e0   :  { %5026 = vmatprep.mubr.bf16.mxu1 %v10545_v57  ;;  %5067 = vmatprep.mubr.bf16.mxu0 %v10545_v57  ;;  %v10995_v57 = vld [vmem:[#allocation74_spill] sm:$0xff] }
0x25e2   :  { %4997 = vmatpush1.bf16.msra.mxu1 %v9859_v15  ;;  %5038 = vmatpush1.bf16.msra.mxu0 %v10986_v38  ;;  %v10996_v15 = vld [vmem:[#allocation75_spill] sm:$0xff] }
0x25e3   :  { %4998 = vmatprep.subr.bf16.mxu1 %v10987_v37  ;;  %5039 = vmatprep.subr.bf16.mxu0 %v10988_v14 }
0x25e6   :  { %4999 = vmatpush1.bf16.msra.mxu1 %v10989_v60  ;;  %5040 = vmatpush1.bf16.msra.mxu0 %v10990_v29 }
0x25e7   :  { %5000 = vmatprep.subr.bf16.mxu1 %v10991_v7  ;;  %5041 = vmatprep.subr.bf16.mxu0 %v10992_v0 }
0x25ea   :  { %5001 = vmatpush1.bf16.msra.mxu1 %v10993_v51  ;;  %5042 = vmatpush1.bf16.msra.mxu0 %v10994_v53 }
0x25eb   :  { %5002 = vmatprep.subr.bf16.mxu1 %v10995_v57  ;;  %5043 = vmatprep.subr.bf16.mxu0 %v10996_v15 }
0x25ee   :  { %5003 = vmatpush1.bf16.msra.mxu1 %v10997_v61  ;;  %5044 = vmatpush1.bf16.msra.mxu0 %v10998_v6 }
0x25ef   :  { %5004 = vmatprep.subr.bf16.mxu1 %v10999_v25  ;;  %5045 = vmatprep.subr.bf16.mxu0 %v11000_v24 }
0x25f2   :  { %5005 = vmatpush1.bf16.msra.mxu1 %v11001_v3  ;;  %5046 = vmatpush1.bf16.msra.mxu0 %v11002_v34 }
0x25f3   :  { %5006 = vmatprep.subr.bf16.mxu1 %v11003_v58  ;;  %5047 = vmatprep.subr.bf16.mxu0 %v11004_v52 }
0x25f6   :  { %5007 = vmatpush1.bf16.msra.mxu1 %v11005_v16  ;;  %5048 = vmatpush1.bf16.msra.mxu0 %v11006_v28 }
0x25f7   :  { %5008 = vmatprep.subr.bf16.mxu1 %v11007_v19  ;;  %5049 = vmatprep.subr.bf16.mxu0 %v11008_v59  ;;  %v5099_v59 = vld [vmem:[#allocation20 + $0x7] sm:$0x1] }
0x25fa   :  { %5009 = vmatpush1.bf16.msra.mxu1 %v11009_v32  ;;  %5050 = vmatpush1.bf16.msra.mxu0 %v11010_v27  ;;  %v5100_v27 = vunpack.c.l.bf16 %v5099_v59 }
0x25fb   :  { %6040 = vmatprep.subr.bf16.mxu1 %v10577_v13  ;;  %6068 = vmatprep.subr.bf16.mxu0 %v10577_v13 }
0x25fd   :  { %5027 = vmatmul.mubr.bf16.vlgmr.msra.gmra.mrb[88].mxu1 %v4993_v31  ;;  %5068 = vmatmul.mubr.bf16.vlgmr.msra.gmra.mrb[88].mxu0 %v4993_v31 }
0x25fe   :  { %6041 = vmatpush3.bf16.msra.mxu1 %v11011_v45  ;;  %6056 = vmatprep.mubr.msk.bf16.mxu1 %vm7460_vm0, %v10577_v13 }
0x25ff   :  { %6042 = vmatprep.subr.bf16.mxu1 %v10577_v13  ;;  %6069 = vmatpush3.bf16.msra.mxu0 %v7063_v46 }
0x2600   :  { %6070 = vmatprep.subr.bf16.mxu0 %v10577_v13  ;;  %6072 = vmatprep.mubr.msk.bf16.mxu0 %vm7460_vm0, %v10577_v13 }
0x2602   :  { %6043 = vmatpush3.bf16.msra.mxu1 %v11012_v11 }
0x2603   :  { %6044 = vmatprep.subr.bf16.mxu1 %v10577_v13  ;;  %6071 = vmatpush3.bf16.msra.mxu0 %v7064_v8 }
0x2604   :  { %6076 = vmatprep.subr.bf16.mxu0 %v10577_v13 }
0x2606   :  { %6045 = vmatpush3.bf16.msra.mxu1 %v11013_v21 }
0x2607   :  { %6046 = vmatprep.subr.bf16.mxu1 %v10577_v13 }
0x260a   :  { %6047 = vmatpush3.bf16.msra.mxu1 %v11014_v56 }
0x260b   :  { %6048 = vmatprep.subr.bf16.mxu1 %v10577_v13 }
0x260d   :  { %v4764_v44 = vpop.permute.xlu1 %4763 }
0x260e   :  { %v4766_v18 = vmul.f32 %v4764_v44, %v10175_v50  ;;  %6049 = vmatpush3.bf16.msra.mxu1 %v11015_v30 }
0x260f   :  { %6050 = vmatprep.subr.bf16.mxu1 %v10577_v13 }
0x2610   :  { %4768 = vrot.lane.b32.xlu1 %v4766_v18, %s7461_s14 }
0x2612   :  { %6051 = vmatpush3.bf16.msra.mxu1 %v11016_v1 }
0x2613   :  { %6052 = vmatprep.subr.bf16.mxu1 %v10577_v13 }
0x2616   :  { %6053 = vmatpush3.bf16.msra.mxu1 %v11017_v22 }
0x2617   :  { %6054 = vmatprep.subr.bf16.mxu1 %v10577_v13 }
0x261a   :  { %6055 = vmatpush3.bf16.msra.mxu1 %v11018_v17 }
0x261b   :  { %6060 = vmatprep.subr.bf16.mxu1 %v10577_v13 }
0x2682   :  { %v4769_v12 = vpop.permute.xlu1 %4768 }
0x2683   :  { %v10189_v63 = vadd.f32 %v4769_v12, %v4761_v2 }
0x2685   :  { %6697 = vtanh.f32 %v10189_v63 }
0x268f   :  { %v6698_v10 = vpop.eup %6697 }
0x2690   :  { %4774 = vrot.lane.b32.xlu1 %v6698_v10, %s7440_s3 }
0x26d0   :  { %v5028_v26 = vpop.f32.mrb[88].mxu1  ;;  %v5069_v47 = vpop.f32.mrb[88].mxu0 }
0x26d1   :  { %v6143_v38 = vadd.f32 %v5028_v26, %v11020_v39  ;;  %v5030_v37 = vpop.f32.mrb[89].mxu1  ;;  %v5071_v14 = vpop.f32.mrb[89].mxu0  ;;  %v6145_v15 = vadd.f32 %v5069_v47, %v8082_v49 }
0x26d2   :  { %v6144_v60 = vadd.f32 %v5030_v37, %v8079_v41  ;;  %v5032_v29 = vpop.f32.mrb[90].mxu1  ;;  %v5073_v7 = vpop.f32.mrb[90].mxu0  ;;  %v6146_v61 = vadd.f32 %v5071_v14, %v8087_v33 }
0x26d3   :  { %v5080_v0 = vmul.f32 0.5, %v6143_v38  ;;  %v5033_v51 = vpop.f32.mrb[91].mxu1  ;;  %v5074_v53 = vpop.f32.mrb[91].mxu0 }
0x26d4   :  { %v5084_v57 = vmul.f32 0.5, %v6144_v60  ;;  %v5089_v6 = vmul.f32 0.5, %v6146_v61  ;;  %v5323_v53 = vld [vmem:[#allocation22] sm:$0x1] }
0x26d5   :  { %6699 = vtanh.f32 %v5080_v0 }
0x26d6   :  { %6701 = vtanh.f32 %v5084_v57  ;;  %v5324_v57 = vunpack.c.l.bf16 %v5323_v53 }
0x26d7   :  { %6703 = vtanh.f32 %v6145_v15 }
0x26d8   :  { %6705 = vtanh.f32 %v5089_v6  ;;  %v5337_v6 = vld [vmem:[#allocation23] sm:$0xff] }
0x26df   :  { %v6700_v25 = vpop.eup %6699 }
0x26e0   :  { %v6702_v24 = vpop.eup %6701  ;;  %v5082_v3 = vmul.f32 0.5, %v6700_v25  ;;  %v5338_v25 = vld [vmem:[#allocation23 + $0x8] sm:$0xff] }
0x26e1   :  { %v5086_v34 = vmul.f32 0.5, %v6702_v24  ;;  %v6704_v58 = vpop.eup %6703  ;;  %v5339_v24 = vld [vmem:[#allocation23 + $0x10] sm:$0xff] }
0x26e2   :  { %v5083_v41 = vadd.f32 0.5, %v5082_v3  ;;  %v6706_v19 = vpop.eup %6705  ;;  %v7463_v3 = vmov 0.0|0.0  }
0x26e3   :  { %v5087_v52 = vadd.f32 0.5, %v5086_v34  ;;  %v5091_v49 = vmul.f32 0.5, %v6706_v19  ;;  %v6096_v34 = vpack.c.bf16 %v5338_v25, %v5337_v6  ;;  %v5581_v19 = vld [vmem:[#allocation25] ss:$0 sm:$0xff] }
0x26e4   :  { %v5094_v16 = vmul.f32 %v6704_v58, %v5083_v41  ;;  %v5340_v41 = vld [vmem:[#allocation23 + $0x18] sm:$0xff] }
0x26e5   :  { %v5093_v28 = vmul.f32 %v5087_v52, %v9997_v55  ;;  %v5092_v32 = vadd.f32 0.5, %v5091_v49  ;;  %v6099_v58 = vpack.c.bf16 %v5340_v41, %v5339_v24 }
0x26e7   :  { %v5095_v40 = vadd.f32 %v5094_v16, %v5093_v28 }
0x26e9   :  { %6707 = vtanh.f32 %v5095_v40 }
0x26f3   :  { %v6708_v33 = vpop.eup %6707 }
0x26f4   :  { %v5097_v31 = vmul.f32 %v6708_v33, %v5092_v32 }
0x26f6   :  { %v5101_v45 = vmul.f32 %v5100_v27, %v5097_v31 }
0x26f8   :  { %v5102_v46 = vpack.c.bf16 %v5101_v45, %v5101_v45 }
0x26fa   :  { %6057 = vmatmul.mubr.bf16.vlgmr.msra.gmra.mrb[92].mxu1 %v5102_v46 }
0x26fb   :  { %6061 = vmatpush3.bf16.msra.mxu1 %v10003_v62  ;;  %6064 = vmatprep.mubr.msk.bf16.mxu1 %vm7460_vm0, %v10577_v13 }
0x26fc   :  { %6062 = vmatprep.subr.bf16.mxu1 %v10577_v13 }
0x26ff   :  { %6063 = vmatpush3.bf16.msra.mxu1 %v10009_v20 }
0x2702   :  { %v4775_v55 = vpop.permute.xlu1 %4774 }
0x2703   :  { %v4777_v11 = vmul.f32 %v4775_v55, %v10175_v50 }
0x2705   :  { %v5253_v8 = vpack.c.bf16 %v4777_v11, %v4777_v11 }
0x2706   :  { %6065 = vmatmul.mubr.msk.bf16.vlgmr.msra.gmra.mrb[92].mxu1 %vm1299_vm1, %v10069_v42 }
0x2707   :  { %5255 = vrot.lane.b32.xlu1 %v5253_v8, %s7461_s14 }
0x27d9   :  { %v5177_v35 = vpop.f32.mrb[92].mxu1 }
0x27da   :  { %v6147_v21 = vadd.f32 %v10052_v43, %v5177_v35  ;;  %v6066_v62 = vpop.f32.mrb[93].mxu1 }
0x27db   :  { %v5180_v23 = vpop.f32.mrb[94].mxu1 }
0x27dc   :  { %6709 = vtanh.f32 %v6147_v21  ;;  %v6067_v56 = vpop.f32.mrb[95].mxu1  ;;  %v5184_v20 = vmul.f32 0.5, %v6147_v21 }
0x27de   :  { %6711 = vtanh.f32 %v5184_v20 }
0x27e6   :  { %v6710_v44 = vpop.eup %6709 }
0x27e7   :  { %5191 = vrot.lane.b32.xlu0 %v6710_v44, %s7440_s3 }
0x27e8   :  { %v6712_v18 = vpop.eup %6711 }
0x27e9   :  { %v5186_v50 = vmul.f32 0.5, %v6712_v18 }
0x27eb   :  { %v5187_v30 = vadd.f32 0.5, %v5186_v50 }
0x27ed   :  { %v5189_v42 = vmul.f32 %v5187_v30, %v10064_v4  ;;  %v5256_v4 = vpop.permute.xlu1 %5255 }
0x2859   :  { %v5192_v1 = vpop.permute.xlu0 %5191 }
0x285a   :  { %v5194_v22 = vmul.f32 %v5192_v1, %v5187_v30 }
0x285c   :  { %5196 = vrot.lane.b32.xlu0 %v5194_v22, %s7461_s14 }
0x28ce   :  { %v5197_v17 = vpop.permute.xlu0 %5196 }
0x28cf   :  { %v5199_v43 = vadd.f32 %v5197_v17, %v5189_v42 }
0x28d1   :  { %6713 = vtanh.f32 %v5199_v43 }
0x28db   :  { %v6714_v54 = vpop.eup %6713 }
0x28dc   :  { %5202 = vrot.lane.b32.xlu0 %v6714_v54, %s7440_s3 }
0x294e   :  { %v5203_v2 = vpop.permute.xlu0 %5202 }
0x294f   :  { %v5205_v12 = vmul.f32 %v5203_v2, %v5187_v30 }
0x2951   :  { %v5206_v10 = vpack.c.bf16 %v5205_v12, %v5205_v12 }
0x2953   :  { %5208 = vrot.lane.b32.xlu0 %v5206_v10, %s7461_s14 }
0x29c5   :  { %v5209_v26 = vpop.permute.xlu0 %5208 }
0x29c6   :  { %6073 = vmatmul.mubr.msk.bf16.vlgmr.msra.gmra.mrb[92].mxu0 %vm1299_vm1, %v5209_v26 }
0x29c7   :  { %6077 = vmatpush3.bf16.msra.mxu0 %v10073_v48  ;;  %6080 = vmatprep.mubr.msk.bf16.mxu0 %vm7460_vm0, %v10577_v13 }
0x29c8   :  { %6078 = vmatprep.subr.bf16.mxu0 %v10577_v13 }
0x29cb   :  { %6079 = vmatpush3.bf16.msra.mxu0 %v10079_v5 }
0x29cc   :  { %6095 = vmatprep.subr.bf16.mxu0 %v7463_v3 }
0x29d2   :  { %6081 = vmatmul.mubr.msk.bf16.vlgmr.msra.gmra.mrb[92].mxu0 %vm1299_vm1, %v5256_v4 }
0x29d3   :  { %6092 = vmatprep.mubr.msk.f32.mxu0 %vm7460_vm0, %v10577_v13  ;;  %v5332_v13 = vrot.slane %v5324_v57, %v10596_v36  ;;  %6097 = vmatpush3.bf16.msra.mxu0 %v6096_v34 }
0x29d4   :  { %6098 = vmatprep.subr.bf16.mxu0 %v7463_v3 }
0x29d7   :  { %6100 = vmatpush3.bf16.msra.mxu0 %v6099_v58 }
0x2aa5   :  { %v5294_v47 = vpop.f32.mrb[92].mxu0 }
0x2aa6   :  { %v6148_v39 = vadd.f32 %v10111_v9, %v5294_v47  ;;  %v6082_v38 = vpop.f32.mrb[93].mxu0 }
0x2aa7   :  { %v5297_v37 = vpop.f32.mrb[94].mxu0 }
0x2aa8   :  { %6715 = vtanh.f32 %v6148_v39  ;;  %v6083_v48 = vpop.f32.mrb[95].mxu0  ;;  %v5301_v60 = vmul.f32 0.5, %v6148_v39 }
0x2aaa   :  { %6717 = vtanh.f32 %v5301_v60 }
0x2ab2   :  { %v6716_v14 = vpop.eup %6715 }
0x2ab3   :  { %5308 = vrot.lane.b32.xlu0 %v6716_v14, %s7440_s3 }
0x2ab4   :  { %v6718_v29 = vpop.eup %6717 }
0x2ab5   :  { %v5303_v5 = vmul.f32 0.5, %v6718_v29 }
0x2ab7   :  { %v5304_v7 = vadd.f32 0.5, %v5303_v5 }
0x2ab9   :  { %v5306_v9 = vmul.f32 %v5304_v7, %v10189_v63 }
0x2b25   :  { %v5309_v0 = vpop.permute.xlu0 %5308 }
0x2b26   :  { %v5311_v51 = vmul.f32 %v5309_v0, %v5304_v7 }
0x2b28   :  { %5313 = vrot.lane.b32.xlu1 %v5311_v51, %s7461_s14 }
0x2b2c   :  { %5333 = vrot.lane.b32.xlu1 %v5332_v13, %s7462_s19 }
0x2b9a   :  { %v5314_v15 = vpop.permute.xlu1 %5313 }
0x2b9b   :  { %v5316_v61 = vadd.f32 %v5314_v15, %v5306_v9 }
0x2b9d   :  { %6719 = vtanh.f32 %v5316_v61 }
0x2b9e   :  { %v5334_v16 = vpop.permute.xlu1 %5333 }
0x2ba7   :  { %v6720_v52 = vpop.eup %6719 }
0x2ba8   :  { %5319 = vrot.lane.b32.xlu0 %v6720_v52, %s7440_s3 }
0x2c1a   :  { %v5320_v36 = vpop.permute.xlu0 %5319 }
0x2c1b   :  { %v5322_v63 = vmul.f32 %v5320_v36, %v5304_v7 }
0x2c1d   :  { %v5336_v28 = vmul.f32 %v5334_v16, %v5322_v63 }
0x2c1f   :  { %5349 = vrot.lane.b32.xlu0 %v5336_v28, %s7461_s14 }
0x2c91   :  { %v5350_v40 = vpop.permute.xlu0 %5349 }
0x2c92   :  { %6093 = vmatmul.mubr.msk.f32.vlgmr.msra.gmra.mrb[96].mxu0 %vm1299_vm1, %v5350_v40 }
0x2d65   :  { %v5419_v49 = vpop.f32.mrb[96].mxu0 }
0x2d66   :  { %v5420_v59 = vadd.f32 %v5581_v19, %v5419_v49  ;;  %v6094_v32 = vpop.f32.mrb[97].mxu0 }
0x2d68   :  { %5424 = vst.msk [vmem:[#allocation26] sm:$0x3] %vm5423_vm2, %v5420_v59 }
0x2d69   :  { %7406 = shalt.err (!%p7403_p12)
}
0x2d6a   :  { %s11021_s11 = sld [smem:[#allocation100_spill]] }
0x2d70   :  { %s7407_s5 = scalar_lea.hbm %s11021_s11, 32 }
0x2d71   :  { %p7408_p13 = scmp.ne.s32.totalorder %s11021_s11, %s7407_s5  ;;  %p7411_p0 = scmp.lt.u32.totalorder %s7407_s5, %s11021_s11 }
0x2d73   :  { %p7413_p1 = pnand %p7411_p0, %p7408_p13 }
0x2d75   :  { %7416 = shalt.err (!%p7413_p1)
}
0x2d76   :  { %5434 = dma.vmem_to_hbm [thread:$0]  %s5432_s18, 32, %s11021_s11, [#allocation4]  }
0x2d77   :  { %7433 = dma.done.wait [#allocation4], 32  }
0x2d78   :  { %7434 = vsyncadd [#allocation4], 4294967264 }
0x2d79   :  { %5438 = vsyncpa [#allocation3], 1 }
0x2d7a   :  { %5439 = vsyncpa [#allocation6], 1 }
0x2d7b   :  { %5440 = vsyncpa [#allocation9], 1 }
0x2d7c   :  { %5441 = vsyncpa [#allocation12], 1 }
0x2d7d   :  { %5442 = vsyncpa [#allocation15], 1 }
0x2d7e   :  { %5443 = vsyncpa [#allocation18], 1 }
0x2d7f   :  { %5444 = vsyncpa [#allocation21], 1 }
0x2d80   :  { %5445 = vsyncpa [#allocation24], 1 }
0x2d81   :  { %5446 = vsyncpa [#allocation4], 1 }

</bundles_post_ra>
